<compile_context>
chip_gen: v7x
topology: tpu7x:2x2x1
jax: 0.10.0
libtpu: 0.0.40
codegen_flags: <defaults>
</compile_context>

<pallas_src>
import math
import functools

import jax
import jax.numpy as jnp
from jax.experimental import pallas as pl
from jax.experimental.pallas import tpu as pltpu

_BN_EPS = 1e-5
_EXPANSION = 4      # Bottleneck
_LANE = 128


# --------------------------- small helpers -----------------------------------

def _round_up(x, m):
    return ((x + m - 1) // m) * m


@functools.lru_cache(maxsize=None)
def _vmem_limit_bytes():
    # Derive the scoped VMEM limit from the hardware, leave headroom for double buffering.
    cap = 64 * 1024 * 1024
    try:
        info = pltpu.get_tpu_info()
        cap = int(getattr(info, "vmem_capacity_bytes", cap) or cap)
    except Exception:
        pass
    return int(max(32 * 1024 * 1024, min(cap // 2, 96 * 1024 * 1024)))


def _cparams(dim_sem):
    return pltpu.CompilerParams(dimension_semantics=dim_sem,
                                vmem_limit_bytes=_vmem_limit_bytes())


def _pick_m_tile(m, cp):
    """Largest divisor of m (multiple of 8 unless == m) with a modest f32 block footprint."""
    cap = max(8, min(2048, (4 << 20) // (cp * 4)))
    for tm in range(min(m, cap), 0, -1):
        if m % tm == 0 and (tm == m or tm % 8 == 0):
            return tm
    return m


def _pick_row_tile(ho, wo, cp):
    """Output-row tile for spatial kernels: divisor of ho, flattened rows multiple of 8."""
    valid = [th for th in range(1, ho + 1)
             if ho % th == 0 and (th == ho or (th * wo) % 8 == 0)]
    fitting = [th for th in valid if th * wo * cp * 4 <= (2 << 20)]
    return max(fitting) if fitting else min(valid)


# --------------------------- Pallas kernels ----------------------------------

def _matmul_stats_kernel(x_ref, w_ref, y_ref, st_ref):
    # 1x1 conv tile: bf16 matmul with f32 accumulation + per-tile BN partial sums.
    acc = jnp.dot(x_ref[...], w_ref[...], preferred_element_type=jnp.float32)
    y_ref[...] = acc
    s1 = jnp.sum(acc, axis=0, keepdims=True)
    s2 = jnp.sum(acc * acc, axis=0, keepdims=True)
    st_ref[...] = jnp.concatenate([s1, s2], axis=0)[None]


def _spatial_conv_kernel(x_ref, w_ref, y_ref, st_ref, *, kh, kw, dil, th, wo, cin, cp):
    # Shift-and-matmul conv: the padded image block lives in VMEM; each tap is a direct
    # slice (no im2col), accumulated over kh*kw MXU matmuls in f32.
    hb = pl.program_id(1)
    row0 = hb * th
    acc = jnp.zeros((th * wo, cp), jnp.float32)
    for ki in range(kh):
        for kj in range(kw):
            tap = x_ref[0, pl.ds(row0 + ki * dil, th), pl.ds(kj * dil, wo), :]
            acc = acc + jnp.dot(tap.reshape(th * wo, cin), w_ref[ki * kw + kj],
                                preferred_element_type=jnp.float32)
    y_ref[...] = acc[None]
    s1 = jnp.sum(acc, axis=0, keepdims=True)
    s2 = jnp.sum(acc * acc, axis=0, keepdims=True)
    st_ref[...] = jnp.concatenate([s1, s2], axis=0)[None, None]


def _bn_act_kernel(y_ref, sc_ref, sh_ref, o_ref, *, relu):
    out = y_ref[...] * sc_ref[...] + sh_ref[...]
    if relu:
        out = jnp.maximum(out, 0.0)
    o_ref[...] = out.astype(o_ref.dtype)


def _bn_add_relu_kernel(y_ref, sc_ref, sh_ref, r_ref, o_ref):
    out = y_ref[...] * sc_ref[...] + sh_ref[...] + r_ref[...].astype(jnp.float32)
    o_ref[...] = jnp.maximum(out, 0.0).astype(o_ref.dtype)


def _maxpool_s2d_kernel(x_ref, o_ref, *, th, wo, taps):
    # 3x3 / stride-2 max-pool over a space-to-depth repacked input: 9 taps become
    # (row, col, phase-group) slices of the resident block -- no 9x HBM stack.
    hb = pl.program_id(1)
    row0 = hb * th
    res = None
    for (a, b, g) in taps:
        tap = x_ref[0, pl.ds(row0 + a, th), pl.ds(b, wo), g, :]
        res = tap if res is None else jnp.maximum(res, tap)
    o_ref[...] = res[None]


# --------------------------- pallas_call wrappers -----------------------------

def _conv_1x1_call(x2, w2):
    m, cin = x2.shape
    cp = w2.shape[-1]
    tm = _pick_m_tile(m, cp)
    nm = m // tm
    y, st = pl.pallas_call(
        _matmul_stats_kernel,
        grid=(nm,),
        in_specs=[pl.BlockSpec((tm, cin), lambda i: (i, 0)),
                  pl.BlockSpec((cin, cp), lambda i: (0, 0))],
        out_specs=[pl.BlockSpec((tm, cp), lambda i: (i, 0)),
                   pl.BlockSpec((1, 2, cp), lambda i: (i, 0, 0))],
        out_shape=(jax.ShapeDtypeStruct((m, cp), jnp.float32),
                   jax.ShapeDtypeStruct((nm, 2, cp), jnp.float32)),
        compiler_params=_cparams(("parallel",)),
    )(x2, w2)
    return y, st


def _conv_spatial_call(xp, w, kh, kw, dil, ho, wo):
    n, hp, wp, cin = xp.shape
    cp = w.shape[-1]
    th = _pick_row_tile(ho, wo, cp)
    nhb = ho // th
    kernel = functools.partial(_spatial_conv_kernel, kh=kh, kw=kw, dil=dil,
                               th=th, wo=wo, cin=cin, cp=cp)
    y, st = pl.pallas_call(
        kernel,
        grid=(n, nhb),
        in_specs=[pl.BlockSpec((1, hp, wp, cin), lambda i, j: (i, 0, 0, 0)),
                  pl.BlockSpec(w.shape, lambda i, j: (0, 0, 0))],
        out_specs=[pl.BlockSpec((1, th * wo, cp), lambda i, j: (i, j, 0)),
                   pl.BlockSpec((1, 1, 2, cp), lambda i, j: (i, j, 0, 0))],
        out_shape=(jax.ShapeDtypeStruct((n, ho * wo, cp), jnp.float32),
                   jax.ShapeDtypeStruct((n, nhb, 2, cp), jnp.float32)),
        compiler_params=_cparams(("parallel", "parallel")),
    )(xp, w)
    return y.reshape(n * ho * wo, cp), st.reshape(n * nhb, 2, cp)


def _bn_act(y, st, m, cp, *, relu, residual=None, eps=_BN_EPS):
    # Global batch statistics from per-tile partials (var = E[x^2] - E[x]^2, biased, like BN).
    s = jnp.sum(st, axis=0)                               # (2, cp)
    mean = s[0] / m
    var = jnp.maximum(s[1] / m - mean * mean, 0.0)
    scale = jax.lax.rsqrt(var + eps)                      # gamma = 1
    shift = -mean * scale                                 # beta  = 0
    scale = scale.reshape(1, cp).astype(jnp.float32)
    shift = shift.reshape(1, cp).astype(jnp.float32)
    tm = _pick_m_tile(m, cp)
    nm = m // tm
    args = [y, scale, shift]
    in_specs = [pl.BlockSpec((tm, cp), lambda i: (i, 0)),
                pl.BlockSpec((1, cp), lambda i: (0, 0)),
                pl.BlockSpec((1, cp), lambda i: (0, 0))]
    if residual is None:
        kernel = functools.partial(_bn_act_kernel, relu=relu)
    else:
        kernel = _bn_add_relu_kernel
        args.append(residual)
        in_specs.append(pl.BlockSpec((tm, cp), lambda i: (i, 0)))
    return pl.pallas_call(
        kernel,
        grid=(nm,),
        in_specs=in_specs,
        out_specs=pl.BlockSpec((tm, cp), lambda i: (i, 0)),
        out_shape=jax.ShapeDtypeStruct((m, cp), jnp.bfloat16),
        compiler_params=_cparams(("parallel",)),
    )(*args)


# --------------------------- JAX glue -----------------------------------------

def _even_pad(xp):
    _, h, w, _ = xp.shape
    return jnp.pad(xp, ((0, 0), (0, h % 2), (0, w % 2), (0, 0)))


def _space_to_depth(xp):
    n, h, w, c = xp.shape
    xs = xp.reshape(n, h // 2, 2, w // 2, 2, c)
    xs = jnp.transpose(xs, (0, 1, 3, 2, 4, 5))
    return xs.reshape(n, h // 2, w // 2, 4, c)


def _conv_bn_act(x, wd, *, relu, residual=None):
    """Conv2d (no bias) + BatchNorm2d(train stats) (+ residual) (+ ReLU), NHWC bf16."""
    n, h, w, cin = x.shape
    kh, kw = wd["kh"], wd["kw"]
    s, d, p = wd["stride"], wd["dilation"], wd["padding"]
    cp = wd["w"].shape[-1]
    ho = (h + 2 * p - d * (kh - 1) - 1) // s + 1
    wo = (w + 2 * p - d * (kw - 1) - 1) // s + 1
    if kh == 1 and kw == 1:
        xin = x if s == 1 else x[:, ::s, ::s, :]          # 1x1 stride-s = subsample + matmul
        y, st = _conv_1x1_call(xin.reshape(n * ho * wo, cin), wd["w"][0])
    elif wd["s2d"]:
        # stride-2 KxK conv -> stride-1 ceil(K/2)-conv over a space-to-depth repack.
        xp = _even_pad(jnp.pad(x, ((0, 0), (p, p), (p, p), (0, 0))))
        xs = _space_to_depth(xp)
        xs = xs.reshape(xs.shape[0], xs.shape[1], xs.shape[2], 4 * cin)
        a = (kh + 1) // 2
        y, st = _conv_spatial_call(xs, wd["w"], a, a, 1, ho, wo)
    else:
        assert s == 1, "spatial convs only support stride 1/2"
        xp = jnp.pad(x, ((0, 0), (p, p), (p, p), (0, 0)))
        y, st = _conv_spatial_call(xp, wd["w"], kh, kw, d, ho, wo)
    m = n * ho * wo
    r2 = residual.reshape(m, cp) if residual is not None else None
    out = _bn_act(y, st, m, cp, relu=relu, residual=r2)
    return out.reshape(n, ho, wo, cp)


def _maxpool3x3(x, stride, padding):
    # TODO(synk): only the stride-2 max-pool of the default strides config is implemented.
    assert stride == 2, "only stride-2 max-pool implemented"
    n, h, w, c = x.shape
    ho = (h + 2 * padding - 3) // stride + 1
    wo = (w + 2 * padding - 3) // stride + 1
    # Zero spatial padding is equivalent to -inf padding here: the input is post-ReLU (>=0)
    # and every pooling window contains at least one real element.
    xp = _even_pad(jnp.pad(x, ((0, 0), (padding, padding), (padding, padding), (0, 0))))
    xs = _space_to_depth(xp)                              # (n, hs, ws, 4, c)
    th = _pick_row_tile(ho, wo, c)
    nhb = ho // th
    taps = tuple((a, b, 2 * pp + qq)
                 for (a, pp) in ((0, 0), (0, 1), (1, 0))
                 for (b, qq) in ((0, 0), (0, 1), (1, 0)))
    kernel = functools.partial(_maxpool_s2d_kernel, th=th, wo=wo, taps=taps)
    return pl.pallas_call(
        kernel,
        grid=(n, nhb),
        in_specs=[pl.BlockSpec((1,) + xs.shape[1:], lambda i, j: (i, 0, 0, 0, 0))],
        out_specs=pl.BlockSpec((1, th, wo, c), lambda i, j: (i, j, 0, 0)),
        out_shape=jax.ShapeDtypeStruct((n, ho, wo, c), x.dtype),
        compiler_params=_cparams(("parallel", "parallel")),
    )(xs)


# --------------------------- parameters --------------------------------------

def _make_conv_w(key, cout, cin_act, cin_real, kh, kw, stride=1, dilation=1, padding=0):
    """Torch-init conv weight, pre-laid-out for the kernels (taps, cin, cout_padded), bf16."""
    cp = _round_up(cout, _LANE)
    std = math.sqrt(2.0 / (kh * kw * cout))               # normal(0, sqrt(2/n)) like the module
    w = jax.random.normal(key, (cout, cin_real, kh, kw), jnp.float32) * std
    w = jnp.transpose(w, (2, 3, 1, 0))                    # (kh, kw, cin, cout)
    w = jnp.pad(w, ((0, 0), (0, 0), (0, cin_act - cin_real), (0, cp - cout)))
    s2d = kh > 1 and stride == 2
    if s2d:
        assert dilation == 1
        a = (kh + 1) // 2
        weff = jnp.zeros((a, a, 4, cin_act, cp), jnp.float32)
        for pp in range(2):
            for qq in range(2):
                sub = w[pp::2, qq::2]
                weff = weff.at[:sub.shape[0], :sub.shape[1], 2 * pp + qq].set(sub)
        wf = weff.reshape(a * a, 4 * cin_act, cp)
    else:
        wf = w.reshape(kh * kw, cin_act, cp)
    return {"w": wf.astype(jnp.bfloat16), "kh": kh, "kw": kw, "stride": stride,
            "dilation": dilation, "padding": padding, "s2d": s2d,
            "cout": cout, "cout_p": cp}


def build_params(key, layers=(1, 1, 2, 2), strides=(2, 2, 2, 1, 1)):
    keys = iter(jax.random.split(key, 512))
    params = {"strides": strides,
              "conv1": _make_conv_w(next(keys), 64, 3, 3, 7, 7,
                                    stride=strides[0], dilation=1, padding=3)}
    inpl_real, inpl_act = 64, params["conv1"]["cout_p"]
    layer_cfg = [(64, layers[0], 1, 1),
                 (128, layers[1], strides[2], 1),
                 (256, layers[2], strides[3], 2 // strides[3]),
                 (512, layers[3], strides[4], 4 ** (2 - strides[4]))]
    all_layers = []
    for planes, nblocks, stride, dilation in layer_cfg:
        blocks = []
        for bi in range(nblocks):
            s = stride if bi == 0 else 1
            d = 1 if bi == 0 else dilation                # first block of a layer: dilation=1
            width = planes                                # groups=1, base_width=64
            wp = _round_up(width, _LANE)
            outc = planes * _EXPANSION
            blk = {"conv1": _make_conv_w(next(keys), width, inpl_act, inpl_real, 1, 1),
                   "conv2": _make_conv_w(next(keys), width, wp, width, 3, 3,
                                         stride=s, dilation=d, padding=d),
                   "conv3": _make_conv_w(next(keys), outc, wp, width, 1, 1),
                   "downsample": None}
            if bi == 0 and (stride != 1 or inpl_real != outc):
                blk["downsample"] = _make_conv_w(next(keys), outc, inpl_act, inpl_real,
                                                 1, 1, stride=s)
            blocks.append(blk)
            inpl_real, inpl_act = outc, _round_up(outc, _LANE)
        all_layers.append(blocks)
    params["layers"] = all_layers
    return params


# --------------------------- forward ------------------------------------------

def _bottleneck(x, blk):
    out = _conv_bn_act(x, blk["conv1"], relu=True)
    out = _conv_bn_act(out, blk["conv2"], relu=True)
    if blk["downsample"] is not None:
        identity = _conv_bn_act(x, blk["downsample"], relu=False)
    else:
        identity = x
    # conv3 + bn3 + residual add + relu fused in the BN kernel
    return _conv_bn_act(out, blk["conv3"], relu=False, residual=identity)


def resnet_forward(x_nchw, params, inter_features=False):
    x = jnp.transpose(x_nchw, (0, 2, 3, 1)).astype(jnp.bfloat16)   # NCHW -> NHWC, bf16 operands
    layer0 = _conv_bn_act(x, params["conv1"], relu=True)
    h = _maxpool3x3(layer0, stride=params["strides"][1], padding=1)
    feats = []
    for blocks in params["layers"]:
        for blk in blocks:
            h = _bottleneck(h, blk)
        feats.append(h)

    def to_nchw(t, c_real):
        return jnp.transpose(t[..., :c_real], (0, 3, 1, 2)).astype(jnp.float32)

    chans = [blocks[-1]["conv3"]["cout"] for blocks in params["layers"]]
    if inter_features:
        l1, l2, l3, l4 = feats
        return (to_nchw(l4, chans[3]), to_nchw(l3, chans[2]), to_nchw(l2, chans[1]),
                to_nchw(l1, chans[0]), to_nchw(layer0, params["conv1"]["cout"]))
    return to_nchw(h, chans[-1])


# --------------------------- main ---------------------------------------------

if __name__ == "__main__":
    key = jax.random.PRNGKey(0)
    pkey, xkey = jax.random.split(key)

    # Small config consistent with the module: Bottleneck, layers=(1,1,2,2),
    # strides=(2,2,2,1,1) => layer3 blocks use dilation=2 and layer4 blocks dilation=4.
    params = build_params(pkey, layers=(1, 1, 2, 2), strides=(2, 2, 2, 1, 1))

    x = jax.random.normal(xkey, (2, 3, 32, 32), jnp.float32)  # NCHW, like PyTorch

    out = resnet_forward(x, params)
    out = jax.block_until_ready(out)
    assert out.shape == (2, 512 * _EXPANSION, 4, 4), out.shape
    assert bool(jnp.all(jnp.isfinite(out))), "non-finite output"
    print("KERNEL_OK")
</pallas_src>

<mosaic_0001>
module attributes {stable_mosaic.version = 11 : i64} {
  func.func @_spatial_conv_kernel(%arg0: i32, %arg1: i32, %arg2: memref<1x19x19x12xbf16, #tpu.memory_space<vmem>>, %arg3: memref<16x12x128xbf16, #tpu.memory_space<vmem>>, %arg4: memref<1x256x128xf32, #tpu.memory_space<vmem>>, %arg5: memref<1x1x2x128xf32, #tpu.memory_space<vmem>>) attributes {dimension_semantics = [#tpu.dimension_semantics<parallel>, #tpu.dimension_semantics<parallel>], iteration_bounds = array<i64: 2, 1>, scalar_prefetch = 0 : i64, scratch_operands = 0 : i64, tpu.core_type = #tpu.core_type<tc>, window_params = [{transform_indices = @transform_0, window_bounds = array<i64: 1, 19, 19, 12>}, {pipeline_mode = #tpu.pipeline_mode<synchronous>, transform_indices = @transform_1, window_bounds = array<i64: 16, 12, 128>}, {transform_indices = @transform_2, window_bounds = array<i64: 1, 256, 128>}, {transform_indices = @transform_3, window_bounds = array<i64: 1, 1, 2, 128>}]} {
    %c16_i32 = arith.constant 16 : i32
    %0 = arith.muli %arg1, %c16_i32 : i32
    %cst = arith.constant 0.000000e+00 : f32
    %1 = vector.broadcast %cst : f32 to vector<256x128xf32>
    %c0_i32 = arith.constant 0 : i32
    %2 = arith.addi %0, %c0_i32 : i32
    %c0 = arith.constant 0 : index
    %3 = arith.index_cast %2 : i32 to index
    %c0_0 = arith.constant 0 : index
    %c0_1 = arith.constant 0 : index
    %4 = vector.load %arg2[%c0, %3, %c0_0, %c0_1] : memref<1x19x19x12xbf16, #tpu.memory_space<vmem>>, vector<1x16x16x12xbf16>
    %5 = vector.shape_cast %4 : vector<1x16x16x12xbf16> to vector<16x16x12xbf16>
    %6 = vector.shape_cast %5 : vector<16x16x12xbf16> to vector<256x12xbf16>
    %c0_2 = arith.constant 0 : index
    %c0_3 = arith.constant 0 : index
    %c0_4 = arith.constant 0 : index
    %7 = vector.load %arg3[%c0_2, %c0_3, %c0_4] : memref<16x12x128xbf16, #tpu.memory_space<vmem>>, vector<1x12x128xbf16>
    %8 = vector.shape_cast %7 : vector<1x12x128xbf16> to vector<12x128xbf16>
    %cst_5 = arith.constant dense<0.000000e+00> : vector<256x128xf32>
    %9 = tpu.matmul %6, %8, %cst_5 {dimension_numbers = #tpu.dot_dimension_numbers<[1], [0], [0], [1], [0, 0, 1, 1], [], []>} : vector<256x12xbf16>, vector<12x128xbf16>, vector<256x128xf32> -> vector<256x128xf32>
    %10 = arith.addf %1, %9 : vector<256x128xf32>
    %c0_i32_6 = arith.constant 0 : i32
    %11 = arith.addi %0, %c0_i32_6 : i32
    %c0_7 = arith.constant 0 : index
    %12 = arith.index_cast %11 : i32 to index
    %c1 = arith.constant 1 : index
    %c0_8 = arith.constant 0 : index
    %13 = vector.load %arg2[%c0_7, %12, %c1, %c0_8] : memref<1x19x19x12xbf16, #tpu.memory_space<vmem>>, vector<1x16x16x12xbf16>
    %14 = vector.shape_cast %13 : vector<1x16x16x12xbf16> to vector<16x16x12xbf16>
    %15 = vector.shape_cast %14 : vector<16x16x12xbf16> to vector<256x12xbf16>
    %c1_9 = arith.constant 1 : index
    %c0_10 = arith.constant 0 : index
    %c0_11 = arith.constant 0 : index
    %16 = vector.load %arg3[%c1_9, %c0_10, %c0_11] : memref<16x12x128xbf16, #tpu.memory_space<vmem>>, vector<1x12x128xbf16>
    %17 = vector.shape_cast %16 : vector<1x12x128xbf16> to vector<12x128xbf16>
    %cst_12 = arith.constant dense<0.000000e+00> : vector<256x128xf32>
    %18 = tpu.matmul %15, %17, %cst_12 {dimension_numbers = #tpu.dot_dimension_numbers<[1], [0], [0], [1], [0, 0, 1, 1], [], []>} : vector<256x12xbf16>, vector<12x128xbf16>, vector<256x128xf32> -> vector<256x128xf32>
    %19 = arith.addf %10, %18 : vector<256x128xf32>
    %c0_i32_13 = arith.constant 0 : i32
    %20 = arith.addi %0, %c0_i32_13 : i32
    %c0_14 = arith.constant 0 : index
    %21 = arith.index_cast %20 : i32 to index
    %c2 = arith.constant 2 : index
    %c0_15 = arith.constant 0 : index
    %22 = vector.load %arg2[%c0_14, %21, %c2, %c0_15] : memref<1x19x19x12xbf16, #tpu.memory_space<vmem>>, vector<1x16x16x12xbf16>
    %23 = vector.shape_cast %22 : vector<1x16x16x12xbf16> to vector<16x16x12xbf16>
    %24 = vector.shape_cast %23 : vector<16x16x12xbf16> to vector<256x12xbf16>
    %c2_16 = arith.constant 2 : index
    %c0_17 = arith.constant 0 : index
    %c0_18 = arith.constant 0 : index
    %25 = vector.load %arg3[%c2_16, %c0_17, %c0_18] : memref<16x12x128xbf16, #tpu.memory_space<vmem>>, vector<1x12x128xbf16>
    %26 = vector.shape_cast %25 : vector<1x12x128xbf16> to vector<12x128xbf16>
    %cst_19 = arith.constant dense<0.000000e+00> : vector<256x128xf32>
    %27 = tpu.matmul %24, %26, %cst_19 {dimension_numbers = #tpu.dot_dimension_numbers<[1], [0], [0], [1], [0, 0, 1, 1], [], []>} : vector<256x12xbf16>, vector<12x128xbf16>, vector<256x128xf32> -> vector<256x128xf32>
    %28 = arith.addf %19, %27 : vector<256x128xf32>
    %c0_i32_20 = arith.constant 0 : i32
    %29 = arith.addi %0, %c0_i32_20 : i32
    %c0_21 = arith.constant 0 : index
    %30 = arith.index_cast %29 : i32 to index
    %c3 = arith.constant 3 : index
    %c0_22 = arith.constant 0 : index
    %31 = vector.load %arg2[%c0_21, %30, %c3, %c0_22] : memref<1x19x19x12xbf16, #tpu.memory_space<vmem>>, vector<1x16x16x12xbf16>
    %32 = vector.shape_cast %31 : vector<1x16x16x12xbf16> to vector<16x16x12xbf16>
    %33 = vector.shape_cast %32 : vector<16x16x12xbf16> to vector<256x12xbf16>
    %c3_23 = arith.constant 3 : index
    %c0_24 = arith.constant 0 : index
    %c0_25 = arith.constant 0 : index
    %34 = vector.load %arg3[%c3_23, %c0_24, %c0_25] : memref<16x12x128xbf16, #tpu.memory_space<vmem>>, vector<1x12x128xbf16>
    %35 = vector.shape_cast %34 : vector<1x12x128xbf16> to vector<12x128xbf16>
    %cst_26 = arith.constant dense<0.000000e+00> : vector<256x128xf32>
    %36 = tpu.matmul %33, %35, %cst_26 {dimension_numbers = #tpu.dot_dimension_numbers<[1], [0], [0], [1], [0, 0, 1, 1], [], []>} : vector<256x12xbf16>, vector<12x128xbf16>, vector<256x128xf32> -> vector<256x128xf32>
    %37 = arith.addf %28, %36 : vector<256x128xf32>
    %c1_i32 = arith.constant 1 : i32
    %38 = arith.addi %0, %c1_i32 : i32
    %c0_27 = arith.constant 0 : index
    %39 = arith.index_cast %38 : i32 to index
    %c0_28 = arith.constant 0 : index
    %c0_29 = arith.constant 0 : index
    %40 = vector.load %arg2[%c0_27, %39, %c0_28, %c0_29] : memref<1x19x19x12xbf16, #tpu.memory_space<vmem>>, vector<1x16x16x12xbf16>
    %41 = vector.shape_cast %40 : vector<1x16x16x12xbf16> to vector<16x16x12xbf16>
    %42 = vector.shape_cast %41 : vector<16x16x12xbf16> to vector<256x12xbf16>
    %c4 = arith.constant 4 : index
    %c0_30 = arith.constant 0 : index
    %c0_31 = arith.constant 0 : index
    %43 = vector.load %arg3[%c4, %c0_30, %c0_31] : memref<16x12x128xbf16, #tpu.memory_space<vmem>>, vector<1x12x128xbf16>
    %44 = vector.shape_cast %43 : vector<1x12x128xbf16> to vector<12x128xbf16>
    %cst_32 = arith.constant dense<0.000000e+00> : vector<256x128xf32>
    %45 = tpu.matmul %42, %44, %cst_32 {dimension_numbers = #tpu.dot_dimension_numbers<[1], [0], [0], [1], [0, 0, 1, 1], [], []>} : vector<256x12xbf16>, vector<12x128xbf16>, vector<256x128xf32> -> vector<256x128xf32>
    %46 = arith.addf %37, %45 : vector<256x128xf32>
    %c1_i32_33 = arith.constant 1 : i32
    %47 = arith.addi %0, %c1_i32_33 : i32
    %c0_34 = arith.constant 0 : index
    %48 = arith.index_cast %47 : i32 to index
    %c1_35 = arith.constant 1 : index
    %c0_36 = arith.constant 0 : index
    %49 = vector.load %arg2[%c0_34, %48, %c1_35, %c0_36] : memref<1x19x19x12xbf16, #tpu.memory_space<vmem>>, vector<1x16x16x12xbf16>
    %50 = vector.shape_cast %49 : vector<1x16x16x12xbf16> to vector<16x16x12xbf16>
    %51 = vector.shape_cast %50 : vector<16x16x12xbf16> to vector<256x12xbf16>
    %c5 = arith.constant 5 : index
    %c0_37 = arith.constant 0 : index
    %c0_38 = arith.constant 0 : index
    %52 = vector.load %arg3[%c5, %c0_37, %c0_38] : memref<16x12x128xbf16, #tpu.memory_space<vmem>>, vector<1x12x128xbf16>
    %53 = vector.shape_cast %52 : vector<1x12x128xbf16> to vector<12x128xbf16>
    %cst_39 = arith.constant dense<0.000000e+00> : vector<256x128xf32>
    %54 = tpu.matmul %51, %53, %cst_39 {dimension_numbers = #tpu.dot_dimension_numbers<[1], [0], [0], [1], [0, 0, 1, 1], [], []>} : vector<256x12xbf16>, vector<12x128xbf16>, vector<256x128xf32> -> vector<256x128xf32>
    %55 = arith.addf %46, %54 : vector<256x128xf32>
    %c1_i32_40 = arith.constant 1 : i32
    %56 = arith.addi %0, %c1_i32_40 : i32
    %c0_41 = arith.constant 0 : index
    %57 = arith.index_cast %56 : i32 to index
    %c2_42 = arith.constant 2 : index
    %c0_43 = arith.constant 0 : index
    %58 = vector.load %arg2[%c0_41, %57, %c2_42, %c0_43] : memref<1x19x19x12xbf16, #tpu.memory_space<vmem>>, vector<1x16x16x12xbf16>
    %59 = vector.shape_cast %58 : vector<1x16x16x12xbf16> to vector<16x16x12xbf16>
    %60 = vector.shape_cast %59 : vector<16x16x12xbf16> to vector<256x12xbf16>
    %c6 = arith.constant 6 : index
    %c0_44 = arith.constant 0 : index
    %c0_45 = arith.constant 0 : index
    %61 = vector.load %arg3[%c6, %c0_44, %c0_45] : memref<16x12x128xbf16, #tpu.memory_space<vmem>>, vector<1x12x128xbf16>
    %62 = vector.shape_cast %61 : vector<1x12x128xbf16> to vector<12x128xbf16>
    %cst_46 = arith.constant dense<0.000000e+00> : vector<256x128xf32>
    %63 = tpu.matmul %60, %62, %cst_46 {dimension_numbers = #tpu.dot_dimension_numbers<[1], [0], [0], [1], [0, 0, 1, 1], [], []>} : vector<256x12xbf16>, vector<12x128xbf16>, vector<256x128xf32> -> vector<256x128xf32>
    %64 = arith.addf %55, %63 : vector<256x128xf32>
    %c1_i32_47 = arith.constant 1 : i32
    %65 = arith.addi %0, %c1_i32_47 : i32
    %c0_48 = arith.constant 0 : index
    %66 = arith.index_cast %65 : i32 to index
    %c3_49 = arith.constant 3 : index
    %c0_50 = arith.constant 0 : index
    %67 = vector.load %arg2[%c0_48, %66, %c3_49, %c0_50] : memref<1x19x19x12xbf16, #tpu.memory_space<vmem>>, vector<1x16x16x12xbf16>
    %68 = vector.shape_cast %67 : vector<1x16x16x12xbf16> to vector<16x16x12xbf16>
    %69 = vector.shape_cast %68 : vector<16x16x12xbf16> to vector<256x12xbf16>
    %c7 = arith.constant 7 : index
    %c0_51 = arith.constant 0 : index
    %c0_52 = arith.constant 0 : index
    %70 = vector.load %arg3[%c7, %c0_51, %c0_52] : memref<16x12x128xbf16, #tpu.memory_space<vmem>>, vector<1x12x128xbf16>
    %71 = vector.shape_cast %70 : vector<1x12x128xbf16> to vector<12x128xbf16>
    %cst_53 = arith.constant dense<0.000000e+00> : vector<256x128xf32>
    %72 = tpu.matmul %69, %71, %cst_53 {dimension_numbers = #tpu.dot_dimension_numbers<[1], [0], [0], [1], [0, 0, 1, 1], [], []>} : vector<256x12xbf16>, vector<12x128xbf16>, vector<256x128xf32> -> vector<256x128xf32>
    %73 = arith.addf %64, %72 : vector<256x128xf32>
    %c2_i32 = arith.constant 2 : i32
    %74 = arith.addi %0, %c2_i32 : i32
    %c0_54 = arith.constant 0 : index
    %75 = arith.index_cast %74 : i32 to index
    %c0_55 = arith.constant 0 : index
    %c0_56 = arith.constant 0 : index
    %76 = vector.load %arg2[%c0_54, %75, %c0_55, %c0_56] : memref<1x19x19x12xbf16, #tpu.memory_space<vmem>>, vector<1x16x16x12xbf16>
    %77 = vector.shape_cast %76 : vector<1x16x16x12xbf16> to vector<16x16x12xbf16>
    %78 = vector.shape_cast %77 : vector<16x16x12xbf16> to vector<256x12xbf16>
    %c8 = arith.constant 8 : index
    %c0_57 = arith.constant 0 : index
    %c0_58 = arith.constant 0 : index
    %79 = vector.load %arg3[%c8, %c0_57, %c0_58] : memref<16x12x128xbf16, #tpu.memory_space<vmem>>, vector<1x12x128xbf16>
    %80 = vector.shape_cast %79 : vector<1x12x128xbf16> to vector<12x128xbf16>
    %cst_59 = arith.constant dense<0.000000e+00> : vector<256x128xf32>
    %81 = tpu.matmul %78, %80, %cst_59 {dimension_numbers = #tpu.dot_dimension_numbers<[1], [0], [0], [1], [0, 0, 1, 1], [], []>} : vector<256x12xbf16>, vector<12x128xbf16>, vector<256x128xf32> -> vector<256x128xf32>
    %82 = arith.addf %73, %81 : vector<256x128xf32>
    %c2_i32_60 = arith.constant 2 : i32
    %83 = arith.addi %0, %c2_i32_60 : i32
    %c0_61 = arith.constant 0 : index
    %84 = arith.index_cast %83 : i32 to index
    %c1_62 = arith.constant 1 : index
    %c0_63 = arith.constant 0 : index
    %85 = vector.load %arg2[%c0_61, %84, %c1_62, %c0_63] : memref<1x19x19x12xbf16, #tpu.memory_space<vmem>>, vector<1x16x16x12xbf16>
    %86 = vector.shape_cast %85 : vector<1x16x16x12xbf16> to vector<16x16x12xbf16>
    %87 = vector.shape_cast %86 : vector<16x16x12xbf16> to vector<256x12xbf16>
    %c9 = arith.constant 9 : index
    %c0_64 = arith.constant 0 : index
    %c0_65 = arith.constant 0 : index
    %88 = vector.load %arg3[%c9, %c0_64, %c0_65] : memref<16x12x128xbf16, #tpu.memory_space<vmem>>, vector<1x12x128xbf16>
    %89 = vector.shape_cast %88 : vector<1x12x128xbf16> to vector<12x128xbf16>
    %cst_66 = arith.constant dense<0.000000e+00> : vector<256x128xf32>
    %90 = tpu.matmul %87, %89, %cst_66 {dimension_numbers = #tpu.dot_dimension_numbers<[1], [0], [0], [1], [0, 0, 1, 1], [], []>} : vector<256x12xbf16>, vector<12x128xbf16>, vector<256x128xf32> -> vector<256x128xf32>
    %91 = arith.addf %82, %90 : vector<256x128xf32>
    %c2_i32_67 = arith.constant 2 : i32
    %92 = arith.addi %0, %c2_i32_67 : i32
    %c0_68 = arith.constant 0 : index
    %93 = arith.index_cast %92 : i32 to index
    %c2_69 = arith.constant 2 : index
    %c0_70 = arith.constant 0 : index
    %94 = vector.load %arg2[%c0_68, %93, %c2_69, %c0_70] : memref<1x19x19x12xbf16, #tpu.memory_space<vmem>>, vector<1x16x16x12xbf16>
    %95 = vector.shape_cast %94 : vector<1x16x16x12xbf16> to vector<16x16x12xbf16>
    %96 = vector.shape_cast %95 : vector<16x16x12xbf16> to vector<256x12xbf16>
    %c10 = arith.constant 10 : index
    %c0_71 = arith.constant 0 : index
    %c0_72 = arith.constant 0 : index
    %97 = vector.load %arg3[%c10, %c0_71, %c0_72] : memref<16x12x128xbf16, #tpu.memory_space<vmem>>, vector<1x12x128xbf16>
    %98 = vector.shape_cast %97 : vector<1x12x128xbf16> to vector<12x128xbf16>
    %cst_73 = arith.constant dense<0.000000e+00> : vector<256x128xf32>
    %99 = tpu.matmul %96, %98, %cst_73 {dimension_numbers = #tpu.dot_dimension_numbers<[1], [0], [0], [1], [0, 0, 1, 1], [], []>} : vector<256x12xbf16>, vector<12x128xbf16>, vector<256x128xf32> -> vector<256x128xf32>
    %100 = arith.addf %91, %99 : vector<256x128xf32>
    %c2_i32_74 = arith.constant 2 : i32
    %101 = arith.addi %0, %c2_i32_74 : i32
    %c0_75 = arith.constant 0 : index
    %102 = arith.index_cast %101 : i32 to index
    %c3_76 = arith.constant 3 : index
    %c0_77 = arith.constant 0 : index
    %103 = vector.load %arg2[%c0_75, %102, %c3_76, %c0_77] : memref<1x19x19x12xbf16, #tpu.memory_space<vmem>>, vector<1x16x16x12xbf16>
    %104 = vector.shape_cast %103 : vector<1x16x16x12xbf16> to vector<16x16x12xbf16>
    %105 = vector.shape_cast %104 : vector<16x16x12xbf16> to vector<256x12xbf16>
    %c11 = arith.constant 11 : index
    %c0_78 = arith.constant 0 : index
    %c0_79 = arith.constant 0 : index
    %106 = vector.load %arg3[%c11, %c0_78, %c0_79] : memref<16x12x128xbf16, #tpu.memory_space<vmem>>, vector<1x12x128xbf16>
    %107 = vector.shape_cast %106 : vector<1x12x128xbf16> to vector<12x128xbf16>
    %cst_80 = arith.constant dense<0.000000e+00> : vector<256x128xf32>
    %108 = tpu.matmul %105, %107, %cst_80 {dimension_numbers = #tpu.dot_dimension_numbers<[1], [0], [0], [1], [0, 0, 1, 1], [], []>} : vector<256x12xbf16>, vector<12x128xbf16>, vector<256x128xf32> -> vector<256x128xf32>
    %109 = arith.addf %100, %108 : vector<256x128xf32>
    %c3_i32 = arith.constant 3 : i32
    %110 = arith.addi %0, %c3_i32 : i32
    %c0_81 = arith.constant 0 : index
    %111 = arith.index_cast %110 : i32 to index
    %c0_82 = arith.constant 0 : index
    %c0_83 = arith.constant 0 : index
    %112 = vector.load %arg2[%c0_81, %111, %c0_82, %c0_83] : memref<1x19x19x12xbf16, #tpu.memory_space<vmem>>, vector<1x16x16x12xbf16>
    %113 = vector.shape_cast %112 : vector<1x16x16x12xbf16> to vector<16x16x12xbf16>
    %114 = vector.shape_cast %113 : vector<16x16x12xbf16> to vector<256x12xbf16>
    %c12 = arith.constant 12 : index
    %c0_84 = arith.constant 0 : index
    %c0_85 = arith.constant 0 : index
    %115 = vector.load %arg3[%c12, %c0_84, %c0_85] : memref<16x12x128xbf16, #tpu.memory_space<vmem>>, vector<1x12x128xbf16>
    %116 = vector.shape_cast %115 : vector<1x12x128xbf16> to vector<12x128xbf16>
    %cst_86 = arith.constant dense<0.000000e+00> : vector<256x128xf32>
    %117 = tpu.matmul %114, %116, %cst_86 {dimension_numbers = #tpu.dot_dimension_numbers<[1], [0], [0], [1], [0, 0, 1, 1], [], []>} : vector<256x12xbf16>, vector<12x128xbf16>, vector<256x128xf32> -> vector<256x128xf32>
    %118 = arith.addf %109, %117 : vector<256x128xf32>
    %c3_i32_87 = arith.constant 3 : i32
    %119 = arith.addi %0, %c3_i32_87 : i32
    %c0_88 = arith.constant 0 : index
    %120 = arith.index_cast %119 : i32 to index
    %c1_89 = arith.constant 1 : index
    %c0_90 = arith.constant 0 : index
    %121 = vector.load %arg2[%c0_88, %120, %c1_89, %c0_90] : memref<1x19x19x12xbf16, #tpu.memory_space<vmem>>, vector<1x16x16x12xbf16>
    %122 = vector.shape_cast %121 : vector<1x16x16x12xbf16> to vector<16x16x12xbf16>
    %123 = vector.shape_cast %122 : vector<16x16x12xbf16> to vector<256x12xbf16>
    %c13 = arith.constant 13 : index
    %c0_91 = arith.constant 0 : index
    %c0_92 = arith.constant 0 : index
    %124 = vector.load %arg3[%c13, %c0_91, %c0_92] : memref<16x12x128xbf16, #tpu.memory_space<vmem>>, vector<1x12x128xbf16>
    %125 = vector.shape_cast %124 : vector<1x12x128xbf16> to vector<12x128xbf16>
    %cst_93 = arith.constant dense<0.000000e+00> : vector<256x128xf32>
    %126 = tpu.matmul %123, %125, %cst_93 {dimension_numbers = #tpu.dot_dimension_numbers<[1], [0], [0], [1], [0, 0, 1, 1], [], []>} : vector<256x12xbf16>, vector<12x128xbf16>, vector<256x128xf32> -> vector<256x128xf32>
    %127 = arith.addf %118, %126 : vector<256x128xf32>
    %c3_i32_94 = arith.constant 3 : i32
    %128 = arith.addi %0, %c3_i32_94 : i32
    %c0_95 = arith.constant 0 : index
    %129 = arith.index_cast %128 : i32 to index
    %c2_96 = arith.constant 2 : index
    %c0_97 = arith.constant 0 : index
    %130 = vector.load %arg2[%c0_95, %129, %c2_96, %c0_97] : memref<1x19x19x12xbf16, #tpu.memory_space<vmem>>, vector<1x16x16x12xbf16>
    %131 = vector.shape_cast %130 : vector<1x16x16x12xbf16> to vector<16x16x12xbf16>
    %132 = vector.shape_cast %131 : vector<16x16x12xbf16> to vector<256x12xbf16>
    %c14 = arith.constant 14 : index
    %c0_98 = arith.constant 0 : index
    %c0_99 = arith.constant 0 : index
    %133 = vector.load %arg3[%c14, %c0_98, %c0_99] : memref<16x12x128xbf16, #tpu.memory_space<vmem>>, vector<1x12x128xbf16>
    %134 = vector.shape_cast %133 : vector<1x12x128xbf16> to vector<12x128xbf16>
    %cst_100 = arith.constant dense<0.000000e+00> : vector<256x128xf32>
    %135 = tpu.matmul %132, %134, %cst_100 {dimension_numbers = #tpu.dot_dimension_numbers<[1], [0], [0], [1], [0, 0, 1, 1], [], []>} : vector<256x12xbf16>, vector<12x128xbf16>, vector<256x128xf32> -> vector<256x128xf32>
    %136 = arith.addf %127, %135 : vector<256x128xf32>
    %c3_i32_101 = arith.constant 3 : i32
    %137 = arith.addi %0, %c3_i32_101 : i32
    %c0_102 = arith.constant 0 : index
    %138 = arith.index_cast %137 : i32 to index
    %c3_103 = arith.constant 3 : index
    %c0_104 = arith.constant 0 : index
    %139 = vector.load %arg2[%c0_102, %138, %c3_103, %c0_104] : memref<1x19x19x12xbf16, #tpu.memory_space<vmem>>, vector<1x16x16x12xbf16>
    %140 = vector.shape_cast %139 : vector<1x16x16x12xbf16> to vector<16x16x12xbf16>
    %141 = vector.shape_cast %140 : vector<16x16x12xbf16> to vector<256x12xbf16>
    %c15 = arith.constant 15 : index
    %c0_105 = arith.constant 0 : index
    %c0_106 = arith.constant 0 : index
    %142 = vector.load %arg3[%c15, %c0_105, %c0_106] : memref<16x12x128xbf16, #tpu.memory_space<vmem>>, vector<1x12x128xbf16>
    %143 = vector.shape_cast %142 : vector<1x12x128xbf16> to vector<12x128xbf16>
    %cst_107 = arith.constant dense<0.000000e+00> : vector<256x128xf32>
    %144 = tpu.matmul %141, %143, %cst_107 {dimension_numbers = #tpu.dot_dimension_numbers<[1], [0], [0], [1], [0, 0, 1, 1], [], []>} : vector<256x12xbf16>, vector<12x128xbf16>, vector<256x128xf32> -> vector<256x128xf32>
    %145 = arith.addf %136, %144 : vector<256x128xf32>
    %146 = vector.shape_cast %145 : vector<256x128xf32> to vector<1x256x128xf32>
    %c0_108 = arith.constant 0 : index
    %c0_109 = arith.constant 0 : index
    %c0_110 = arith.constant 0 : index
    %147 = vector.load %arg4[%c0_108, %c0_109, %c0_110] : memref<1x256x128xf32, #tpu.memory_space<vmem>>, vector<1x256x128xf32>
    tpu.vector_store %arg4[%c0_108, %c0_109, %c0_110], %146 {strides = array<i32>} : memref<1x256x128xf32, #tpu.memory_space<vmem>>, vector<1x256x128xf32>,
    %cst_111 = arith.constant dense<0.000000e+00> : vector<128xf32>
    %148 = vector.multi_reduction <add>, %145, %cst_111 [0] : vector<256x128xf32> to vector<128xf32>
    %149 = vector.shape_cast %148 : vector<128xf32> to vector<1x128xf32>
    %150 = arith.mulf %145, %145 : vector<256x128xf32>
    %cst_112 = arith.constant dense<0.000000e+00> : vector<128xf32>
    %151 = vector.multi_reduction <add>, %150, %cst_112 [0] : vector<256x128xf32> to vector<128xf32>
    %152 = vector.shape_cast %151 : vector<128xf32> to vector<1x128xf32>
    %153 = tpu.concatenate %149, %152 in 0 : vector<1x128xf32>, vector<1x128xf32> -> vector<2x128xf32>
    %154 = vector.shape_cast %153 : vector<2x128xf32> to vector<1x1x2x128xf32>
    %c0_113 = arith.constant 0 : index
    %c0_114 = arith.constant 0 : index
    %c0_115 = arith.constant 0 : index
    %c0_116 = arith.constant 0 : index
    %155 = vector.load %arg5[%c0_113, %c0_114, %c0_115, %c0_116] : memref<1x1x2x128xf32, #tpu.memory_space<vmem>>, vector<1x1x2x128xf32>
    tpu.vector_store %arg5[%c0_113, %c0_114, %c0_115, %c0_116], %154 {strides = array<i32>} : memref<1x1x2x128xf32, #tpu.memory_space<vmem>>, vector<1x1x2x128xf32>,
    return
  }
  func.func @transform_0(%arg0: i32, %arg1: i32) -> (i32, i32, i32, i32) {
    %c0_i32 = arith.constant 0 : i32
    %c0_i32_0 = arith.constant 0 : i32
    %c0_i32_1 = arith.constant 0 : i32
    %c0_i32_2 = arith.constant 0 : i32
    return %arg0, %c0_i32, %c0_i32_0, %c0_i32_1 : i32, i32, i32, i32
  }
  func.func @transform_1(%arg0: i32, %arg1: i32) -> (i32, i32, i32) {
    %c0_i32 = arith.constant 0 : i32
    %c0_i32_0 = arith.constant 0 : i32
    %c0_i32_1 = arith.constant 0 : i32
    %c0_i32_2 = arith.constant 0 : i32
    return %c0_i32, %c0_i32_0, %c0_i32_1 : i32, i32, i32
  }
  func.func @transform_2(%arg0: i32, %arg1: i32) -> (i32, i32, i32) {
    %c0_i32 = arith.constant 0 : i32
    %c0_i32_0 = arith.constant 0 : i32
    return %arg0, %arg1, %c0_i32 : i32, i32, i32
  }
  func.func @transform_3(%arg0: i32, %arg1: i32) -> (i32, i32, i32, i32) {
    %c0_i32 = arith.constant 0 : i32
    %c0_i32_0 = arith.constant 0 : i32
    %c0_i32_1 = arith.constant 0 : i32
    return %arg0, %arg1, %c0_i32, %c0_i32_0 : i32, i32, i32, i32
  }
}

</mosaic_0001>

<bundles_post_ra>
// kernel: tpu_custom_call.1
= control target key start
LH: loop header
LB: loop body
LE: loop exit
PB: predicated region body
PF: predicated region fallthrough
CT: control target
= control target key end

     0   :  { %9 = vsyncpa [#allocation3], 0  ;;  %s15258_s0 = inlined_call_operand.vmem [shape: bf16[2,19,19,12], index: 0, kind: input, shape index: {}]   ;;  %s15259_s1 = inlined_call_operand.vmem [shape: bf16[16,12,128], index: 1, kind: input, shape index: {}]   ;;  %s15260_s2 = inlined_call_operand.hbm [shape: f32[2,256,128], index: 2, kind: output, shape index: {0}]   ;;  %s15261_s3 = inlined_call_operand.hbm [shape: f32[2,1,2,128], index: 3, kind: output, shape index: {1}]  }
   0x1   :  { %11 = vsyncpa [#allocation3 + $0x1], 0 }
   0x2   :  { %12 = vsyncpa [#allocation5], 0 }
   0x3   :  { %14 = vsyncpa [#allocation5 + $0x1], 0  ;;  %s12089_s12 = smov 0   ;;  %s12091_s13 = smov 0  }
   0x4   :  { %s12093_s14 = smov 0   ;;  %s12095_s15 = smov 0  }
   0x5   :  { %s12097_s16 = smov 0   ;;  %s12099_s17 = smov 0  }
   0x6 LB: > { %s9432_s18 = sadd.s32 4294967295, %s12063_s17   ;;  %s9433_s19 = sadd.s32 4294967294, %s12063_s17   ;;  %s12063_s17 = sphi %s12099_s17, %s20_s17   ;;  %s12059_s16 = sphi %s12097_s16, %s15722_s16   ;;  %s12055_s15 = sphi %s12095_s15, %s15721_s15   ;;  %s12051_s14 = sphi %s12093_s14, %s15720_s14   ;;  %s12047_s13 = sphi %s12091_s13, %s15719_s13   ;;  %s12043_s12 = sphi %s12089_s12, %s15718_s12  }
   0x7   : > { %s32_s20 = sadd.s32 1, %s12059_s16  ;;  %s88_s21 = sadd.s32 1, %s12051_s14 }
   0x8   : > { %p34_p0 = scmp.ge.s32.totalorder %s32_s20, 2  ;;  %p98_p1 = scmp.ne.s32.totalorder %s12051_s14, %s12047_s13 }
   0x9   : > { %p99_p2 = scmp.eq.s32.totalorder %s9432_s18, 1  ;;  %p104_p3 = scmp.ne.s32.totalorder %s12047_s13, %s12043_s12 }
   0xa   : > { %s15724_s20 = smov (%p34_p0, %s32_s20), 0  ;;  %p105_p5 = scmp.eq.s32.totalorder %s9433_s19, 1 }
   0xb   : > { %p12129_p4 = por %p99_p2, %p98_p1  ;;  %s83_s23 = ssub.s32 %s12059_s16, %s15724_s20 }
   0xc   : > { %p9436_p6 = scmp.ge.s32.totalorder %s12063_s17, 1  ;;  %p86_p7 = scmp.eq.s32.totalorder %s83_s23, 0 }
   0xd   : > { %p12136_p8 = por %p105_p5, %p104_p3  ;;  %p162_p9 = scmp.lt.s32.totalorder %s12063_s17, 3 }
   0xe   : > { %s12142_s25 = scalar_select %p86_p7, %s12051_s14, %s88_s21  }
   0xf   : > { %p163_p10 = pnand %p9436_p6, %p162_p9 }
  0x11   : > { %166 = sbr.rel (%p163_p10) target bundleno = 1014 (0x3f6), region = 28 }
  0x18   : > { %vm744_vm0 = vcmask 1045504   ;;  %p191_p11 = scmp.lt.s32.totalorder %s12055_s15, 1  ;;  %v11781_v0 = vld [vmem:[%s15259_s1 + $0x40] sm:$0x3f]   ;;  %v11784_v1 = vld [vmem:[%s15259_s1 + $0x8] sm:$0x3f]  }
  0x19   : > { %11710 = vmatprep.subr.msk.bf16.mxu0 %vm744_vm0, %v11781_v0  ;;  %v4789_v2 = vsel %vm744_vm0, %v11781_v0, 0  ;;  %vm695_vm1 = vcmask 97280   ;;  %11702 = vmatprep.subr.msk.bf16.mxu1 %vm744_vm0, %v11784_v1  ;;  %v746_v3 = vsel %vm744_vm0, %v11784_v1, 0  ;;  %vm252_vm2 = vsmask.f32 3328  ;;  %s10405_s7 = sshll.u32 %s12055_s15, 12 }
  0x1a   : > { %s192_s28 = scalar_select %p191_p11, %s12055_s15, 1  ;;  %10951 = vmatpush3.bf16.msra.mxu0 %v4789_v2  ;;  %10679 = vmatpush3.bf16.msra.mxu1 %v746_v3  ;;  %vm253_vm3 = vsmask.f32 7440  ;;  %v11786_v4 = vld [vmem:[%s15259_s1] sm:$0x3f]   ;;  %v15485_v38 = vmov 0 }
  0x1b   : > { %v11788_v5 = vld [vmem:[%s15259_s1 + $0x48] sm:$0x3f]   ;;  %11703 = vmatprep.subr.msk.bf16.mxu1 %vm744_vm0, %v11786_v4  ;;  %v12193_v20 = vsel %vm744_vm0, %v11786_v4, 0  ;;  %vm12216_vm4 = vmor %vm252_vm2, %vm253_vm3  ;;  %vm1254_vm5 = vcmask 1042432   ;;  %vm1255_vm6 = vcmask 1046532   ;;  %s15174_s18 = scalar_lea.hbm %s15260_s2, %s10405_s7  ;;  %s12065_s23 = smov [#allocation2]  }
  0x1c   : > { %s11718_s4 = smul.u32 228, %s192_s28  ;;  %11711 = vmatprep.subr.msk.bf16.mxu0 %vm744_vm0, %v11788_v5  ;;  %v5521_v8 = vsel %vm744_vm0, %v11788_v5, 0  ;;  %v15486_v38 = vsel %vm12216_vm4, 4294967295, %v15485_v38  ;;  %vm12923_vm7 = vmor %vm1254_vm5, %vm1255_vm6  ;;  %vm1685_vm8 = vsmask.f32 2304  ;;  %s11957_s26 = sshll.u32 %s12065_s23, 4  ;;  %s11958_s26 = int_to_ptr.vmem [resolvable:$false] %s11957_s26 }
  0x1d   : > { %15487 = vst [vmem:[#allocation12_spill] sm:$0xff] %v15486_v38  ;;  %vm1686_vm9 = vsmask.f32 6416  ;;  %s11959_s27 = scalar_lea.vmem %s11958_s26, 8192 }
  0x1e   : > { %s12162_s9 = scalar_lea.vmem %s15258_s0, %s11718_s4  ;;  %vm13317_vm10 = vmor %vm1685_vm8, %vm1686_vm9 }
  0x1f   : > { %v11782_v6 = vld [vmem:[%s12162_s9 + $0x18] sm:$0xff]   ;;  %v11783_v7 = vld [vmem:[%s12162_s9 + $0x24] sm:$0xff]   ;;  %v11785_v9 = vld [vmem:[%s12162_s9 + $0x30] sm:$0xff]  }
  0x20   : > { %10952 = vmatprep.mubr.msk.bf16.mxu0 %vm695_vm1, %v11782_v6  ;;  %v12176_v10 = vld [vmem:[%s12162_s9] sm:$0xf]  ;;  %v12179_v11 = vld [vmem:[%s12162_s9 + $0x4] sm:$0xf]  ;;  %v12182_v12 = vld [vmem:[%s12162_s9 + $0x8] sm:$0x1] }
  0x21   : > { %10953 = vmatmul.mubr.msk.bf16.vlgmr.msra.gmra.mrb[0].mxu0 %vm695_vm1, %v11783_v7  ;;  %15481 = vst [vmem:[#allocation8_spill] sm:$0xff] %v12182_v12  ;;  %v256_v13 = vshrl.u32 %v12176_v10, 16  ;;  %v259_v14 = vshll.u32 %v12176_v10, 16  ;;  %v265_v15 = vshll.u32 %v12179_v11, 16  ;;  %v269_v16 = vshrl.u32 %v12179_v11, 16  ;;  %v11787_v19 = vld [vmem:[%s12162_s9 + $0x3c] sm:$0xff]  }
  0x22   : > { %10956 = vmatprep.mubr.msk.bf16.mxu0 %vm695_vm1, %v11785_v9  ;;  %10985 = vmatpush3.bf16.msra.mxu0 %v5521_v8  ;;  %v275_v17 = vshll.u32 %v12182_v12, 16  ;;  %v12198_v26 = vld [vmem:[%s12162_s9 + $0xc] sm:$0xf]  ;;  %v12206_v31 = vld [vmem:[%s12162_s9 + $0x10] sm:$0xf]  ;;  %v11790_v62 = vld [vmem:[%s12162_s9 + $0x54] sm:$0xff]  }
  0x23   : > { %v258_v22 = vrot.slane %v256_v13, 4  ;;  %v261_v23 = vrot.slane %v259_v14, 5  ;;  %v267_v24 = vrot.slane %v265_v15, 5  ;;  %v271_v25 = vrot.slane %v269_v16, 4  ;;  %v11789_v27 = vld [vmem:[%s12162_s9 + $0x48] sm:$0xff]  }
  0x24   : > { %v277_v28 = vrot.slane %v275_v17, 5  ;;  %v12201_v29 = vrot.slane %v269_v16, 5  ;;  %v12203_v30 = vrot.slane %v265_v15, 6  ;;  %v280_v32 = vshrl.u32 %v12198_v26, 16  ;;  %v12210_v35 = vld [vmem:[%s12162_s9 + $0x14] sm:$0x1] }
  0x25   : > { %v262_v33 = vor.u32 %v261_v23, %v258_v22  ;;  %v272_v34 = vor.u32 %v271_v25, %v267_v24  ;;  %15484 = vst [vmem:[#allocation11_spill] sm:$0xff] %v12210_v35  ;;  %v283_v36 = vshll.u32 %v12198_v26, 16  ;;  %v289_v37 = vshll.u32 %v12206_v31, 16  ;;  %v12224_v47 = vld [vmem:[%s12162_s9 + $0x18] sm:$0xf]  ;;  %v11791_v17 = vld [vmem:[%s12162_s9 + $0x60] sm:$0xff]  }
  0x26   : > { %15482 = vst [vmem:[#allocation9_spill] sm:$0xff] %v12201_v29  ;;  %15483 = vst [vmem:[#allocation10_spill] sm:$0xff] %v12203_v30  ;;  %v282_v39 = vrot.slane %v280_v32, 4  ;;  %v293_v40 = vshrl.u32 %v12206_v31, 16  ;;  %v299_v41 = vshll.u32 %v12210_v35, 16  ;;  %v304_v57 = vshrl.u32 %v12224_v47, 16 }
  0x27   : > { %v263_v43 = vrot.slane %v262_v33, 4  ;;  %v273_v44 = vrot.slane %v272_v34, 4  ;;  %v285_v45 = vrot.slane %v283_v36, 5  ;;  %v291_v46 = vrot.slane %v289_v37, 5  ;;  %v12228_v52 = vld [vmem:[%s12162_s9 + $0x1c] sm:$0xf] }
  0x28   : > { %v295_v48 = vrot.slane %v293_v40, 4  ;;  %v301_v49 = vrot.slane %v299_v41, 5  ;;  %v1720_v50 = vrot.slane %v293_v40, 5  ;;  %v1721_v51 = vrot.slane %v289_v37, 6  ;;  %15488 = vst [vmem:[#allocation13_spill] sm:$0xff] %v12228_v52 }
  0x29   : > { %10957 = vmatmul.mubr.msk.bf16.gmra.mrb[4].mxu0 %vm695_vm1, %v11787_v19  ;;  %v268_v53 = vsel %vm12216_vm4, %v263_v43, %v267_v24  ;;  %v278_v54 = vsel %vm12216_vm4, %v273_v44, %v277_v28  ;;  %v286_v55 = vor.u32 %v285_v45, %v282_v39  ;;  %v238_v56 = vld [vmem:[%s12162_s9 + $0x20] sm:$0x1]  ;;  %v307_v61 = vshll.u32 %v12224_v47, 16  ;;  %v12242_v63 = vld [vmem:[%s12162_s9 + $0x24] sm:$0xf] }
  0x2a   : > { %10960 = vmatprep.mubr.msk.bf16.mxu0 %vm695_vm1, %v11789_v27  ;;  %v9442_v58 = vcombine.low %v268_v53, %v278_v54  ;;  %v296_v59 = vor.u32 %v295_v48, %v291_v46  ;;  %v12237_v60 = vor.u32 %v1721_v51, %v1720_v50  ;;  %v306_v1 = vrot.slane %v304_v57, 4  ;;  %v12247_v4 = vld [vmem:[%s12162_s9 + $0x28] sm:$0xf]  ;;  %v239_v9 = vld [vmem:[%s12162_s9 + $0x2c] sm:$0x1] }
  0x2b   : > { %v287_v0 = vrot.slane %v286_v55, 4  ;;  %v15284_v2 = vshll.u32 %v12228_v52, 16  ;;  %v15285_v3 = vshrl.u32 %v12228_v52, 16  ;;  %15490 = vst [vmem:[#allocation15_spill] sm:$0xff] %v12247_v4  ;;  %v309_v7 = vrot.slane %v307_v61, 5  ;;  %v11792_v57 = vld [vmem:[%s12162_s9 + $0x6c] sm:$0xff]  }
  0x2c   : > { %15489 = vst [vmem:[#allocation14_spill] sm:$0xff] %v12237_v60  ;;  %10680 = vmatprep.mubr.msk.bf16.mxu1 %vm695_vm1, %v9442_v58  ;;  %v297_v5 = vrot.slane %v296_v59, 4  ;;  %v323_v8 = vshll.u32 %v238_v56, 16  ;;  %v328_v16 = vshrl.u32 %v12242_v63, 16  ;;  %v331_v24 = vshll.u32 %v12242_v63, 16 }
  0x2d   : > { %v292_v13 = vsel %vm12216_vm4, %v287_v0, %v291_v46  ;;  %v315_v14 = vrot.slane %v15284_v2, 5  ;;  %v319_v15 = vrot.slane %v15285_v3, 4  ;;  %v310_v22 = vor.u32 %v309_v7, %v306_v1  ;;  %v12264_v25 = vld [vmem:[%s12162_s9 + $0x30] sm:$0xf]  ;;  %v12268_v34 = vld [vmem:[%s12162_s9 + $0x34] sm:$0xf] }
  0x2e   : > { %v302_v19 = vsel %vm12216_vm4, %v297_v5, %v301_v49  ;;  %v325_v23 = vrot.slane %v323_v8, 5  ;;  %v330_v32 = vrot.slane %v328_v16, 4  ;;  %v15280_v33 = vshll.u32 %v12247_v4, 16  ;;  %15491 = vst [vmem:[#allocation16_spill] sm:$0xff] %v12268_v34  ;;  %v240_v51 = vld [vmem:[%s12162_s9 + $0x38] sm:$0x1] }
  0x2f   : > { %v9443_v27 = vcombine.low %v292_v13, %v302_v19  ;;  %v320_v28 = vor.u32 %v319_v15, %v315_v14  ;;  %v311_v36 = vrot.slane %v310_v22, 4  ;;  %v333_v37 = vrot.slane %v331_v24, 5  ;;  %v12285_v53 = vld [vmem:[%s12162_s9 + $0x3c] sm:$0xf]  ;;  %v12292_v58 = vld [vmem:[%s12162_s9 + $0x40] sm:$0xf] }
  0x30   : > { %v15283_v39 = vshrl.u32 %v12247_v4, 16  ;;  %v347_v40 = vshll.u32 %v239_v9, 16  ;;  %v339_v43 = vrot.slane %v15280_v33, 5  ;;  %v352_v44 = vshrl.u32 %v12264_v25, 16  ;;  %15492 = vst [vmem:[#allocation17_spill] sm:$0xff] %v12292_v58  ;;  %v11793_v13 = vld [vmem:[%s12162_s9 + $0x78] sm:$0xff]  }
  0x31   : > { %10961 = vmatmul.mubr.msk.bf16.gmra.mrb[8].mxu0 %vm695_vm1, %v11790_v62  ;;  %10681 = vmatmul.mubr.msk.bf16.vlgmr.msra.gmra.mrb[0].mxu1 %vm695_vm1, %v9443_v27  ;;  %v321_v41 = vrot.slane %v320_v28, 4  ;;  %v355_v45 = vshll.u32 %v12264_v25, 16  ;;  %v316_v46 = vsel %vm12216_vm4, %v311_v36, %v315_v14  ;;  %v334_v48 = vor.u32 %v333_v37, %v330_v32  ;;  %v241_v8 = vld [vmem:[%s12162_s9 + $0x44] sm:$0x1]  ;;  %v12307_v19 = vld [vmem:[%s12162_s9 + $0x48] sm:$0xf] }
  0x32   : > { %10964 = vmatprep.mubr.msk.bf16.mxu0 %vm695_vm1, %v11791_v17  ;;  %10713 = vmatpush3.bf16.msra.mxu1 %v12193_v20  ;;  %v343_v49 = vrot.slane %v15283_v39, 4  ;;  %v349_v50 = vrot.slane %v347_v40, 5  ;;  %v354_v55 = vrot.slane %v352_v44, 4  ;;  %v15276_v20 = vshll.u32 %v12268_v34, 16  ;;  %v12311_v28 = vld [vmem:[%s12162_s9 + $0x4c] sm:$0xf] }
  0x33   : > { %v326_v54 = vsel %vm12216_vm4, %v321_v41, %v325_v23  ;;  %v357_v56 = vrot.slane %v355_v45, 5  ;;  %v335_v61 = vrot.slane %v334_v48, 4  ;;  %v15279_v0 = vshrl.u32 %v12268_v34, 16  ;;  %15493 = vst [vmem:[#allocation18_spill] sm:$0xff] %v12311_v28  ;;  %v9932_v3 = vld [vmem:[%s12162_s9 + $0x24] sm:$0xf] }
  0x34   : > { %v9444_v59 = vcombine.low %v316_v46, %v326_v54  ;;  %v344_v62 = vor.u32 %v343_v49, %v339_v43  ;;  %v363_v5 = vrot.slane %v15276_v20, 5  ;;  %v371_v7 = vshll.u32 %v240_v51, 16  ;;  %v242_v46 = vld [vmem:[%s12162_s9 + $0x50] sm:$0x1]  ;;  %v11794_v54 = vld [vmem:[%s12162_s9 + $0x84] sm:$0xff]  }
  0x35   : > { %v358_v1 = vor.u32 %v357_v56, %v354_v55  ;;  %v376_v9 = vshrl.u32 %v12285_v53, 16  ;;  %v340_v14 = vsel %vm12216_vm4, %v335_v61, %v339_v43  ;;  %v367_v16 = vrot.slane %v15279_v0, 4  ;;  %v12328_v55 = vld [vmem:[%s12162_s9 + $0x54] sm:$0xf]  ;;  %v9938_v35 = vld [vmem:[%s12162_s9 + $0x3c] sm:$0xf] }
  0x36   : > { %10684 = vmatprep.mubr.msk.bf16.mxu1 %vm695_vm1, %v9444_v59  ;;  %v345_v15 = vrot.slane %v344_v62, 4  ;;  %v379_v17 = vshll.u32 %v12285_v53, 16  ;;  %v373_v23 = vrot.slane %v371_v7, 5  ;;  %v15272_v27 = vshll.u32 %v12292_v58, 16 }
  0x37   : > { %v359_v22 = vrot.slane %v358_v1, 4  ;;  %v378_v24 = vrot.slane %v376_v9, 4  ;;  %v368_v36 = vor.u32 %v367_v16, %v363_v5  ;;  %v15273_v40 = vshrl.u32 %v12292_v58, 16  ;;  %v243_v16 = vld [vmem:[%s12162_s9 + $0x5c] sm:$0x1] }
  0x38   : > { %v350_v32 = vsel %vm12216_vm4, %v345_v15, %v349_v50  ;;  %v381_v37 = vrot.slane %v379_v17, 5  ;;  %v387_v44 = vrot.slane %v15272_v27, 5  ;;  %v395_v45 = vshll.u32 %v241_v8, 16  ;;  %v12337_v8 = vld [vmem:[%s12162_s9 + $0x58] sm:$0xf]  ;;  %v11795_v17 = vld [vmem:[%s12162_s9 + $0x90] sm:$0xff]  }
  0x39   : > { %10965 = vmatmul.mubr.msk.bf16.gmra.mrb[12].mxu0 %vm695_vm1, %v11792_v57  ;;  %v9445_v41 = vcombine.low %v340_v14, %v350_v32  ;;  %v364_v43 = vsel %vm12216_vm4, %v359_v22, %v363_v5  ;;  %v369_v48 = vrot.slane %v368_v36, 4  ;;  %v391_v50 = vrot.slane %v15273_v40, 4  ;;  %15494 = vst [vmem:[#allocation19_spill] sm:$0xff] %v12337_v8  ;;  %v12349_v36 = vld [vmem:[%s12162_s9 + $0x60] sm:$0xf] }
  0x3a   : > { %10968 = vmatprep.mubr.msk.bf16.mxu0 %vm695_vm1, %v11793_v13  ;;  %v382_v49 = vor.u32 %v381_v37, %v378_v24  ;;  %v400_v51 = vshrl.u32 %v12307_v19, 16  ;;  %v397_v56 = vrot.slane %v395_v45, 5  ;;  %v403_v57 = vshll.u32 %v12307_v19, 16 }
  0x3b   : > { %10685 = vmatmul.mubr.msk.bf16.gmra.mrb[4].mxu1 %vm695_vm1, %v9445_v41  ;;  %v15268_v59 = vshll.u32 %v12311_v28, 16  ;;  %v15269_v61 = vshrl.u32 %v12311_v28, 16  ;;  %v374_v62 = vsel %vm12216_vm4, %v369_v48, %v373_v23  ;;  %v392_v5 = vor.u32 %v391_v50, %v387_v44  ;;  %v12359_v50 = vld [vmem:[%s12162_s9 + $0x64] sm:$0xf] }
  0x3c   : > { %v383_v1 = vrot.slane %v382_v49, 4  ;;  %v402_v7 = vrot.slane %v400_v51, 4  ;;  %v9446_v9 = vcombine.low %v364_v43, %v374_v62  ;;  %v405_v13 = vrot.slane %v403_v57, 5  ;;  %15495 = vst [vmem:[#allocation20_spill] sm:$0xff] %v12359_v50 }
  0x3d   : > { %v411_v14 = vrot.slane %v15268_v59, 5  ;;  %v415_v15 = vrot.slane %v15269_v61, 4  ;;  %v393_v23 = vrot.slane %v392_v5, 4  ;;  %v419_v24 = vshll.u32 %v242_v46, 16  ;;  %v244_v5 = vld [vmem:[%s12162_s9 + $0x68] sm:$0x1] }
  0x3e   : > { %v388_v22 = vsel %vm12216_vm4, %v383_v1, %v387_v44  ;;  %v424_v32 = vshrl.u32 %v12328_v55, 16  ;;  %10688 = vmatprep.mubr.msk.bf16.mxu1 %vm695_vm1, %v9446_v9  ;;  %v406_v37 = vor.u32 %v405_v13, %v402_v7  ;;  %v427_v43 = vshll.u32 %v12328_v55, 16  ;;  %v12369_v13 = vld [vmem:[%s12162_s9 + $0x6c] sm:$0xf] }
  0x3f   : > { %v416_v41 = vor.u32 %v415_v15, %v411_v14  ;;  %v15262_v45 = vshll.u32 %v12337_v8, 16  ;;  %v398_v48 = vsel %vm12216_vm4, %v393_v23, %v397_v56  ;;  %v421_v44 = vrot.slane %v419_v24, 5 }
  0x40   : > { %v426_v46 = vrot.slane %v424_v32, 4  ;;  %v15263_v49 = vshrl.u32 %v12337_v8, 16  ;;  %v9447_v51 = vcombine.low %v388_v22, %v398_v48  ;;  %v407_v57 = vrot.slane %v406_v37, 4  ;;  %v11797_v48 = vld [vmem:[%s12162_s9 + $0xa8] sm:$0xff]  }
  0x41   : > { %10969 = vmatmul.mubr.msk.bf16.gmra.mrb[16].mxu0 %vm695_vm1, %v11794_v54  ;;  %v417_v62 = vrot.slane %v416_v41, 4  ;;  %v429_v1 = vrot.slane %v427_v43, 5  ;;  %v435_v56 = vrot.slane %v15262_v45, 5  ;;  %v443_v7 = vshll.u32 %v243_v16, 16  ;;  %v11796_v41 = vld [vmem:[%s12162_s9 + $0x9c] sm:$0xff]  }
  0x42   : > { %10972 = vmatprep.mubr.msk.bf16.mxu0 %vm695_vm1, %v11795_v17  ;;  %v439_v54 = vrot.slane %v15263_v49, 4  ;;  %v448_v9 = vshrl.u32 %v12349_v36, 16  ;;  %v412_v15 = vsel %vm12216_vm4, %v407_v57, %v411_v14  ;;  %v451_v23 = vshll.u32 %v12349_v36, 16  ;;  %v12379_v43 = vld [vmem:[%s12162_s9 + $0x70] sm:$0xf] }
  0x43   : > { %10689 = vmatmul.mubr.msk.bf16.gmra.mrb[8].mxu1 %vm695_vm1, %v9447_v51  ;;  %v422_v17 = vsel %vm12216_vm4, %v417_v62, %v421_v44  ;;  %v430_v22 = vor.u32 %v429_v1, %v426_v46  ;;  %v445_v37 = vrot.slane %v443_v7, 5  ;;  %15496 = vst [vmem:[#allocation21_spill] sm:$0xff] %v12379_v43  ;;  %v15264_v49 = vshll.u32 %v12359_v50, 16  ;;  %v245_v57 = vld [vmem:[%s12162_s9 + $0x74] sm:$0x1] }
  0x44   : > { %v9448_v24 = vcombine.low %v412_v15, %v422_v17  ;;  %v440_v32 = vor.u32 %v439_v54, %v435_v56  ;;  %v450_v16 = vrot.slane %v448_v9, 4  ;;  %v453_v45 = vrot.slane %v451_v23, 5  ;;  %v12395_v17 = vld [vmem:[%s12162_s9 + $0x78] sm:$0xf] }
  0x45   : > { %v431_v51 = vrot.slane %v430_v22, 4  ;;  %v15266_v14 = vshrl.u32 %v12359_v50, 16  ;;  %v467_v46 = vshll.u32 %v244_v5, 16  ;;  %v472_v62 = vshrl.u32 %v12369_v13, 16 }
  0x46   : > { %10692 = vmatprep.mubr.msk.bf16.mxu1 %vm695_vm1, %v9448_v24  ;;  %v441_v44 = vrot.slane %v440_v32, 4  ;;  %v475_v1 = vshll.u32 %v12369_v13, 16  ;;  %v454_v7 = vor.u32 %v453_v45, %v450_v16  ;;  %v459_v9 = vrot.slane %v15264_v49, 5 }
  0x47   : > { %v436_v54 = vsel %vm12216_vm4, %v431_v51, %v435_v56  ;;  %v463_v15 = vrot.slane %v15266_v14, 4  ;;  %v469_v22 = vrot.slane %v467_v46, 5  ;;  %v474_v23 = vrot.slane %v472_v62, 4  ;;  %v12403_v51 = vld [vmem:[%s12162_s9 + $0x7c] sm:$0xf]  ;;  %v11799_v14 = vld [vmem:[%s12162_s9 + $0xc0] sm:$0xff]  }
  0x48   : > { %v446_v5 = vsel %vm12216_vm4, %v441_v44, %v445_v37  ;;  %v477_v24 = vrot.slane %v475_v1, 5  ;;  %v455_v45 = vrot.slane %v454_v7, 4  ;;  %v15265_v16 = vshll.u32 %v12379_v43, 16  ;;  %15497 = vst [vmem:[#allocation22_spill] sm:$0xff] %v12403_v51  ;;  %v246_v1 = vld [vmem:[%s12162_s9 + $0x80] sm:$0x1] }
  0x49   : > { %10973 = vmatmul.mubr.msk.bf16.gmra.mrb[20].mxu0 %vm695_vm1, %v11796_v41  ;;  %v9449_v32 = vcombine.low %v436_v54, %v446_v5  ;;  %v464_v56 = vor.u32 %v463_v15, %v459_v9  ;;  %v15267_v37 = vshrl.u32 %v12379_v43, 16  ;;  %v491_v44 = vshll.u32 %v245_v57, 16  ;;  %v11798_v7 = vld [vmem:[%s12162_s9 + $0xb4] sm:$0xff]  }
  0x4a   : > { %10976 = vmatprep.mubr.msk.bf16.mxu0 %vm695_vm1, %v11797_v48  ;;  %v478_v49 = vor.u32 %v477_v24, %v474_v23  ;;  %v496_v41 = vshrl.u32 %v12395_v17, 16  ;;  %v460_v46 = vsel %vm12216_vm4, %v455_v45, %v459_v9  ;;  %v483_v48 = vrot.slane %v15265_v16, 5  ;;  %v12418_v24 = vld [vmem:[%s12162_s9 + $0x84] sm:$0xf]  ;;  %v12425_v16 = vld [vmem:[%s12162_s9 + $0x88] sm:$0xf] }
  0x4b   : > { %10693 = vmatmul.mubr.msk.bf16.gmra.mrb[12].mxu1 %vm695_vm1, %v9449_v32  ;;  %v465_v62 = vrot.slane %v464_v56, 4  ;;  %v499_v54 = vshll.u32 %v12395_v17, 16  ;;  %v487_v57 = vrot.slane %v15267_v37, 4  ;;  %v493_v5 = vrot.slane %v491_v44, 5  ;;  %15498 = vst [vmem:[#allocation23_spill] sm:$0xff] %v12425_v16 }
  0x4c   : > { %v479_v15 = vrot.slane %v478_v49, 4  ;;  %v498_v23 = vrot.slane %v496_v41, 4  ;;  %v15270_v45 = vshll.u32 %v12403_v51, 16  ;;  %v15271_v56 = vshrl.u32 %v12403_v51, 16 }
  0x4d   : > { %v470_v9 = vsel %vm12216_vm4, %v465_v62, %v469_v22  ;;  %v501_v32 = vrot.slane %v499_v54, 5  ;;  %v488_v44 = vor.u32 %v487_v57, %v483_v48  ;;  %v515_v59 = vshll.u32 %v246_v1, 16  ;;  %v247_v62 = vld [vmem:[%s12162_s9 + $0x8c] sm:$0x1] }
  0x4e   : > { %v9450_v49 = vcombine.low %v460_v46, %v470_v9  ;;  %v484_v37 = vsel %vm12216_vm4, %v479_v15, %v483_v48  ;;  %v507_v61 = vrot.slane %v15270_v45, 5  ;;  %v511_v22 = vrot.slane %v15271_v56, 4  ;;  %v12443_v45 = vld [vmem:[%s12162_s9 + $0x90] sm:$0xf]  ;;  %v12450_v56 = vld [vmem:[%s12162_s9 + $0x94] sm:$0xf] }
  0x4f   : > { %v502_v41 = vor.u32 %v501_v32, %v498_v23  ;;  %v520_v54 = vshrl.u32 %v12418_v24, 16  ;;  %v489_v46 = vrot.slane %v488_v44, 4  ;;  %v517_v9 = vrot.slane %v515_v59, 5  ;;  %15499 = vst [vmem:[#allocation24_spill] sm:$0xff] %v12450_v56 }
  0x50   : > { %10696 = vmatprep.mubr.msk.bf16.mxu1 %vm695_vm1, %v9450_v49  ;;  %v523_v48 = vshll.u32 %v12418_v24, 16  ;;  %v15274_v1 = vshll.u32 %v12425_v16, 16  ;;  %v512_v57 = vor.u32 %v511_v22, %v507_v61  ;;  %v15275_v32 = vshrl.u32 %v12425_v16, 16 }
  0x51   : > { %10977 = vmatmul.mubr.msk.bf16.gmra.mrb[24].mxu0 %vm695_vm1, %v11798_v7  ;;  %v503_v15 = vrot.slane %v502_v41, 4  ;;  %v522_v23 = vrot.slane %v520_v54, 4  ;;  %v494_v59 = vsel %vm12216_vm4, %v489_v46, %v493_v5  ;;  %v539_v44 = vshll.u32 %v247_v62, 16  ;;  %v248_v5 = vld [vmem:[%s12162_s9 + $0x98] sm:$0x1]  ;;  %v11800_v62 = vld [vmem:[%s12162_s9 + $0xcc] sm:$0xff]  }
  0x52   : > { %10980 = vmatprep.mubr.msk.bf16.mxu0 %vm695_vm1, %v11799_v14  ;;  %v525_v49 = vrot.slane %v523_v48, 5  ;;  %v531_v7 = vrot.slane %v15274_v1, 5  ;;  %v9451_v41 = vcombine.low %v484_v37, %v494_v59  ;;  %v513_v54 = vrot.slane %v512_v57, 4  ;;  %v12466_v57 = vld [vmem:[%s12162_s9 + $0x9c] sm:$0xf] }
  0x53   : > { %v508_v22 = vsel %vm12216_vm4, %v503_v15, %v507_v61  ;;  %v535_v14 = vrot.slane %v15275_v32, 4  ;;  %v541_v40 = vrot.slane %v539_v44, 5  ;;  %v544_v46 = vshrl.u32 %v12443_v45, 16  ;;  %v12469_v32 = vld [vmem:[%s12162_s9 + $0xa0] sm:$0xf] }
  0x54   : > { %v526_v27 = vor.u32 %v525_v49, %v522_v23  ;;  %v547_v48 = vshll.u32 %v12443_v45, 16  ;;  %10697 = vmatmul.mubr.msk.bf16.gmra.mrb[16].mxu1 %vm695_vm1, %v9451_v41  ;;  %v518_v37 = vsel %vm12216_vm4, %v513_v54, %v517_v9  ;;  %v15277_v61 = vshll.u32 %v12450_v56, 16  ;;  %15500 = vst [vmem:[#allocation25_spill] sm:$0xff] %v12469_v32 }
  0x55   : > { %v536_v59 = vor.u32 %v535_v14, %v531_v7  ;;  %v15278_v15 = vshrl.u32 %v12450_v56, 16  ;;  %v9452_v23 = vcombine.low %v508_v22, %v518_v37  ;;  %v546_v44 = vrot.slane %v544_v46, 4  ;;  %v249_v14 = vld [vmem:[%s12162_s9 + $0xa4] sm:$0x1] }
  0x56   : > { %v527_v49 = vrot.slane %v526_v27, 4  ;;  %v549_v1 = vrot.slane %v547_v48, 5  ;;  %v555_v41 = vrot.slane %v15277_v61, 5  ;;  %v563_v54 = vshll.u32 %v248_v5, 16  ;;  %v9929_v61 = vld [vmem:[%s12162_s9 + $0x18] sm:$0xf] }
  0x57   : > { %v537_v20 = vrot.slane %v536_v59, 4  ;;  %v559_v9 = vrot.slane %v15278_v15, 4  ;;  %10700 = vmatprep.mubr.msk.bf16.mxu1 %vm695_vm1, %v9452_v23  ;;  %v568_v46 = vshrl.u32 %v12466_v57, 16  ;;  %v571_v48 = vshll.u32 %v12466_v57, 16 }
  0x58   : > { %v532_v22 = vsel %vm12216_vm4, %v527_v49, %v531_v7  ;;  %v550_v27 = vor.u32 %v549_v1, %v546_v44  ;;  %v565_v5 = vrot.slane %v563_v54, 5  ;;  %v15281_v23 = vshll.u32 %v12469_v32, 16  ;;  %v12487_v49 = vld [vmem:[%s12162_s9 + $0x1c] sm:$0xf]  ;;  %v12495_v54 = vld [vmem:[%s12162_s9 + $0x20] sm:$0x1] }
  0x59   : > { %10981 = vmatmul.mubr.msk.bf16.gmra.mrb[28].mxu0 %vm695_vm1, %v11800_v62  ;;  %v542_v37 = vsel %vm12216_vm4, %v537_v20, %v541_v40  ;;  %v560_v59 = vor.u32 %v559_v9, %v555_v41  ;;  %v570_v7 = vrot.slane %v568_v46, 4  ;;  %v573_v1 = vrot.slane %v571_v48, 5  ;;  %v12500_v46 = vld [vmem:[%s15259_s1 + $0x10] sm:$0x3f]  }
  0x5a   : > { %v9453_v15 = vcombine.low %v532_v22, %v542_v37  ;;  %v551_v0 = vrot.slane %v550_v27, 4  ;;  %v579_v44 = vrot.slane %v15281_v23, 5  ;;  %v15282_v33 = vshrl.u32 %v12469_v32, 16  ;;  %v12509_v37 = vld [vmem:[%s12162_s9 + $0xa8] sm:$0xf]  ;;  %11704 = vmatprep.subr.msk.bf16.mxu1 %vm744_vm0, %v12500_v46 }
  0x5b   : > { %v561_v62 = vrot.slane %v560_v59, 4  ;;  %v587_v20 = vshll.u32 %v249_v14, 16  ;;  %v574_v9 = vor.u32 %v573_v1, %v570_v7  ;;  %v5033_v22 = vshrl.u32 %v9929_v61, 16  ;;  %v12512_v23 = vld [vmem:[%s12162_s9 + $0xac] sm:$0xf] }
  0x5c   : > { %v556_v40 = vsel %vm12216_vm4, %v551_v0, %v555_v41  ;;  %v5036_v27 = vshll.u32 %v9929_v61, 16  ;;  %10701 = vmatmul.mubr.msk.bf16.gmra.mrb[20].mxu1 %vm695_vm1, %v9453_v15  ;;  %v583_v0 = vrot.slane %v15282_v33, 4  ;;  %v15286_v48 = vshll.u32 %v12487_v49, 16  ;;  %15501 = vst [vmem:[#allocation26_spill] sm:$0xff] %v12512_v23  ;;  %v250_v33 = vld [vmem:[%s12162_s9 + $0xb0] sm:$0x1] }
  0x5d   : > { %v566_v14 = vsel %vm12216_vm4, %v561_v62, %v565_v5  ;;  %v589_v41 = vrot.slane %v587_v20, 5  ;;  %v575_v59 = vrot.slane %v574_v9, 4  ;;  %v5035_v7 = vrot.slane %v5033_v22, 4 }
  0x5e   : > { %v9454_v61 = vcombine.low %v556_v40, %v566_v14  ;;  %v5038_v1 = vrot.slane %v5036_v27, 5  ;;  %v584_v15 = vor.u32 %v583_v0, %v579_v44  ;;  %v5044_v5 = vrot.slane %v15286_v48, 5 }
  0x5f   : > { %v15287_v62 = vshrl.u32 %v12487_v49, 16  ;;  %v5052_v20 = vshll.u32 %v12495_v54, 16  ;;  %v580_v40 = vsel %vm12216_vm4, %v575_v59, %v579_v44  ;;  %v592_v22 = vshrl.u32 %v12509_v37, 16 }
  0x60   : > { %10704 = vmatprep.mubr.msk.bf16.mxu1 %vm695_vm1, %v9454_v61  ;;  %v5039_v9 = vor.u32 %v5038_v1, %v5035_v7  ;;  %v595_v27 = vshll.u32 %v12509_v37, 16  ;;  %v585_v14 = vrot.slane %v584_v15, 4  ;;  %v15288_v2 = vshll.u32 %v12512_v23, 16  ;;  %v12532_v61 = vld [vmem:[%s15259_s1 + $0x50] sm:$0x3f]  }
  0x61   : > { %v5048_v0 = vrot.slane %v15287_v62, 4  ;;  %v5054_v39 = vrot.slane %v5052_v20, 5  ;;  %v594_v59 = vrot.slane %v592_v22, 4  ;;  %v15289_v1 = vshrl.u32 %v12512_v23, 16  ;;  %v12541_v62 = vld [vmem:[%s12162_s9 + $0x28] sm:$0xf]  ;;  %11712 = vmatprep.subr.msk.bf16.mxu0 %vm744_vm0, %v12532_v61 }
  0x62   : > { %v5040_v44 = vrot.slane %v5039_v9, 4  ;;  %v597_v7 = vrot.slane %v595_v27, 5  ;;  %v590_v15 = vsel %vm12216_vm4, %v585_v14, %v589_v41  ;;  %v603_v20 = vrot.slane %v15288_v2, 5  ;;  %v12550_v41 = vld [vmem:[%s12162_s9 + $0x2c] sm:$0x1] }
  0x63   : > { %v5049_v6 = vor.u32 %v5048_v0, %v5044_v5  ;;  %v611_v48 = vshll.u32 %v250_v33, 16  ;;  %v9455_v9 = vcombine.low %v580_v40, %v590_v15  ;;  %v607_v42 = vrot.slane %v15289_v1, 4 }
  0x64   : > { %v5045_v22 = vsel %vm12216_vm4, %v5040_v44, %v5044_v5  ;;  %v598_v27 = vor.u32 %v597_v7, %v594_v59  ;;  %v5057_v33 = vshrl.u32 %v9932_v3, 16  ;;  %v5060_v2 = vshll.u32 %v9932_v3, 16  ;;  %v12556_v44 = vld [vmem:[%s12162_s9 + $0xb4] sm:$0xf]  ;;  %v12562_v3 = vld [vmem:[%s12162_s9 + $0xb8] sm:$0xf] }
  0x65   : > { %v5050_v14 = vrot.slane %v5049_v6, 4  ;;  %v613_v0 = vrot.slane %v611_v48, 5  ;;  %10705 = vmatmul.mubr.msk.bf16.gmra.mrb[24].mxu1 %vm695_vm1, %v9455_v9  ;;  %v608_v21 = vor.u32 %v607_v42, %v603_v20  ;;  %v15290_v40 = vshll.u32 %v12541_v62, 16  ;;  %15502 = vst [vmem:[#allocation27_spill] sm:$0xff] %v12562_v3 }
  0x66   : > { %v599_v18 = vrot.slane %v598_v27, 4  ;;  %v15291_v5 = vshrl.u32 %v12541_v62, 16  ;;  %v5059_v7 = vrot.slane %v5057_v33, 4  ;;  %v5062_v15 = vrot.slane %v5060_v2, 5  ;;  %v251_v2 = vld [vmem:[%s12162_s9 + $0xbc] sm:$0x1] }
  0x67   : > { %v5055_v59 = vsel %vm12216_vm4, %v5050_v14, %v5054_v39  ;;  %v5076_v6 = vshll.u32 %v12550_v41, 16  ;;  %v609_v9 = vrot.slane %v608_v21, 4  ;;  %v5068_v27 = vrot.slane %v15290_v40, 5 }
  0x68   : > { %v9979_v48 = vcombine.low %v5045_v22, %v5055_v59  ;;  %v604_v42 = vsel %vm12216_vm4, %v599_v18, %v603_v20  ;;  %v5063_v1 = vor.u32 %v5062_v15, %v5059_v7  ;;  %v5072_v39 = vrot.slane %v15291_v5, 4  ;;  %v9935_v59 = vld [vmem:[%s12162_s9 + $0x30] sm:$0xf]  ;;  %v12580_v5 = vld [vmem:[%s12162_s9 + $0x34] sm:$0xf] }
  0x69   : > { %v5078_v14 = vrot.slane %v5076_v6, 5  ;;  %v616_v33 = vshrl.u32 %v12556_v44, 16  ;;  %v614_v22 = vsel %vm12216_vm4, %v609_v9, %v613_v0  ;;  %v619_v18 = vshll.u32 %v12556_v44, 16 }
  0x6a   : > { %10986 = vmatprep.mubr.msk.bf16.mxu0 %vm695_vm1, %v9979_v48  ;;  %v15294_v21 = vshll.u32 %v12562_v3, 16  ;;  %v15296_v20 = vshrl.u32 %v12562_v3, 16  ;;  %v9456_v7 = vcombine.low %v604_v42, %v614_v22  ;;  %v5064_v15 = vrot.slane %v5063_v1, 4 }
  0x6b   : > { %v5073_v40 = vor.u32 %v5072_v39, %v5068_v27  ;;  %v618_v6 = vrot.slane %v616_v33, 4  ;;  %v621_v60 = vrot.slane %v619_v18, 5  ;;  %v635_v9 = vshll.u32 %v251_v2, 16  ;;  %v12590_v18 = vld [vmem:[%s12162_s9 + $0x38] sm:$0x1] }
  0x6c   : > { %v627_v48 = vrot.slane %v15294_v21, 5  ;;  %v631_v0 = vrot.slane %v15296_v20, 4  ;;  %10708 = vmatprep.mubr.msk.bf16.mxu1 %vm695_vm1, %v9456_v7  ;;  %v5069_v1 = vsel %vm12216_vm4, %v5064_v15, %v5068_v27  ;;  %v5081_v39 = vshrl.u32 %v9935_v59, 16  ;;  %v12598_v27 = vld [vmem:[%s12162_s9 + $0x40] sm:$0xf] }
  0x6d   : > { %v5074_v42 = vrot.slane %v5073_v40, 4  ;;  %v5084_v33 = vshll.u32 %v9935_v59, 16  ;;  %v622_v22 = vor.u32 %v621_v60, %v618_v6  ;;  %v637_v29 = vrot.slane %v635_v9, 5 }
  0x6e   : > { %v632_v30 = vor.u32 %v631_v0, %v627_v48  ;;  %v15298_v21 = vshll.u32 %v12580_v5, 16  ;;  %v5083_v20 = vrot.slane %v5081_v39, 4  ;;  %v15299_v12 = vshrl.u32 %v12580_v5, 16 }
  0x6f   : > { %v5079_v2 = vsel %vm12216_vm4, %v5074_v42, %v5078_v14  ;;  %v5086_v7 = vrot.slane %v5084_v33, 5  ;;  %v623_v59 = vrot.slane %v622_v22, 4  ;;  %v5100_v9 = vshll.u32 %v12590_v18, 16 }
  0x70   : > { %v9980_v40 = vcombine.low %v5069_v1, %v5079_v2  ;;  %v633_v60 = vrot.slane %v632_v30, 4  ;;  %v5092_v15 = vrot.slane %v15298_v21, 5  ;;  %v5096_v0 = vrot.slane %v15299_v12, 4  ;;  %v12611_v30 = vld [vmem:[%s12162_s9 + $0x44] sm:$0x1] }
  0x71   : > { %v5087_v6 = vor.u32 %v5086_v7, %v5083_v20  ;;  %v5105_v14 = vshrl.u32 %v9938_v35, 16  ;;  %v628_v42 = vsel %vm12216_vm4, %v623_v59, %v627_v48  ;;  %v5108_v39 = vshll.u32 %v9938_v35, 16  ;;  %v9941_v59 = vld [vmem:[%s12162_s9 + $0x48] sm:$0xf] }
  0x72   : > { %10987 = vmatmul.mubr.msk.bf16.vlgmr.msra.gmra.mrb[0].mxu0 %vm695_vm1, %v9980_v40  ;;  %v638_v1 = vsel %vm12216_vm4, %v633_v60, %v637_v29  ;;  %v15300_v20 = vshll.u32 %v12598_v27, 16  ;;  %v5097_v2 = vor.u32 %v5096_v0, %v5092_v15  ;;  %v5102_v7 = vrot.slane %v5100_v9, 5  ;;  %v12625_v0 = vld [vmem:[%s12162_s9 + $0x4c] sm:$0xf] }
  0x73   : > { %v9457_v33 = vcombine.low %v628_v42, %v638_v1  ;;  %v5088_v22 = vrot.slane %v5087_v6, 4  ;;  %v5107_v21 = vrot.slane %v5105_v14, 4  ;;  %v5110_v12 = vrot.slane %v5108_v39, 5 }
  0x74   : > { %v5116_v40 = vrot.slane %v15300_v20, 5  ;;  %v15301_v48 = vshrl.u32 %v12598_v27, 16  ;;  %v5098_v35 = vrot.slane %v5097_v2, 4  ;;  %v5124_v60 = vshll.u32 %v12611_v30, 16 }
  0x75   : > { %10709 = vmatmul.mubr.msk.bf16.gmra.mrb[28].mxu1 %vm695_vm1, %v9457_v33  ;;  %v5093_v29 = vsel %vm12216_vm4, %v5088_v22, %v5092_v15  ;;  %v9476_v6 = vcombine.low %v12198_v26, %v12206_v31  ;;  %v15503_v9 = vcombine.low %v12176_v10, %v12179_v11  ;;  %v5111_v14 = vor.u32 %v5110_v12, %v5107_v21  ;;  %v12638_v26 = vld [vmem:[%s12162_s9 + $0x50] sm:$0x1] }
  0x76   : > { %v5120_v42 = vrot.slane %v15301_v48, 4  ;;  %v1474_v15 = vsel %vm744_vm0, %v12500_v46, 0  ;;  %v5997_v1 = vsel %vm744_vm0, %v12532_v61, 0  ;;  %v5103_v31 = vsel %vm12216_vm4, %v5098_v35, %v5102_v7  ;;  %v9944_v46 = vld [vmem:[%s12162_s9 + $0x54] sm:$0xf] }
  0x77   : > { %10714 = vmatprep.mubr.msk.bf16.mxu1 %vm695_vm1, %v15503_v9  ;;  %v5126_v10 = vrot.slane %v5124_v60, 5  ;;  %11019 = vmatpush3.bf16.msra.mxu0 %v5997_v1  ;;  %v5129_v11 = vshrl.u32 %v9941_v59, 16  ;;  %v5132_v39 = vshll.u32 %v9941_v59, 16  ;;  %v9981_v12 = vcombine.low %v5093_v29, %v5103_v31  ;;  %v12647_v48 = vld [vmem:[%s12162_s9 + $0x58] sm:$0xf] }
  0x78   : > { %v5112_v21 = vrot.slane %v5111_v14, 4  ;;  %v5121_v33 = vor.u32 %v5120_v42, %v5116_v40  ;;  %v15304_v22 = vshll.u32 %v12625_v0, 16  ;;  %v15305_v61 = vshrl.u32 %v12625_v0, 16  ;;  %v12659_v1 = vld [vmem:[%s12162_s9 + $0x5c] sm:$0x1] }
  0x79   : > { %v5131_v2 = vrot.slane %v5129_v11, 4  ;;  %v5134_v9 = vrot.slane %v5132_v39, 5  ;;  %v5148_v20 = vshll.u32 %v12638_v26, 16  ;;  %10990 = vmatprep.mubr.msk.bf16.mxu0 %vm695_vm1, %v9981_v12  ;;  %v9477_v35 = vcombine.low %v12224_v47, %v12228_v52 }
  0x7a   : > { %v5117_v7 = vsel %vm12216_vm4, %v5112_v21, %v5116_v40  ;;  %v5122_v59 = vrot.slane %v5121_v33, 4  ;;  %v5140_v29 = vrot.slane %v15304_v22, 5  ;;  %v5144_v14 = vrot.slane %v15305_v61, 4  ;;  %v9947_v21 = vld [vmem:[%s12162_s9 + $0x60] sm:$0xf] }
  0x7b   : > { %v5135_v60 = vor.u32 %v5134_v9, %v5131_v2  ;;  %v5150_v42 = vrot.slane %v5148_v20, 5  ;;  %v5153_v31 = vshrl.u32 %v9944_v46, 16  ;;  %v5156_v40 = vshll.u32 %v9944_v46, 16  ;;  %v12668_v20 = vld [vmem:[%s12162_s9 + $0x64] sm:$0xf] }
  0x7c   : > { %v5127_v11 = vsel %vm12216_vm4, %v5122_v59, %v5126_v10  ;;  %v15302_v39 = vshll.u32 %v12647_v48, 16  ;;  %v15303_v12 = vshrl.u32 %v12647_v48, 16  ;;  %v5145_v2 = vor.u32 %v5144_v14, %v5140_v29  ;;  %v12688_v22 = vld [vmem:[%s15259_s1 + $0x18] sm:$0x3f]  }
  0x7d   : > { %v9982_v47 = vcombine.low %v5117_v7, %v5127_v11  ;;  %10715 = vmatmul.mubr.msk.bf16.vlgmr.msra.gmra.mrb[0].mxu1 %vm695_vm1, %v9476_v6  ;;  %v5136_v33 = vrot.slane %v5135_v60, 4  ;;  %v5155_v9 = vrot.slane %v5153_v31, 4  ;;  %v5158_v10 = vrot.slane %v5156_v40, 5  ;;  %v12677_v11 = vld [vmem:[%s12162_s9 + $0x68] sm:$0x1] }
  0x7e   : > { %10747 = vmatpush3.bf16.msra.mxu1 %v1474_v15  ;;  %10718 = vmatprep.mubr.msk.bf16.mxu1 %vm695_vm1, %v9477_v35  ;;  %v5164_v46 = vrot.slane %v15302_v39, 5  ;;  %v5168_v59 = vrot.slane %v15303_v12, 4  ;;  %v5172_v7 = vshll.u32 %v12659_v1, 16  ;;  %v5146_v15 = vrot.slane %v5145_v2, 4  ;;  %v9950_v12 = vld [vmem:[%s12162_s9 + $0x6c] sm:$0xf] }
  0x7f   : > { %10991 = vmatmul.mubr.msk.bf16.gmra.mrb[4].mxu0 %vm695_vm1, %v9982_v47  ;;  %v5141_v6 = vsel %vm12216_vm4, %v5136_v33, %v5140_v29  ;;  %v9478_v35 = vcombine.low %v12242_v63, %v12247_v4  ;;  %v5177_v60 = vshrl.u32 %v9947_v21, 16  ;;  %v5159_v14 = vor.u32 %v5158_v10, %v5155_v9  ;;  %v12695_v63 = vld [vmem:[%s12162_s9 + $0x70] sm:$0xf]  ;;  %11705 = vmatprep.subr.msk.bf16.mxu1 %vm744_vm0, %v12688_v22  ;;  %v9953_v4 = vld [vmem:[%s12162_s9 + $0x78] sm:$0xf] }
  0x80   : > { %v5169_v31 = vor.u32 %v5168_v59, %v5164_v46  ;;  %v5174_v40 = vrot.slane %v5172_v7, 5  ;;  %v5180_v39 = vshll.u32 %v9947_v21, 16  ;;  %v5151_v47 = vsel %vm12216_vm4, %v5146_v15, %v5150_v42  ;;  %15504 = vst [vmem:[#allocation28_spill] sm:$0xff] %v12695_v63 }
  0x81   : > { %v5179_v61 = vrot.slane %v5177_v60, 4  ;;  %v15306_v29 = vshll.u32 %v12668_v20, 16  ;;  %v15307_v33 = vshrl.u32 %v12668_v20, 16  ;;  %v9983_v2 = vcombine.low %v5141_v6, %v5151_v47  ;;  %v12709_v6 = vld [vmem:[%s15259_s1 + $0x58] sm:$0x3f]  }
  0x82   : > { %v5160_v9 = vrot.slane %v5159_v14, 4  ;;  %v5170_v21 = vrot.slane %v5169_v31, 4  ;;  %v5182_v10 = vrot.slane %v5180_v39, 5  ;;  %v5196_v7 = vshll.u32 %v12677_v11, 16  ;;  %v12717_v31 = vld [vmem:[%s12162_s9 + $0x74] sm:$0x1]  ;;  %11713 = vmatprep.subr.msk.bf16.mxu0 %vm744_vm0, %v12709_v6 }
  0x83   : > { %v5188_v59 = vrot.slane %v15306_v29, 5  ;;  %v5192_v42 = vrot.slane %v15307_v33, 4  ;;  %v9479_v15 = vcombine.low %v12264_v25, %v12268_v34  ;;  %10994 = vmatprep.mubr.msk.bf16.mxu0 %vm695_vm1, %v9983_v2  ;;  %15505 = vst [vmem:[#allocation29_spill] sm:$0xff] %v12717_v31  ;;  %v5201_v47 = vshrl.u32 %v9950_v12, 16 }
  0x84   : > { %v5165_v39 = vsel %vm12216_vm4, %v5160_v9, %v5164_v46  ;;  %v5175_v60 = vsel %vm12216_vm4, %v5170_v21, %v5174_v40  ;;  %v5183_v14 = vor.u32 %v5182_v10, %v5179_v61  ;;  %v5198_v33 = vrot.slane %v5196_v7, 5  ;;  %v12731_v10 = vld [vmem:[%s12162_s9 + $0x7c] sm:$0xf] }
  0x85   : > { %v9984_v29 = vcombine.low %v5165_v39, %v5175_v60  ;;  %10719 = vmatmul.mubr.msk.bf16.gmra.mrb[4].mxu1 %vm695_vm1, %v9478_v35  ;;  %v5193_v25 = vor.u32 %v5192_v42, %v5188_v59  ;;  %v5204_v34 = vshll.u32 %v9950_v12, 16  ;;  %v5203_v40 = vrot.slane %v5201_v47, 4  ;;  %15506 = vst [vmem:[#allocation30_spill] sm:$0xff] %v12731_v10  ;;  %v9956_v47 = vld [vmem:[%s12162_s9 + $0x84] sm:$0xf] }
  0x86   : > { %v5184_v46 = vrot.slane %v5183_v14, 4  ;;  %10722 = vmatprep.mubr.msk.bf16.mxu1 %vm695_vm1, %v9479_v15  ;;  %v15314_v61 = vshll.u32 %v12695_v63, 16  ;;  %v15317_v2 = vshrl.u32 %v12695_v63, 16  ;;  %v5220_v12 = vshll.u32 %v12717_v31, 16  ;;  %v12749_v63 = vld [vmem:[%s12162_s9 + $0x88] sm:$0xf] }
  0x87   : > { %10995 = vmatmul.mubr.msk.bf16.gmra.mrb[8].mxu0 %vm695_vm1, %v9984_v29  ;;  %v5194_v35 = vrot.slane %v5193_v25, 4  ;;  %v5206_v9 = vrot.slane %v5204_v34, 5  ;;  %v9480_v21 = vcombine.low %v12285_v53, %v12292_v58  ;;  %v12740_v29 = vld [vmem:[%s12162_s9 + $0x80] sm:$0x1]  ;;  %v5225_v34 = vshrl.u32 %v9953_v4, 16 }
  0x88   : > { %v5189_v42 = vsel %vm12216_vm4, %v5184_v46, %v5188_v59  ;;  %v5212_v7 = vrot.slane %v15314_v61, 5  ;;  %v5216_v15 = vrot.slane %v15317_v2, 4  ;;  %v5222_v53 = vrot.slane %v5220_v12, 5 }
  0x89   : > { %v5199_v39 = vsel %vm12216_vm4, %v5194_v35, %v5198_v33  ;;  %v5207_v60 = vor.u32 %v5206_v9, %v5203_v40  ;;  %v5228_v14 = vshll.u32 %v9953_v4, 16  ;;  %v5227_v59 = vrot.slane %v5225_v34, 4  ;;  %v12762_v34 = vld [vmem:[%s12162_s9 + $0x8c] sm:$0x1] }
  0x8a   : > { %v9985_v25 = vcombine.low %v5189_v42, %v5199_v39  ;;  %v5217_v58 = vor.u32 %v5216_v15, %v5212_v7  ;;  %v15322_v46 = vshll.u32 %v12731_v10, 16  ;;  %v15324_v2 = vshrl.u32 %v12731_v10, 16 }
  0x8b   : > { %v5208_v61 = vrot.slane %v5207_v60, 4  ;;  %v5230_v52 = vrot.slane %v5228_v14, 5  ;;  %v5244_v31 = vshll.u32 %v12740_v29, 16  ;;  %v9481_v40 = vcombine.low %v12307_v19, %v12311_v28 }
  0x8c   : > { %10998 = vmatprep.mubr.msk.bf16.mxu0 %vm695_vm1, %v9985_v25  ;;  %v5218_v33 = vrot.slane %v5217_v58, 4  ;;  %v5236_v4 = vrot.slane %v15322_v46, 5  ;;  %v5249_v35 = vshrl.u32 %v9956_v47, 16  ;;  %v5240_v42 = vrot.slane %v15324_v2, 4  ;;  %v12771_v25 = vld [vmem:[%s12162_s9 + $0x94] sm:$0xf] }
  0x8d   : > { %v5213_v9 = vsel %vm12216_vm4, %v5208_v61, %v5212_v7  ;;  %10723 = vmatmul.mubr.msk.bf16.gmra.mrb[8].mxu1 %vm695_vm1, %v9480_v21  ;;  %v5231_v12 = vor.u32 %v5230_v52, %v5227_v59  ;;  %v5246_v15 = vrot.slane %v5244_v31, 5  ;;  %v5252_v39 = vshll.u32 %v9956_v47, 16  ;;  %v9959_v61 = vld [vmem:[%s12162_s9 + $0x90] sm:$0xf]  ;;  %15507 = vst [vmem:[#allocation31_spill] sm:$0xff] %v12771_v25 }
  0x8e   : > { %v5223_v58 = vsel %vm12216_vm4, %v5218_v33, %v5222_v53  ;;  %10726 = vmatprep.mubr.msk.bf16.mxu1 %vm695_vm1, %v9481_v40  ;;  %v5251_v19 = vrot.slane %v5249_v35, 4  ;;  %v15321_v60 = vshll.u32 %v12749_v63, 16  ;;  %v5241_v52 = vor.u32 %v5240_v42, %v5236_v4 }
  0x8f   : > { %v9986_v7 = vcombine.low %v5213_v9, %v5223_v58  ;;  %v5232_v21 = vrot.slane %v5231_v12, 4  ;;  %v15323_v14 = vshrl.u32 %v12749_v63, 16  ;;  %v5254_v31 = vrot.slane %v5252_v39, 5  ;;  %v12784_v58 = vld [vmem:[%s12162_s9 + $0x98] sm:$0x1] }
  0x90   : > { %v5260_v59 = vrot.slane %v15321_v60, 5  ;;  %v5268_v53 = vshll.u32 %v12762_v34, 16  ;;  %v9482_v47 = vcombine.low %v12328_v55, %v12337_v8  ;;  %v5242_v40 = vrot.slane %v5241_v52, 4 }
  0x91   : > { %10999 = vmatmul.mubr.msk.bf16.gmra.mrb[12].mxu0 %vm695_vm1, %v9986_v7  ;;  %v5237_v33 = vsel %vm12216_vm4, %v5232_v21, %v5236_v4  ;;  %v5264_v35 = vrot.slane %v15323_v14, 4  ;;  %v5273_v9 = vshrl.u32 %v9959_v61, 16  ;;  %v5255_v12 = vor.u32 %v5254_v31, %v5251_v19  ;;  %v9962_v21 = vld [vmem:[%s12162_s9 + $0x9c] sm:$0xf]  ;;  %v12794_v31 = vld [vmem:[%s12162_s9 + $0xa0] sm:$0xf] }
  0x92   : > { %v5270_v42 = vrot.slane %v5268_v53, 5  ;;  %v5276_v39 = vshll.u32 %v9959_v61, 16  ;;  %v15325_v60 = vshll.u32 %v12771_v25, 16  ;;  %v5247_v55 = vsel %vm12216_vm4, %v5242_v40, %v5246_v15 }
  0x93   : > { %v5265_v7 = vor.u32 %v5264_v35, %v5260_v59  ;;  %v5275_v46 = vrot.slane %v5273_v9, 4  ;;  %v15326_v4 = vshrl.u32 %v12771_v25, 16  ;;  %v9987_v52 = vcombine.low %v5237_v33, %v5247_v55  ;;  %v12806_v9 = vld [vmem:[%s12162_s9 + $0xa4] sm:$0x1] }
  0x94   : > { %v5256_v14 = vrot.slane %v5255_v12, 4  ;;  %v5278_v2 = vrot.slane %v5276_v39, 5  ;;  %v5284_v19 = vrot.slane %v15325_v60, 5  ;;  %v5292_v53 = vshll.u32 %v12784_v58, 16 }
  0x95   : > { %v5266_v61 = vrot.slane %v5265_v7, 4  ;;  %10727 = vmatmul.mubr.msk.bf16.gmra.mrb[12].mxu1 %vm695_vm1, %v9482_v47  ;;  %v5288_v15 = vrot.slane %v15326_v4, 4  ;;  %v9483_v40 = vcombine.low %v12349_v36, %v12359_v50  ;;  %11002 = vmatprep.mubr.msk.bf16.mxu0 %vm695_vm1, %v9987_v52  ;;  %v5297_v12 = vshrl.u32 %v9962_v21, 16  ;;  %v9965_v52 = vld [vmem:[%s12162_s9 + $0xa8] sm:$0xf] }
  0x96   : > { %v5261_v33 = vsel %vm12216_vm4, %v5256_v14, %v5260_v59  ;;  %v5279_v35 = vor.u32 %v5278_v2, %v5275_v46  ;;  %v5300_v39 = vshll.u32 %v9962_v21, 16  ;;  %v5294_v7 = vrot.slane %v5292_v53, 5  ;;  %v12814_v2 = vld [vmem:[%s12162_s9 + $0xac] sm:$0xf] }
  0x97   : > { %v5271_v47 = vsel %vm12216_vm4, %v5266_v61, %v5270_v42  ;;  %v5289_v55 = vor.u32 %v5288_v15, %v5284_v19  ;;  %10730 = vmatprep.mubr.msk.bf16.mxu1 %vm695_vm1, %v9483_v40  ;;  %v15329_v36 = vshll.u32 %v12794_v31, 16  ;;  %v5299_v50 = vrot.slane %v5297_v12, 4  ;;  %v12821_v61 = vld [vmem:[%s12162_s9 + $0xb0] sm:$0x1] }
  0x98   : > { %v9988_v60 = vcombine.low %v5261_v33, %v5271_v47  ;;  %v5280_v4 = vrot.slane %v5279_v35, 4  ;;  %v5302_v14 = vrot.slane %v5300_v39, 5  ;;  %v15333_v42 = vshrl.u32 %v12794_v31, 16 }
  0x99   : > { %v5290_v46 = vrot.slane %v5289_v55, 4  ;;  %v5308_v59 = vrot.slane %v15329_v36, 5  ;;  %v5316_v21 = vshll.u32 %v12806_v9, 16  ;;  %v9484_v40 = vcombine.low %v12369_v13, %v12379_v43  ;;  %v9968_v55 = vld [vmem:[%s12162_s9 + $0xb4] sm:$0xf] }
  0x9a   : > { %11003 = vmatmul.mubr.msk.bf16.gmra.mrb[16].mxu0 %vm695_vm1, %v9988_v60  ;;  %v5285_v15 = vsel %vm12216_vm4, %v5280_v4, %v5284_v19  ;;  %v5303_v53 = vor.u32 %v5302_v14, %v5299_v50  ;;  %v5321_v33 = vshrl.u32 %v9965_v52, 16  ;;  %v5312_v12 = vrot.slane %v15333_v42, 4  ;;  %v12835_v50 = vld [vmem:[%s12162_s9 + $0xb8] sm:$0xf] }
  0x9b   : > { %v5295_v35 = vsel %vm12216_vm4, %v5290_v46, %v5294_v7  ;;  %v5318_v39 = vrot.slane %v5316_v21, 5  ;;  %v5324_v47 = vshll.u32 %v9965_v52, 16  ;;  %v15332_v4 = vshll.u32 %v12814_v2, 16 }
  0x9c   : > { %v9989_v36 = vcombine.low %v5285_v15, %v5295_v35  ;;  %v5304_v60 = vrot.slane %v5303_v53, 4  ;;  %v5323_v8 = vrot.slane %v5321_v33, 4  ;;  %v5313_v19 = vor.u32 %v5312_v12, %v5308_v59  ;;  %v12848_v15 = vld [vmem:[%s12162_s9 + $0xbc] sm:$0x1] }
  0x9d   : > { %10731 = vmatmul.mubr.msk.bf16.gmra.mrb[16].mxu1 %vm695_vm1, %v9484_v40  ;;  %v5326_v13 = vrot.slane %v5324_v47, 5  ;;  %v15334_v7 = vshrl.u32 %v12814_v2, 16  ;;  %v5340_v14 = vshll.u32 %v12821_v61, 16  ;;  %v5332_v46 = vrot.slane %v15332_v4, 5 }
  0x9e   : > { %11006 = vmatprep.mubr.msk.bf16.mxu0 %vm695_vm1, %v9989_v36  ;;  %v5309_v52 = vsel %vm12216_vm4, %v5304_v60, %v5308_v59  ;;  %v9485_v21 = vcombine.low %v12395_v17, %v12403_v51  ;;  %v5345_v53 = vshrl.u32 %v9968_v55, 16  ;;  %v5314_v40 = vrot.slane %v5313_v19, 4  ;;  %v9971_v19 = vld [vmem:[%s12162_s9 + $0xc0] sm:$0xf]  ;;  %v9974_v51 = vld [vmem:[%s12162_s9 + $0xcc] sm:$0xf] }
  0x9f   : > { %v5327_v33 = vor.u32 %v5326_v13, %v5323_v8  ;;  %v5336_v35 = vrot.slane %v15334_v7, 4  ;;  %v5342_v36 = vrot.slane %v5340_v14, 5  ;;  %v5348_v12 = vshll.u32 %v9968_v55, 16  ;;  %v12860_v13 = vld [vmem:[%s12162_s9 + $0xc4] sm:$0xf] }
  0xa0   : > { %10734 = vmatprep.mubr.msk.bf16.mxu1 %vm695_vm1, %v9485_v21  ;;  %v5347_v59 = vrot.slane %v5345_v53, 4  ;;  %v15335_v47 = vshll.u32 %v12835_v50, 16  ;;  %v15338_v17 = vshrl.u32 %v12835_v50, 16  ;;  %v5319_v60 = vsel %vm12216_vm4, %v5314_v40, %v5318_v39  ;;  %v12867_v53 = vld [vmem:[%s12162_s9 + $0xc8] sm:$0x1] }
  0xa1   : > { %v5328_v4 = vrot.slane %v5327_v33, 4  ;;  %v5337_v42 = vor.u32 %v5336_v35, %v5332_v46  ;;  %v5364_v8 = vshll.u32 %v12848_v15, 16  ;;  %v9990_v14 = vcombine.low %v5309_v52, %v5319_v60 }
  0xa2   : > { %v5350_v7 = vrot.slane %v5348_v12, 5  ;;  %v5356_v55 = vrot.slane %v15335_v47, 5  ;;  %v5360_v21 = vrot.slane %v15338_v17, 4  ;;  %v9486_v35 = vcombine.low %v12418_v24, %v12425_v16  ;;  %v12882_v24 = vld [vmem:[%s12162_s9 + $0xd0] sm:$0xf] }
  0xa3   : > { %v5333_v39 = vsel %vm12216_vm4, %v5328_v4, %v5332_v46  ;;  %v5338_v40 = vrot.slane %v5337_v42, 4  ;;  %v5366_v33 = vrot.slane %v5364_v8, 5  ;;  %11007 = vmatmul.mubr.msk.bf16.gmra.mrb[20].mxu0 %vm695_vm1, %v9990_v14  ;;  %v5369_v60 = vshrl.u32 %v9971_v19, 16 }
  0xa4   : > { %v5351_v52 = vor.u32 %v5350_v7, %v5347_v59  ;;  %v5361_v12 = vor.u32 %v5360_v21, %v5356_v55  ;;  %v5372_v47 = vshll.u32 %v9971_v19, 16  ;;  %v15339_v4 = vshll.u32 %v12860_v13, 16 }
  0xa5   : > { %v5343_v17 = vsel %vm12216_vm4, %v5338_v40, %v5342_v36  ;;  %10735 = vmatmul.mubr.msk.bf16.gmra.mrb[20].mxu1 %vm695_vm1, %v9486_v35  ;;  %v15340_v42 = vshrl.u32 %v12860_v13, 16  ;;  %v5388_v46 = vshll.u32 %v12867_v53, 16  ;;  %v5371_v19 = vrot.slane %v5369_v60, 4  ;;  %v12889_v35 = vld [vmem:[%s12162_s9 + $0xd4] sm:$0x1] }
  0xa6   : > { %v9991_v8 = vcombine.low %v5333_v39, %v5343_v17  ;;  %v5352_v7 = vrot.slane %v5351_v52, 4  ;;  %v5362_v59 = vrot.slane %v5361_v12, 4  ;;  %v5374_v14 = vrot.slane %v5372_v47, 5 }
  0xa7   : > { %v5380_v21 = vrot.slane %v15339_v4, 5  ;;  %v5384_v36 = vrot.slane %v15340_v42, 4  ;;  %v5390_v40 = vrot.slane %v5388_v46, 5  ;;  %v9487_v47 = vcombine.low %v12443_v45, %v12450_v56  ;;  %v12899_v46 = vld [vmem:[%s12162_s9 + $0x18] sm:$0xe] }
  0xa8   : > { %11010 = vmatprep.mubr.msk.bf16.mxu0 %vm695_vm1, %v9991_v8  ;;  %v5357_v17 = vsel %vm12216_vm4, %v5352_v7, %v5356_v55  ;;  %v5367_v39 = vsel %vm12216_vm4, %v5362_v59, %v5366_v33  ;;  %v5393_v52 = vshrl.u32 %v9974_v51, 16  ;;  %v5375_v60 = vor.u32 %v5374_v14, %v5371_v19  ;;  %v12906_v7 = vld [vmem:[%s12162_s9 + $0x24] sm:$0xe]  ;;  %v11866_v56 = vld [vmem:[%s12162_s9 + $0x2c] sm:$0x1] }
  0xa9   : > { %v9992_v12 = vcombine.low %v5357_v17, %v5367_v39  ;;  %v5385_v4 = vor.u32 %v5384_v36, %v5380_v21  ;;  %v5396_v42 = vshll.u32 %v9974_v51, 16  ;;  %10738 = vmatprep.mubr.msk.bf16.mxu1 %vm695_vm1, %v9487_v47  ;;  %v15343_v16 = vshll.u32 %v12882_v24, 16  ;;  %v12916_v39 = vld [vmem:[%s12162_s9 + $0x30] sm:$0xe] }
  0xaa   : > { %v5395_v8 = vrot.slane %v5393_v52, 4  ;;  %v15344_v55 = vshrl.u32 %v12882_v24, 16  ;;  %v5412_v33 = vshll.u32 %v12889_v35, 16  ;;  %v5376_v45 = vrot.slane %v5375_v60, 4 }
  0xab   : > { %v5386_v59 = vrot.slane %v5385_v4, 4  ;;  %v5398_v17 = vrot.slane %v5396_v42, 5  ;;  %v9488_v51 = vcombine.low %v12466_v57, %v12469_v32  ;;  %11011 = vmatmul.mubr.msk.bf16.gmra.mrb[24].mxu0 %vm695_vm1, %v9992_v12  ;;  %v5404_v19 = vrot.slane %v15343_v16, 5  ;;  %v11865_v32 = vld [vmem:[%s12162_s9 + $0x28] sm:$0xf] }
  0xac   : > { %v5408_v14 = vrot.slane %v15344_v55, 4  ;;  %v5414_v36 = vrot.slane %v5412_v33, 5  ;;  %v5381_v4 = vsel %vm12216_vm4, %v5376_v45, %v5380_v21  ;;  %v10028_v60 = vrot.slane %v12899_v46, 9  ;;  %v12934_v45 = vld [vmem:[%s12162_s9] sm:$0xe] }
  0xad   : > { %v5391_v57 = vsel %vm12216_vm4, %v5386_v59, %v5390_v40  ;;  %v5399_v42 = vor.u32 %v5398_v17, %v5395_v8  ;;  %10739 = vmatmul.mubr.msk.bf16.gmra.mrb[24].mxu1 %vm695_vm1, %v9488_v51  ;;  %v5782_v33 = vrot.slane %v12487_v49, 5  ;;  %v5785_v21 = vrot.slane %v12495_v54, 5  ;;  %v12937_v59 = vld [vmem:[%s12162_s9 + $0x3c] sm:$0xe] }
  0xae   : > { %v9993_v47 = vcombine.low %v5381_v4, %v5391_v57  ;;  %v5409_v52 = vor.u32 %v5408_v14, %v5404_v19  ;;  %v9489_v40 = vcombine.low %v12509_v37, %v12512_v23  ;;  %v10029_v8 = vrot.slane %v12906_v7, 9 }
  0xaf   : > { %v5400_v16 = vrot.slane %v5399_v42, 4  ;;  %v5783_v51 = vsel %vm12923_vm7, %v10028_v60, %v5782_v33  ;;  %v5784_v14 = vrot.slane %v5782_v33, 4  ;;  %v5789_v4 = vrot.slane %v12541_v62, 5 }
  0xb0   : > { %11014 = vmatprep.mubr.msk.bf16.mxu0 %vm695_vm1, %v9993_v47  ;;  %v5410_v17 = vrot.slane %v5409_v52, 4  ;;  %10742 = vmatprep.mubr.msk.bf16.mxu1 %vm695_vm1, %v9489_v40  ;;  %v5792_v37 = vrot.slane %v12550_v41, 5  ;;  %v9490_v57 = vcombine.low %v12556_v44, %v12562_v3  ;;  %v10030_v42 = vrot.slane %v12916_v39, 9  ;;  %v13028_v3 = vld [vmem:[%s15259_s1 + $0x20] sm:$0x3f]  }
  0xb1   : > { %v5405_v54 = vsel %vm12216_vm4, %v5400_v16, %v5404_v19  ;;  %v5786_v52 = vsel %vm12923_vm7, %v5784_v14, %v5785_v21  ;;  %v5790_v60 = vsel %vm12923_vm7, %v10029_v8, %v5789_v4  ;;  %v5791_v16 = vrot.slane %v5789_v4, 4  ;;  %v12957_v19 = vld [vmem:[%s12162_s9 + $0xc] sm:$0xe]  ;;  %v11861_v21 = vld [vmem:[%s12162_s9 + $0x4] sm:$0xf] }
  0xb2   : > { %v5415_v47 = vsel %vm12216_vm4, %v5410_v17, %v5414_v36  ;;  %v10046_v41 = vcombine.low %v5783_v51, %v5786_v52  ;;  %v5796_v40 = vrot.slane %v12580_v5, 5  ;;  %v5799_v44 = vrot.slane %v12590_v18, 5 }
  0xb3   : > { %v9994_v33 = vcombine.low %v5405_v54, %v5415_v47  ;;  %v5793_v55 = vsel %vm12923_vm7, %v5791_v16, %v5792_v37  ;;  %v9508_v36 = vrot.slane %v12934_v45, 9  ;;  %v1259_v17 = vrot.slane %v11861_v21, 5  ;;  %v12972_v54 = vld [vmem:[%s12162_s9 + $0x48] sm:$0xe] }
  0xb4   : > { %v10031_v8 = vrot.slane %v12937_v59, 9  ;;  %v10047_v14 = vcombine.low %v5790_v60, %v5793_v55  ;;  %v5797_v18 = vsel %vm12923_vm7, %v10030_v42, %v5796_v40  ;;  %v5798_v51 = vrot.slane %v5796_v40, 4  ;;  %v12990_v40 = vld [vmem:[%s12162_s9 + $0x54] sm:$0xe]  ;;  %v15510_v21 = vld [vmem:[#allocation8_spill] sm:$0xff] }
  0xb5   : > { %11015 = vmatmul.mubr.msk.bf16.gmra.mrb[28].mxu0 %vm695_vm1, %v9994_v33  ;;  %10743 = vmatmul.mubr.msk.bf16.gmra.mrb[28].mxu1 %vm695_vm1, %v9490_v57  ;;  %v5803_v4 = vrot.slane %v12598_v27, 5  ;;  %v1260_v37 = vsel %vm12923_vm7, %v9508_v36, %v1259_v17  ;;  %v1261_v47 = vrot.slane %v1259_v17, 4  ;;  %v5806_v52 = vrot.slane %v12611_v30, 5  ;;  %v12980_v57 = vld [vmem:[%s12162_s9 + $0x18] sm:$0xe] }
  0xb6   : > { %11020 = vmatprep.mubr.msk.bf16.mxu0 %vm695_vm1, %v10046_v41  ;;  %v9509_v55 = vrot.slane %v12957_v19, 9  ;;  %v5800_v42 = vsel %vm12923_vm7, %v5798_v51, %v5799_v44  ;;  %v11862_v33 = vld [vmem:[%s12162_s9 + $0x10] sm:$0xf]  ;;  %v15511_v30 = vrot.slane %v15510_v21, 5  ;;  %v2161_v38 = vsel %vm744_vm0, %v12688_v22, 0 }
  0xb7   : > { %v12986_v60 = vsel %vm12923_vm7, %v10031_v8, %v5803_v4  ;;  %v5805_v16 = vrot.slane %v5803_v4, 4  ;;  %v1266_v41 = vrot.slane %v11862_v33, 5  ;;  %v10048_v36 = vcombine.low %v5797_v18, %v5800_v42  ;;  %v13007_v42 = vld [vmem:[%s12162_s9 + $0x24] sm:$0xe] }
  0xb8   : > { %v1263_v17 = vsel %vm12923_vm7, %v1261_v47, %v15511_v30  ;;  %v6681_v44 = vsel %vm744_vm0, %v12709_v6, 0  ;;  %v10032_v22 = vrot.slane %v12972_v54, 9  ;;  %v5810_v6 = vrot.slane %v12625_v0, 5  ;;  %v11864_v30 = vld [vmem:[%s12162_s9 + $0x20] sm:$0x1] }
  0xb9   : > { %v9526_v8 = vcombine.low %v1260_v37, %v1263_v17  ;;  %v13002_v51 = vsel %vm12923_vm7, %v5805_v16, %v5806_v52  ;;  %v1267_v18 = vsel %vm12923_vm7, %v9509_v55, %v1266_v41  ;;  %v1268_v4 = vrot.slane %v1266_v41, 4  ;;  %v15512_v52 = vld [vmem:[#allocation11_spill] sm:$0xff] }
  0xba   : > { %v5813_v37 = vrot.slane %v12638_v26, 5  ;;  %v15513_v16 = vrot.slane %v15512_v52, 5  ;;  %v9510_v33 = vrot.slane %v12980_v57, 9  ;;  %v11863_v41 = vld [vmem:[%s12162_s9 + $0x1c] sm:$0xf]  ;;  %v1276_v17 = vrot.slane %v11864_v30, 5 }
  0xbb   : > { %10748 = vmatprep.mubr.msk.bf16.mxu1 %vm695_vm1, %v9526_v8  ;;  %v1273_v21 = vrot.slane %v11863_v41, 5  ;;  %v13023_v47 = vld [vmem:[%s12162_s9 + $0x60] sm:$0xe]  ;;  %v5811_v8 = vsel %vm12923_vm7, %v10032_v22, %v5810_v6  ;;  %v10033_v52 = vrot.slane %v12990_v40, 9  ;;  %v5817_v22 = vrot.slane %v12647_v48, 5 }
  0xbc   : > { %v1270_v55 = vsel %vm12923_vm7, %v1268_v4, %v15513_v16  ;;  %v5812_v4 = vrot.slane %v5810_v6, 4  ;;  %v13034_v16 = vld [vmem:[%s12162_s9 + $0x30] sm:$0xe]  ;;  %v13039_v41 = vld [vmem:[%s15259_s1 + $0x60] sm:$0x3f]   ;;  %v5820_v6 = vrot.slane %v12659_v1, 5 }
  0xbd   : > { %v9527_v26 = vcombine.low %v1267_v18, %v1270_v55  ;;  %15514 = vst [vmem:[#allocation8_spill] sm:$0xff] %v13034_v16  ;;  %11021 = vmatmul.mubr.msk.bf16.vlgmr.msra.gmra.mrb[0].mxu0 %vm695_vm1, %v10047_v14  ;;  %v1274_v18 = vsel %vm12923_vm7, %v9510_v33, %v1273_v21  ;;  %v1275_v55 = vrot.slane %v1273_v21, 4  ;;  %v9511_v23 = vrot.slane %v13007_v42, 9  ;;  %v13054_v33 = vld [vmem:[%s12162_s9 + $0x6c] sm:$0xe] }
  0xbe   : > { %11024 = vmatprep.mubr.msk.bf16.mxu0 %vm695_vm1, %v10048_v36  ;;  %v5814_v30 = vsel %vm12923_vm7, %v5812_v4, %v5813_v37  ;;  %v1280_v14 = vrot.slane %v11865_v32, 5  ;;  %v1283_v43 = vrot.slane %v11866_v56, 5  ;;  %15515 = vst [vmem:[#allocation11_spill] sm:$0xff] %v13054_v33  ;;  %11053 = vmatpush3.bf16.msra.mxu0 %v6681_v44  ;;  %v13060_v36 = vsel %vm12923_vm7, %v10033_v52, %v5817_v22  ;;  %v13066_v44 = vld [vmem:[%s12162_s9 + $0x3c] sm:$0xe] }
  0xbf   : > { %10749 = vmatmul.mubr.msk.bf16.vlgmr.msra.gmra.mrb[0].mxu1 %vm695_vm1, %v9527_v26  ;;  %v10050_v21 = vcombine.low %v5811_v8, %v5814_v30  ;;  %v1277_v1 = vsel %vm12923_vm7, %v1275_v55, %v1276_v17  ;;  %v5819_v37 = vrot.slane %v5817_v22, 4  ;;  %11714 = vmatprep.subr.msk.bf16.mxu0 %vm744_vm0, %v13039_v41  ;;  %v5824_v8 = vrot.slane %v12668_v20, 5  ;;  %v11867_v55 = vld [vmem:[%s12162_s9 + $0x34] sm:$0xf] }
  0xc0   : > { %10781 = vmatpush3.bf16.msra.mxu1 %v2161_v38  ;;  %v9528_v26 = vcombine.low %v1274_v18, %v1277_v1  ;;  %v1281_v32 = vsel %vm12923_vm7, %v9511_v23, %v1280_v14  ;;  %v1282_v56 = vrot.slane %v1280_v14, 4  ;;  %v10034_v38 = vrot.slane %v13023_v47, 9  ;;  %v13087_v14 = vld [vmem:[%s12162_s9 + $0x78] sm:$0xe] }
  0xc1   : > { %11706 = vmatprep.subr.msk.bf16.mxu1 %vm744_vm0, %v13028_v3  ;;  %v13074_v17 = vsel %vm12923_vm7, %v5819_v37, %v5820_v6  ;;  %v5827_v23 = vrot.slane %v12677_v11, 5  ;;  %v9512_v4 = vrot.slane %v13034_v16, 9  ;;  %v1287_v22 = vrot.slane %v11867_v55, 5  ;;  %v11868_v6 = vld [vmem:[%s12162_s9 + $0x38] sm:$0x1]  ;;  %v15517_v55 = vld [vmem:[#allocation29_spill] sm:$0xff] }
  0xc2   : > { %10752 = vmatprep.mubr.msk.bf16.mxu1 %vm695_vm1, %v9528_v26  ;;  %v10051_v52 = vcombine.low %v13060_v36, %v13074_v17  ;;  %v1284_v18 = vsel %vm12923_vm7, %v1282_v56, %v1283_v43  ;;  %v1290_v30 = vrot.slane %v11868_v6, 5  ;;  %v5825_v1 = vsel %vm12923_vm7, %v10034_v38, %v5824_v8  ;;  %v15516_v56 = vld [vmem:[#allocation28_spill] sm:$0xff] }
  0xc3   : > { %v9529_v11 = vcombine.low %v1281_v32, %v1284_v18  ;;  %v5826_v37 = vrot.slane %v5824_v8, 4  ;;  %v10035_v26 = vrot.slane %v13054_v33, 9  ;;  %v1288_v36 = vsel %vm12923_vm7, %v9512_v4, %v1287_v22  ;;  %v1212_v6 = vld [vmem:[%s12162_s9 + $0x48] sm:$0xe]  ;;  %v11869_v8 = vld [vmem:[%s12162_s9 + $0x40] sm:$0xf] }
  0xc4   : > { %v1289_v43 = vrot.slane %v1287_v22, 4  ;;  %v5831_v17 = vrot.slane %v15516_v56, 5  ;;  %v5834_v28 = vrot.slane %v15517_v55, 5  ;;  %v15518_v16 = vcombine.low %v12986_v60, %v13002_v51  ;;  %v11870_v4 = vld [vmem:[%s12162_s9 + $0x44] sm:$0x1] }
  0xc5   : > { %v5828_v32 = vsel %vm12923_vm7, %v5826_v37, %v5827_v23  ;;  %v9513_v38 = vrot.slane %v13066_v44, 9  ;;  %v1294_v18 = vrot.slane %v11869_v8, 5  ;;  %v1297_v22 = vrot.slane %v11870_v4, 5  ;;  %v10021_v33 = vld [vmem:[%s12162_s9 + $0x84] sm:$0xe] }
  0xc6   : > { %11025 = vmatmul.mubr.msk.bf16.gmra.mrb[4].mxu0 %vm695_vm1, %v15518_v16  ;;  %v10052_v55 = vcombine.low %v5825_v1, %v5828_v32  ;;  %v1291_v60 = vsel %vm12923_vm7, %v1289_v43, %v1290_v30  ;;  %v13113_v51 = vsel %vm12923_vm7, %v10035_v26, %v5831_v17  ;;  %v5833_v16 = vrot.slane %v5831_v17, 4  ;;  %v11871_v32 = vld [vmem:[%s12162_s9 + $0x4c] sm:$0xf]  ;;  %v10022_v4 = vld [vmem:[%s12162_s9 + $0x90] sm:$0xe] }
  0xc7   : > { %11028 = vmatprep.mubr.msk.bf16.mxu0 %vm695_vm1, %v10050_v21  ;;  %10753 = vmatmul.mubr.msk.bf16.gmra.mrb[4].mxu1 %vm695_vm1, %v9529_v11  ;;  %v9530_v23 = vcombine.low %v1288_v36, %v1291_v60  ;;  %v1295_v37 = vsel %vm12923_vm7, %v9513_v38, %v1294_v18  ;;  %v1296_v8 = vrot.slane %v1294_v18, 4  ;;  %v10036_v21 = vrot.slane %v13087_v14, 9  ;;  %v1213_v11 = vld [vmem:[%s12162_s9 + $0x54] sm:$0xe]  ;;  %v11872_v18 = vld [vmem:[%s12162_s9 + $0x50] sm:$0x1] }
  0xc8   : > { %v13121_v1 = vsel %vm12923_vm7, %v5833_v16, %v5834_v28  ;;  %v5838_v30 = vrot.slane %v12731_v10, 5  ;;  %v5841_v26 = vrot.slane %v12740_v29, 5  ;;  %v9514_v43 = vrot.slane %v1212_v6, 9  ;;  %v11874_v10 = vld [vmem:[%s12162_s9 + $0x5c] sm:$0x1] }
  0xc9   : > { %10756 = vmatprep.mubr.msk.bf16.mxu1 %vm695_vm1, %v9530_v23  ;;  %v1298_v17 = vsel %vm12923_vm7, %v1296_v8, %v1297_v22  ;;  %v1301_v38 = vrot.slane %v11871_v32, 5  ;;  %v1304_v28 = vrot.slane %v11872_v18, 5  ;;  %v10037_v16 = vrot.slane %v10021_v33, 9  ;;  %v1214_v32 = vld [vmem:[%s12162_s9 + $0x60] sm:$0xe] }
  0xca   : > { %v9531_v60 = vcombine.low %v1295_v37, %v1298_v17  ;;  %v13135_v29 = vsel %vm12923_vm7, %v10036_v21, %v5838_v30  ;;  %v5840_v6 = vrot.slane %v5838_v30, 4  ;;  %v5845_v22 = vrot.slane %v12749_v63, 5  ;;  %v11873_v17 = vld [vmem:[%s12162_s9 + $0x58] sm:$0xf] }
  0xcb   : > { %v1302_v23 = vsel %vm12923_vm7, %v9514_v43, %v1301_v38  ;;  %v1303_v36 = vrot.slane %v1301_v38, 4  ;;  %v5848_v8 = vrot.slane %v12762_v34, 5  ;;  %v9515_v37 = vrot.slane %v1213_v11, 9 }
  0xcc   : > { %v5842_v18 = vsel %vm12923_vm7, %v5840_v6, %v5841_v26  ;;  %v1308_v21 = vrot.slane %v11873_v17, 5  ;;  %v1311_v30 = vrot.slane %v11874_v10, 5  ;;  %v13152_v34 = vsel %vm12923_vm7, %v10037_v16, %v5845_v22  ;;  %v10023_v26 = vld [vmem:[%s12162_s9 + $0x9c] sm:$0xe] }
  0xcd   : > { %v10054_v33 = vcombine.low %v13135_v29, %v5842_v18  ;;  %v1305_v43 = vsel %vm12923_vm7, %v1303_v36, %v1304_v28  ;;  %v5847_v38 = vrot.slane %v5845_v22, 4  ;;  %v10038_v29 = vrot.slane %v10022_v4, 9  ;;  %v1215_v36 = vld [vmem:[%s12162_s9 + $0x6c] sm:$0xe]  ;;  %v11875_v4 = vld [vmem:[%s12162_s9 + $0x64] sm:$0xf] }
  0xce   : > { %11029 = vmatmul.mubr.msk.bf16.gmra.mrb[8].mxu0 %vm695_vm1, %v10051_v52  ;;  %v9532_v10 = vcombine.low %v1302_v23, %v1305_v43  ;;  %v1309_v52 = vsel %vm12923_vm7, %v9515_v37, %v1308_v21  ;;  %v1310_v11 = vrot.slane %v1308_v21, 4  ;;  %v5852_v6 = vrot.slane %v12771_v25, 5  ;;  %v11876_v18 = vld [vmem:[%s12162_s9 + $0x68] sm:$0x1]  ;;  %v10024_v37 = vld [vmem:[%s12162_s9 + $0xa8] sm:$0xe] }
  0xcf   : > { %11032 = vmatprep.mubr.msk.bf16.mxu0 %vm695_vm1, %v10052_v55  ;;  %10757 = vmatmul.mubr.msk.bf16.gmra.mrb[8].mxu1 %vm695_vm1, %v9531_v60  ;;  %v13162_v28 = vsel %vm12923_vm7, %v5847_v38, %v5848_v8  ;;  %v5855_v55 = vrot.slane %v12784_v58, 5  ;;  %v9516_v16 = vrot.slane %v1214_v32, 9  ;;  %v1315_v22 = vrot.slane %v11875_v4, 5  ;;  %v1216_v43 = vld [vmem:[%s12162_s9 + $0x78] sm:$0xe] }
  0xd0   : > { %10760 = vmatprep.mubr.msk.bf16.mxu1 %vm695_vm1, %v9532_v10  ;;  %v1312_v23 = vsel %vm12923_vm7, %v1310_v11, %v1311_v30  ;;  %v1318_v8 = vrot.slane %v11876_v18, 5  ;;  %v13176_v58 = vsel %vm12923_vm7, %v10038_v29, %v5852_v6  ;;  %v5854_v32 = vrot.slane %v5852_v6, 4  ;;  %v11878_v60 = vld [vmem:[%s12162_s9 + $0x74] sm:$0x1]  ;;  %v10025_v25 = vld [vmem:[%s12162_s9 + $0xb4] sm:$0xe] }
  0xd1   : > { %v9533_v17 = vcombine.low %v1309_v52, %v1312_v23  ;;  %v10039_v21 = vrot.slane %v10023_v26, 9  ;;  %v1316_v38 = vsel %vm12923_vm7, %v9516_v16, %v1315_v22  ;;  %v1317_v30 = vrot.slane %v1315_v22, 4  ;;  %v11877_v52 = vld [vmem:[%s12162_s9 + $0x70] sm:$0xf] }
  0xd2   : > { %v5859_v10 = vrot.slane %v12794_v31, 5  ;;  %v5862_v11 = vrot.slane %v12806_v9, 5  ;;  %v5856_v4 = vsel %vm12923_vm7, %v5854_v32, %v5855_v55  ;;  %v9517_v18 = vrot.slane %v1215_v36, 9 }
  0xd3   : > { %v1322_v23 = vrot.slane %v11877_v52, 5  ;;  %v1325_v29 = vrot.slane %v11878_v60, 5  ;;  %v10056_v26 = vcombine.low %v13176_v58, %v5856_v4  ;;  %v1319_v6 = vsel %vm12923_vm7, %v1317_v30, %v1318_v8  ;;  %v11880_v30 = vld [vmem:[%s12162_s9 + $0x80] sm:$0x1]  ;;  %v1218_v52 = vld [vmem:[%s12162_s9 + $0x90] sm:$0xe] }
  0xd4   : > { %v13193_v16 = vsel %vm12923_vm7, %v10039_v21, %v5859_v10  ;;  %v5861_v9 = vrot.slane %v5859_v10, 4  ;;  %v15519_v55 = vcombine.low %v13113_v51, %v13121_v1  ;;  %v9534_v36 = vcombine.low %v1316_v38, %v1319_v6  ;;  %v1217_v21 = vld [vmem:[%s12162_s9 + $0x84] sm:$0xe] }
  0xd5   : > { %v1323_v60 = vsel %vm12923_vm7, %v9517_v18, %v1322_v23  ;;  %v1324_v22 = vrot.slane %v1322_v23, 4  ;;  %v10040_v58 = vrot.slane %v10024_v37, 9  ;;  %v5866_v51 = vrot.slane %v12814_v2, 5 }
  0xd6   : > { %11033 = vmatmul.mubr.msk.bf16.gmra.mrb[12].mxu0 %vm695_vm1, %v15519_v55  ;;  %v13205_v8 = vsel %vm12923_vm7, %v5861_v9, %v5862_v11  ;;  %v5869_v1 = vrot.slane %v12821_v61, 5  ;;  %v9518_v32 = vrot.slane %v1216_v43, 9  ;;  %v1332_v10 = vrot.slane %v11880_v30, 5  ;;  %v10026_v11 = vld [vmem:[%s12162_s9 + $0xc0] sm:$0xe] }
  0xd7   : > { %11036 = vmatprep.mubr.msk.bf16.mxu0 %vm695_vm1, %v10054_v33  ;;  %10761 = vmatmul.mubr.msk.bf16.gmra.mrb[12].mxu1 %vm695_vm1, %v9533_v17  ;;  %v10057_v37 = vcombine.low %v13193_v16, %v13205_v8  ;;  %v1326_v33 = vsel %vm12923_vm7, %v1324_v22, %v1325_v29  ;;  %v11879_v17 = vld [vmem:[%s12162_s9 + $0x7c] sm:$0xf]  ;;  %v13220_v61 = vsel %vm12923_vm7, %v10040_v58, %v5866_v51  ;;  %v5868_v43 = vrot.slane %v5866_v51, 4  ;;  %v11882_v58 = vld [vmem:[%s12162_s9 + $0x8c] sm:$0x1] }
  0xd8   : > { %10764 = vmatprep.mubr.msk.bf16.mxu1 %vm695_vm1, %v9534_v36  ;;  %v1329_v38 = vrot.slane %v11879_v17, 5  ;;  %v9535_v4 = vcombine.low %v1323_v60, %v1326_v33  ;;  %v10041_v18 = vrot.slane %v10025_v25, 9  ;;  %v5873_v6 = vrot.slane %v12835_v50, 5  ;;  %v11881_v60 = vld [vmem:[%s12162_s9 + $0x88] sm:$0xf] }
  0xd9   : > { %v5876_v9 = vrot.slane %v12848_v15, 5  ;;  %v13229_v55 = vsel %vm12923_vm7, %v5868_v43, %v5869_v1  ;;  %v9519_v36 = vrot.slane %v1217_v21, 9  ;;  %v1336_v22 = vrot.slane %v11881_v60, 5  ;;  %v10027_v25 = vld [vmem:[%s12162_s9 + $0xcc] sm:$0xe] }
  0xda   : > { %v1330_v23 = vsel %vm12923_vm7, %v9518_v32, %v1329_v38  ;;  %v1331_v29 = vrot.slane %v1329_v38, 4  ;;  %v1339_v51 = vrot.slane %v11882_v58, 5  ;;  %v10058_v33 = vcombine.low %v13220_v61, %v13229_v55 }
  0xdb   : > { %v13240_v15 = vsel %vm12923_vm7, %v10041_v18, %v5873_v6  ;;  %v5875_v1 = vrot.slane %v5873_v6, 4  ;;  %v1337_v21 = vsel %vm12923_vm7, %v9519_v36, %v1336_v22  ;;  %v1338_v38 = vrot.slane %v1336_v22, 4 }
  0xdc   : > { %v1333_v32 = vsel %vm12923_vm7, %v1331_v29, %v1332_v10  ;;  %v10042_v30 = vrot.slane %v10026_v11, 9  ;;  %v15520_v43 = vcombine.low %v13152_v34, %v13162_v28  ;;  %v5880_v61 = vrot.slane %v12860_v13, 5  ;;  %v1219_v29 = vld [vmem:[%s12162_s9 + $0x9c] sm:$0xe]  ;;  %v11883_v28 = vld [vmem:[%s12162_s9 + $0x94] sm:$0xf] }
  0xdd   : > { %v9536_v17 = vcombine.low %v1330_v23, %v1333_v32  ;;  %v13250_v10 = vsel %vm12923_vm7, %v5875_v1, %v5876_v9  ;;  %v5883_v18 = vrot.slane %v12867_v53, 5  ;;  %v9520_v23 = vrot.slane %v1218_v52, 9  ;;  %v11884_v9 = vld [vmem:[%s12162_s9 + $0x98] sm:$0x1]  ;;  %v11885_v1 = vld [vmem:[%s12162_s9 + $0xa0] sm:$0xf] }
  0xde   : > { %11037 = vmatmul.mubr.msk.bf16.gmra.mrb[16].mxu0 %vm695_vm1, %v15520_v43  ;;  %v10059_v11 = vcombine.low %v13240_v15, %v13250_v10  ;;  %v1340_v34 = vsel %vm12923_vm7, %v1338_v38, %v1339_v51  ;;  %v1343_v6 = vrot.slane %v11883_v28, 5  ;;  %v1346_v55 = vrot.slane %v11884_v9, 5  ;;  %v1220_v9 = vld [vmem:[%s12162_s9 + $0xa8] sm:$0xe]  ;;  %v11890_v10 = vld [vmem:[%s12162_s9 + $0xbc] sm:$0x1] }
  0xdf   : > { %11040 = vmatprep.mubr.msk.bf16.mxu0 %vm695_vm1, %v10056_v26  ;;  %10765 = vmatmul.mubr.msk.bf16.gmra.mrb[16].mxu1 %vm695_vm1, %v9535_v4  ;;  %v9537_v53 = vcombine.low %v1337_v21, %v1340_v34  ;;  %v13266_v26 = vsel %vm12923_vm7, %v10042_v30, %v5880_v61  ;;  %v5882_v4 = vrot.slane %v5880_v61, 4  ;;  %v10043_v52 = vrot.slane %v10027_v25, 9  ;;  %v11886_v21 = vld [vmem:[%s12162_s9 + $0xa4] sm:$0x1] }
  0xe0   : > { %10768 = vmatprep.mubr.msk.bf16.mxu1 %vm695_vm1, %v9536_v17  ;;  %v1344_v36 = vsel %vm12923_vm7, %v9520_v23, %v1343_v6  ;;  %v1345_v60 = vrot.slane %v1343_v6, 4  ;;  %v5887_v22 = vrot.slane %v12882_v24, 5  ;;  %v5890_v58 = vrot.slane %v12889_v35, 5 }
  0xe1   : > { %v13274_v51 = vsel %vm12923_vm7, %v5882_v4, %v5883_v18  ;;  %v9521_v32 = vrot.slane %v1219_v29, 9  ;;  %v1350_v17 = vrot.slane %v11885_v1, 5  ;;  %v1353_v38 = vrot.slane %v11886_v21, 5  ;;  %v10079_v29 = vld [vmem:[%s12162_s9 + $0x20] sm:$0x3] }
  0xe2   : > { %v10060_v25 = vcombine.low %v13266_v26, %v13274_v51  ;;  %v1347_v30 = vsel %vm12923_vm7, %v1345_v60, %v1346_v55  ;;  %v13284_v43 = vsel %vm12923_vm7, %v10043_v52, %v5887_v22  ;;  %v5889_v35 = vrot.slane %v5887_v22, 4  ;;  %v11888_v21 = vld [vmem:[%s12162_s9 + $0xb0] sm:$0x1] }
  0xe3   : > { %v9538_v61 = vcombine.low %v1344_v36, %v1347_v30  ;;  %v1351_v18 = vsel %vm12923_vm7, %v9521_v32, %v1350_v17  ;;  %v1352_v23 = vrot.slane %v1350_v17, 4  ;;  %v6209_v28 = vshrl.u32 %v12899_v46, 16  ;;  %v11887_v32 = vld [vmem:[%s12162_s9 + $0xac] sm:$0xf] }
  0xe4   : > { %v13291_v34 = vsel %vm12923_vm7, %v5889_v35, %v5890_v58  ;;  %v6212_v6 = vshll.u32 %v12899_v46, 16  ;;  %v15521_v4 = vshrl.u32 %v12487_v49, 16  ;;  %v15522_v36 = vshll.u32 %v12487_v49, 16 }
  0xe5   : > { %v10061_v55 = vcombine.low %v13284_v43, %v13291_v34  ;;  %v1354_v26 = vsel %vm12923_vm7, %v1352_v23, %v1353_v38  ;;  %v6211_v8 = vrot.slane %v6209_v28, 5  ;;  %v6223_v60 = vshrl.u32 %v10079_v29, 16 }
  0xe6   : > { %11041 = vmatmul.mubr.msk.bf16.gmra.mrb[20].mxu0 %vm695_vm1, %v10057_v37  ;;  %v6217_v52 = vrot.slane %v15521_v4, 5  ;;  %v6218_v46 = vrot.slane %v15522_v36, 6  ;;  %v9539_v16 = vcombine.low %v1351_v18, %v1354_v26  ;;  %v6214_v37 = vrot.slane %v6212_v6, 6  ;;  %v1221_v4 = vld [vmem:[%s12162_s9 + $0xb4] sm:$0xe] }
  0xe7   : > { %11044 = vmatprep.mubr.msk.bf16.mxu0 %vm695_vm1, %v10058_v33  ;;  %10769 = vmatmul.mubr.msk.bf16.gmra.mrb[20].mxu1 %vm695_vm1, %v9537_v53  ;;  %v6226_v58 = vshll.u32 %v10079_v29, 16  ;;  %v9522_v51 = vrot.slane %v1220_v9, 9  ;;  %v1357_v1 = vrot.slane %v11887_v32, 5  ;;  %v6225_v17 = vrot.slane %v6223_v60, 5  ;;  %v10080_v33 = vld [vmem:[%s12162_s9 + $0x2c] sm:$0x3] }
  0xe8   : > { %10772 = vmatprep.mubr.msk.bf16.mxu1 %vm695_vm1, %v9538_v61  ;;  %v6219_v22 = vor.u32 %v6218_v46, %v6217_v52  ;;  %v6215_v49 = vor.u32 %v6214_v37, %v6211_v8  ;;  %v1360_v38 = vrot.slane %v11888_v21, 5  ;;  %v6232_v30 = vshrl.u32 %v12906_v7, 16 }
  0xe9   : > { %v6228_v61 = vrot.slane %v6226_v58, 6  ;;  %v1358_v18 = vsel %vm12923_vm7, %v9522_v51, %v1357_v1  ;;  %v1359_v23 = vrot.slane %v1357_v1, 4  ;;  %v6235_v6 = vshll.u32 %v12906_v7, 16 }
  0xea   : > { %v6221_v35 = vrot.slane %v6219_v22, 4  ;;  %v6216_v29 = vrot.slane %v6215_v49, 4  ;;  %v6234_v28 = vrot.slane %v6232_v30, 5  ;;  %v15525_v9 = vshrl.u32 %v12541_v62, 16  ;;  %v10081_v30 = vld [vmem:[%s12162_s9 + $0x38] sm:$0x3] }
  0xeb   : > { %v6229_v52 = vor.u32 %v6228_v61, %v6225_v17  ;;  %v1361_v36 = vsel %vm12923_vm7, %v1359_v23, %v1360_v38  ;;  %v15526_v46 = vshll.u32 %v12541_v62, 16  ;;  %v6246_v37 = vshrl.u32 %v10080_v33, 16  ;;  %v11889_v38 = vld [vmem:[%s12162_s9 + $0xb8] sm:$0xf] }
  0xec   : > { %v6240_v26 = vrot.slane %v15525_v9, 5  ;;  %v6220_v60 = vsel %vm13317_vm10, %v6216_v29, %v6219_v22  ;;  %v9540_v58 = vcombine.low %v1358_v18, %v1361_v36  ;;  %v6237_v51 = vrot.slane %v6235_v6, 6 }
  0xed   : > { %v6241_v8 = vrot.slane %v15526_v46, 6  ;;  %v6249_v7 = vshll.u32 %v10080_v33, 16  ;;  %v6230_v32 = vsel %vm13317_vm10, %v6221_v35, %v6229_v52  ;;  %v6248_v1 = vrot.slane %v6246_v37, 5 }
  0xee   : > { %11045 = vmatmul.mubr.msk.bf16.gmra.mrb[24].mxu0 %vm695_vm1, %v10059_v11  ;;  %v9523_v49 = vrot.slane %v1221_v4, 9  ;;  %v10097_v22 = vcombine.low %v6220_v60, %v6230_v32  ;;  %v6238_v17 = vor.u32 %v6237_v51, %v6234_v28  ;;  %v1364_v33 = vrot.slane %v11889_v38, 5 }
  0xef   : > { %v6242_v62 = vor.u32 %v6241_v8, %v6240_v26  ;;  %11048 = vmatprep.mubr.msk.bf16.mxu0 %vm695_vm1, %v10060_v25  ;;  %10773 = vmatmul.mubr.msk.bf16.gmra.mrb[24].mxu1 %vm695_vm1, %v9539_v16  ;;  %v6251_v21 = vrot.slane %v6249_v7, 6  ;;  %v1367_v11 = vrot.slane %v11890_v10, 5  ;;  %v6255_v35 = vshrl.u32 %v12916_v39, 16  ;;  %v1669_v8 = vld [vmem:[%s12162_s9 + $0x8] sm:$0x3] }
  0xf0   : > { %10776 = vmatprep.mubr.msk.bf16.mxu1 %vm695_vm1, %v9540_v58  ;;  %v6258_v61 = vshll.u32 %v12916_v39, 16  ;;  %v6239_v18 = vrot.slane %v6238_v17, 4  ;;  %v1365_v16 = vsel %vm12923_vm7, %v9523_v49, %v1364_v33  ;;  %v1366_v23 = vrot.slane %v1364_v33, 4  ;;  %v15529_v17 = vld [vmem:[#allocation9_spill] sm:$0xff] }
  0xf1   : > { %v6244_v15 = vrot.slane %v6242_v62, 4  ;;  %v6252_v25 = vor.u32 %v6251_v21, %v6248_v1  ;;  %v6257_v29 = vrot.slane %v6255_v35, 5  ;;  %v15527_v6 = vshrl.u32 %v12580_v5, 16  ;;  %v15530_v21 = vld [vmem:[#allocation10_spill] sm:$0xff] }
  0xf2   : > { %v6260_v28 = vrot.slane %v6258_v61, 6  ;;  %v15528_v26 = vshll.u32 %v12580_v5, 16  ;;  %v6243_v52 = vsel %vm13317_vm10, %v6239_v18, %v6242_v62  ;;  %v1368_v36 = vsel %vm12923_vm7, %v1366_v23, %v1367_v11 }
  0xf3   : > { %v6263_v9 = vrot.slane %v15527_v6, 5  ;;  %v6253_v39 = vsel %vm13317_vm10, %v6244_v15, %v6252_v25  ;;  %v6269_v46 = vshrl.u32 %v10081_v30, 16  ;;  %v9541_v60 = vcombine.low %v1365_v16, %v1368_v36 }
  0xf4   : > { %v6264_v4 = vrot.slane %v15528_v26, 6  ;;  %v10098_v37 = vcombine.low %v6243_v52, %v6253_v39  ;;  %v6261_v58 = vor.u32 %v6260_v28, %v6257_v29  ;;  %v6272_v32 = vshll.u32 %v10081_v30, 16 }
  0xf5   : > { %v6271_v7 = vrot.slane %v6269_v46, 5  ;;  %v1689_v5 = vshrl.u32 %v12934_v45, 16  ;;  %v1692_v1 = vshll.u32 %v12934_v45, 16  ;;  %v1699_v38 = vor.u32 %v15530_v21, %v15529_v17  ;;  %v10082_v45 = vld [vmem:[%s12162_s9 + $0x44] sm:$0x3] }
  0xf6   : > { %v6265_v51 = vor.u32 %v6264_v4, %v6263_v9  ;;  %11049 = vmatmul.mubr.msk.bf16.gmra.mrb[28].mxu0 %vm695_vm1, %v10061_v55  ;;  %v6262_v62 = vrot.slane %v6261_v58, 4  ;;  %v1703_v33 = vshrl.u32 %v1669_v8, 16  ;;  %v6274_v15 = vrot.slane %v6272_v32, 6  ;;  %v1670_v58 = vld [vmem:[%s12162_s9 + $0x14] sm:$0x3] }
  0xf7   : > { %11054 = vmatprep.mubr.msk.bf16.mxu0 %vm695_vm1, %v10097_v22  ;;  %10777 = vmatmul.mubr.msk.bf16.gmra.mrb[28].mxu1 %vm695_vm1, %v9541_v60  ;;  %v1691_v10 = vrot.slane %v1689_v5, 5  ;;  %v1694_v11 = vrot.slane %v1692_v1, 6  ;;  %v1706_v30 = vshll.u32 %v1669_v8, 16  ;;  %v1701_v34 = vrot.slane %v1699_v38, 4 }
  0xf8   : > { %v6267_v49 = vrot.slane %v6265_v51, 4  ;;  %v6266_v43 = vsel %vm13317_vm10, %v6262_v62, %v6265_v51  ;;  %v1705_v55 = vrot.slane %v1703_v33, 5  ;;  %v6278_v35 = vshrl.u32 %v12937_v59, 16 }
  0xf9   : > { %v6275_v61 = vor.u32 %v6274_v15, %v6271_v7  ;;  %v1695_v18 = vor.u32 %v1694_v11, %v1691_v10  ;;  %v1708_v25 = vrot.slane %v1706_v30, 6  ;;  %v6281_v22 = vshll.u32 %v12937_v59, 16  ;;  %v10083_v11 = vld [vmem:[%s12162_s9 + $0x50] sm:$0x3] }
  0xfa   : > { %v6280_v16 = vrot.slane %v6278_v35, 5  ;;  %v15531_v23 = vshrl.u32 %v12598_v27, 16  ;;  %v15532_v28 = vshll.u32 %v12598_v27, 16  ;;  %v6292_v9 = vshrl.u32 %v10082_v45, 16 }
  0xfb   : > { %v6276_v26 = vsel %vm13317_vm10, %v6267_v49, %v6275_v61  ;;  %v1696_v4 = vrot.slane %v1695_v18, 4  ;;  %v1709_v52 = vor.u32 %v1708_v25, %v1705_v55  ;;  %v6283_v39 = vrot.slane %v6281_v22, 6 }
  0xfc   : > { %v6286_v29 = vrot.slane %v15531_v23, 5  ;;  %v6287_v6 = vrot.slane %v15532_v28, 6  ;;  %v10099_v36 = vcombine.low %v6266_v43, %v6276_v26  ;;  %v6294_v8 = vrot.slane %v6292_v9, 5  ;;  %v15535_v26 = vld [vmem:[#allocation14_spill] sm:$0xff] }
  0xfd   : > { %v6295_v60 = vshll.u32 %v10082_v45, 16  ;;  %v1700_v59 = vsel %vm13317_vm10, %v1696_v4, %v1699_v38  ;;  %v1710_v51 = vsel %vm13317_vm10, %v1701_v34, %v1709_v52  ;;  %v6284_v27 = vor.u32 %v6283_v39, %v6280_v16  ;;  %v11829_v34 = vld [vmem:[%s15259_s1 + $0x68] sm:$0x3f]  }
  0xfe   : > { %v6288_v46 = vor.u32 %v6287_v6, %v6286_v29  ;;  %v1712_v7 = vshrl.u32 %v12957_v19, 16  ;;  %11055 = vmatmul.mubr.msk.bf16.vlgmr.msra.gmra.mrb[0].mxu0 %vm695_vm1, %v10098_v37  ;;  %v9561_v32 = vcombine.low %v1700_v59, %v1710_v51  ;;  %v1715_v62 = vshll.u32 %v12957_v19, 16 }
  0xff   : > { %v6297_v1 = vrot.slane %v6295_v60, 6  ;;  %11058 = vmatprep.mubr.msk.bf16.mxu0 %vm695_vm1, %v10099_v36  ;;  %v6285_v49 = vrot.slane %v6284_v27, 4  ;;  %v1726_v21 = vshrl.u32 %v1670_v58, 16  ;;  %v1729_v38 = vshll.u32 %v1670_v58, 16  ;;  %v1671_v58 = vld [vmem:[%s12162_s9 + $0x20] sm:$0x3] }
 0x100   : > { %v6290_v5 = vrot.slane %v6288_v46, 4  ;;  %v1714_v17 = vrot.slane %v1712_v7, 5  ;;  %10782 = vmatprep.mubr.msk.bf16.mxu1 %vm695_vm1, %v9561_v32  ;;  %v1717_v15 = vrot.slane %v1715_v62, 6  ;;  %v2529_v10 = vsel %vm744_vm0, %v13028_v3, 0  ;;  %v13424_v32 = vld [vmem:[%s15259_s1 + $0x28] sm:$0x3f]  }
 0x101   : > { %v6298_v33 = vor.u32 %v6297_v1, %v6294_v8  ;;  %v7049_v37 = vsel %vm744_vm0, %v13039_v41, 0  ;;  %v6289_v19 = vsel %vm13317_vm10, %v6285_v49, %v6288_v46  ;;  %v1728_v30 = vrot.slane %v1726_v21, 5  ;;  %v15537_v1 = vld [vmem:[#allocation13_spill] sm:$0xff] }
 0x102   : > { %v1731_v45 = vrot.slane %v1729_v38, 6  ;;  %11087 = vmatpush3.bf16.msra.mxu0 %v7049_v37  ;;  %v6301_v43 = vshrl.u32 %v12972_v54, 16  ;;  %v1718_v3 = vor.u32 %v1717_v15, %v1714_v17  ;;  %v6304_v35 = vshll.u32 %v12972_v54, 16 }
 0x103   : > { %v6299_v55 = vsel %vm13317_vm10, %v6290_v5, %v6298_v33  ;;  %v15533_v41 = vshrl.u32 %v12625_v0, 16  ;;  %v15534_v16 = vshll.u32 %v12625_v0, 16  ;;  %11715 = vmatprep.subr.msk.bf16.mxu0 %vm744_vm0, %v11829_v34  ;;  %v6315_v6 = vshrl.u32 %v10083_v11, 16 }
 0x104   : > { %v10100_v18 = vcombine.low %v6289_v19, %v6299_v55  ;;  %v1732_v25 = vor.u32 %v1731_v45, %v1728_v30  ;;  %v6303_v22 = vrot.slane %v6301_v43, 5  ;;  %v1719_v29 = vrot.slane %v1718_v3, 4  ;;  %v10084_v45 = vld [vmem:[%s12162_s9 + $0x5c] sm:$0x3] }
 0x105   : > { %v6309_v61 = vrot.slane %v15533_v41, 5  ;;  %v6310_v23 = vrot.slane %v15534_v16, 6  ;;  %v6306_v28 = vrot.slane %v6304_v35, 6  ;;  %v6318_v9 = vshll.u32 %v10083_v11, 16 }
 0x106   : > { %v15536_v4 = vrot.slane %v15535_v26, 4  ;;  %v1735_v39 = vshrl.u32 %v12980_v57, 16  ;;  %v1738_v36 = vshll.u32 %v12980_v57, 16  ;;  %11059 = vmatmul.mubr.msk.bf16.gmra.mrb[4].mxu0 %vm695_vm1, %v10100_v18  ;;  %v1723_v0 = vsel %vm13317_vm10, %v1719_v29, %v15535_v26 }
 0x107   : > { %v6311_v52 = vor.u32 %v6310_v23, %v6309_v61  ;;  %v6307_v46 = vor.u32 %v6306_v28, %v6303_v22  ;;  %v6317_v8 = vrot.slane %v6315_v6, 5  ;;  %v6320_v60 = vrot.slane %v6318_v9, 6  ;;  %v1672_v9 = vld [vmem:[%s12162_s9 + $0x2c] sm:$0x3] }
 0x108   : > { %v1733_v54 = vsel %vm13317_vm10, %v15536_v4, %v1732_v25  ;;  %v1737_v27 = vrot.slane %v1735_v39, 5  ;;  %v1740_v7 = vrot.slane %v1738_v36, 6  ;;  %v15538_v62 = vshrl.u32 %v15537_v1, 16  ;;  %v15542_v36 = vld [vmem:[#allocation15_spill] sm:$0xff] }
 0x109   : > { %v9562_v59 = vcombine.low %v1723_v0, %v1733_v54  ;;  %v6313_v51 = vrot.slane %v6311_v52, 4  ;;  %v6308_v57 = vrot.slane %v6307_v46, 4  ;;  %v6321_v5 = vor.u32 %v6320_v60, %v6317_v8 }
 0x10a   : > { %v1743_v49 = vrot.slane %v15538_v62, 5  ;;  %v15539_v17 = vshll.u32 %v15537_v1, 16  ;;  %v1741_v38 = vor.u32 %v1740_v7, %v1737_v27  ;;  %v1749_v33 = vshrl.u32 %v1671_v58, 16 }
 0x10b   : > { %10783 = vmatmul.mubr.msk.bf16.vlgmr.msra.gmra.mrb[0].mxu1 %vm695_vm1, %v9562_v59  ;;  %v1752_v15 = vshll.u32 %v1671_v58, 16  ;;  %v6324_v37 = vshrl.u32 %v12990_v40, 16  ;;  %v6312_v11 = vsel %vm13317_vm10, %v6308_v57, %v6311_v52  ;;  %v6322_v19 = vsel %vm13317_vm10, %v6313_v51, %v6321_v5 }
 0x10c   : > { %v1744_v21 = vrot.slane %v15539_v17, 6  ;;  %10815 = vmatpush3.bf16.msra.mxu1 %v2529_v10  ;;  %v6327_v43 = vshll.u32 %v12990_v40, 16  ;;  %v10101_v34 = vcombine.low %v6312_v11, %v6322_v19  ;;  %v1742_v55 = vrot.slane %v1741_v38, 4  ;;  %v10085_v38 = vld [vmem:[%s12162_s9 + $0x68] sm:$0x3] }
 0x10d   : > { %v1751_v3 = vrot.slane %v1749_v33, 5  ;;  %v1754_v35 = vrot.slane %v1752_v15, 6  ;;  %11707 = vmatprep.subr.msk.bf16.mxu1 %vm744_vm0, %v13424_v32  ;;  %v6326_v10 = vrot.slane %v6324_v37, 5  ;;  %v15540_v18 = vshrl.u32 %v12647_v48, 16 }
 0x10e   : > { %v1745_v30 = vor.u32 %v1744_v21, %v1743_v49  ;;  %v6329_v61 = vrot.slane %v6327_v43, 6  ;;  %11062 = vmatprep.mubr.msk.bf16.mxu0 %vm695_vm1, %v10101_v34  ;;  %v15541_v16 = vshll.u32 %v12647_v48, 16  ;;  %v6338_v29 = vshrl.u32 %v10084_v45, 16 }
 0x10f   : > { %v6332_v25 = vrot.slane %v15540_v18, 5  ;;  %v1755_v40 = vor.u32 %v1754_v35, %v1751_v3  ;;  %v6341_v6 = vshll.u32 %v10084_v45, 16  ;;  %v1758_v26 = vshrl.u32 %v13007_v42, 16 }
 0x110   : > { %v1747_v41 = vrot.slane %v1745_v30, 4  ;;  %v1746_v22 = vsel %vm13317_vm10, %v1742_v55, %v1745_v30  ;;  %v6333_v23 = vrot.slane %v15541_v16, 6  ;;  %v6330_v28 = vor.u32 %v6329_v61, %v6326_v10 }
 0x111   : > { %v1761_v4 = vshll.u32 %v13007_v42, 16  ;;  %v6340_v39 = vrot.slane %v6338_v29, 5  ;;  %v15543_v0 = vshrl.u32 %v15542_v36, 16  ;;  %v6343_v60 = vrot.slane %v6341_v6, 6 }
 0x112   : > { %v1756_v54 = vsel %vm13317_vm10, %v1747_v41, %v1755_v40  ;;  %v6334_v52 = vor.u32 %v6333_v23, %v6332_v25  ;;  %v6331_v48 = vrot.slane %v6330_v28, 4  ;;  %v1760_v58 = vrot.slane %v1758_v26, 5  ;;  %v15547_v25 = vld [vmem:[#allocation8_spill] sm:$0xff] }
 0x113   : > { %v1766_v46 = vrot.slane %v15543_v0, 5  ;;  %v9563_v8 = vcombine.low %v1746_v22, %v1756_v54  ;;  %v1763_v51 = vrot.slane %v1761_v4, 6  ;;  %v15544_v27 = vshll.u32 %v15542_v36, 16 }
 0x114   : > { %v6336_v59 = vrot.slane %v6334_v52, 4  ;;  %v1772_v57 = vshrl.u32 %v1672_v9, 16  ;;  %v6335_v42 = vsel %vm13317_vm10, %v6331_v48, %v6334_v52  ;;  %v6344_v5 = vor.u32 %v6343_v60, %v6340_v39  ;;  %v15548_v39 = vld [vmem:[#allocation16_spill] sm:$0xff] }
 0x115   : > { %v1767_v7 = vrot.slane %v15544_v27, 6  ;;  %10786 = vmatprep.mubr.msk.bf16.mxu1 %vm695_vm1, %v9563_v8  ;;  %v1775_v1 = vshll.u32 %v1672_v9, 16  ;;  %v6347_v62 = vshrl.u32 %v13023_v47, 16  ;;  %v1764_v49 = vor.u32 %v1763_v51, %v1760_v58 }
 0x116   : > { %v1774_v21 = vrot.slane %v1772_v57, 5  ;;  %v6350_v33 = vshll.u32 %v13023_v47, 16  ;;  %v6345_v15 = vsel %vm13317_vm10, %v6336_v59, %v6344_v5  ;;  %v15545_v19 = vshrl.u32 %v12668_v20, 16  ;;  %v15551_v57 = vld [vmem:[#allocation11_spill] sm:$0xff] }
 0x117   : > { %v1768_v17 = vor.u32 %v1767_v7, %v1766_v46  ;;  %v1777_v37 = vrot.slane %v1775_v1, 6  ;;  %v6349_v11 = vrot.slane %v6347_v62, 5  ;;  %v10102_v45 = vcombine.low %v6335_v42, %v6345_v15  ;;  %v10086_v7 = vld [vmem:[%s12162_s9 + $0x74] sm:$0x3] }
 0x118   : > { %v6355_v30 = vrot.slane %v15545_v19, 5  ;;  %v1765_v43 = vrot.slane %v1764_v49, 4  ;;  %v6352_v55 = vrot.slane %v6350_v33, 6  ;;  %v15546_v35 = vshll.u32 %v12668_v20, 16  ;;  %v1673_v20 = vld [vmem:[%s12162_s9 + $0x38] sm:$0x3] }
 0x119   : > { %v1770_v34 = vrot.slane %v1768_v17, 4  ;;  %v1778_v3 = vor.u32 %v1777_v37, %v1774_v21  ;;  %v6361_v10 = vshrl.u32 %v10085_v38, 16  ;;  %v6364_v61 = vshll.u32 %v10085_v38, 16  ;;  %11063 = vmatmul.mubr.msk.bf16.gmra.mrb[8].mxu0 %vm695_vm1, %v10102_v45 }
 0x11a   : > { %v6356_v41 = vrot.slane %v15546_v35, 6  ;;  %v1769_v47 = vsel %vm13317_vm10, %v1765_v43, %v1768_v17  ;;  %v6353_v18 = vor.u32 %v6352_v55, %v6349_v11  ;;  %v1781_v22 = vshrl.u32 %v15547_v25, 16 }
 0x11b   : > { %v1784_v40 = vshll.u32 %v15547_v25, 16  ;;  %v1779_v16 = vsel %vm13317_vm10, %v1770_v34, %v1778_v3  ;;  %v6363_v29 = vrot.slane %v6361_v10, 5  ;;  %v6366_v28 = vrot.slane %v6364_v61, 6  ;;  %v1674_v3 = vld [vmem:[%s12162_s9 + $0x44] sm:$0x3] }
 0x11c   : > { %v6357_v23 = vor.u32 %v6356_v41, %v6355_v30  ;;  %v9564_v6 = vcombine.low %v1769_v47, %v1779_v16  ;;  %v6354_v9 = vrot.slane %v6353_v18, 4  ;;  %v1783_v26 = vrot.slane %v1781_v22, 5  ;;  %v15554_v18 = vld [vmem:[#allocation17_spill] sm:$0xff] }
 0x11d   : > { %v1786_v4 = vrot.slane %v1784_v40, 6  ;;  %v6367_v52 = vor.u32 %v6366_v28, %v6363_v29  ;;  %v15549_v36 = vshrl.u32 %v15548_v39, 16  ;;  %v15550_v46 = vshll.u32 %v15548_v39, 16 }
 0x11e   : > { %v6359_v54 = vrot.slane %v6357_v23, 4  ;;  %10787 = vmatmul.mubr.msk.bf16.gmra.mrb[4].mxu1 %vm695_vm1, %v9564_v6  ;;  %v6358_v48 = vsel %vm13317_vm10, %v6354_v9, %v6357_v23  ;;  %v1795_v58 = vshrl.u32 %v1673_v20, 16  ;;  %v1798_v59 = vshll.u32 %v1673_v20, 16 }
 0x11f   : > { %v1789_v0 = vrot.slane %v15549_v36, 5  ;;  %v1790_v8 = vrot.slane %v15550_v46, 6  ;;  %v1787_v60 = vor.u32 %v1786_v4, %v1783_v26  ;;  %v6370_v42 = vshrl.u32 %v15551_v57, 16 }
 0x120   : > { %v6368_v51 = vsel %vm13317_vm10, %v6359_v54, %v6367_v52  ;;  %v6373_v5 = vshll.u32 %v15551_v57, 16  ;;  %v1797_v49 = vrot.slane %v1795_v58, 5  ;;  %v1800_v17 = vrot.slane %v1798_v59, 6  ;;  %v15557_v58 = vld [vmem:[#allocation30_spill] sm:$0xff] }
 0x121   : > { %v1791_v27 = vor.u32 %v1790_v8, %v1789_v0  ;;  %v10103_v1 = vcombine.low %v6358_v48, %v6368_v51  ;;  %v1788_v62 = vrot.slane %v1787_v60, 4  ;;  %v6372_v38 = vrot.slane %v6370_v42, 5  ;;  %v10087_v0 = vld [vmem:[%s12162_s9 + $0x80] sm:$0x3] }
 0x122   : > { %v6375_v33 = vrot.slane %v6373_v5, 6  ;;  %v15552_v15 = vshrl.u32 %v15516_v56, 16  ;;  %v1801_v19 = vor.u32 %v1800_v17, %v1797_v49  ;;  %v15553_v30 = vshll.u32 %v15516_v56, 16 }
 0x123   : > { %v1793_v21 = vrot.slane %v1791_v27, 4  ;;  %11066 = vmatprep.mubr.msk.bf16.mxu0 %vm695_vm1, %v10103_v1  ;;  %v1792_v11 = vsel %vm13317_vm10, %v1788_v62, %v1791_v27  ;;  %v6384_v43 = vshrl.u32 %v10086_v7, 16  ;;  %v6387_v55 = vshll.u32 %v10086_v7, 16 }
 0x124   : > { %v6378_v37 = vrot.slane %v15552_v15, 5  ;;  %v6379_v45 = vrot.slane %v15553_v30, 6  ;;  %v6376_v34 = vor.u32 %v6375_v33, %v6372_v38  ;;  %v1804_v35 = vshrl.u32 %v13066_v44, 16  ;;  %v11891_v38 = vld [vmem:[%s12162_s9 + $0x48] sm:$0xe] }
 0x125   : > { %v1807_v41 = vshll.u32 %v13066_v44, 16  ;;  %v1802_v10 = vsel %vm13317_vm10, %v1793_v21, %v1801_v19  ;;  %v6386_v47 = vrot.slane %v6384_v43, 5  ;;  %v15555_v25 = vshrl.u32 %v15554_v18, 16 }
 0x126   : > { %v6380_v61 = vor.u32 %v6379_v45, %v6378_v37  ;;  %v9565_v40 = vcombine.low %v1792_v11, %v1802_v10  ;;  %v6377_v56 = vrot.slane %v6376_v34, 4  ;;  %v6389_v16 = vrot.slane %v6387_v55, 6  ;;  %v1675_v45 = vld [vmem:[%s12162_s9 + $0x50] sm:$0x3]  ;;  %v15560_v10 = vld [vmem:[#allocation18_spill] sm:$0xff] }
 0x127   : > { %v1812_v22 = vrot.slane %v15555_v25, 5  ;;  %v1806_v23 = vrot.slane %v1804_v35, 5  ;;  %v1809_v28 = vrot.slane %v1807_v41, 6  ;;  %v15556_v20 = vshll.u32 %v15554_v18, 16 }
 0x128   : > { %v6382_v29 = vrot.slane %v6380_v61, 4  ;;  %v1818_v9 = vshrl.u32 %v1674_v3, 16  ;;  %10790 = vmatprep.mubr.msk.bf16.mxu1 %vm695_vm1, %v9565_v40  ;;  %v6381_v44 = vsel %vm13317_vm10, %v6377_v56, %v6380_v61  ;;  %v6390_v26 = vor.u32 %v6389_v16, %v6386_v47 }
 0x129   : > { %v1813_v6 = vrot.slane %v15556_v20, 6  ;;  %v1821_v4 = vshll.u32 %v1674_v3, 16  ;;  %v6393_v54 = vshrl.u32 %v13087_v14, 16  ;;  %v1810_v52 = vor.u32 %v1809_v28, %v1806_v23  ;;  %v10088_v28 = vld [vmem:[%s12162_s9 + $0x8c] sm:$0x3] }
 0x12a   : > { %v1820_v36 = vrot.slane %v1818_v9, 5  ;;  %v6396_v46 = vshll.u32 %v13087_v14, 16  ;;  %v6391_v8 = vsel %vm13317_vm10, %v6382_v29, %v6390_v26  ;;  %v15558_v59 = vshrl.u32 %v15557_v58, 16  ;;  %v11892_v20 = vld [vmem:[%s12162_s9 + $0x84] sm:$0xe] }
 0x12b   : > { %v1814_v39 = vor.u32 %v1813_v6, %v1812_v22  ;;  %v1823_v48 = vrot.slane %v1821_v4, 6  ;;  %v6395_v60 = vrot.slane %v6393_v54, 5  ;;  %v10104_v27 = vcombine.low %v6381_v44, %v6391_v8 }
 0x12c   : > { %v6401_v51 = vrot.slane %v15558_v59, 5  ;;  %v1811_v7 = vrot.slane %v1810_v52, 4  ;;  %v6398_v42 = vrot.slane %v6396_v46, 6  ;;  %v15559_v1 = vshll.u32 %v15557_v58, 16 }
 0x12d   : > { %v1816_v57 = vrot.slane %v1814_v39, 4  ;;  %v1824_v5 = vor.u32 %v1823_v48, %v1820_v36  ;;  %v6407_v49 = vshrl.u32 %v10087_v0, 16  ;;  %v6410_v14 = vshll.u32 %v10087_v0, 16  ;;  %11067 = vmatmul.mubr.msk.bf16.gmra.mrb[12].mxu0 %vm695_vm1, %v10104_v27 }
 0x12e   : > { %v6402_v62 = vrot.slane %v15559_v1, 6  ;;  %v1815_v17 = vsel %vm13317_vm10, %v1811_v7, %v1814_v39  ;;  %v6399_v21 = vor.u32 %v6398_v42, %v6395_v60  ;;  %v1827_v33 = vshrl.u32 %v11891_v38, 16  ;;  %v1676_v7 = vld [vmem:[%s12162_s9 + $0x5c] sm:$0x3] }
 0x12f   : > { %v1830_v15 = vshll.u32 %v11891_v38, 16  ;;  %v1825_v37 = vsel %vm13317_vm10, %v1816_v57, %v1824_v5  ;;  %v6409_v19 = vrot.slane %v6407_v49, 5  ;;  %v6412_v30 = vrot.slane %v6410_v14, 6  ;;  %v11893_v57 = vld [vmem:[%s12162_s9 + $0x54] sm:$0xe]  ;;  %v15565_v14 = vld [vmem:[#allocation19_spill] sm:$0xff] }
 0x130   : > { %v6403_v11 = vor.u32 %v6402_v62, %v6401_v51  ;;  %v9566_v43 = vcombine.low %v1815_v17, %v1825_v37  ;;  %v6400_v34 = vrot.slane %v6399_v21, 4  ;;  %v1829_v55 = vrot.slane %v1827_v33, 5 }
 0x131   : > { %v1832_v3 = vrot.slane %v1830_v15, 6  ;;  %v6413_v41 = vor.u32 %v6412_v30, %v6409_v19  ;;  %v15561_v61 = vshrl.u32 %v15560_v10, 16  ;;  %v15562_v18 = vshll.u32 %v15560_v10, 16 }
 0x132   : > { %v6405_v35 = vrot.slane %v6403_v11, 4  ;;  %10791 = vmatmul.mubr.msk.bf16.gmra.mrb[8].mxu1 %vm695_vm1, %v9566_v43  ;;  %v6404_v22 = vsel %vm13317_vm10, %v6400_v34, %v6403_v11  ;;  %v1841_v56 = vshrl.u32 %v1675_v45, 16  ;;  %v1844_v16 = vshll.u32 %v1675_v45, 16 }
 0x133   : > { %v1835_v47 = vrot.slane %v15561_v61, 5  ;;  %v1836_v25 = vrot.slane %v15562_v18, 6  ;;  %v1833_v40 = vor.u32 %v1832_v3, %v1829_v55  ;;  %v6416_v6 = vshrl.u32 %v11892_v20, 16  ;;  %v11894_v3 = vld [vmem:[%s12162_s9 + $0x90] sm:$0xe] }
 0x134   : > { %v6414_v23 = vsel %vm13317_vm10, %v6405_v35, %v6413_v41  ;;  %v6419_v9 = vshll.u32 %v11892_v20, 16  ;;  %v1843_v4 = vrot.slane %v1841_v56, 5  ;;  %v1846_v54 = vrot.slane %v1844_v16, 6  ;;  %v15568_v56 = vld [vmem:[#allocation31_spill] sm:$0xff] }
 0x135   : > { %v1837_v29 = vor.u32 %v1836_v25, %v1835_v47  ;;  %v10105_v44 = vcombine.low %v6404_v22, %v6414_v23  ;;  %v1834_v26 = vrot.slane %v1833_v40, 4  ;;  %v6418_v39 = vrot.slane %v6416_v6, 5  ;;  %v10089_v47 = vld [vmem:[%s12162_s9 + $0x98] sm:$0x3] }
 0x136   : > { %v6421_v36 = vrot.slane %v6419_v9, 6  ;;  %v15563_v0 = vshrl.u32 %v12749_v63, 16  ;;  %v1847_v48 = vor.u32 %v1846_v54, %v1843_v4  ;;  %v15564_v60 = vshll.u32 %v12749_v63, 16 }
 0x137   : > { %v1839_v52 = vrot.slane %v1837_v29, 4  ;;  %11070 = vmatprep.mubr.msk.bf16.mxu0 %vm695_vm1, %v10105_v44  ;;  %v1838_v8 = vsel %vm13317_vm10, %v1834_v26, %v1837_v29  ;;  %v6430_v59 = vshrl.u32 %v10088_v28, 16  ;;  %v6433_v27 = vshll.u32 %v10088_v28, 16 }
 0x138   : > { %v6424_v46 = vrot.slane %v15563_v0, 5  ;;  %v6425_v58 = vrot.slane %v15564_v60, 6  ;;  %v6422_v51 = vor.u32 %v6421_v36, %v6418_v39  ;;  %v1850_v42 = vshrl.u32 %v11893_v57, 16  ;;  %v11895_v36 = vld [vmem:[%s12162_s9 + $0x60] sm:$0xe] }
 0x139   : > { %v1853_v5 = vshll.u32 %v11893_v57, 16  ;;  %v1848_v1 = vsel %vm13317_vm10, %v1839_v52, %v1847_v48  ;;  %v6432_v49 = vrot.slane %v6430_v59, 5  ;;  %v15566_v17 = vshrl.u32 %v15565_v14, 16  ;;  %v1677_v59 = vld [vmem:[%s12162_s9 + $0x68] sm:$0x3] }
 0x13a   : > { %v6426_v62 = vor.u32 %v6425_v58, %v6424_v46  ;;  %v9567_v38 = vcombine.low %v1838_v8, %v1848_v1  ;;  %v6423_v33 = vrot.slane %v6422_v51, 4  ;;  %v6435_v63 = vrot.slane %v6433_v27, 6  ;;  %v15571_v1 = vld [vmem:[#allocation20_spill] sm:$0xff] }
 0x13b   : > { %v1858_v21 = vrot.slane %v15566_v17, 5  ;;  %v1852_v15 = vrot.slane %v1850_v42, 5  ;;  %v1855_v11 = vrot.slane %v1853_v5, 6  ;;  %v15567_v19 = vshll.u32 %v15565_v14, 16 }
 0x13c   : > { %v6428_v37 = vrot.slane %v6426_v62, 4  ;;  %v1864_v45 = vshrl.u32 %v1676_v7, 16  ;;  %10794 = vmatprep.mubr.msk.bf16.mxu1 %vm695_vm1, %v9567_v38  ;;  %v6427_v43 = vsel %vm13317_vm10, %v6423_v33, %v6426_v62  ;;  %v6436_v34 = vor.u32 %v6435_v63, %v6432_v49 }
 0x13d   : > { %v1859_v30 = vrot.slane %v15567_v19, 6  ;;  %v1867_v55 = vshll.u32 %v1676_v7, 16  ;;  %v6439_v35 = vshrl.u32 %v11894_v3, 16  ;;  %v1856_v41 = vor.u32 %v1855_v11, %v1852_v15  ;;  %v10090_v11 = vld [vmem:[%s12162_s9 + $0xa4] sm:$0x3] }
 0x13e   : > { %v1866_v61 = vrot.slane %v1864_v45, 5  ;;  %v6442_v18 = vshll.u32 %v11894_v3, 16  ;;  %v6437_v25 = vsel %vm13317_vm10, %v6428_v37, %v6436_v34  ;;  %v15569_v16 = vshrl.u32 %v15568_v56, 16  ;;  %v11896_v19 = vld [vmem:[%s12162_s9 + $0x9c] sm:$0xe] }
 0x13f   : > { %v1860_v10 = vor.u32 %v1859_v30, %v1858_v21  ;;  %v1869_v22 = vrot.slane %v1867_v55, 6  ;;  %v6441_v40 = vrot.slane %v6439_v35, 5  ;;  %v10106_v29 = vcombine.low %v6427_v43, %v6437_v25 }
 0x140   : > { %v6447_v23 = vrot.slane %v15569_v16, 5  ;;  %v1857_v28 = vrot.slane %v1856_v41, 4  ;;  %v6444_v6 = vrot.slane %v6442_v18, 6  ;;  %v15570_v44 = vshll.u32 %v15568_v56, 16 }
 0x141   : > { %v1862_v20 = vrot.slane %v1860_v10, 4  ;;  %v1870_v9 = vor.u32 %v1869_v22, %v1866_v61  ;;  %v6453_v4 = vshrl.u32 %v10089_v47, 16  ;;  %v6456_v54 = vshll.u32 %v10089_v47, 16  ;;  %11071 = vmatmul.mubr.msk.bf16.gmra.mrb[16].mxu0 %vm695_vm1, %v10106_v29  ;;  %v1678_v29 = vld [vmem:[%s12162_s9 + $0x74] sm:$0x3] }
 0x142   : > { %v6448_v26 = vrot.slane %v15570_v44, 6  ;;  %v1861_v52 = vsel %vm13317_vm10, %v1857_v28, %v1860_v10  ;;  %v6445_v39 = vor.u32 %v6444_v6, %v6441_v40  ;;  %v1873_v0 = vshrl.u32 %v11895_v36, 16  ;;  %v11897_v28 = vld [vmem:[%s12162_s9 + $0x6c] sm:$0xe] }
 0x143   : > { %v1876_v46 = vshll.u32 %v11895_v36, 16  ;;  %v1871_v8 = vsel %vm13317_vm10, %v1862_v20, %v1870_v9  ;;  %v6455_v60 = vrot.slane %v6453_v4, 5  ;;  %v6458_v58 = vrot.slane %v6456_v54, 6  ;;  %v15576_v4 = vld [vmem:[#allocation21_spill] sm:$0xff] }
 0x144   : > { %v6449_v48 = vor.u32 %v6448_v26, %v6447_v23  ;;  %v9568_v51 = vcombine.low %v1861_v52, %v1871_v8  ;;  %v6446_v27 = vrot.slane %v6445_v39, 4  ;;  %v1875_v7 = vrot.slane %v1873_v0, 5 }
 0x145   : > { %v1878_v57 = vrot.slane %v1876_v46, 6  ;;  %v6459_v5 = vor.u32 %v6458_v58, %v6455_v60  ;;  %v15572_v62 = vshrl.u32 %v15571_v1, 16  ;;  %v15573_v14 = vshll.u32 %v15571_v1, 16 }
 0x146   : > { %v6451_v42 = vrot.slane %v6449_v48, 4  ;;  %10795 = vmatmul.mubr.msk.bf16.gmra.mrb[12].mxu1 %vm695_vm1, %v9568_v51  ;;  %v6450_v21 = vsel %vm13317_vm10, %v6446_v27, %v6449_v48  ;;  %v1887_v33 = vshrl.u32 %v1677_v59, 16  ;;  %v1890_v63 = vshll.u32 %v1677_v59, 16 }
 0x147   : > { %v1881_v49 = vrot.slane %v15572_v62, 5  ;;  %v1882_v17 = vrot.slane %v15573_v14, 6  ;;  %v1879_v38 = vor.u32 %v1878_v57, %v1875_v7  ;;  %v6462_v30 = vshrl.u32 %v11896_v19, 16  ;;  %v11898_v7 = vld [vmem:[%s12162_s9 + $0xa8] sm:$0xe] }
 0x148   : > { %v6460_v15 = vsel %vm13317_vm10, %v6451_v42, %v6459_v5  ;;  %v6465_v45 = vshll.u32 %v11896_v19, 16  ;;  %v1889_v55 = vrot.slane %v1887_v33, 5  ;;  %v1892_v3 = vrot.slane %v1890_v63, 6  ;;  %v10091_v62 = vld [vmem:[%s12162_s9 + $0xb0] sm:$0x3] }
 0x149   : > { %v1883_v37 = vor.u32 %v1882_v17, %v1881_v49  ;;  %v10107_v43 = vcombine.low %v6450_v21, %v6460_v15  ;;  %v1880_v34 = vrot.slane %v1879_v38, 4  ;;  %v6464_v41 = vrot.slane %v6462_v30, 5 }
 0x14a   : > { %v6467_v10 = vrot.slane %v6465_v45, 6  ;;  %v15574_v61 = vshrl.u32 %v12794_v31, 16  ;;  %v1893_v25 = vor.u32 %v1892_v3, %v1889_v55  ;;  %v15575_v22 = vshll.u32 %v12794_v31, 16 }
 0x14b   : > { %v1885_v35 = vrot.slane %v1883_v37, 4  ;;  %11074 = vmatprep.mubr.msk.bf16.mxu0 %vm695_vm1, %v10107_v43  ;;  %v1884_v18 = vsel %vm13317_vm10, %v1880_v34, %v1883_v37  ;;  %v6476_v56 = vshrl.u32 %v10090_v11, 16  ;;  %v6479_v23 = vshll.u32 %v10090_v11, 16 }
 0x14c   : > { %v6470_v47 = vrot.slane %v15574_v61, 5  ;;  %v6471_v40 = vrot.slane %v15575_v22, 6  ;;  %v6468_v16 = vor.u32 %v6467_v10, %v6464_v41  ;;  %v1896_v20 = vshrl.u32 %v11897_v28, 16  ;;  %v1679_v22 = vld [vmem:[%s12162_s9 + $0x80] sm:$0x3] }
 0x14d   : > { %v1899_v6 = vshll.u32 %v11897_v28, 16  ;;  %v1894_v9 = vsel %vm13317_vm10, %v1885_v35, %v1893_v25  ;;  %v6478_v26 = vrot.slane %v6476_v56, 5  ;;  %v15577_v54 = vshrl.u32 %v15576_v4, 16  ;;  %v11899_v35 = vld [vmem:[%s12162_s9 + $0x78] sm:$0xe] }
 0x14e   : > { %v6472_v44 = vor.u32 %v6471_v40, %v6470_v47  ;;  %v9569_v39 = vcombine.low %v1884_v18, %v1894_v9  ;;  %v6469_v36 = vrot.slane %v6468_v16, 4  ;;  %v6481_v31 = vrot.slane %v6479_v23, 6  ;;  %v15581_v28 = vld [vmem:[#allocation22_spill] sm:$0xff] }
 0x14f   : > { %v1904_v52 = vrot.slane %v15577_v54, 5  ;;  %v1898_v0 = vrot.slane %v1896_v20, 5  ;;  %v1901_v8 = vrot.slane %v1899_v6, 6  ;;  %v15578_v48 = vshll.u32 %v15576_v4, 16 }
 0x150   : > { %v6474_v46 = vrot.slane %v6472_v44, 4  ;;  %v1910_v58 = vshrl.u32 %v1678_v29, 16  ;;  %10798 = vmatprep.mubr.msk.bf16.mxu1 %vm695_vm1, %v9569_v39  ;;  %v6473_v59 = vsel %vm13317_vm10, %v6469_v36, %v6472_v44  ;;  %v6482_v51 = vor.u32 %v6481_v31, %v6478_v26  ;;  %v10092_v31 = vld [vmem:[%s12162_s9 + $0xbc] sm:$0x3] }
 0x151   : > { %v1905_v60 = vrot.slane %v15578_v48, 6  ;;  %v1913_v27 = vshll.u32 %v1678_v29, 16  ;;  %v6485_v57 = vshrl.u32 %v11898_v7, 16  ;;  %v1902_v42 = vor.u32 %v1901_v8, %v1898_v0  ;;  %v11900_v0 = vld [vmem:[%s12162_s9 + $0xb4] sm:$0xe] }
 0x152   : > { %v1912_v1 = vrot.slane %v1910_v58, 5  ;;  %v6488_v49 = vshll.u32 %v11898_v7, 16  ;;  %v6483_v14 = vsel %vm13317_vm10, %v6474_v46, %v6482_v51  ;;  %v15579_v38 = vshrl.u32 %v12814_v2, 16 }
 0x153   : > { %v1906_v5 = vor.u32 %v1905_v60, %v1904_v52  ;;  %v1915_v17 = vrot.slane %v1913_v27, 6  ;;  %v6487_v21 = vrot.slane %v6485_v57, 5  ;;  %v10108_v63 = vcombine.low %v6473_v59, %v6483_v14 }
 0x154   : > { %v6493_v33 = vrot.slane %v15579_v38, 5  ;;  %v1903_v15 = vrot.slane %v1902_v42, 4  ;;  %v6490_v11 = vrot.slane %v6488_v49, 6  ;;  %v15580_v30 = vshll.u32 %v12814_v2, 16  ;;  %v1680_v38 = vld [vmem:[%s12162_s9 + $0x8c] sm:$0x3] }
 0x155   : > { %v1908_v37 = vrot.slane %v1906_v5, 4  ;;  %v1916_v19 = vor.u32 %v1915_v17, %v1912_v1  ;;  %v6499_v43 = vshrl.u32 %v10091_v62, 16  ;;  %v6502_v34 = vshll.u32 %v10091_v62, 16  ;;  %11075 = vmatmul.mubr.msk.bf16.gmra.mrb[20].mxu0 %vm695_vm1, %v10108_v63 }
 0x156   : > { %v6494_v45 = vrot.slane %v15580_v30, 6  ;;  %v1907_v55 = vsel %vm13317_vm10, %v1903_v15, %v1906_v5  ;;  %v6491_v3 = vor.u32 %v6490_v11, %v6487_v21  ;;  %v1919_v41 = vshrl.u32 %v11899_v35, 16  ;;  %v15586_v30 = vld [vmem:[#allocation23_spill] sm:$0xff] }
 0x157   : > { %v1922_v10 = vshll.u32 %v11899_v35, 16  ;;  %v1917_v61 = vsel %vm13317_vm10, %v1908_v37, %v1916_v19  ;;  %v6501_v18 = vrot.slane %v6499_v43, 5  ;;  %v6504_v25 = vrot.slane %v6502_v34, 6 }
 0x158   : > { %v6495_v47 = vor.u32 %v6494_v45, %v6493_v33  ;;  %v9570_v2 = vcombine.low %v1907_v55, %v1917_v61  ;;  %v6492_v40 = vrot.slane %v6491_v3, 4  ;;  %v1921_v56 = vrot.slane %v1919_v41, 5  ;;  %v11901_v33 = vld [vmem:[%s12162_s9 + $0x84] sm:$0xe] }
 0x159   : > { %v1924_v16 = vrot.slane %v1922_v10, 6  ;;  %v6505_v29 = vor.u32 %v6504_v25, %v6501_v18  ;;  %v15582_v20 = vshrl.u32 %v15581_v28, 16  ;;  %v15583_v9 = vshll.u32 %v15581_v28, 16 }
 0x15a   : > { %v6497_v23 = vrot.slane %v6495_v47, 4  ;;  %10799 = vmatmul.mubr.msk.bf16.gmra.mrb[16].mxu1 %vm695_vm1, %v9570_v2  ;;  %v6496_v26 = vsel %vm13317_vm10, %v6492_v40, %v6495_v47  ;;  %v1933_v54 = vshrl.u32 %v1679_v22, 16  ;;  %v1936_v52 = vshll.u32 %v1679_v22, 16  ;;  %v11902_v2 = vld [vmem:[%s12162_s9 + $0xc0] sm:$0xe] }
 0x15b   : > { %v1927_v6 = vrot.slane %v15582_v20, 5  ;;  %v1928_v44 = vrot.slane %v15583_v9, 6  ;;  %v1925_v4 = vor.u32 %v1924_v16, %v1921_v56  ;;  %v6508_v46 = vshrl.u32 %v11900_v0, 16 }
 0x15c   : > { %v6506_v39 = vsel %vm13317_vm10, %v6497_v23, %v6505_v29  ;;  %v6511_v8 = vshll.u32 %v11900_v0, 16  ;;  %v1935_v58 = vrot.slane %v1933_v54, 5  ;;  %v1938_v59 = vrot.slane %v1936_v52, 6  ;;  %v10093_v29 = vld [vmem:[%s12162_s9 + $0xc8] sm:$0x3] }
 0x15d   : > { %v1929_v36 = vor.u32 %v1928_v44, %v1927_v6  ;;  %v10109_v48 = vcombine.low %v6496_v26, %v6506_v39  ;;  %v1926_v60 = vrot.slane %v1925_v4, 4  ;;  %v6510_v27 = vrot.slane %v6508_v46, 5 }
 0x15e   : > { %v6513_v7 = vrot.slane %v6511_v8, 6  ;;  %v15584_v57 = vshrl.u32 %v12835_v50, 16  ;;  %v1939_v1 = vor.u32 %v1938_v59, %v1935_v58  ;;  %v15585_v62 = vshll.u32 %v12835_v50, 16  ;;  %v11903_v58 = vld [vmem:[%s12162_s9 + $0x90] sm:$0xe] }
 0x15f   : > { %v1931_v51 = vrot.slane %v1929_v36, 4  ;;  %11078 = vmatprep.mubr.msk.bf16.mxu0 %vm695_vm1, %v10109_v48  ;;  %v1930_v5 = vsel %vm13317_vm10, %v1926_v60, %v1929_v36  ;;  %v6522_v14 = vshrl.u32 %v10092_v31, 16  ;;  %v6525_v21 = vshll.u32 %v10092_v31, 16 }
 0x160   : > { %v6516_v42 = vrot.slane %v15584_v57, 5  ;;  %v6517_v49 = vrot.slane %v15585_v62, 6  ;;  %v6514_v17 = vor.u32 %v6513_v7, %v6510_v27  ;;  %v1942_v63 = vshrl.u32 %v11901_v33, 16 }
 0x161   : > { %v1945_v15 = vshll.u32 %v11901_v33, 16  ;;  %v1940_v37 = vsel %vm13317_vm10, %v1931_v51, %v1939_v1  ;;  %v6524_v19 = vrot.slane %v6522_v14, 5  ;;  %v15587_v45 = vshrl.u32 %v15586_v30, 16 }
 0x162   : > { %v6518_v11 = vor.u32 %v6517_v49, %v6516_v42  ;;  %v9571_v34 = vcombine.low %v1930_v5, %v1940_v37  ;;  %v6515_v55 = vrot.slane %v6514_v17, 4  ;;  %v6527_v50 = vrot.slane %v6525_v21, 6  ;;  %v1681_v5 = vld [vmem:[%s12162_s9 + $0x98] sm:$0x3]  ;;  %v15591_v21 = vld [vmem:[#allocation24_spill] sm:$0xff] }
 0x163   : > { %v1950_v43 = vrot.slane %v15587_v45, 5  ;;  %v1944_v3 = vrot.slane %v1942_v63, 5  ;;  %v1947_v41 = vrot.slane %v1945_v15, 6  ;;  %v15588_v10 = vshll.u32 %v15586_v30, 16 }
 0x164   : > { %v6520_v35 = vrot.slane %v6518_v11, 4  ;;  %v1956_v47 = vshrl.u32 %v1680_v38, 16  ;;  %10802 = vmatprep.mubr.msk.bf16.mxu1 %vm695_vm1, %v9571_v34  ;;  %v6519_v18 = vsel %vm13317_vm10, %v6515_v55, %v6518_v11  ;;  %v6528_v25 = vor.u32 %v6527_v50, %v6524_v19  ;;  %v10094_v34 = vld [vmem:[%s12162_s9 + $0xd4] sm:$0x3]  ;;  %v11904_v55 = vld [vmem:[%s12162_s9 + $0xcc] sm:$0xe] }
 0x165   : > { %v1951_v61 = vrot.slane %v15588_v10, 6  ;;  %v1959_v22 = vshll.u32 %v1680_v38, 16  ;;  %v6531_v40 = vshrl.u32 %v11902_v2, 16  ;;  %v1948_v56 = vor.u32 %v1947_v41, %v1944_v3 }
 0x166   : > { %v1958_v23 = vrot.slane %v1956_v47, 5  ;;  %v6534_v28 = vshll.u32 %v11902_v2, 16  ;;  %v6529_v20 = vsel %vm13317_vm10, %v6520_v35, %v6528_v25  ;;  %v15589_v44 = vshrl.u32 %v12860_v13, 16 }
 0x167   : > { %v1952_v16 = vor.u32 %v1951_v61, %v1950_v43  ;;  %v1961_v6 = vrot.slane %v1959_v22, 6  ;;  %v6533_v9 = vrot.slane %v6531_v40, 5  ;;  %v10110_v4 = vcombine.low %v6519_v18, %v6529_v20 }
 0x168   : > { %v6539_v26 = vrot.slane %v15589_v44, 5  ;;  %v1949_v54 = vrot.slane %v1948_v56, 4  ;;  %v6536_v39 = vrot.slane %v6534_v28, 6  ;;  %v15590_v31 = vshll.u32 %v12860_v13, 16 }
 0x169   : > { %v1954_v52 = vrot.slane %v1952_v16, 4  ;;  %v1962_v36 = vor.u32 %v1961_v6, %v1958_v23  ;;  %v6545_v46 = vshrl.u32 %v10093_v29, 16  ;;  %v6548_v8 = vshll.u32 %v10093_v29, 16  ;;  %11079 = vmatmul.mubr.msk.bf16.gmra.mrb[24].mxu0 %vm695_vm1, %v10110_v4  ;;  %v1682_v6 = vld [vmem:[%s12162_s9 + $0xa4] sm:$0x3] }
 0x16a   : > { %v6540_v0 = vrot.slane %v15590_v31, 6  ;;  %v1953_v48 = vsel %vm13317_vm10, %v1949_v54, %v1952_v16  ;;  %v6537_v60 = vor.u32 %v6536_v39, %v6533_v9  ;;  %v1965_v59 = vshrl.u32 %v11903_v58, 16  ;;  %v11905_v9 = vld [vmem:[%s12162_s9 + $0x9c] sm:$0xe]  ;;  %v15596_v39 = vld [vmem:[#allocation25_spill] sm:$0xff] }
 0x16b   : > { %v1968_v51 = vshll.u32 %v11903_v58, 16  ;;  %v1963_v27 = vsel %vm13317_vm10, %v1954_v52, %v1962_v36  ;;  %v6547_v57 = vrot.slane %v6545_v46, 5  ;;  %v6550_v42 = vrot.slane %v6548_v8, 6 }
 0x16c   : > { %v6541_v7 = vor.u32 %v6540_v0, %v6539_v26  ;;  %v9572_v13 = vcombine.low %v1953_v48, %v1963_v27  ;;  %v6538_v1 = vrot.slane %v6537_v60, 4  ;;  %v1967_v62 = vrot.slane %v1965_v59, 5 }
 0x16d   : > { %v1970_v49 = vrot.slane %v1968_v51, 6  ;;  %v6551_v17 = vor.u32 %v6550_v42, %v6547_v57  ;;  %v15592_v38 = vshrl.u32 %v15591_v21, 16  ;;  %v15593_v63 = vshll.u32 %v15591_v21, 16  ;;  %v11906_v42 = vld [vmem:[%s12162_s9 + $0xa8] sm:$0xe] }
 0x16e   : > { %v6543_v14 = vrot.slane %v6541_v7, 4  ;;  %10803 = vmatmul.mubr.msk.bf16.gmra.mrb[20].mxu1 %vm695_vm1, %v9572_v13  ;;  %v6542_v37 = vsel %vm13317_vm10, %v6538_v1, %v6541_v7  ;;  %v1979_v19 = vshrl.u32 %v1681_v5, 16  ;;  %v1982_v30 = vshll.u32 %v1681_v5, 16 }
 0x16f   : > { %v1973_v33 = vrot.slane %v15592_v38, 5  ;;  %v1974_v15 = vrot.slane %v15593_v63, 6  ;;  %v1971_v11 = vor.u32 %v1970_v49, %v1967_v62  ;;  %v6554_v50 = vshrl.u32 %v11904_v55, 16  ;;  %v1683_v49 = vld [vmem:[%s12162_s9 + $0xb0] sm:$0x3]  ;;  %v11823_v38 = vld [vmem:[%s12162_s9 + $0x24] sm:$0xff]  }
 0x170   : > { %v6552_v45 = vsel %vm13317_vm10, %v6543_v14, %v6551_v17  ;;  %v6557_v3 = vshll.u32 %v11904_v55, 16  ;;  %v1981_v10 = vrot.slane %v1979_v19, 5  ;;  %v1984_v61 = vrot.slane %v1982_v30, 6  ;;  %v15599_v63 = vld [vmem:[#allocation26_spill] sm:$0xff] }
 0x171   : > { %v1975_v43 = vor.u32 %v1974_v15, %v1973_v33  ;;  %v10111_v35 = vcombine.low %v6542_v37, %v6552_v45  ;;  %v1972_v41 = vrot.slane %v1971_v11, 4  ;;  %v6556_v18 = vrot.slane %v6554_v50, 5 }
 0x172   : > { %v6559_v25 = vrot.slane %v6557_v3, 6  ;;  %v15594_v22 = vshrl.u32 %v12882_v24, 16  ;;  %v1985_v56 = vor.u32 %v1984_v61, %v1981_v10  ;;  %v15595_v16 = vshll.u32 %v12882_v24, 16  ;;  %v11907_v10 = vld [vmem:[%s12162_s9 + $0xb4] sm:$0xe] }
 0x173   : > { %v1977_v47 = vrot.slane %v1975_v43, 4  ;;  %11082 = vmatprep.mubr.msk.bf16.mxu0 %vm695_vm1, %v10111_v35  ;;  %v1976_v40 = vsel %vm13317_vm10, %v1972_v41, %v1975_v43  ;;  %v6568_v29 = vshrl.u32 %v10094_v34, 16  ;;  %v6571_v20 = vshll.u32 %v10094_v34, 16 }
 0x174   : > { %v6562_v2 = vrot.slane %v15594_v22, 5  ;;  %v6563_v23 = vrot.slane %v15595_v16, 6  ;;  %v6560_v28 = vor.u32 %v6559_v25, %v6556_v18  ;;  %v1988_v44 = vshrl.u32 %v11905_v9, 16 }
 0x175   : > { %v1991_v26 = vshll.u32 %v11905_v9, 16  ;;  %v1986_v4 = vsel %vm13317_vm10, %v1977_v47, %v1985_v56  ;;  %v6570_v52 = vrot.slane %v6568_v29, 5  ;;  %v15597_v36 = vshrl.u32 %v15596_v39, 16  ;;  %v15602_v9 = vld [vmem:[#allocation27_spill] sm:$0xff] }
 0x176   : > { %v6564_v54 = vor.u32 %v6563_v23, %v6562_v2  ;;  %v9573_v0 = vcombine.low %v1976_v40, %v1986_v4  ;;  %v6561_v46 = vrot.slane %v6560_v28, 4  ;;  %v6573_v24 = vrot.slane %v6571_v20, 6  ;;  %v1684_v40 = vld [vmem:[%s12162_s9 + $0xbc] sm:$0x3] }
 0x177   : > { %v1996_v31 = vrot.slane %v15597_v36, 5  ;;  %v1990_v8 = vrot.slane %v1988_v44, 5  ;;  %v1993_v60 = vrot.slane %v1991_v26, 6  ;;  %v15598_v58 = vshll.u32 %v15596_v39, 16 }
 0x178   : > { %v6566_v48 = vrot.slane %v6564_v54, 4  ;;  %v2002_v51 = vshrl.u32 %v1682_v6, 16  ;;  %10806 = vmatprep.mubr.msk.bf16.mxu1 %vm695_vm1, %v9573_v0  ;;  %v6565_v27 = vsel %vm13317_vm10, %v6561_v46, %v6564_v54  ;;  %v6574_v7 = vor.u32 %v6573_v24, %v6570_v52  ;;  %v11825_v52 = vld [vmem:[%s12162_s9 + $0x3c] sm:$0xff]   ;;  %v10197_v46 = vld [vmem:[%s12162_s9 + $0x24] sm:$0xf] }
 0x179   : > { %v1997_v59 = vrot.slane %v15598_v58, 6  ;;  %v2005_v57 = vshll.u32 %v1682_v6, 16  ;;  %v2011_v5 = vshrl.u32 %v11906_v42, 16  ;;  %v1994_v13 = vor.u32 %v1993_v60, %v1990_v8  ;;  %v11824_v6 = vld [vmem:[%s12162_s9 + $0x30] sm:$0xff]   ;;  %v13712_v24 = vld [vmem:[%s12162_s9 + $0x28] sm:$0xf] }
 0x17a   : > { %v2004_v62 = vrot.slane %v2002_v51, 5  ;;  %v2014_v14 = vshll.u32 %v11906_v42, 16  ;;  %v6575_v17 = vsel %vm13317_vm10, %v6566_v48, %v6574_v7  ;;  %v15600_v15 = vshrl.u32 %v15599_v63, 16  ;;  %v11908_v58 = vld [vmem:[%s15259_s1 + $0x68] sm:$0x3f]  }
 0x17b   : > { %v1998_v1 = vor.u32 %v1997_v59, %v1996_v31  ;;  %v2007_v21 = vrot.slane %v2005_v57, 6  ;;  %v2013_v33 = vrot.slane %v2011_v5, 5  ;;  %v10112_v11 = vcombine.low %v6565_v27, %v6575_v17  ;;  %v10199_v51 = vld [vmem:[%s12162_s9 + $0x2c] sm:$0x1]  ;;  %v10200_v27 = vld [vmem:[%s12162_s9 + $0x30] sm:$0xf] }
 0x17c   : > { %v2019_v37 = vrot.slane %v15600_v15, 5  ;;  %v1995_v19 = vrot.slane %v1994_v13, 4  ;;  %v2016_v45 = vrot.slane %v2014_v14, 6  ;;  %v15601_v34 = vshll.u32 %v15599_v63, 16  ;;  %v13729_v13 = vld [vmem:[%s15259_s1 + $0x70] sm:$0x3f]  }
 0x17d   : > { %v2000_v30 = vrot.slane %v1998_v1, 4  ;;  %v2008_v43 = vor.u32 %v2007_v21, %v2004_v62  ;;  %v2025_v50 = vshrl.u32 %v1683_v49, 16  ;;  %v2028_v3 = vshll.u32 %v1683_v49, 16  ;;  %11083 = vmatmul.mubr.msk.bf16.gmra.mrb[28].mxu0 %vm695_vm1, %v10112_v11  ;;  %v10202_v11 = vld [vmem:[%s12162_s9 + $0x38] sm:$0x1] }
 0x17e   : > { %v2020_v55 = vrot.slane %v15601_v34, 6  ;;  %v1999_v35 = vsel %vm13317_vm10, %v1995_v19, %v1998_v1  ;;  %v2017_v41 = vor.u32 %v2016_v45, %v2013_v33  ;;  %v2034_v61 = vshrl.u32 %v11907_v10, 16  ;;  %11088 = vmatprep.mubr.msk.bf16.mxu0 %vm695_vm1, %v11823_v38  ;;  %v13738_v33 = vld [vmem:[%s12162_s9 + $0x34] sm:$0xf]  ;;  %v11826_v45 = vld [vmem:[%s12162_s9 + $0xc] sm:$0xff]  }
 0x17f   : > { %v2037_v47 = vshll.u32 %v11907_v10, 16  ;;  %v2009_v18 = vsel %vm13317_vm10, %v2000_v30, %v2008_v43  ;;  %v2027_v22 = vrot.slane %v2025_v50, 5  ;;  %v2030_v2 = vrot.slane %v2028_v3, 6  ;;  %v10203_v50 = vld [vmem:[%s12162_s9 + $0x3c] sm:$0xf] }
 0x180   : > { %v2021_v25 = vor.u32 %v2020_v55, %v2019_v37  ;;  %v9574_v56 = vcombine.low %v1999_v35, %v2009_v18  ;;  %v2018_v16 = vrot.slane %v2017_v41, 4  ;;  %v2036_v23 = vrot.slane %v2034_v61, 5  ;;  %v11828_v61 = vld [vmem:[%s12162_s9 + $0x48] sm:$0xff]  }
 0x181   : > { %v2039_v29 = vrot.slane %v2037_v47, 6  ;;  %v2031_v20 = vor.u32 %v2030_v2, %v2027_v22  ;;  %v15603_v44 = vshrl.u32 %v15602_v9, 16  ;;  %v15604_v4 = vshll.u32 %v15602_v9, 16  ;;  %v13756_v2 = vld [vmem:[%s12162_s9 + $0x40] sm:$0xf] }
 0x182   : > { %v2023_v28 = vrot.slane %v2021_v25, 4  ;;  %10807 = vmatmul.mubr.msk.bf16.gmra.mrb[24].mxu1 %vm695_vm1, %v9574_v56  ;;  %v2022_v39 = vsel %vm13317_vm10, %v2018_v16, %v2021_v25  ;;  %v2048_v31 = vshrl.u32 %v1684_v40, 16  ;;  %v2051_v0 = vshll.u32 %v1684_v40, 16  ;;  %15605 = vst [vmem:[#allocation28_spill] sm:$0xff] %v13756_v2  ;;  %v11831_v40 = vld [vmem:[%s12162_s9 + $0x54] sm:$0xff]  }
 0x183   : > { %v2042_v26 = vrot.slane %v15603_v44, 5  ;;  %v2043_v54 = vrot.slane %v15604_v4, 6  ;;  %v2040_v36 = vor.u32 %v2039_v29, %v2036_v23  ;;  %v13718_v60 = vsel %vm744_vm0, %v13424_v32, 0  ;;  %v10205_v44 = vld [vmem:[%s12162_s9 + $0x44] sm:$0x1] }
 0x184   : > { %v2032_v8 = vsel %vm13317_vm10, %v2023_v28, %v2031_v20  ;;  %v7781_v59 = vsel %vm744_vm0, %v11908_v58, 0  ;;  %v2050_v42 = vrot.slane %v2048_v31, 5  ;;  %v2053_v5 = vrot.slane %v2051_v0, 6  ;;  %v11830_v58 = vld [vmem:[%s12162_s9 + $0x18] sm:$0xff]  }
 0x185   : > { %v2044_v48 = vor.u32 %v2043_v54, %v2042_v26  ;;  %v9575_v7 = vcombine.low %v2022_v39, %v2032_v8  ;;  %v2041_v57 = vrot.slane %v2040_v36, 4  ;;  %v7293_v1 = vshrl.u32 %v10197_v46, 16  ;;  %11089 = vmatmul.mubr.msk.bf16.vlgmr.msra.gmra.mrb[0].mxu0 %vm695_vm1, %v11824_v6  ;;  %v9661_v36 = vld [vmem:[%s12162_s9 + $0xc] sm:$0xf] }
 0x186   : > { %v7296_v62 = vshll.u32 %v10197_v46, 16  ;;  %v15413_v49 = vshll.u32 %v13712_v24, 16  ;;  %v2054_v17 = vor.u32 %v2053_v5, %v2050_v42  ;;  %v15416_v21 = vshrl.u32 %v13712_v24, 16  ;;  %11092 = vmatprep.mubr.msk.bf16.mxu0 %vm695_vm1, %v11825_v52  ;;  %11121 = vmatpush3.bf16.msra.mxu0 %v7781_v59  ;;  %v11832_v42 = vld [vmem:[%s12162_s9 + $0x24] sm:$0xff]  }
 0x187   : > { %v2046_v32 = vrot.slane %v2044_v48, 4  ;;  %10810 = vmatprep.mubr.msk.bf16.mxu1 %vm695_vm1, %v9575_v7  ;;  %v2045_v14 = vsel %vm13317_vm10, %v2041_v57, %v2044_v48  ;;  %v7312_v38 = vshll.u32 %v10199_v51, 16  ;;  %v7295_v63 = vrot.slane %v7293_v1, 4  ;;  %11716 = vmatprep.subr.msk.bf16.mxu0 %vm744_vm0, %v13729_v13  ;;  %v13775_v48 = vld [vmem:[%s12162_s9 + $0x10] sm:$0xf] }
 0x188   : > { %v7298_v15 = vrot.slane %v7296_v62, 5  ;;  %v7304_v37 = vrot.slane %v15413_v49, 5  ;;  %v7317_v19 = vshrl.u32 %v10200_v27, 16  ;;  %v7308_v43 = vrot.slane %v15416_v21, 4  ;;  %15607 = vst [vmem:[#allocation29_spill] sm:$0xff] %v13775_v48 }
 0x189   : > { %v2055_v30 = vsel %vm13317_vm10, %v2046_v32, %v2054_v17  ;;  %v7314_v34 = vrot.slane %v7312_v38, 5  ;;  %v7320_v55 = vshll.u32 %v10200_v27, 16  ;;  %v15407_v10 = vshll.u32 %v13738_v33, 16  ;;  %v10206_v57 = vld [vmem:[%s12162_s9 + $0x48] sm:$0xf] }
 0x18a   : > { %v9576_v3 = vcombine.low %v2045_v14, %v2055_v30  ;;  %v7299_v35 = vor.u32 %v7298_v15, %v7295_v63  ;;  %v7319_v41 = vrot.slane %v7317_v19, 4  ;;  %v7309_v47 = vor.u32 %v7308_v43, %v7304_v37  ;;  %v9663_v62 = vld [vmem:[%s12162_s9 + $0x14] sm:$0x1]  ;;  %v9694_v49 = vld [vmem:[%s12162_s9 + $0x90] sm:$0xf] }
 0x18b   : > { %v7322_v18 = vrot.slane %v7320_v55, 5  ;;  %v15409_v25 = vshrl.u32 %v13738_v33, 16  ;;  %v7336_v22 = vshll.u32 %v10202_v11, 16  ;;  %v7328_v16 = vrot.slane %v15407_v10, 5  ;;  %v11833_v11 = vld [vmem:[%s12162_s9 + $0x60] sm:$0xff]   ;;  %v11835_v55 = vld [vmem:[%s12162_s9 + $0x6c] sm:$0xff]  }
 0x18c   : > { %10811 = vmatmul.mubr.msk.bf16.gmra.mrb[28].mxu1 %vm695_vm1, %v9576_v3  ;;  %v7300_v56 = vrot.slane %v7299_v35, 4  ;;  %v7341_v23 = vshrl.u32 %v10203_v50, 16  ;;  %v7344_v29 = vshll.u32 %v10203_v50, 16  ;;  %v7310_v28 = vrot.slane %v7309_v47, 4  ;;  %v14247_v10 = vld [vmem:[%s12162_s9 + $0x88] sm:$0xf] }
 0x18d   : > { %10816 = vmatprep.mubr.msk.bf16.mxu1 %vm695_vm1, %v11826_v45  ;;  %v7323_v20 = vor.u32 %v7322_v18, %v7319_v41  ;;  %v7332_v6 = vrot.slane %v15409_v25, 4  ;;  %v7338_v9 = vrot.slane %v7336_v22, 5  ;;  %v15401_v39 = vshll.u32 %v13756_v2, 16  ;;  %11093 = vmatmul.mubr.msk.bf16.gmra.mrb[4].mxu0 %vm695_vm1, %v11828_v61  ;;  %v10208_v22 = vld [vmem:[%s12162_s9 + $0x50] sm:$0x1] }
 0x18e   : > { %v7305_v4 = vsel %vm12216_vm4, %v7300_v56, %v7304_v37  ;;  %v7343_v54 = vrot.slane %v7341_v23, 4  ;;  %v7346_v52 = vrot.slane %v7344_v29, 5  ;;  %v7315_v31 = vsel %vm12216_vm4, %v7310_v28, %v7314_v34  ;;  %11096 = vmatprep.mubr.msk.bf16.mxu0 %vm695_vm1, %v11831_v40  ;;  %v13794_v37 = vld [vmem:[%s15259_s1 + $0x30] sm:$0x3f]   ;;  %v13801_v34 = vld [vmem:[%s12162_s9 + $0x4c] sm:$0xf] }
 0x18f   : > { %v7324_v0 = vrot.slane %v7323_v20, 4  ;;  %v7333_v46 = vor.u32 %v7332_v6, %v7328_v16  ;;  %v15404_v8 = vshrl.u32 %v13756_v2, 16  ;;  %v13779_v59 = vcombine.low %v7305_v4, %v7315_v31  ;;  %15608 = vst [vmem:[#allocation9_spill] sm:$0xff] %v13801_v34  ;;  %v9664_v29 = vld [vmem:[%s12162_s9 + $0x18] sm:$0xf]  ;;  %v11834_v4 = vld [vmem:[%s12162_s9 + $0x30] sm:$0xff]  }
 0x190   : > { %v7347_v51 = vor.u32 %v7346_v52, %v7343_v54  ;;  %v7352_v27 = vrot.slane %v15401_v39, 5  ;;  %v7360_v7 = vshll.u32 %v10205_v44, 16  ;;  %v2773_v14 = vshrl.u32 %v9661_v36, 16  ;;  %v13825_v44 = vld [vmem:[%s12162_s9 + $0x1c] sm:$0xf]  ;;  %v15639_v12 = vld [vmem:[#allocation29_spill] sm:$0xff] }
 0x191   : > { %v7329_v5 = vsel %vm12216_vm4, %v7324_v0, %v7328_v16  ;;  %v7334_v32 = vrot.slane %v7333_v46, 4  ;;  %v7356_v1 = vrot.slane %v15404_v8, 4  ;;  %v2776_v63 = vshll.u32 %v9661_v36, 16  ;;  %15609 = vst [vmem:[#allocation10_spill] sm:$0xff] %v13825_v44  ;;  %v11836_v0 = vld [vmem:[%s12162_s9 + $0x3c] sm:$0xff]  }
 0x192   : > { %v7348_v17 = vrot.slane %v7347_v51, 4  ;;  %v7362_v38 = vrot.slane %v7360_v7, 5  ;;  %v15387_v15 = vshll.u32 %v13775_v48, 16  ;;  %v2775_v45 = vrot.slane %v2773_v14, 4  ;;  %v14204_v39 = vld [vmem:[%s12162_s9 + $0x7c] sm:$0xf] }
 0x193   : > { %v7339_v19 = vsel %vm12216_vm4, %v7334_v32, %v7338_v9  ;;  %v7357_v30 = vor.u32 %v7356_v1, %v7352_v27  ;;  %v15395_v43 = vshrl.u32 %v13775_v48, 16  ;;  %v2778_v35 = vrot.slane %v2776_v63, 5  ;;  %v11837_v1 = vld [vmem:[%s12162_s9 + $0x78] sm:$0xff]   ;;  %v10209_v63 = vld [vmem:[%s12162_s9 + $0x54] sm:$0xf] }
 0x194   : > { %10817 = vmatmul.mubr.msk.bf16.vlgmr.msra.gmra.mrb[0].mxu1 %vm695_vm1, %v11830_v58  ;;  %v13805_v50 = vcombine.low %v7329_v5, %v7339_v19  ;;  %v7353_v3 = vsel %vm12216_vm4, %v7348_v17, %v7352_v27  ;;  %v2784_v41 = vrot.slane %v15387_v15, 5  ;;  %v2792_v18 = vshll.u32 %v9663_v62, 16  ;;  %v9681_v15 = vld [vmem:[%s12162_s9 + $0x5c] sm:$0x1]  ;;  %v14465_v48 = vld [vmem:[%s12162_s9 + $0x48] sm:$0xe] }
 0x195   : > { %10849 = vmatpush3.bf16.msra.mxu1 %v13718_v60  ;;  %10820 = vmatprep.mubr.msk.bf16.mxu1 %vm695_vm1, %v11832_v42  ;;  %v7358_v61 = vrot.slane %v7357_v30, 4  ;;  %v2788_v47 = vrot.slane %v15395_v43, 4  ;;  %v7365_v40 = vshrl.u32 %v10206_v57, 16  ;;  %v2779_v56 = vor.u32 %v2778_v35, %v2775_v45  ;;  %v9666_v42 = vld [vmem:[%s12162_s9 + $0x20] sm:$0x1] }
 0x196   : > { %11708 = vmatprep.subr.msk.bf16.mxu1 %vm744_vm0, %v13794_v37  ;;  %v7368_v16 = vshll.u32 %v10206_v57, 16  ;;  %v15384_v23 = vshll.u32 %v13801_v34, 16  ;;  %v15386_v60 = vshrl.u32 %v13801_v34, 16  ;;  %11097 = vmatmul.mubr.msk.bf16.gmra.mrb[8].mxu0 %vm695_vm1, %v11833_v11  ;;  %v2794_v6 = vrot.slane %v2792_v18, 5  ;;  %v11839_v11 = vld [vmem:[%s12162_s9 + $0x84] sm:$0xff]  }
 0x197   : > { %v7363_v28 = vsel %vm12216_vm4, %v7358_v61, %v7362_v38  ;;  %v2789_v20 = vor.u32 %v2788_v47, %v2784_v41  ;;  %v7367_v9 = vrot.slane %v7365_v40, 4  ;;  %11100 = vmatprep.mubr.msk.bf16.mxu0 %vm695_vm1, %v11835_v55  ;;  %v2780_v52 = vrot.slane %v2779_v56, 4  ;;  %v13857_v47 = vld [vmem:[%s12162_s9 + $0x58] sm:$0xf]  ;;  %v10211_v56 = vld [vmem:[%s12162_s9 + $0x5c] sm:$0x1] }
 0x198   : > { %v13829_v54 = vcombine.low %v7353_v3, %v7363_v28  ;;  %v7370_v36 = vrot.slane %v7368_v16, 5  ;;  %v7376_v31 = vrot.slane %v15384_v23, 5  ;;  %v7380_v58 = vrot.slane %v15386_v60, 4  ;;  %15610 = vst [vmem:[#allocation14_spill] sm:$0xff] %v13857_v47  ;;  %v14456_v34 = vld [vmem:[%s12162_s9 + $0xc] sm:$0xe] }
 0x199   : > { %v2790_v46 = vrot.slane %v2789_v20, 4  ;;  %v7384_v51 = vshll.u32 %v10208_v22, 16  ;;  %v2797_v27 = vshrl.u32 %v9664_v29, 16  ;;  %v2785_v7 = vsel %vm12216_vm4, %v2780_v52, %v2784_v41  ;;  %15622 = vst [vmem:[#allocation21_spill] sm:$0xff] %v14456_v34  ;;  %v11913_v2 = vld [vmem:[%s12162_s9 + $0x40] sm:$0xf] }
 0x19a   : > { %v7371_v57 = vor.u32 %v7370_v36, %v7367_v9  ;;  %v2800_v5 = vshll.u32 %v9664_v29, 16  ;;  %v15378_v32 = vshll.u32 %v13825_v44, 16  ;;  %v7381_v14 = vor.u32 %v7380_v58, %v7376_v31  ;;  %v11838_v9 = vld [vmem:[%s12162_s9 + $0x48] sm:$0xff]  }
 0x19b   : > { %v2795_v62 = vsel %vm12216_vm4, %v2790_v46, %v2794_v6  ;;  %v7386_v17 = vrot.slane %v7384_v51, 5  ;;  %v2799_v38 = vrot.slane %v2797_v27, 4  ;;  %v15382_v35 = vshrl.u32 %v13825_v44, 16  ;;  %v9667_v6 = vld [vmem:[%s12162_s9 + $0x24] sm:$0xf] }
 0x19c   : > { %10821 = vmatmul.mubr.msk.bf16.gmra.mrb[4].mxu1 %vm695_vm1, %v11834_v4  ;;  %v13846_v19 = vcombine.low %v2785_v7, %v2795_v62  ;;  %v7372_v30 = vrot.slane %v7371_v57, 4  ;;  %v2802_v45 = vrot.slane %v2800_v5, 5  ;;  %v2808_v55 = vrot.slane %v15378_v32, 5  ;;  %v13880_v27 = vld [vmem:[%s12162_s9 + $0x28] sm:$0xf]  ;;  %v11841_v62 = vld [vmem:[%s12162_s9 + $0x90] sm:$0xff]  }
 0x19d   : > { %10824 = vmatprep.mubr.msk.bf16.mxu1 %vm695_vm1, %v11836_v0  ;;  %v7382_v3 = vrot.slane %v7381_v14, 4  ;;  %v2816_v41 = vshll.u32 %v9666_v42, 16  ;;  %v13854_v61 = vsel %vm744_vm0, %v13794_v37, 0  ;;  %v13863_v40 = vsel %vm744_vm0, %v13729_v13, 0  ;;  %15611 = vst [vmem:[#allocation13_spill] sm:$0xff] %v13880_v27  ;;  %v11843_v14 = vld [vmem:[%s12162_s9 + $0x9c] sm:$0xff]  }
 0x19e   : > { %v7377_v18 = vsel %vm12216_vm4, %v7372_v30, %v7376_v31  ;;  %v2803_v22 = vor.u32 %v2802_v45, %v2799_v38  ;;  %v7389_v16 = vshrl.u32 %v10209_v63, 16  ;;  %11101 = vmatmul.mubr.msk.bf16.gmra.mrb[12].mxu0 %vm695_vm1, %v11837_v1  ;;  %v2812_v37 = vrot.slane %v15382_v35, 4  ;;  %v11840_v31 = vld [vmem:[%s12162_s9 + $0x54] sm:$0xff]   ;;  %v9669_v42 = vld [vmem:[%s12162_s9 + $0x2c] sm:$0x1] }
 0x19f   : > { %v7387_v29 = vsel %vm12216_vm4, %v7382_v3, %v7386_v17  ;;  %v2818_v28 = vrot.slane %v2816_v41, 5  ;;  %v7392_v20 = vshll.u32 %v10209_v63, 16  ;;  %11104 = vmatprep.mubr.msk.bf16.mxu0 %vm695_vm1, %v11839_v11  ;;  %v15376_v36 = vshll.u32 %v13857_v47, 16  ;;  %v10212_v41 = vld [vmem:[%s12162_s9 + $0x60] sm:$0xf] }
 0x1a0   : > { %v13874_v13 = vcombine.low %v7377_v18, %v7387_v29  ;;  %v2804_v4 = vrot.slane %v2803_v22, 4  ;;  %v7391_v52 = vrot.slane %v7389_v16, 4  ;;  %v2813_v0 = vor.u32 %v2812_v37, %v2808_v55  ;;  %v13899_v29 = vld [vmem:[%s12162_s9 + $0x64] sm:$0xf]  ;;  %v11911_v44 = vld [vmem:[%s12162_s9 + $0x34] sm:$0xf] }
 0x1a1   : > { %v7394_v46 = vrot.slane %v7392_v20, 5  ;;  %v15377_v58 = vshrl.u32 %v13857_v47, 16  ;;  %v7408_v51 = vshll.u32 %v10211_v56, 16  ;;  %v7400_v57 = vrot.slane %v15376_v36, 5  ;;  %15612 = vst [vmem:[#allocation15_spill] sm:$0xff] %v13899_v29 }
 0x1a2   : > { %v2809_v7 = vsel %vm12216_vm4, %v2804_v4, %v2808_v55  ;;  %v2821_v5 = vshrl.u32 %v9667_v6, 16  ;;  %v2824_v1 = vshll.u32 %v9667_v6, 16  ;;  %v2814_v17 = vrot.slane %v2813_v0, 4  ;;  %v10214_v4 = vld [vmem:[%s12162_s9 + $0x68] sm:$0x1] }
 0x1a3   : > { %v7395_v38 = vor.u32 %v7394_v46, %v7391_v52  ;;  %v7404_v63 = vrot.slane %v15377_v58, 4  ;;  %v7410_v11 = vrot.slane %v7408_v51, 5  ;;  %v15371_v55 = vshll.u32 %v13880_v27, 16  ;;  %v11842_v46 = vld [vmem:[%s12162_s9 + $0x60] sm:$0xff]  }
 0x1a4   : > { %10825 = vmatmul.mubr.msk.bf16.gmra.mrb[8].mxu1 %vm695_vm1, %v11838_v9  ;;  %v2823_v30 = vrot.slane %v2821_v5, 4  ;;  %v2826_v45 = vrot.slane %v2824_v1, 5  ;;  %v15372_v3 = vshrl.u32 %v13880_v27, 16  ;;  %v2819_v18 = vsel %vm12216_vm4, %v2814_v17, %v2818_v28  ;;  %v9670_v1 = vld [vmem:[%s12162_s9 + $0x30] sm:$0xf] }
 0x1a5   : > { %10828 = vmatprep.mubr.msk.bf16.mxu1 %vm695_vm1, %v11840_v31  ;;  %v7396_v22 = vrot.slane %v7395_v38, 4  ;;  %v7405_v56 = vor.u32 %v7404_v63, %v7400_v57  ;;  %v2840_v16 = vshll.u32 %v9669_v42, 16  ;;  %v13901_v37 = vcombine.low %v2809_v7, %v2819_v18  ;;  %v11844_v17 = vld [vmem:[%s12162_s9 + $0x6c] sm:$0xff]   ;;  %v14409_v27 = vld [vmem:[%s12162_s9 + $0xbc] sm:$0x1] }
 0x1a6   : > { %v2827_v20 = vor.u32 %v2826_v45, %v2823_v30  ;;  %v2832_v6 = vrot.slane %v15371_v55, 5  ;;  %v2836_v9 = vrot.slane %v15372_v3, 4  ;;  %11105 = vmatmul.mubr.msk.bf16.gmra.mrb[16].mxu0 %vm695_vm1, %v11841_v62  ;;  %v7413_v0 = vshrl.u32 %v10212_v41, 16  ;;  %v13920_v30 = vld [vmem:[%s12162_s9 + $0x34] sm:$0xf]  ;;  %v11845_v45 = vld [vmem:[%s12162_s9 + $0xa8] sm:$0xff]  }
 0x1a7   : > { %v7401_v28 = vsel %vm12216_vm4, %v7396_v22, %v7400_v57  ;;  %v7406_v52 = vrot.slane %v7405_v56, 4  ;;  %v2842_v31 = vrot.slane %v2840_v16, 5  ;;  %11108 = vmatprep.mubr.msk.bf16.mxu0 %vm695_vm1, %v11843_v14  ;;  %v7416_v42 = vshll.u32 %v10212_v41, 16  ;;  %15613 = vst [vmem:[#allocation8_spill] sm:$0xff] %v13920_v30 }
 0x1a8   : > { %v2828_v51 = vrot.slane %v2827_v20, 4  ;;  %v2837_v7 = vor.u32 %v2836_v9, %v2832_v6  ;;  %v15367_v5 = vshll.u32 %v13899_v29, 16  ;;  %v7415_v57 = vrot.slane %v7413_v0, 4  ;;  %v9672_v20 = vld [vmem:[%s12162_s9 + $0x38] sm:$0x1] }
 0x1a9   : > { %v7411_v62 = vsel %vm12216_vm4, %v7406_v52, %v7410_v11  ;;  %v15370_v38 = vshrl.u32 %v13899_v29, 16  ;;  %v7432_v63 = vshll.u32 %v10214_v4, 16  ;;  %v7418_v22 = vrot.slane %v7416_v42, 5  ;;  %v11847_v4 = vld [vmem:[%s12162_s9 + $0xb4] sm:$0xff]  }
 0x1aa   : > { %v13923_v14 = vcombine.low %v7401_v28, %v7411_v62  ;;  %v2833_v41 = vsel %vm12216_vm4, %v2828_v51, %v2832_v6  ;;  %v2838_v18 = vrot.slane %v2837_v7, 4  ;;  %v7424_v56 = vrot.slane %v15367_v5, 5  ;;  %v10215_v51 = vld [vmem:[%s12162_s9 + $0x6c] sm:$0xf] }
 0x1ab   : > { %v7428_v11 = vrot.slane %v15370_v38, 4  ;;  %v7434_v16 = vrot.slane %v7432_v63, 5  ;;  %v2845_v9 = vshrl.u32 %v9670_v1, 16  ;;  %v7419_v6 = vor.u32 %v7418_v22, %v7415_v57 }
 0x1ac   : > { %10829 = vmatmul.mubr.msk.bf16.gmra.mrb[12].mxu1 %vm695_vm1, %v11842_v46  ;;  %v2843_v28 = vsel %vm12216_vm4, %v2838_v18, %v2842_v31  ;;  %v2848_v52 = vshll.u32 %v9670_v1, 16  ;;  %v15368_v0 = vshll.u32 %v13920_v30, 16  ;;  %v15369_v63 = vshrl.u32 %v13920_v30, 16  ;;  %v13943_v46 = vld [vmem:[%s12162_s9 + $0x70] sm:$0xf] }
 0x1ad   : > { %10832 = vmatprep.mubr.msk.bf16.mxu1 %vm695_vm1, %v11844_v17  ;;  %v13939_v7 = vcombine.low %v2833_v41, %v2843_v28  ;;  %v7429_v42 = vor.u32 %v7428_v11, %v7424_v56  ;;  %v2847_v62 = vrot.slane %v2845_v9, 4  ;;  %15614 = vst [vmem:[#allocation16_spill] sm:$0xff] %v13943_v46  ;;  %v7420_v5 = vrot.slane %v7419_v6, 4  ;;  %v11846_v17 = vld [vmem:[%s12162_s9 + $0x78] sm:$0xff]  }
 0x1ae   : > { %v2850_v31 = vrot.slane %v2848_v52, 5  ;;  %v2856_v1 = vrot.slane %v15368_v0, 5  ;;  %v2864_v57 = vshll.u32 %v9672_v20, 16  ;;  %11109 = vmatmul.mubr.msk.bf16.gmra.mrb[20].mxu0 %vm695_vm1, %v11845_v45  ;;  %v2860_v18 = vrot.slane %v15369_v63, 4  ;;  %v10217_v52 = vld [vmem:[%s12162_s9 + $0x74] sm:$0x1] }
 0x1af   : > { %v7430_v41 = vrot.slane %v7429_v42, 4  ;;  %v7437_v22 = vshrl.u32 %v10215_v51, 16  ;;  %v7440_v11 = vshll.u32 %v10215_v51, 16  ;;  %11112 = vmatprep.mubr.msk.bf16.mxu0 %vm695_vm1, %v11847_v4  ;;  %v7425_v9 = vsel %vm12216_vm4, %v7420_v5, %v7424_v56  ;;  %v9673_v45 = vld [vmem:[%s12162_s9 + $0x3c] sm:$0xf]  ;;  %v11848_v42 = vld [vmem:[%s12162_s9 + $0x84] sm:$0xff]  }
 0x1b0   : > { %v2851_v28 = vor.u32 %v2850_v31, %v2847_v62  ;;  %v2866_v6 = vrot.slane %v2864_v57, 5  ;;  %v15373_v20 = vshll.u32 %v13943_v46, 16  ;;  %v2861_v63 = vor.u32 %v2860_v18, %v2856_v1  ;;  %v13961_v4 = vld [vmem:[%s12162_s9 + $0x40] sm:$0xf] }
 0x1b1   : > { %v7435_v0 = vsel %vm12216_vm4, %v7430_v41, %v7434_v16  ;;  %v7439_v51 = vrot.slane %v7437_v22, 4  ;;  %v7442_v38 = vrot.slane %v7440_v11, 5  ;;  %15615 = vst [vmem:[#allocation11_spill] sm:$0xff] %v13961_v4  ;;  %v15374_v62 = vshrl.u32 %v13943_v46, 16  ;;  %v11849_v31 = vld [vmem:[%s12162_s9 + $0xc0] sm:$0xff]   ;;  %v11851_v22 = vld [vmem:[%s12162_s9 + $0xcc] sm:$0xff]  }
 0x1b2   : > { %v13963_v55 = vcombine.low %v7425_v9, %v7435_v0  ;;  %v2852_v5 = vrot.slane %v2851_v28, 4  ;;  %v7448_v56 = vrot.slane %v15373_v20, 5  ;;  %v2862_v57 = vrot.slane %v2861_v63, 4  ;;  %v9675_v41 = vld [vmem:[%s12162_s9 + $0x44] sm:$0x1] }
 0x1b3   : > { %v7443_v3 = vor.u32 %v7442_v38, %v7439_v51  ;;  %v7456_v16 = vshll.u32 %v10217_v52, 16  ;;  %v2869_v18 = vshrl.u32 %v9673_v45, 16  ;;  %v7452_v11 = vrot.slane %v15374_v62, 4  ;;  %v10218_v20 = vld [vmem:[%s12162_s9 + $0x78] sm:$0xf] }
 0x1b4   : > { %10833 = vmatmul.mubr.msk.bf16.gmra.mrb[16].mxu1 %vm695_vm1, %v11846_v17  ;;  %v2857_v0 = vsel %vm12216_vm4, %v2852_v5, %v2856_v1  ;;  %v2872_v9 = vshll.u32 %v9673_v45, 16  ;;  %v15375_v28 = vshll.u32 %v13961_v4, 16  ;;  %v2867_v38 = vsel %vm12216_vm4, %v2862_v57, %v2866_v6  ;;  %v13982_v51 = vld [vmem:[%s12162_s9 + $0x7c] sm:$0xf]  ;;  %v14386_v46 = vld [vmem:[%s12162_s9 + $0x24] sm:$0xe] }
 0x1b5   : > { %10836 = vmatprep.mubr.msk.bf16.mxu1 %vm695_vm1, %v11848_v42  ;;  %v7444_v63 = vrot.slane %v7443_v3, 4  ;;  %v7458_v17 = vrot.slane %v7456_v16, 5  ;;  %v2871_v52 = vrot.slane %v2869_v18, 4  ;;  %15616 = vst [vmem:[#allocation17_spill] sm:$0xff] %v13982_v51  ;;  %v13984_v1 = vcombine.low %v2857_v0, %v2867_v38  ;;  %v11850_v42 = vld [vmem:[%s12162_s9 + $0x90] sm:$0xff]   ;;  %v11852_v18 = vld [vmem:[%s12162_s9 + $0x9c] sm:$0xff]  }
 0x1b6   : > { %v7453_v5 = vor.u32 %v7452_v11, %v7448_v56  ;;  %v2874_v62 = vrot.slane %v2872_v9, 5  ;;  %v2880_v45 = vrot.slane %v15375_v28, 5  ;;  %11113 = vmatmul.mubr.msk.bf16.gmra.mrb[24].mxu0 %vm695_vm1, %v11849_v31  ;;  %v15379_v3 = vshrl.u32 %v13961_v4, 16  ;;  %v10220_v9 = vld [vmem:[%s12162_s9 + $0x80] sm:$0x1] }
 0x1b7   : > { %v7449_v6 = vsel %vm12216_vm4, %v7444_v63, %v7448_v56  ;;  %v2888_v57 = vshll.u32 %v9675_v41, 16  ;;  %v7461_v16 = vshrl.u32 %v10218_v20, 16  ;;  %11116 = vmatprep.mubr.msk.bf16.mxu0 %vm695_vm1, %v11851_v22  ;;  %v7464_v38 = vshll.u32 %v10218_v20, 16  ;;  %v9676_v63 = vld [vmem:[%s12162_s9 + $0x48] sm:$0xf] }
 0x1b8   : > { %v7454_v0 = vrot.slane %v7453_v5, 4  ;;  %v2875_v11 = vor.u32 %v2874_v62, %v2871_v52  ;;  %v15380_v31 = vshll.u32 %v13982_v51, 16  ;;  %v2884_v28 = vrot.slane %v15379_v3, 4  ;;  %v14006_v20 = vld [vmem:[%s12162_s9 + $0x4c] sm:$0xf]  ;;  %v11853_v52 = vld [vmem:[%s12162_s9 + $0xd8] sm:$0xff]  }
 0x1b9   : > { %v2890_v36 = vrot.slane %v2888_v57, 5  ;;  %v7463_v56 = vrot.slane %v7461_v16, 4  ;;  %v15381_v41 = vshrl.u32 %v13982_v51, 16  ;;  %v7466_v32 = vrot.slane %v7464_v38, 5  ;;  %15617 = vst [vmem:[#allocation30_spill] sm:$0xff] %v14006_v20 }
 0x1ba   : > { %v7459_v22 = vsel %vm12216_vm4, %v7454_v0, %v7458_v17  ;;  %v2876_v58 = vrot.slane %v2875_v11, 4  ;;  %v7472_v62 = vrot.slane %v15380_v31, 5  ;;  %v2885_v3 = vor.u32 %v2884_v28, %v2880_v45  ;;  %v9678_v11 = vld [vmem:[%s12162_s9 + $0x50] sm:$0x1]  ;;  %v14371_v51 = vld [vmem:[%s12162_s9 + $0xac] sm:$0xf] }
 0x1bb   : > { %v14009_v5 = vcombine.low %v7449_v6, %v7459_v22  ;;  %v7476_v57 = vrot.slane %v15381_v41, 4  ;;  %v7480_v16 = vshll.u32 %v10220_v9, 16  ;;  %v7467_v0 = vor.u32 %v7466_v32, %v7463_v56  ;;  %v10221_v32 = vld [vmem:[%s12162_s9 + $0x84] sm:$0xf] }
 0x1bc   : > { %10837 = vmatmul.mubr.msk.bf16.gmra.mrb[20].mxu1 %vm695_vm1, %v11850_v42  ;;  %v2881_v17 = vsel %vm12216_vm4, %v2876_v58, %v2880_v45  ;;  %v2893_v38 = vshrl.u32 %v9676_v63, 16  ;;  %v2896_v31 = vshll.u32 %v9676_v63, 16  ;;  %v2886_v6 = vrot.slane %v2885_v3, 4  ;;  %v14027_v63 = vld [vmem:[%s12162_s9 + $0x88] sm:$0xf] }
 0x1bd   : > { %10840 = vmatprep.mubr.msk.bf16.mxu1 %vm695_vm1, %v11852_v18  ;;  %v7477_v28 = vor.u32 %v7476_v57, %v7472_v62  ;;  %v7482_v22 = vrot.slane %v7480_v16, 5  ;;  %v15383_v41 = vshll.u32 %v14006_v20, 16  ;;  %v7468_v9 = vrot.slane %v7467_v0, 4  ;;  %15618 = vst [vmem:[#allocation18_spill] sm:$0xff] %v14027_v63  ;;  %v11854_v57 = vld [vmem:[%s12162_s9 + $0xa8] sm:$0xff]  }
 0x1be   : > { %v2895_v35 = vrot.slane %v2893_v38, 4  ;;  %v2898_v42 = vrot.slane %v2896_v31, 5  ;;  %v15385_v58 = vshrl.u32 %v14006_v20, 16  ;;  %11117 = vmatmul.mubr.msk.bf16.gmra.mrb[28].mxu0 %vm695_vm1, %v11853_v52  ;;  %v2891_v45 = vsel %vm12216_vm4, %v2886_v6, %v2890_v36  ;;  %v10223_v0 = vld [vmem:[%s12162_s9 + $0x8c] sm:$0x1]  ;;  %v11855_v38 = vld [vmem:[%s12162_s9 + $0xb4] sm:$0xff]  }
 0x1bf   : > { %v7478_v18 = vrot.slane %v7477_v28, 4  ;;  %v2904_v3 = vrot.slane %v15383_v41, 5  ;;  %v2912_v56 = vshll.u32 %v9678_v11, 16  ;;  %11122 = vmatprep.mubr.msk.bf16.mxu0 %vm695_vm1, %v13779_v59  ;;  %v14032_v31 = vcombine.low %v2881_v17, %v2891_v45  ;;  %v9679_v59 = vld [vmem:[%s12162_s9 + $0x54] sm:$0xf] }
 0x1c0   : > { %v7473_v52 = vsel %vm12216_vm4, %v7468_v9, %v7472_v62  ;;  %v2899_v16 = vor.u32 %v2898_v42, %v2895_v35  ;;  %v2908_v36 = vrot.slane %v15385_v58, 4  ;;  %v7485_v28 = vshrl.u32 %v10221_v32, 16  ;;  %v14047_v62 = vld [vmem:[%s12162_s9 + $0x58] sm:$0xf] }
 0x1c1   : > { %v7483_v11 = vsel %vm12216_vm4, %v7478_v18, %v7482_v22  ;;  %v2914_v6 = vrot.slane %v2912_v56, 5  ;;  %v7488_v41 = vshll.u32 %v10221_v32, 16  ;;  %v15389_v35 = vshll.u32 %v14027_v63, 16  ;;  %15619 = vst [vmem:[#allocation19_spill] sm:$0xff] %v14047_v62 }
 0x1c2   : > { %v14043_v17 = vcombine.low %v7473_v52, %v7483_v11  ;;  %v2900_v45 = vrot.slane %v2899_v16, 4  ;;  %v2909_v23 = vor.u32 %v2908_v36, %v2904_v3  ;;  %v7487_v9 = vrot.slane %v7485_v28, 4  ;;  %v10224_v52 = vld [vmem:[%s12162_s9 + $0x90] sm:$0xf] }
 0x1c3   : > { %v7490_v42 = vrot.slane %v7488_v41, 5  ;;  %v15391_v58 = vshrl.u32 %v14027_v63, 16  ;;  %v7504_v60 = vshll.u32 %v10223_v0, 16  ;;  %v7496_v18 = vrot.slane %v15389_v35, 5 }
 0x1c4   : > { %10841 = vmatmul.mubr.msk.bf16.gmra.mrb[24].mxu1 %vm695_vm1, %v11854_v57  ;;  %v2905_v22 = vsel %vm12216_vm4, %v2900_v45, %v2904_v3  ;;  %v2910_v32 = vrot.slane %v2909_v23, 4  ;;  %v2917_v56 = vshrl.u32 %v9679_v59, 16  ;;  %v2920_v0 = vshll.u32 %v9679_v59, 16  ;;  %v14063_v3 = vld [vmem:[%s15259_s1 + $0x78] sm:$0x3f]  }
 0x1c5   : > { %10844 = vmatprep.mubr.msk.bf16.mxu1 %vm695_vm1, %v11855_v38  ;;  %v7491_v41 = vor.u32 %v7490_v42, %v7487_v9  ;;  %v7500_v16 = vrot.slane %v15391_v58, 4  ;;  %v7506_v36 = vrot.slane %v7504_v60, 5  ;;  %v15388_v11 = vshll.u32 %v14047_v62, 16  ;;  %v14074_v9 = vld [vmem:[%s12162_s9 + $0x94] sm:$0xf]  ;;  %v11856_v42 = vld [vmem:[%s12162_s9 + $0xc0] sm:$0xff]  }
 0x1c6   : > { %v2915_v23 = vsel %vm12216_vm4, %v2910_v32, %v2914_v6  ;;  %v2919_v57 = vrot.slane %v2917_v56, 4  ;;  %v15390_v38 = vshrl.u32 %v14047_v62, 16  ;;  %11123 = vmatmul.mubr.msk.bf16.vlgmr.msra.gmra.mrb[0].mxu0 %vm695_vm1, %v13805_v50  ;;  %v2922_v45 = vrot.slane %v2920_v0, 5  ;;  %15620 = vst [vmem:[#allocation31_spill] sm:$0xff] %v14074_v9  ;;  %v14087_v0 = vld [vmem:[%s12162_s9 + $0x98] sm:$0x1] }
 0x1c7   : > { %v14071_v28 = vcombine.low %v2905_v22, %v2915_v23  ;;  %v7492_v60 = vrot.slane %v7491_v41, 4  ;;  %v7501_v59 = vor.u32 %v7500_v16, %v7496_v18  ;;  %11126 = vmatprep.mubr.msk.bf16.mxu0 %vm695_vm1, %v13829_v54  ;;  %11155 = vmatpush3.bf16.msra.mxu0 %v13863_v40  ;;  %v2928_v6 = vrot.slane %v15388_v11, 5  ;;  %v14333_v62 = vld [vmem:[%s12162_s9 + $0xa0] sm:$0xf] }
 0x1c8   : > { %v2932_v50 = vrot.slane %v15390_v38, 4  ;;  %v2936_v22 = vshll.u32 %v9681_v15, 16  ;;  %v7509_v32 = vshrl.u32 %v10224_v52, 16  ;;  %v2923_v16 = vor.u32 %v2922_v45, %v2919_v57  ;;  %11717 = vmatprep.subr.msk.bf16.mxu0 %vm744_vm0, %v14063_v3  ;;  %v9682_v15 = vld [vmem:[%s12162_s9 + $0x60] sm:$0xf] }
 0x1c9   : > { %v7497_v56 = vsel %vm12216_vm4, %v7492_v60, %v7496_v18  ;;  %v7502_v41 = vrot.slane %v7501_v59, 4  ;;  %v7512_v54 = vshll.u32 %v10224_v52, 16  ;;  %v15392_v35 = vshll.u32 %v14074_v9, 16  ;;  %v14097_v60 = vld [vmem:[%s12162_s9 + $0x64] sm:$0xf] }
 0x1ca   : > { %v2933_v40 = vor.u32 %v2932_v50, %v2928_v6  ;;  %v2938_v23 = vrot.slane %v2936_v22, 5  ;;  %v7511_v11 = vrot.slane %v7509_v32, 4  ;;  %v2924_v58 = vrot.slane %v2923_v16, 4 }
 0x1cb   : > { %v7507_v38 = vsel %vm12216_vm4, %v7502_v41, %v7506_v36  ;;  %v7514_v18 = vrot.slane %v7512_v54, 5  ;;  %v15394_v57 = vshrl.u32 %v14074_v9, 16  ;;  %v7520_v45 = vrot.slane %v15392_v35, 5 }
 0x1cc   : > { %10845 = vmatmul.mubr.msk.bf16.gmra.mrb[28].mxu1 %vm695_vm1, %v11856_v42  ;;  %v14100_v52 = vcombine.low %v7497_v56, %v7507_v38  ;;  %v2934_v59 = vrot.slane %v2933_v40, 4  ;;  %v7528_v50 = vshll.u32 %v14087_v0, 16  ;;  %v2929_v36 = vsel %vm12216_vm4, %v2924_v58, %v2928_v6  ;;  %v14112_v42 = vld [vmem:[%s12162_s9 + $0x68] sm:$0x1] }
 0x1cd   : > { %10850 = vmatprep.mubr.msk.bf16.mxu1 %vm695_vm1, %v13846_v19  ;;  %v7515_v22 = vor.u32 %v7514_v18, %v7511_v11  ;;  %v7524_v32 = vrot.slane %v15394_v57, 4  ;;  %v2941_v38 = vshrl.u32 %v9682_v15, 16  ;;  %v2944_v16 = vshll.u32 %v9682_v15, 16  ;;  %v10227_v19 = vld [vmem:[%s12162_s9 + $0x9c] sm:$0xf] }
 0x1ce   : > { %v2939_v56 = vsel %vm12216_vm4, %v2934_v59, %v2938_v23  ;;  %v7530_v41 = vrot.slane %v7528_v50, 5  ;;  %v15393_v54 = vshll.u32 %v14097_v60, 16  ;;  %11127 = vmatmul.mubr.msk.bf16.gmra.mrb[4].mxu0 %vm695_vm1, %v13874_v13  ;;  %v14123_v18 = vld [vmem:[%s12162_s9 + $0xa0] sm:$0xf]  ;;  %v15396_v59 = vshrl.u32 %v14097_v60, 16 }
 0x1cf   : > { %v14120_v58 = vcombine.low %v2929_v36, %v2939_v56  ;;  %v7516_v11 = vrot.slane %v7515_v22, 4  ;;  %v7525_v6 = vor.u32 %v7524_v32, %v7520_v45  ;;  %v2943_v40 = vrot.slane %v2941_v38, 4  ;;  %11130 = vmatprep.mubr.msk.bf16.mxu0 %vm695_vm1, %v13923_v14  ;;  %v14132_v13 = vld [vmem:[%s12162_s9 + $0xa4] sm:$0x1]  ;;  %v9685_v56 = vld [vmem:[%s12162_s9 + $0x6c] sm:$0xf] }
 0x1d0   : > { %v2946_v23 = vrot.slane %v2944_v16, 5  ;;  %v2952_v15 = vrot.slane %v15393_v54, 5  ;;  %v2960_v50 = vshll.u32 %v14112_v42, 16  ;;  %v7533_v32 = vshrl.u32 %v10227_v19, 16  ;;  %v14143_v57 = vld [vmem:[%s15259_s1 + $0x38] sm:$0x3f]  }
 0x1d1   : > { %v7521_v36 = vsel %vm12216_vm4, %v7516_v11, %v7520_v45  ;;  %v7526_v22 = vrot.slane %v7525_v6, 4  ;;  %v7536_v38 = vshll.u32 %v10227_v19, 16  ;;  %v2956_v14 = vrot.slane %v15396_v59, 4  ;;  %v14149_v6 = vld [vmem:[%s12162_s9 + $0x70] sm:$0xf] }
 0x1d2   : > { %v2947_v35 = vor.u32 %v2946_v23, %v2943_v40  ;;  %v2962_v16 = vrot.slane %v2960_v50, 5  ;;  %v15397_v54 = vshll.u32 %v14123_v18, 16  ;;  %v7535_v45 = vrot.slane %v7533_v32, 4 }
 0x1d3   : > { %v7531_v43 = vsel %vm12216_vm4, %v7526_v22, %v7530_v41  ;;  %v7538_v11 = vrot.slane %v7536_v38, 5  ;;  %v15399_v19 = vshrl.u32 %v14123_v18, 16  ;;  %v2957_v50 = vor.u32 %v2956_v14, %v2952_v15 }
 0x1d4   : > { %10851 = vmatmul.mubr.msk.bf16.vlgmr.msra.gmra.mrb[0].mxu1 %vm695_vm1, %v13901_v37  ;;  %v14153_v40 = vcombine.low %v7521_v36, %v7531_v43  ;;  %v2948_v23 = vrot.slane %v2947_v35, 4  ;;  %v7544_v59 = vrot.slane %v15397_v54, 5  ;;  %v7552_v32 = vshll.u32 %v14132_v13, 16  ;;  %v14166_v36 = vld [vmem:[%s12162_s9 + $0x74] sm:$0x1] }
 0x1d5   : > { %10883 = vmatpush3.bf16.msra.mxu1 %v13854_v61  ;;  %10854 = vmatprep.mubr.msk.bf16.mxu1 %vm695_vm1, %v13939_v7  ;;  %v7539_v41 = vor.u32 %v7538_v11, %v7535_v45  ;;  %v7548_v22 = vrot.slane %v15399_v19, 4  ;;  %v2965_v37 = vshrl.u32 %v9685_v56, 16  ;;  %v2958_v35 = vrot.slane %v2957_v50, 4  ;;  %v10230_v54 = vld [vmem:[%s12162_s9 + $0xa8] sm:$0xf] }
 0x1d6   : > { %v2953_v43 = vsel %vm12216_vm4, %v2948_v23, %v2952_v15  ;;  %v2968_v38 = vshll.u32 %v9685_v56, 16  ;;  %v15398_v61 = vshll.u32 %v14149_v6, 16  ;;  %11709 = vmatprep.subr.msk.bf16.mxu1 %vm744_vm0, %v14143_v57  ;;  %11131 = vmatmul.mubr.msk.bf16.gmra.mrb[8].mxu0 %vm695_vm1, %v13963_v55  ;;  %v7554_v45 = vrot.slane %v7552_v32, 5  ;;  %v14182_v55 = vld [vmem:[%s12162_s9 + $0xac] sm:$0xf] }
 0x1d7   : > { %v7540_v7 = vrot.slane %v7539_v41, 4  ;;  %v7549_v14 = vor.u32 %v7548_v22, %v7544_v59  ;;  %v2967_v11 = vrot.slane %v2965_v37, 4  ;;  %11134 = vmatprep.mubr.msk.bf16.mxu0 %vm695_vm1, %v14009_v5  ;;  %v2963_v15 = vsel %vm12216_vm4, %v2958_v35, %v2962_v16  ;;  %v14192_v35 = vld [vmem:[%s12162_s9 + $0xb0] sm:$0x1] }
 0x1d8   : > { %v2970_v56 = vrot.slane %v2968_v38, 5  ;;  %v2976_v23 = vrot.slane %v15398_v61, 5  ;;  %v15400_v50 = vshrl.u32 %v14149_v6, 16  ;;  %v14184_v41 = vcombine.low %v2953_v43, %v2963_v15 }
 0x1d9   : > { %v7545_v22 = vsel %vm12216_vm4, %v7540_v7, %v7544_v59  ;;  %v7550_v32 = vrot.slane %v7549_v14, 4  ;;  %v2984_v5 = vshll.u32 %v14166_v36, 16  ;;  %v7557_v38 = vshrl.u32 %v10230_v54, 16  ;;  %v9688_v7 = vld [vmem:[%s12162_s9 + $0x78] sm:$0xf] }
 0x1da   : > { %v2971_v37 = vor.u32 %v2970_v56, %v2967_v11  ;;  %v2980_v16 = vrot.slane %v15400_v50, 4  ;;  %v7560_v61 = vshll.u32 %v10230_v54, 16  ;;  %v15402_v15 = vshll.u32 %v14182_v55, 16 }
 0x1db   : > { %v7555_v19 = vsel %vm12216_vm4, %v7550_v32, %v7554_v45  ;;  %v2986_v43 = vrot.slane %v2984_v5, 5  ;;  %v15403_v59 = vshrl.u32 %v14182_v55, 16  ;;  %v7559_v50 = vrot.slane %v7557_v38, 4  ;;  %v14218_v38 = vld [vmem:[%s12162_s9 + $0x80] sm:$0x1] }
 0x1dc   : > { %10855 = vmatmul.mubr.msk.bf16.gmra.mrb[4].mxu1 %vm695_vm1, %v13984_v1  ;;  %v14201_v14 = vcombine.low %v7545_v22, %v7555_v19  ;;  %v2972_v11 = vrot.slane %v2971_v37, 4  ;;  %v2981_v56 = vor.u32 %v2980_v16, %v2976_v23  ;;  %v7562_v54 = vrot.slane %v7560_v61, 5 }
 0x1dd   : > { %10858 = vmatprep.mubr.msk.bf16.mxu1 %vm695_vm1, %v14032_v31  ;;  %v7568_v45 = vrot.slane %v15402_v15, 5  ;;  %v7572_v32 = vrot.slane %v15403_v59, 4  ;;  %v7576_v1 = vshll.u32 %v14192_v35, 16  ;;  %v2989_v5 = vshrl.u32 %v9688_v7, 16  ;;  %v10233_v59 = vld [vmem:[%s12162_s9 + $0xb4] sm:$0xf] }
 0x1de   : > { %v2977_v19 = vsel %vm12216_vm4, %v2972_v11, %v2976_v23  ;;  %v2982_v22 = vrot.slane %v2981_v56, 4  ;;  %v2992_v37 = vshll.u32 %v9688_v7, 16  ;;  %11135 = vmatmul.mubr.msk.bf16.gmra.mrb[12].mxu0 %vm695_vm1, %v14043_v17  ;;  %v7563_v31 = vor.u32 %v7562_v54, %v7559_v50  ;;  %v14228_v50 = vld [vmem:[%s12162_s9 + $0xb8] sm:$0xf] }
 0x1df   : > { %v7573_v61 = vor.u32 %v7572_v32, %v7568_v45  ;;  %v7578_v16 = vrot.slane %v7576_v1, 5  ;;  %v15405_v15 = vshll.u32 %v14204_v39, 16  ;;  %11138 = vmatprep.mubr.msk.bf16.mxu0 %vm695_vm1, %v14100_v52  ;;  %v2991_v11 = vrot.slane %v2989_v5, 4 }
 0x1e0   : > { %v2987_v23 = vsel %vm12216_vm4, %v2982_v22, %v2986_v43  ;;  %v2994_v7 = vrot.slane %v2992_v37, 5  ;;  %v15406_v17 = vshrl.u32 %v14204_v39, 16  ;;  %v7564_v54 = vrot.slane %v7563_v31, 4 }
 0x1e1   : > { %v9719_v56 = vcombine.low %v2977_v19, %v2987_v23  ;;  %v7574_v32 = vrot.slane %v7573_v61, 4  ;;  %v3000_v1 = vrot.slane %v15405_v15, 5  ;;  %v3008_v43 = vshll.u32 %v14218_v38, 16  ;;  %v14240_v19 = vld [vmem:[%s12162_s9 + $0xbc] sm:$0x1] }
 0x1e2   : > { %v2995_v8 = vor.u32 %v2994_v7, %v2991_v11  ;;  %v3004_v52 = vrot.slane %v15406_v17, 4  ;;  %v7581_v22 = vshrl.u32 %v10233_v59, 16  ;;  %v7569_v5 = vsel %vm12216_vm4, %v7564_v54, %v7568_v45  ;;  %v9691_v23 = vld [vmem:[%s12162_s9 + $0x84] sm:$0xf] }
 0x1e3   : > { %v7579_v37 = vsel %vm12216_vm4, %v7574_v32, %v7578_v16  ;;  %v7584_v31 = vshll.u32 %v10233_v59, 16  ;;  %v15408_v61 = vshll.u32 %v14228_v50, 16  ;;  %v3010_v17 = vrot.slane %v3008_v43, 5 }
 0x1e4   : > { %10859 = vmatmul.mubr.msk.bf16.gmra.mrb[8].mxu1 %vm695_vm1, %v14071_v28  ;;  %v10258_v11 = vcombine.low %v7569_v5, %v7579_v37  ;;  %v2996_v7 = vrot.slane %v2995_v8, 4  ;;  %v3005_v15 = vor.u32 %v3004_v52, %v3000_v1  ;;  %v7583_v45 = vrot.slane %v7581_v22, 4  ;;  %v14258_v52 = vld [vmem:[%s12162_s9 + $0x8c] sm:$0x1] }
 0x1e5   : > { %10862 = vmatprep.mubr.msk.bf16.mxu1 %vm695_vm1, %v14120_v58  ;;  %v7586_v16 = vrot.slane %v7584_v31, 5  ;;  %v7592_v59 = vrot.slane %v15408_v61, 5  ;;  %v15410_v54 = vshrl.u32 %v14228_v50, 16  ;;  %v7600_v8 = vshll.u32 %v14240_v19, 16  ;;  %v10236_v31 = vld [vmem:[%s12162_s9 + $0xc0] sm:$0xf] }
 0x1e6   : > { %v3001_v28 = vsel %vm12216_vm4, %v2996_v7, %v3000_v1  ;;  %v3006_v32 = vrot.slane %v3005_v15, 4  ;;  %v3013_v43 = vshrl.u32 %v9691_v23, 16  ;;  %11139 = vmatmul.mubr.msk.bf16.gmra.mrb[16].mxu0 %vm695_vm1, %v14153_v40  ;;  %v3016_v5 = vshll.u32 %v9691_v23, 16  ;;  %v14272_v23 = vld [vmem:[%s12162_s9 + $0xc4] sm:$0xf] }
 0x1e7   : > { %v7587_v58 = vor.u32 %v7586_v16, %v7583_v45  ;;  %v7596_v22 = vrot.slane %v15410_v54, 4  ;;  %v15411_v37 = vshll.u32 %v14247_v10, 16  ;;  %11142 = vmatprep.mubr.msk.bf16.mxu0 %vm695_vm1, %v14201_v14  ;;  %v7602_v1 = vrot.slane %v7600_v8, 5 }
 0x1e8   : > { %v3011_v15 = vsel %vm12216_vm4, %v3006_v32, %v3010_v17  ;;  %v3015_v7 = vrot.slane %v3013_v43, 4  ;;  %v15412_v61 = vshrl.u32 %v14247_v10, 16  ;;  %v3018_v25 = vrot.slane %v3016_v5, 5 }
 0x1e9   : > { %v9720_v40 = vcombine.low %v3001_v28, %v3011_v15  ;;  %v7588_v45 = vrot.slane %v7587_v58, 4  ;;  %v7597_v16 = vor.u32 %v7596_v22, %v7592_v59  ;;  %v3024_v54 = vrot.slane %v15411_v37, 5  ;;  %v14282_v58 = vld [vmem:[%s12162_s9 + $0xc8] sm:$0x1] }
 0x1ea   : > { %v3028_v14 = vrot.slane %v15412_v61, 4  ;;  %v3032_v17 = vshll.u32 %v14258_v52, 16  ;;  %v7605_v32 = vshrl.u32 %v10236_v31, 16  ;;  %v3019_v43 = vor.u32 %v3018_v25, %v3015_v7 }
 0x1eb   : > { %v7593_v8 = vsel %vm12216_vm4, %v7588_v45, %v7592_v59  ;;  %v7598_v28 = vrot.slane %v7597_v16, 4  ;;  %v7608_v22 = vshll.u32 %v10236_v31, 16  ;;  %v15414_v61 = vshll.u32 %v14272_v23, 16  ;;  %v14293_v31 = vld [vmem:[%s12162_s9 + $0x94] sm:$0xf] }
 0x1ec   : > { %10863 = vmatmul.mubr.msk.bf16.gmra.mrb[12].mxu1 %vm695_vm1, %v14184_v41  ;;  %v3029_v5 = vor.u32 %v3028_v14, %v3024_v54  ;;  %v3034_v15 = vrot.slane %v3032_v17, 5  ;;  %v7607_v37 = vrot.slane %v7605_v32, 4  ;;  %v3020_v45 = vrot.slane %v3019_v43, 4 }
 0x1ed   : > { %10866 = vmatprep.mubr.msk.bf16.mxu1 %vm695_vm1, %v9719_v56  ;;  %v7603_v59 = vsel %vm12216_vm4, %v7598_v28, %v7602_v1  ;;  %v7610_v25 = vrot.slane %v7608_v22, 5  ;;  %v15415_v7 = vshrl.u32 %v14272_v23, 16  ;;  %v7616_v14 = vrot.slane %v15414_v61, 5  ;;  %v14304_v28 = vld [vmem:[%s12162_s9 + $0x98] sm:$0x1] }
 0x1ee   : > { %v10259_v41 = vcombine.low %v7593_v8, %v7603_v59  ;;  %v3030_v16 = vrot.slane %v3029_v5, 4  ;;  %v7624_v17 = vshll.u32 %v14282_v58, 16  ;;  %11143 = vmatmul.mubr.msk.bf16.gmra.mrb[20].mxu0 %vm695_vm1, %v10258_v11  ;;  %v3025_v56 = vsel %vm12216_vm4, %v3020_v45, %v3024_v54  ;;  %v10239_v59 = vld [vmem:[%s12162_s9 + $0xcc] sm:$0xf] }
 0x1ef   : > { %v7611_v1 = vor.u32 %v7610_v25, %v7607_v37  ;;  %v7620_v32 = vrot.slane %v15415_v7, 4  ;;  %v3037_v43 = vshrl.u32 %v9694_v49, 16  ;;  %v3040_v5 = vshll.u32 %v9694_v49, 16  ;;  %v14312_v25 = vld [vmem:[%s12162_s9 + $0xd0] sm:$0xf] }
 0x1f0   : > { %11146 = vmatprep.mubr.msk.bf16.mxu0 %vm695_vm1, %v10259_v41  ;;  %v3035_v8 = vsel %vm12216_vm4, %v3030_v16, %v3034_v15  ;;  %v7626_v22 = vrot.slane %v7624_v17, 5  ;;  %v15417_v11 = vshll.u32 %v14293_v31, 16  ;;  %v15420_v21 = vshrl.u32 %v14293_v31, 16  ;;  %v14321_v17 = vld [vmem:[%s12162_s9 + $0xd4] sm:$0x1] }
 0x1f1   : > { %v9721_v61 = vcombine.low %v3025_v56, %v3035_v8  ;;  %v7612_v54 = vrot.slane %v7611_v1, 4  ;;  %v7621_v37 = vor.u32 %v7620_v32, %v7616_v14  ;;  %v3039_v45 = vrot.slane %v3037_v43, 4 }
 0x1f2   : > { %v3042_v7 = vrot.slane %v3040_v5, 5  ;;  %v3048_v41 = vrot.slane %v15417_v11, 5  ;;  %v3056_v15 = vshll.u32 %v14304_v28, 16  ;;  %v7629_v56 = vshrl.u32 %v10239_v59, 16  ;;  %v9697_v11 = vld [vmem:[%s12162_s9 + $0x9c] sm:$0xf] }
 0x1f3   : > { %v7617_v49 = vsel %vm12216_vm4, %v7612_v54, %v7616_v14  ;;  %v7622_v16 = vrot.slane %v7621_v37, 4  ;;  %v7632_v1 = vshll.u32 %v10239_v59, 16  ;;  %v3052_v43 = vrot.slane %v15420_v21, 4 }
 0x1f4   : > { %10867 = vmatmul.mubr.msk.bf16.gmra.mrb[16].mxu1 %vm695_vm1, %v9720_v40  ;;  %v3043_v32 = vor.u32 %v3042_v7, %v3039_v45  ;;  %v3058_v8 = vrot.slane %v3056_v15, 5  ;;  %v15421_v5 = vshll.u32 %v14312_v25, 16  ;;  %v7631_v54 = vrot.slane %v7629_v56, 4 }
 0x1f5   : > { %10870 = vmatprep.mubr.msk.bf16.mxu1 %vm695_vm1, %v9721_v61  ;;  %v7627_v14 = vsel %vm12216_vm4, %v7622_v16, %v7626_v22  ;;  %v7634_v37 = vrot.slane %v7632_v1, 5  ;;  %v15422_v59 = vshrl.u32 %v14312_v25, 16  ;;  %v3053_v45 = vor.u32 %v3052_v43, %v3048_v41  ;;  %v14344_v1 = vld [vmem:[%s12162_s9 + $0xa4] sm:$0x1] }
 0x1f6   : > { %v10260_v40 = vcombine.low %v7617_v49, %v7627_v14  ;;  %v3044_v7 = vrot.slane %v3043_v32, 4  ;;  %v7640_v15 = vrot.slane %v15421_v5, 5  ;;  %v7648_v22 = vshll.u32 %v14321_v17, 16 }
 0x1f7   : > { %v7635_v21 = vor.u32 %v7634_v37, %v7631_v54  ;;  %v7644_v61 = vrot.slane %v15422_v59, 4  ;;  %v3061_v16 = vshrl.u32 %v9697_v11, 16  ;;  %v3054_v49 = vrot.slane %v3053_v45, 4  ;;  %v10242_v59 = vld [vmem:[%s12162_s9 + $0xd8] sm:$0xf] }
 0x1f8   : > { %11147 = vmatmul.mubr.msk.bf16.gmra.mrb[24].mxu0 %vm695_vm1, %v10260_v40  ;;  %v3049_v56 = vsel %vm12216_vm4, %v3044_v7, %v3048_v41  ;;  %v3064_v32 = vshll.u32 %v9697_v11, 16  ;;  %v15427_v43 = vshll.u32 %v14333_v62, 16  ;;  %v7650_v37 = vrot.slane %v7648_v22, 5  ;;  %v14354_v7 = vld [vmem:[%s12162_s9 + $0xdc] sm:$0xf] }
 0x1f9   : > { %v7636_v14 = vrot.slane %v7635_v21, 4  ;;  %v7645_v54 = vor.u32 %v7644_v61, %v7640_v15  ;;  %v3063_v5 = vrot.slane %v3061_v16, 4  ;;  %v3059_v63 = vsel %vm12216_vm4, %v3054_v49, %v3058_v8  ;;  %v14362_v16 = vld [vmem:[%s12162_s9 + $0xe0] sm:$0x1] }
 0x1fa   : > { %v3066_v20 = vrot.slane %v3064_v32, 5  ;;  %v3072_v40 = vrot.slane %v15427_v43, 5  ;;  %v15428_v41 = vshrl.u32 %v14333_v62, 16  ;;  %v9722_v11 = vcombine.low %v3049_v56, %v3059_v63 }
 0x1fb   : > { %v7641_v21 = vsel %vm12216_vm4, %v7636_v14, %v7640_v15  ;;  %v7646_v45 = vrot.slane %v7645_v54, 4  ;;  %v3080_v61 = vshll.u32 %v14344_v1, 16  ;;  %v7653_v49 = vshrl.u32 %v10242_v59, 16  ;;  %v9700_v54 = vld [vmem:[%s12162_s9 + $0xa8] sm:$0xf] }
 0x1fc   : > { %v3067_v22 = vor.u32 %v3066_v20, %v3063_v5  ;;  %v3076_v8 = vrot.slane %v15428_v41, 4  ;;  %v7656_v32 = vshll.u32 %v10242_v59, 16  ;;  %10871 = vmatmul.mubr.msk.bf16.gmra.mrb[20].mxu1 %vm695_vm1, %v9722_v11  ;;  %v15433_v15 = vshll.u32 %v14354_v7, 16 }
 0x1fd   : > { %v7651_v63 = vsel %vm12216_vm4, %v7646_v45, %v7650_v37  ;;  %v3082_v56 = vrot.slane %v3080_v61, 5  ;;  %v15436_v14 = vshrl.u32 %v14354_v7, 16  ;;  %v7655_v41 = vrot.slane %v7653_v49, 4 }
 0x1fe   : > { %v10261_v43 = vcombine.low %v7641_v21, %v7651_v63  ;;  %v3068_v20 = vrot.slane %v3067_v22, 4  ;;  %v3077_v5 = vor.u32 %v3076_v8, %v3072_v40  ;;  %v7658_v59 = vrot.slane %v7656_v32, 5  ;;  %v14382_v32 = vld [vmem:[%s12162_s9 + $0xb0] sm:$0x1] }
 0x1ff   : > { %v7664_v11 = vrot.slane %v15433_v15, 5  ;;  %v7668_v37 = vrot.slane %v15436_v14, 4  ;;  %v7672_v45 = vshll.u32 %v14362_v16, 16  ;;  %v3085_v22 = vshrl.u32 %v9700_v54, 16 }
 0x200   : > { %11150 = vmatprep.mubr.msk.bf16.mxu0 %vm695_vm1, %v10261_v43  ;;  %v3073_v21 = vsel %vm12216_vm4, %v3068_v20, %v3072_v40  ;;  %v3078_v61 = vrot.slane %v3077_v5, 4  ;;  %v3088_v8 = vshll.u32 %v9700_v54, 16  ;;  %v7659_v49 = vor.u32 %v7658_v59, %v7655_v41 }
 0x201   : > { %v7669_v63 = vor.u32 %v7668_v37, %v7664_v11  ;;  %v7674_v4 = vrot.slane %v7672_v45, 5  ;;  %v15439_v15 = vshll.u32 %v14371_v51, 16  ;;  %v3087_v43 = vrot.slane %v3085_v22, 4  ;;  %v11909_v22 = vld [vmem:[%s12162_s9 + $0x28] sm:$0xf] }
 0x202   : > { %v3083_v14 = vsel %vm12216_vm4, %v3078_v61, %v3082_v56  ;;  %v3090_v30 = vrot.slane %v3088_v8, 5  ;;  %v15440_v40 = vshrl.u32 %v14371_v51, 16  ;;  %v7660_v41 = vrot.slane %v7659_v49, 4  ;;  %v9703_v61 = vld [vmem:[%s12162_s9 + $0xb4] sm:$0xf] }
 0x203   : > { %v9723_v54 = vcombine.low %v3073_v21, %v3083_v14  ;;  %v7670_v20 = vrot.slane %v7669_v63, 4  ;;  %v3096_v5 = vrot.slane %v15439_v15, 5  ;;  %v3104_v56 = vshll.u32 %v14382_v32, 16  ;;  %v14406_v63 = vld [vmem:[%s12162_s9 + $0xb8] sm:$0xf] }
 0x204   : > { %v3091_v59 = vor.u32 %v3090_v30, %v3087_v43  ;;  %v3100_v37 = vrot.slane %v15440_v40, 4  ;;  %v10296_v45 = vrot.slane %v14386_v46, 9  ;;  %v7665_v14 = vsel %vm12216_vm4, %v7660_v41, %v7664_v11  ;;  %v11910_v30 = vld [vmem:[%s12162_s9 + $0x2c] sm:$0x1] }
 0x205   : > { %10874 = vmatprep.mubr.msk.bf16.mxu1 %vm695_vm1, %v9723_v54  ;;  %v7675_v21 = vsel %vm12216_vm4, %v7670_v20, %v7674_v4  ;;  %v8042_v8 = vrot.slane %v11909_v22, 5  ;;  %v8045_v49 = vrot.slane %v11910_v30, 5  ;;  %v3106_v29 = vrot.slane %v3104_v56, 5  ;;  %v14419_v56 = vld [vmem:[%s12162_s9 + $0x30] sm:$0xe] }
 0x206   : > { %v10262_v43 = vcombine.low %v7665_v14, %v7675_v21  ;;  %v3092_v15 = vrot.slane %v3091_v59, 4  ;;  %v3101_v40 = vor.u32 %v3100_v37, %v3096_v5  ;;  %v3109_v41 = vshrl.u32 %v9703_v61, 16 }
 0x207   : > { %v8043_v11 = vsel %vm12923_vm7, %v10296_v45, %v8042_v8  ;;  %v8044_v54 = vrot.slane %v8042_v8, 4  ;;  %v3112_v4 = vshll.u32 %v9703_v61, 16  ;;  %v15449_v59 = vshll.u32 %v14406_v63, 16  ;;  %v9706_v8 = vld [vmem:[%s12162_s9 + $0xc0] sm:$0xf] }
 0x208   : > { %11151 = vmatmul.mubr.msk.bf16.gmra.mrb[28].mxu0 %vm695_vm1, %v10262_v43  ;;  %v3097_v20 = vsel %vm12216_vm4, %v3092_v15, %v3096_v5  ;;  %v3102_v22 = vrot.slane %v3101_v40, 4  ;;  %v15450_v37 = vshrl.u32 %v14406_v63, 16  ;;  %v3111_v45 = vrot.slane %v3109_v41, 4  ;;  %v14432_v43 = vld [vmem:[%s12162_s9 + $0xc4] sm:$0xf] }
 0x209   : > { %v8046_v14 = vsel %vm12923_vm7, %v8044_v54, %v8045_v49  ;;  %v3114_v21 = vrot.slane %v3112_v4, 5  ;;  %v3128_v61 = vshll.u32 %v14409_v27, 16  ;;  %v3120_v5 = vrot.slane %v15449_v59, 5  ;;  %15621 = vst [vmem:[#allocation20_spill] sm:$0xff] %v14432_v43 }
 0x20a   : > { %v3107_v15 = vsel %vm12216_vm4, %v3102_v22, %v3106_v29  ;;  %v10314_v40 = vcombine.low %v8043_v11, %v8046_v14  ;;  %v3124_v30 = vrot.slane %v15450_v37, 4  ;;  %v10297_v4 = vrot.slane %v14419_v56, 9  ;;  %v11912_v11 = vld [vmem:[%s12162_s9 + $0x38] sm:$0x1]  ;;  %v14439_v14 = vld [vmem:[%s12162_s9 + $0xc8] sm:$0x1] }
 0x20b   : > { %v9724_v49 = vcombine.low %v3097_v20, %v3107_v15  ;;  %v3115_v54 = vor.u32 %v3114_v21, %v3111_v45  ;;  %v3130_v41 = vrot.slane %v3128_v61, 5  ;;  %v8049_v29 = vrot.slane %v11911_v44, 5  ;;  %v14445_v61 = vld [vmem:[%s12162_s9 + $0x3c] sm:$0xe] }
 0x20c   : > { %11156 = vmatprep.mubr.msk.bf16.mxu0 %vm695_vm1, %v10314_v40  ;;  %v3125_v47 = vor.u32 %v3124_v30, %v3120_v5  ;;  %v8052_v22 = vrot.slane %v11912_v11, 5  ;;  %v3133_v59 = vshrl.u32 %v9706_v8, 16  ;;  %v3136_v20 = vshll.u32 %v9706_v8, 16 }
 0x20d   : > { %10875 = vmatmul.mubr.msk.bf16.gmra.mrb[24].mxu1 %vm695_vm1, %v9724_v49  ;;  %v3116_v37 = vrot.slane %v3115_v54, 4  ;;  %v15453_v45 = vshll.u32 %v14432_v43, 16  ;;  %v15456_v21 = vshrl.u32 %v14432_v43, 16  ;;  %v8050_v44 = vsel %vm12923_vm7, %v10297_v4, %v8049_v29 }
 0x20e   : > { %v3126_v15 = vrot.slane %v3125_v47, 4  ;;  %v8051_v40 = vrot.slane %v8049_v29, 4  ;;  %v3135_v30 = vrot.slane %v3133_v59, 4  ;;  %v3138_v49 = vrot.slane %v3136_v20, 5 }
 0x20f   : > { %v3121_v11 = vsel %vm12216_vm4, %v3116_v37, %v3120_v5  ;;  %v3144_v8 = vrot.slane %v15453_v45, 5  ;;  %v3148_v54 = vrot.slane %v15456_v21, 4  ;;  %v3152_v4 = vshll.u32 %v14439_v14, 16 }
 0x210   : > { %v3131_v47 = vsel %vm12216_vm4, %v3126_v15, %v3130_v41  ;;  %v8053_v59 = vsel %vm12923_vm7, %v8051_v40, %v8052_v22  ;;  %v10298_v37 = vrot.slane %v14445_v61, 9  ;;  %v3139_v20 = vor.u32 %v3138_v49, %v3135_v30  ;;  %v11914_v41 = vld [vmem:[%s12162_s9 + $0x44] sm:$0x1]  ;;  %v11916_v49 = vld [vmem:[%s12162_s9 + $0x14] sm:$0x1] }
 0x211   : > { %v9725_v5 = vcombine.low %v3121_v11, %v3131_v47  ;;  %v10315_v29 = vcombine.low %v8050_v44, %v8053_v59  ;;  %v3149_v45 = vor.u32 %v3148_v54, %v3144_v8  ;;  %v3154_v21 = vrot.slane %v3152_v4, 5  ;;  %v11915_v11 = vld [vmem:[%s12162_s9 + $0x10] sm:$0xf]  ;;  %v11917_v4 = vld [vmem:[%s12162_s9 + $0x4c] sm:$0xf] }
 0x212   : > { %v8056_v43 = vrot.slane %v11913_v2, 5  ;;  %v8059_v15 = vrot.slane %v11914_v41, 5  ;;  %v9760_v22 = vrot.slane %v14456_v34, 9  ;;  %v3140_v40 = vrot.slane %v3139_v20, 4  ;;  %v14479_v34 = vld [vmem:[%s12162_s9 + $0x18] sm:$0xe] }
 0x213   : > { %10878 = vmatprep.mubr.msk.bf16.mxu1 %vm695_vm1, %v9725_v5  ;;  %11157 = vmatmul.mubr.msk.bf16.vlgmr.msra.gmra.mrb[0].mxu0 %vm695_vm1, %v10315_v29  ;;  %v3150_v44 = vrot.slane %v3149_v45, 4  ;;  %v3522_v30 = vrot.slane %v11915_v11, 5  ;;  %v3525_v54 = vrot.slane %v11916_v49, 5  ;;  %v10299_v59 = vrot.slane %v14465_v48, 9 }
 0x214   : > { %v8057_v47 = vsel %vm12923_vm7, %v10298_v37, %v8056_v43  ;;  %v8058_v2 = vrot.slane %v8056_v43, 4  ;;  %v8063_v41 = vrot.slane %v11917_v4, 5  ;;  %v3145_v5 = vsel %vm12216_vm4, %v3140_v40, %v3144_v8  ;;  %v14492_v4 = vld [vmem:[%s12162_s9 + $0x54] sm:$0xe] }
 0x215   : > { %v3155_v45 = vsel %vm12216_vm4, %v3150_v44, %v3154_v21  ;;  %v3523_v29 = vsel %vm12923_vm7, %v9760_v22, %v3522_v30  ;;  %v3524_v37 = vrot.slane %v3522_v30, 4  ;;  %v11918_v21 = vld [vmem:[%s12162_s9 + $0x50] sm:$0x1]  ;;  %v9761_v40 = vrot.slane %v14479_v34, 9  ;;  %v11919_v44 = vld [vmem:[%s12162_s9 + $0x1c] sm:$0xf] }
 0x216   : > { %v9726_v43 = vcombine.low %v3145_v5, %v3155_v45  ;;  %v8060_v20 = vsel %vm12923_vm7, %v8058_v2, %v8059_v15  ;;  %v8064_v11 = vsel %vm12923_vm7, %v10299_v59, %v8063_v41  ;;  %v8065_v49 = vrot.slane %v8063_v41, 4  ;;  %v11920_v2 = vld [vmem:[%s12162_s9 + $0x20] sm:$0x1]  ;;  %v14504_v41 = vld [vmem:[%s12162_s9 + $0x24] sm:$0xe] }
 0x217   : > { %v10316_v8 = vcombine.low %v8057_v47, %v8060_v20  ;;  %v3526_v26 = vsel %vm12923_vm7, %v3524_v37, %v3525_v54  ;;  %v8066_v22 = vrot.slane %v11918_v21, 5  ;;  %v3529_v30 = vrot.slane %v11919_v44, 5  ;;  %15623 = vst [vmem:[#allocation22_spill] sm:$0xff] %v14504_v41  ;;  %v11923_v44 = vld [vmem:[%s12162_s9 + $0x28] sm:$0xf] }
 0x218   : > { %10879 = vmatmul.mubr.msk.bf16.gmra.mrb[28].mxu1 %vm695_vm1, %v9726_v43  ;;  %v9778_v15 = vcombine.low %v3523_v29, %v3526_v26  ;;  %v3532_v59 = vrot.slane %v11920_v2, 5  ;;  %v4421_v47 = vsel %vm744_vm0, %v14143_v57, 0  ;;  %v8941_v5 = vsel %vm744_vm0, %v14063_v3, 0  ;;  %v11921_v29 = vld [vmem:[%s12162_s9 + $0x58] sm:$0xf] }
 0x219   : > { %11160 = vmatprep.mubr.msk.bf16.mxu0 %vm695_vm1, %v10316_v8  ;;  %v8067_v54 = vsel %vm12923_vm7, %v8065_v49, %v8066_v22  ;;  %v10300_v45 = vrot.slane %v14492_v4, 9  ;;  %v8070_v37 = vrot.slane %v11921_v29, 5  ;;  %v14514_v43 = vld [vmem:[%s12162_s9 + $0x60] sm:$0xe]  ;;  %v3530_v20 = vsel %vm12923_vm7, %v9761_v40, %v3529_v30  ;;  %11189 = vmatpush3.bf16.msra.mxu0 %v8941_v5  ;;  %v11922_v49 = vld [vmem:[%s12162_s9 + $0x5c] sm:$0x1] }
 0x21a   : > { %15624 = vst [vmem:[#allocation23_spill] sm:$0xff] %v14514_v43  ;;  %10884 = vmatprep.mubr.msk.bf16.mxu1 %vm695_vm1, %v9778_v15  ;;  %v10317_v57 = vcombine.low %v8064_v11, %v8067_v54  ;;  %v3531_v8 = vrot.slane %v3529_v30, 4  ;;  %v8073_v26 = vrot.slane %v11922_v49, 5  ;;  %v9762_v22 = vrot.slane %v14504_v41, 9  ;;  %v11924_v40 = vld [vmem:[%s12162_s9 + $0x2c] sm:$0x1] }
 0x21b   : > { %v8071_v3 = vsel %vm12923_vm7, %v10300_v45, %v8070_v37  ;;  %v8072_v21 = vrot.slane %v8070_v37, 4  ;;  %v3536_v2 = vrot.slane %v11923_v44, 5  ;;  %v3539_v15 = vrot.slane %v11924_v40, 5  ;;  %v11925_v54 = vld [vmem:[%s12162_s9 + $0x64] sm:$0xf] }
 0x21c   : > { %11161 = vmatmul.mubr.msk.bf16.gmra.mrb[4].mxu0 %vm695_vm1, %v10317_v57  ;;  %v3533_v11 = vsel %vm12923_vm7, %v3531_v8, %v3532_v59  ;;  %v10301_v30 = vrot.slane %v14514_v43, 9  ;;  %v8077_v5 = vrot.slane %v11925_v54, 5  ;;  %v14531_v45 = vld [vmem:[%s12162_s9 + $0x30] sm:$0xe]  ;;  %v14538_v59 = vld [vmem:[%s12162_s9 + $0x6c] sm:$0xe] }
 0x21d   : > { %v9779_v29 = vcombine.low %v3530_v20, %v3533_v11  ;;  %v8074_v37 = vsel %vm12923_vm7, %v8072_v21, %v8073_v26  ;;  %v3537_v57 = vsel %vm12923_vm7, %v9762_v22, %v3536_v2  ;;  %v3538_v49 = vrot.slane %v3536_v2, 4  ;;  %15625 = vst [vmem:[#allocation24_spill] sm:$0xff] %v14538_v59  ;;  %v11926_v54 = vld [vmem:[%s12162_s9 + $0x68] sm:$0x1]  ;;  %v11927_v21 = vld [vmem:[%s12162_s9 + $0x34] sm:$0xf] }
 0x21e   : > { %v10318_v8 = vcombine.low %v8071_v3, %v8074_v37  ;;  %v8078_v44 = vsel %vm12923_vm7, %v10301_v30, %v8077_v5  ;;  %v8079_v40 = vrot.slane %v8077_v5, 4  ;;  %v8080_v43 = vrot.slane %v11926_v54, 5  ;;  %v11928_v22 = vld [vmem:[%s12162_s9 + $0x38] sm:$0x1]  ;;  %v14549_v41 = vld [vmem:[%s12162_s9 + $0x3c] sm:$0xe] }
 0x21f   : > { %v3540_v20 = vsel %vm12923_vm7, %v3538_v49, %v3539_v15  ;;  %v9763_v26 = vrot.slane %v14531_v45, 9  ;;  %v3543_v11 = vrot.slane %v11927_v21, 5  ;;  %v3546_v2 = vrot.slane %v11928_v22, 5  ;;  %15626 = vst [vmem:[#allocation25_spill] sm:$0xff] %v14549_v41  ;;  %v11929_v5 = vld [vmem:[%s12162_s9 + $0x70] sm:$0xf] }
 0x220   : > { %10885 = vmatmul.mubr.msk.bf16.vlgmr.msra.gmra.mrb[0].mxu1 %vm695_vm1, %v9779_v29  ;;  %11164 = vmatprep.mubr.msk.bf16.mxu0 %vm695_vm1, %v10318_v8  ;;  %v9780_v3 = vcombine.low %v3537_v57, %v3540_v20  ;;  %v8081_v30 = vsel %vm12923_vm7, %v8079_v40, %v8080_v43  ;;  %v10302_v15 = vrot.slane %v14538_v59, 9  ;;  %v8084_v37 = vrot.slane %v11929_v5, 5  ;;  %v14558_v49 = vld [vmem:[%s12162_s9 + $0x78] sm:$0xe]  ;;  %v11930_v57 = vld [vmem:[%s12162_s9 + $0x74] sm:$0x1] }
 0x221   : > { %15627 = vst [vmem:[#allocation26_spill] sm:$0xff] %v14558_v49  ;;  %10917 = vmatpush3.bf16.msra.mxu1 %v4421_v47  ;;  %v10319_v54 = vcombine.low %v8078_v44, %v8081_v30  ;;  %v3544_v29 = vsel %vm12923_vm7, %v9763_v26, %v3543_v11  ;;  %v3545_v8 = vrot.slane %v3543_v11, 4  ;;  %v8087_v20 = vrot.slane %v11930_v57, 5  ;;  %v11931_v22 = vld [vmem:[%s12162_s9 + $0x40] sm:$0xf] }
 0x222   : > { %10888 = vmatprep.mubr.msk.bf16.mxu1 %vm695_vm1, %v9780_v3  ;;  %v8085_v43 = vsel %vm12923_vm7, %v10302_v15, %v8084_v37  ;;  %v8086_v40 = vrot.slane %v8084_v37, 4  ;;  %v9764_v21 = vrot.slane %v14549_v41, 9  ;;  %v3550_v47 = vrot.slane %v11931_v22, 5  ;;  %v11932_v26 = vld [vmem:[%s12162_s9 + $0x44] sm:$0x1] }
 0x223   : > { %v3547_v44 = vsel %vm12923_vm7, %v3545_v8, %v3546_v2  ;;  %v3553_v30 = vrot.slane %v11932_v26, 5  ;;  %v10303_v11 = vrot.slane %v14558_v49, 9  ;;  %v11933_v5 = vld [vmem:[%s12162_s9 + $0x7c] sm:$0xf]  ;;  %v14574_v57 = vld [vmem:[%s12162_s9 + $0x48] sm:$0xe] }
 0x224   : > { %v8091_v3 = vrot.slane %v11933_v5, 5  ;;  %11165 = vmatmul.mubr.msk.bf16.gmra.mrb[8].mxu0 %vm695_vm1, %v10319_v54  ;;  %v9781_v15 = vcombine.low %v3544_v29, %v3547_v44  ;;  %v8088_v37 = vsel %vm12923_vm7, %v8086_v40, %v8087_v20  ;;  %v3551_v2 = vsel %vm12923_vm7, %v9764_v21, %v3550_v47  ;;  %v14582_v22 = vld [vmem:[%s12162_s9 + $0x84] sm:$0xe]  ;;  %v11934_v41 = vld [vmem:[%s12162_s9 + $0x80] sm:$0x1] }
 0x225   : > { %v3552_v8 = vrot.slane %v3550_v47, 4  ;;  %15628 = vst [vmem:[#allocation27_spill] sm:$0xff] %v14582_v22  ;;  %v10320_v26 = vcombine.low %v8085_v43, %v8088_v37  ;;  %v8094_v54 = vrot.slane %v11934_v41, 5  ;;  %v9765_v20 = vrot.slane %v14574_v57, 9  ;;  %v11935_v40 = vld [vmem:[%s12162_s9 + $0x4c] sm:$0xf] }
 0x226   : > { %v8092_v5 = vsel %vm12923_vm7, %v10303_v11, %v8091_v3  ;;  %v8093_v49 = vrot.slane %v8091_v3, 4  ;;  %v3557_v21 = vrot.slane %v11935_v40, 5  ;;  %v11936_v47 = vld [vmem:[%s12162_s9 + $0x50] sm:$0x1]  ;;  %v14593_v59 = vld [vmem:[%s12162_s9 + $0x54] sm:$0xe] }
 0x227   : > { %v3554_v29 = vsel %vm12923_vm7, %v3552_v8, %v3553_v30  ;;  %v3560_v44 = vrot.slane %v11936_v47, 5  ;;  %15629 = vst [vmem:[#allocation12_spill] sm:$0xff] %v14593_v59  ;;  %11168 = vmatprep.mubr.msk.bf16.mxu0 %vm695_vm1, %v10320_v26  ;;  %v10304_v41 = vrot.slane %v14582_v22, 9  ;;  %v11937_v3 = vld [vmem:[%s12162_s9 + $0x88] sm:$0xf]  ;;  %v9766_v47 = vrot.slane %v14593_v59, 9 }
 0x228   : > { %v9782_v43 = vcombine.low %v3551_v2, %v3554_v29  ;;  %v8095_v11 = vsel %vm12923_vm7, %v8093_v49, %v8094_v54  ;;  %v8098_v30 = vrot.slane %v11937_v3, 5  ;;  %v14601_v37 = vld [vmem:[%s12162_s9 + $0x90] sm:$0xe]  ;;  %10889 = vmatmul.mubr.msk.bf16.gmra.mrb[4].mxu1 %vm695_vm1, %v9781_v15  ;;  %v3558_v40 = vsel %vm12923_vm7, %v9765_v20, %v3557_v21  ;;  %v11938_v2 = vld [vmem:[%s12162_s9 + $0x8c] sm:$0x1] }
 0x229   : > { %v10321_v8 = vcombine.low %v8092_v5, %v8095_v11  ;;  %v3559_v26 = vrot.slane %v3557_v21, 4  ;;  %v8101_v29 = vrot.slane %v11938_v2, 5  ;;  %v11939_v3 = vld [vmem:[%s12162_s9 + $0x58] sm:$0xf]  ;;  %v11940_v5 = vld [vmem:[%s12162_s9 + $0x5c] sm:$0x1] }
 0x22a   : > { %10892 = vmatprep.mubr.msk.bf16.mxu1 %vm695_vm1, %v9782_v43  ;;  %v8099_v49 = vsel %vm12923_vm7, %v10304_v41, %v8098_v30  ;;  %v8100_v54 = vrot.slane %v8098_v30, 4  ;;  %v3564_v22 = vrot.slane %v11939_v3, 5  ;;  %v3567_v11 = vrot.slane %v11940_v5, 5  ;;  %v14618_v43 = vld [vmem:[%s12162_s9 + $0x60] sm:$0xe] }
 0x22b   : > { %v3561_v15 = vsel %vm12923_vm7, %v3559_v26, %v3560_v44  ;;  %v10305_v20 = vrot.slane %v14601_v37, 9  ;;  %v8105_v21 = vrot.slane %v14074_v9, 5  ;;  %v14625_v59 = vld [vmem:[%s12162_s9 + $0x9c] sm:$0xe]  ;;  %v8108_v9 = vrot.slane %v14087_v0, 5 }
 0x22c   : > { %v9783_v2 = vcombine.low %v3558_v40, %v3561_v15  ;;  %v8102_v41 = vsel %vm12923_vm7, %v8100_v54, %v8101_v29  ;;  %v3565_v30 = vsel %vm12923_vm7, %v9766_v47, %v3564_v22  ;;  %v3566_v3 = vrot.slane %v3564_v22, 4  ;;  %11169 = vmatmul.mubr.msk.bf16.gmra.mrb[12].mxu0 %vm695_vm1, %v10321_v8  ;;  %v14637_v47 = vld [vmem:[%s12162_s9 + $0x6c] sm:$0xe] }
 0x22d   : > { %v10322_v44 = vcombine.low %v8099_v49, %v8102_v41  ;;  %v8106_v26 = vsel %vm12923_vm7, %v10305_v20, %v8105_v21  ;;  %v8107_v5 = vrot.slane %v8105_v21, 4  ;;  %v9767_v29 = vrot.slane %v14618_v43, 9 }
 0x22e   : > { %v3568_v40 = vsel %vm12923_vm7, %v3566_v3, %v3567_v11  ;;  %v3571_v54 = vrot.slane %v14097_v60, 5  ;;  %v3574_v22 = vrot.slane %v14112_v42, 5  ;;  %v10306_v15 = vrot.slane %v14625_v59, 9  ;;  %v10291_v11 = vld [vmem:[%s12162_s9 + $0xa8] sm:$0xe] }
 0x22f   : > { %11172 = vmatprep.mubr.msk.bf16.mxu0 %vm695_vm1, %v10322_v44  ;;  %v9784_v8 = vcombine.low %v3565_v30, %v3568_v40  ;;  %v8109_v49 = vsel %vm12923_vm7, %v8107_v5, %v8108_v9  ;;  %v8112_v0 = vrot.slane %v14123_v18, 5  ;;  %v8115_v42 = vrot.slane %v14132_v13, 5 }
 0x230   : > { %v10323_v20 = vcombine.low %v8106_v26, %v8109_v49  ;;  %v3572_v21 = vsel %vm12923_vm7, %v9767_v29, %v3571_v54  ;;  %v3573_v41 = vrot.slane %v3571_v54, 4  ;;  %10893 = vmatmul.mubr.msk.bf16.gmra.mrb[8].mxu1 %vm695_vm1, %v9783_v2  ;;  %v9768_v3 = vrot.slane %v14637_v47, 9  ;;  %v9753_v2 = vld [vmem:[%s12162_s9 + $0x78] sm:$0xe] }
 0x231   : > { %v8113_v30 = vsel %vm12923_vm7, %v10306_v15, %v8112_v0  ;;  %v8114_v9 = vrot.slane %v8112_v0, 4  ;;  %v3578_v44 = vrot.slane %v14149_v6, 5  ;;  %10896 = vmatprep.mubr.msk.bf16.mxu1 %vm695_vm1, %v9784_v8  ;;  %v3581_v5 = vrot.slane %v14166_v36, 5  ;;  %v10292_v0 = vld [vmem:[%s12162_s9 + $0xb4] sm:$0xe] }
 0x232   : > { %v3575_v26 = vsel %vm12923_vm7, %v3573_v41, %v3574_v22  ;;  %v10307_v40 = vrot.slane %v10291_v11, 9  ;;  %v8119_v13 = vrot.slane %v14182_v55, 5  ;;  %v8122_v11 = vrot.slane %v14192_v35, 5 }
 0x233   : > { %v9785_v29 = vcombine.low %v3572_v21, %v3575_v26  ;;  %v8116_v54 = vsel %vm12923_vm7, %v8114_v9, %v8115_v42  ;;  %v3579_v49 = vsel %vm12923_vm7, %v9768_v3, %v3578_v44  ;;  %v3580_v15 = vrot.slane %v3578_v44, 4  ;;  %v9754_v3 = vld [vmem:[%s12162_s9 + $0x84] sm:$0xe] }
 0x234   : > { %v10324_v8 = vcombine.low %v8113_v30, %v8116_v54  ;;  %v8120_v22 = vsel %vm12923_vm7, %v10307_v40, %v8119_v13  ;;  %v8121_v36 = vrot.slane %v8119_v13, 4  ;;  %11173 = vmatmul.mubr.msk.bf16.gmra.mrb[16].mxu0 %vm695_vm1, %v10323_v20  ;;  %v9769_v41 = vrot.slane %v9753_v2, 9  ;;  %v10293_v20 = vld [vmem:[%s12162_s9 + $0xc0] sm:$0xe] }
 0x235   : > { %v3582_v21 = vsel %vm12923_vm7, %v3580_v15, %v3581_v5  ;;  %v3585_v42 = vrot.slane %v14204_v39, 5  ;;  %v3588_v9 = vrot.slane %v14218_v38, 5  ;;  %v10308_v26 = vrot.slane %v10292_v0, 9 }
 0x236   : > { %11176 = vmatprep.mubr.msk.bf16.mxu0 %vm695_vm1, %v10324_v8  ;;  %v9786_v30 = vcombine.low %v3579_v49, %v3582_v21  ;;  %v8123_v44 = vsel %vm12923_vm7, %v8121_v36, %v8122_v11  ;;  %v8126_v35 = vrot.slane %v14228_v50, 5  ;;  %v8129_v2 = vrot.slane %v14240_v19, 5  ;;  %v9755_v19 = vld [vmem:[%s12162_s9 + $0x90] sm:$0xe] }
 0x237   : > { %v10325_v40 = vcombine.low %v8120_v22, %v8123_v44  ;;  %v3586_v5 = vsel %vm12923_vm7, %v9769_v41, %v3585_v42  ;;  %v3587_v13 = vrot.slane %v3585_v42, 4  ;;  %v9770_v49 = vrot.slane %v9754_v3, 9  ;;  %v10294_v42 = vld [vmem:[%s12162_s9 + $0xcc] sm:$0xe] }
 0x238   : > { %v8127_v38 = vsel %vm12923_vm7, %v10308_v26, %v8126_v35  ;;  %v8128_v54 = vrot.slane %v8126_v35, 4  ;;  %v3592_v15 = vrot.slane %v14247_v10, 5  ;;  %10897 = vmatmul.mubr.msk.bf16.gmra.mrb[12].mxu1 %vm695_vm1, %v9785_v29  ;;  %v3595_v8 = vrot.slane %v14258_v52, 5 }
 0x239   : > { %v3589_v0 = vsel %vm12923_vm7, %v3587_v13, %v3588_v9  ;;  %v10309_v22 = vrot.slane %v10293_v20, 9  ;;  %v8133_v36 = vrot.slane %v14272_v23, 5  ;;  %10900 = vmatprep.mubr.msk.bf16.mxu1 %vm695_vm1, %v9786_v30  ;;  %v8136_v44 = vrot.slane %v14282_v58, 5  ;;  %v10295_v58 = vld [vmem:[%s12162_s9 + $0xd8] sm:$0xe] }
 0x23a   : > { %v9787_v11 = vcombine.low %v3586_v5, %v3589_v0  ;;  %v8130_v21 = vsel %vm12923_vm7, %v8128_v54, %v8129_v2  ;;  %v3593_v41 = vsel %vm12923_vm7, %v9770_v49, %v3592_v15  ;;  %v3594_v29 = vrot.slane %v3592_v15, 4  ;;  %v9756_v5 = vld [vmem:[%s12162_s9 + $0x9c] sm:$0xe] }
 0x23b   : > { %v10326_v9 = vcombine.low %v8127_v38, %v8130_v21  ;;  %v8134_v52 = vsel %vm12923_vm7, %v10309_v22, %v8133_v36  ;;  %v8135_v3 = vrot.slane %v8133_v36, 4  ;;  %v9771_v26 = vrot.slane %v9755_v19, 9 }
 0x23c   : > { %v3596_v30 = vsel %vm12923_vm7, %v3594_v29, %v3595_v8  ;;  %v3599_v35 = vrot.slane %v14293_v31, 5  ;;  %v3602_v20 = vrot.slane %v14304_v28, 5  ;;  %11177 = vmatmul.mubr.msk.bf16.gmra.mrb[20].mxu0 %vm695_vm1, %v10325_v40  ;;  %v10310_v38 = vrot.slane %v10294_v42, 9  ;;  %v9757_v42 = vld [vmem:[%s12162_s9 + $0xa8] sm:$0xe] }
 0x23d   : > { %v9788_v13 = vcombine.low %v3593_v41, %v3596_v30  ;;  %v8137_v2 = vsel %vm12923_vm7, %v8135_v3, %v8136_v44  ;;  %v8140_v54 = vrot.slane %v14312_v25, 5  ;;  %11180 = vmatprep.mubr.msk.bf16.mxu0 %vm695_vm1, %v10326_v9  ;;  %v8143_v28 = vrot.slane %v14321_v17, 5 }
 0x23e   : > { %v10327_v49 = vcombine.low %v8134_v52, %v8137_v2  ;;  %v3600_v15 = vsel %vm12923_vm7, %v9771_v26, %v3599_v35  ;;  %v3601_v0 = vrot.slane %v3599_v35, 4  ;;  %v9772_v22 = vrot.slane %v9756_v5, 9  ;;  %v10347_v2 = vld [vmem:[%s12162_s9 + $0x2c] sm:$0x3] }
 0x23f   : > { %v8141_v40 = vsel %vm12923_vm7, %v10310_v38, %v8140_v54  ;;  %v8142_v8 = vrot.slane %v8140_v54, 4  ;;  %v3606_v36 = vrot.slane %v14333_v62, 5  ;;  %v3609_v21 = vrot.slane %v14344_v1, 5 }
 0x240   : > { %v3603_v19 = vsel %vm12923_vm7, %v3601_v0, %v3602_v20  ;;  %v10311_v41 = vrot.slane %v10295_v58, 9  ;;  %v8147_v29 = vrot.slane %v14354_v7, 5  ;;  %10901 = vmatmul.mubr.msk.bf16.gmra.mrb[16].mxu1 %vm695_vm1, %v9787_v11  ;;  %v8150_v26 = vrot.slane %v14362_v16, 5 }
 0x241   : > { %v9789_v17 = vcombine.low %v3600_v15, %v3603_v19  ;;  %v8144_v9 = vsel %vm12923_vm7, %v8142_v8, %v8143_v28  ;;  %v3607_v52 = vsel %vm12923_vm7, %v9772_v22, %v3606_v36  ;;  %v3608_v3 = vrot.slane %v3606_v36, 4  ;;  %10904 = vmatprep.mubr.msk.bf16.mxu1 %vm695_vm1, %v9788_v13  ;;  %v9758_v15 = vld [vmem:[%s12162_s9 + $0xb4] sm:$0xe] }
 0x242   : > { %v10328_v44 = vcombine.low %v8141_v40, %v8144_v9  ;;  %v8148_v1 = vsel %vm12923_vm7, %v10311_v41, %v8147_v29  ;;  %v8149_v30 = vrot.slane %v8147_v29, 4  ;;  %v9773_v35 = vrot.slane %v9757_v42, 9 }
 0x243   : > { %v3610_v11 = vsel %vm12923_vm7, %v3608_v3, %v3609_v21  ;;  %v3613_v20 = vrot.slane %v14371_v51, 5  ;;  %v3616_v5 = vrot.slane %v14382_v32, 5  ;;  %v8469_v54 = vshrl.u32 %v14386_v46, 16 }
 0x244   : > { %v9790_v38 = vcombine.low %v3607_v52, %v3610_v11  ;;  %v8151_v13 = vsel %vm12923_vm7, %v8149_v30, %v8150_v26  ;;  %v8472_v58 = vshll.u32 %v14386_v46, 16  ;;  %11181 = vmatmul.mubr.msk.bf16.gmra.mrb[24].mxu0 %vm695_vm1, %v10327_v49  ;;  %v15630_v40 = vshrl.u32 %v13712_v24, 16 }
 0x245   : > { %v10329_v16 = vcombine.low %v8148_v1, %v8151_v13  ;;  %v3614_v0 = vsel %vm12923_vm7, %v9773_v35, %v3613_v20  ;;  %v3615_v28 = vrot.slane %v3613_v20, 4  ;;  %11184 = vmatprep.mubr.msk.bf16.mxu0 %vm695_vm1, %v10328_v44  ;;  %v8471_v8 = vrot.slane %v8469_v54, 5  ;;  %v10348_v35 = vld [vmem:[%s12162_s9 + $0x38] sm:$0x3] }
 0x246   : > { %v8477_v32 = vrot.slane %v15630_v40, 5  ;;  %v8474_v22 = vrot.slane %v8472_v58, 6  ;;  %v15631_v36 = vshll.u32 %v13712_v24, 16  ;;  %v8483_v21 = vshrl.u32 %v10347_v2, 16 }
 0x247   : > { %v3617_v46 = vsel %vm12923_vm7, %v3615_v28, %v3616_v5  ;;  %v8486_v49 = vshll.u32 %v10347_v2, 16  ;;  %v9774_v41 = vrot.slane %v9758_v15, 9  ;;  %v3620_v29 = vrot.slane %v14406_v63, 5 }
 0x248   : > { %v8478_v19 = vrot.slane %v15631_v36, 6  ;;  %v9791_v42 = vcombine.low %v3614_v0, %v3617_v46  ;;  %v8475_v9 = vor.u32 %v8474_v22, %v8471_v8  ;;  %v8485_v3 = vrot.slane %v8483_v21, 5  ;;  %10905 = vmatmul.mubr.msk.bf16.gmra.mrb[20].mxu1 %vm695_vm1, %v9789_v17  ;;  %v15634_v21 = vld [vmem:[#allocation20_spill] sm:$0xff] }
 0x249   : > { %v8488_v44 = vrot.slane %v8486_v49, 6  ;;  %v3621_v24 = vsel %vm12923_vm7, %v9774_v41, %v3620_v29  ;;  %v3622_v1 = vrot.slane %v3620_v29, 4  ;;  %v3623_v30 = vrot.slane %v14409_v27, 5  ;;  %10908 = vmatprep.mubr.msk.bf16.mxu1 %vm695_vm1, %v9790_v38  ;;  %v9759_v27 = vld [vmem:[%s12162_s9 + $0xc0] sm:$0xe] }
 0x24a   : > { %v8479_v52 = vor.u32 %v8478_v19, %v8477_v32  ;;  %v8476_v26 = vrot.slane %v8475_v9, 4  ;;  %v8492_v20 = vshrl.u32 %v14419_v56, 16  ;;  %v8495_v5 = vshll.u32 %v14419_v56, 16 }
 0x24b   : > { %v8489_v2 = vor.u32 %v8488_v44, %v8485_v3  ;;  %v3624_v17 = vsel %vm12923_vm7, %v3622_v1, %v3623_v30  ;;  %v15632_v13 = vshrl.u32 %v13738_v33, 16  ;;  %v15633_v58 = vshll.u32 %v13738_v33, 16 }
 0x24c   : > { %v8481_v11 = vrot.slane %v8479_v52, 4  ;;  %v8480_v38 = vsel %vm13317_vm10, %v8476_v26, %v8479_v52  ;;  %v9792_v0 = vcombine.low %v3621_v24, %v3624_v17  ;;  %v8494_v28 = vrot.slane %v8492_v20, 5  ;;  %11185 = vmatmul.mubr.msk.bf16.gmra.mrb[28].mxu0 %vm695_vm1, %v10329_v16  ;;  %v10349_v52 = vld [vmem:[%s12162_s9 + $0x44] sm:$0x3] }
 0x24d   : > { %v8500_v54 = vrot.slane %v15632_v13, 5  ;;  %v8501_v15 = vrot.slane %v15633_v58, 6  ;;  %v8497_v40 = vrot.slane %v8495_v5, 6  ;;  %v8506_v8 = vshrl.u32 %v10348_v35, 16  ;;  %v15635_v26 = vld [vmem:[#allocation28_spill] sm:$0xff] }
 0x24e   : > { %v8490_v56 = vsel %vm13317_vm10, %v8481_v11, %v8489_v2  ;;  %v8509_v22 = vshll.u32 %v10348_v35, 16  ;;  %v9775_v33 = vrot.slane %v9759_v27, 9  ;;  %v3627_v46 = vrot.slane %v15634_v21, 5 }
 0x24f   : > { %v8502_v32 = vor.u32 %v8501_v15, %v8500_v54  ;;  %v10365_v36 = vcombine.low %v8480_v38, %v8490_v56  ;;  %v8498_v19 = vor.u32 %v8497_v40, %v8494_v28  ;;  %v8508_v41 = vrot.slane %v8506_v8, 5  ;;  %v9811_v15 = vld [vmem:[%s12162_s9 + $0x14] sm:$0x3]  ;;  %v15638_v40 = vld [vmem:[#allocation21_spill] sm:$0xff] }
 0x250   : > { %v8511_v29 = vrot.slane %v8509_v22, 6  ;;  %v3630_v9 = vrot.slane %v14439_v14, 5  ;;  %v3628_v3 = vsel %vm12923_vm7, %v9775_v33, %v3627_v46  ;;  %v3629_v44 = vrot.slane %v3627_v46, 4  ;;  %10909 = vmatmul.mubr.msk.bf16.gmra.mrb[24].mxu1 %vm695_vm1, %v9791_v42 }
 0x251   : > { %v8504_v49 = vrot.slane %v8502_v32, 4  ;;  %11190 = vmatprep.mubr.msk.bf16.mxu0 %vm695_vm1, %v10365_v36  ;;  %v8499_v16 = vrot.slane %v8498_v19, 4  ;;  %v8515_v24 = vshrl.u32 %v14445_v61, 16  ;;  %v8518_v30 = vshll.u32 %v14445_v61, 16  ;;  %10912 = vmatprep.mubr.msk.bf16.mxu1 %vm695_vm1, %v9792_v0 }
 0x252   : > { %v8512_v1 = vor.u32 %v8511_v29, %v8508_v41  ;;  %v15636_v11 = vshrl.u32 %v15635_v26, 16  ;;  %v15637_v14 = vshll.u32 %v15635_v26, 16  ;;  %v3631_v2 = vsel %vm12923_vm7, %v3629_v44, %v3630_v9 }
 0x253   : > { %v8503_v5 = vsel %vm13317_vm10, %v8499_v16, %v8502_v32  ;;  %v8517_v17 = vrot.slane %v8515_v24, 5  ;;  %v8529_v13 = vshrl.u32 %v10349_v52, 16  ;;  %v9793_v61 = vcombine.low %v3628_v3, %v3631_v2 }
 0x254   : > { %v8523_v35 = vrot.slane %v15636_v11, 5  ;;  %v8524_v20 = vrot.slane %v15637_v14, 6  ;;  %v8513_v42 = vsel %vm13317_vm10, %v8504_v49, %v8512_v1  ;;  %v8520_v54 = vrot.slane %v8518_v30, 6 }
 0x255   : > { %v10366_v27 = vcombine.low %v8503_v5, %v8513_v42  ;;  %v8531_v38 = vrot.slane %v8529_v13, 5  ;;  %v8532_v28 = vshll.u32 %v10349_v52, 16  ;;  %v3949_v0 = vshrl.u32 %v15638_v40, 16 }
 0x256   : > { %v8525_v58 = vor.u32 %v8524_v20, %v8523_v35  ;;  %v8521_v56 = vor.u32 %v8520_v54, %v8517_v17  ;;  %v3952_v32 = vshll.u32 %v15638_v40, 16  ;;  %v15640_v22 = vshrl.u32 %v15639_v12, 16  ;;  %v10350_v35 = vld [vmem:[%s12162_s9 + $0x50] sm:$0x3] }
 0x257   : > { %11191 = vmatmul.mubr.msk.bf16.vlgmr.msra.gmra.mrb[0].mxu0 %vm695_vm1, %v10366_v27  ;;  %v8534_v19 = vrot.slane %v8532_v28, 6  ;;  %v3951_v33 = vrot.slane %v3949_v0, 5  ;;  %v15641_v46 = vshll.u32 %v15639_v12, 16  ;;  %v3963_v41 = vshrl.u32 %v9811_v15, 16  ;;  %v15642_v17 = vld [vmem:[#allocation9_spill] sm:$0xff] }
 0x258   : > { %v8527_v8 = vrot.slane %v8525_v58, 4  ;;  %v3957_v36 = vrot.slane %v15640_v22, 5  ;;  %v8522_v29 = vrot.slane %v8521_v56, 4  ;;  %v3954_v9 = vrot.slane %v3952_v32, 6  ;;  %10913 = vmatmul.mubr.msk.bf16.gmra.mrb[28].mxu1 %vm695_vm1, %v9793_v61  ;;  %v9812_v32 = vld [vmem:[%s12162_s9 + $0x20] sm:$0x3] }
 0x259   : > { %v3958_v49 = vrot.slane %v15641_v46, 6  ;;  %v3966_v52 = vshll.u32 %v9811_v15, 16  ;;  %v8538_v16 = vshrl.u32 %v14465_v48, 16  ;;  %v8535_v3 = vor.u32 %v8534_v19, %v8531_v38 }
 0x25a   : > { %v3965_v24 = vrot.slane %v3963_v41, 5  ;;  %v8541_v1 = vshll.u32 %v14465_v48, 16  ;;  %v8526_v30 = vsel %vm13317_vm10, %v8522_v29, %v8525_v58  ;;  %v3955_v26 = vor.u32 %v3954_v9, %v3951_v33  ;;  %v15645_v29 = vld [vmem:[#allocation10_spill] sm:$0xff] }
 0x25b   : > { %v3959_v44 = vor.u32 %v3958_v49, %v3957_v36  ;;  %v3968_v11 = vrot.slane %v3966_v52, 6  ;;  %v8540_v14 = vrot.slane %v8538_v16, 5  ;;  %v8536_v20 = vsel %vm13317_vm10, %v8527_v8, %v8535_v3 }
 0x25c   : > { %v8543_v2 = vrot.slane %v8541_v1, 6  ;;  %v15643_v13 = vshrl.u32 %v15642_v17, 16  ;;  %v10367_v54 = vcombine.low %v8526_v30, %v8536_v20  ;;  %v3956_v48 = vrot.slane %v3955_v26, 4  ;;  %v10351_v26 = vld [vmem:[%s12162_s9 + $0x5c] sm:$0x3] }
 0x25d   : > { %v3961_v5 = vrot.slane %v3959_v44, 4  ;;  %v3969_v15 = vor.u32 %v3968_v11, %v3965_v24  ;;  %v15644_v61 = vshll.u32 %v15642_v17, 16  ;;  %v8552_v38 = vshrl.u32 %v10350_v35, 16 }
 0x25e   : > { %v8546_v42 = vrot.slane %v15643_v13, 5  ;;  %v8544_v58 = vor.u32 %v8543_v2, %v8540_v14  ;;  %v8555_v28 = vshll.u32 %v10350_v35, 16  ;;  %v3972_v40 = vshrl.u32 %v14479_v34, 16  ;;  %11194 = vmatprep.mubr.msk.bf16.mxu0 %vm695_vm1, %v10367_v54  ;;  %v15648_v2 = vld [vmem:[#allocation14_spill] sm:$0xff] }
 0x25f   : > { %v8547_v27 = vrot.slane %v15644_v61, 6  ;;  %v3960_v0 = vsel %vm13317_vm10, %v3956_v48, %v3959_v44  ;;  %v3970_v56 = vsel %vm13317_vm10, %v3961_v5, %v3969_v15  ;;  %v3975_v12 = vshll.u32 %v14479_v34, 16 }
 0x260   : > { %v9829_v22 = vcombine.low %v3960_v0, %v3970_v56  ;;  %v8545_v36 = vrot.slane %v8544_v58, 4  ;;  %v8554_v19 = vrot.slane %v8552_v38, 5  ;;  %v8557_v33 = vrot.slane %v8555_v28, 6  ;;  %v15651_v56 = vld [vmem:[#allocation22_spill] sm:$0xff] }
 0x261   : > { %v8548_v8 = vor.u32 %v8547_v27, %v8546_v42  ;;  %v3974_v49 = vrot.slane %v3972_v40, 5  ;;  %v3977_v41 = vrot.slane %v3975_v12, 6  ;;  %v15646_v9 = vshrl.u32 %v15645_v29, 16 }
 0x262   : > { %10918 = vmatprep.mubr.msk.bf16.mxu1 %vm695_vm1, %v9829_v22  ;;  %v8558_v3 = vor.u32 %v8557_v33, %v8554_v19  ;;  %v15647_v44 = vshll.u32 %v15645_v29, 16  ;;  %v3986_v24 = vshrl.u32 %v9812_v32, 16  ;;  %v3989_v30 = vshll.u32 %v9812_v32, 16 }
 0x263   : > { %v8550_v46 = vrot.slane %v8548_v8, 4  ;;  %v3980_v52 = vrot.slane %v15646_v9, 5  ;;  %v8549_v16 = vsel %vm13317_vm10, %v8545_v36, %v8548_v8  ;;  %v3978_v1 = vor.u32 %v3977_v41, %v3974_v49  ;;  %v9813_v36 = vld [vmem:[%s12162_s9 + $0x2c] sm:$0x3] }
 0x264   : > { %v3981_v34 = vrot.slane %v15647_v44, 6  ;;  %v8561_v11 = vshrl.u32 %v14492_v4, 16  ;;  %v8564_v35 = vshll.u32 %v14492_v4, 16  ;;  %v3988_v5 = vrot.slane %v3986_v24, 5  ;;  %v15652_v41 = vld [vmem:[#allocation13_spill] sm:$0xff] }
 0x265   : > { %v8559_v14 = vsel %vm13317_vm10, %v8550_v46, %v8558_v3  ;;  %v15649_v17 = vshrl.u32 %v15648_v2, 16  ;;  %v3979_v54 = vrot.slane %v3978_v1, 4  ;;  %v3991_v48 = vrot.slane %v3989_v30, 6 }
 0x266   : > { %v3982_v20 = vor.u32 %v3981_v34, %v3980_v52  ;;  %v10368_v42 = vcombine.low %v8549_v16, %v8559_v14  ;;  %v8563_v15 = vrot.slane %v8561_v11, 5  ;;  %v8566_v27 = vrot.slane %v8564_v35, 6  ;;  %v15655_v14 = vld [vmem:[#allocation23_spill] sm:$0xff] }
 0x267   : > { %v8569_v13 = vrot.slane %v15649_v17, 5  ;;  %v15650_v58 = vshll.u32 %v15648_v2, 16  ;;  %v8575_v28 = vshrl.u32 %v10351_v26, 16  ;;  %v3992_v40 = vor.u32 %v3991_v48, %v3988_v5 }
 0x268   : > { %v3984_v61 = vrot.slane %v3982_v20, 4  ;;  %11195 = vmatmul.mubr.msk.bf16.gmra.mrb[4].mxu0 %vm695_vm1, %v10368_v42  ;;  %v3983_v4 = vsel %vm13317_vm10, %v3979_v54, %v3982_v20  ;;  %v8578_v0 = vshll.u32 %v10351_v26, 16  ;;  %v3995_v8 = vshrl.u32 %v15651_v56, 16  ;;  %v10352_v54 = vld [vmem:[%s12162_s9 + $0x68] sm:$0x3] }
 0x269   : > { %v8570_v38 = vrot.slane %v15650_v58, 6  ;;  %v8567_v32 = vor.u32 %v8566_v27, %v8563_v15  ;;  %v8577_v22 = vrot.slane %v8575_v28, 5  ;;  %v3998_v19 = vshll.u32 %v15651_v56, 16  ;;  %v15656_v28 = vld [vmem:[#allocation15_spill] sm:$0xff] }
 0x26a   : > { %v3993_v33 = vsel %vm13317_vm10, %v3984_v61, %v3992_v40  ;;  %v8580_v46 = vrot.slane %v8578_v0, 6  ;;  %v3997_v49 = vrot.slane %v3995_v8, 5  ;;  %v15653_v29 = vshrl.u32 %v15652_v41, 16 }
 0x26b   : > { %v8571_v12 = vor.u32 %v8570_v38, %v8569_v13  ;;  %v9830_v52 = vcombine.low %v3983_v4, %v3993_v33  ;;  %v8568_v16 = vrot.slane %v8567_v32, 4  ;;  %v4000_v44 = vrot.slane %v3998_v19, 6  ;;  %v9814_v33 = vld [vmem:[%s12162_s9 + $0x38] sm:$0x3] }
 0x26c   : > { %v4003_v9 = vrot.slane %v15653_v29, 5  ;;  %v8581_v34 = vor.u32 %v8580_v46, %v8577_v22  ;;  %v15654_v24 = vshll.u32 %v15652_v41, 16  ;;  %v4009_v30 = vshrl.u32 %v9813_v36, 16 }
 0x26d   : > { %v8573_v3 = vrot.slane %v8571_v12, 4  ;;  %v4012_v26 = vshll.u32 %v9813_v36, 16  ;;  %10919 = vmatmul.mubr.msk.bf16.vlgmr.msra.gmra.mrb[0].mxu1 %vm695_vm1, %v9830_v52  ;;  %v8572_v11 = vsel %vm13317_vm10, %v8568_v16, %v8571_v12  ;;  %v4001_v35 = vor.u32 %v4000_v44, %v3997_v49 }
 0x26e   : > { %v4004_v1 = vrot.slane %v15654_v24, 6  ;;  %v8584_v20 = vshrl.u32 %v15655_v14, 16  ;;  %v8587_v5 = vshll.u32 %v15655_v14, 16  ;;  %v4011_v13 = vrot.slane %v4009_v30, 5 }
 0x26f   : > { %v8582_v2 = vsel %vm13317_vm10, %v8573_v3, %v8581_v34  ;;  %v4014_v42 = vrot.slane %v4012_v26, 6  ;;  %v4002_v15 = vrot.slane %v4001_v35, 4  ;;  %v15657_v4 = vshrl.u32 %v15656_v28, 16  ;;  %v15659_v34 = vld [vmem:[#allocation8_spill] sm:$0xff] }
 0x270   : > { %v4005_v17 = vor.u32 %v4004_v1, %v4003_v9  ;;  %v10369_v48 = vcombine.low %v8572_v11, %v8582_v2  ;;  %v8586_v61 = vrot.slane %v8584_v20, 5  ;;  %v8589_v27 = vrot.slane %v8587_v5, 6  ;;  %v10353_v5 = vld [vmem:[%s12162_s9 + $0x74] sm:$0x3]  ;;  %v15662_v2 = vld [vmem:[#allocation24_spill] sm:$0xff] }
 0x271   : > { %v4015_v38 = vor.u32 %v4014_v42, %v4011_v13  ;;  %v8592_v40 = vrot.slane %v15657_v4, 5  ;;  %v15658_v0 = vshll.u32 %v15656_v28, 16  ;;  %v8598_v12 = vshrl.u32 %v10352_v54, 16 }
 0x272   : > { %v4007_v58 = vrot.slane %v4005_v17, 4  ;;  %11198 = vmatprep.mubr.msk.bf16.mxu0 %vm695_vm1, %v10369_v48  ;;  %v4006_v8 = vsel %vm13317_vm10, %v4002_v15, %v4005_v17  ;;  %v8590_v32 = vor.u32 %v8589_v27, %v8586_v61  ;;  %v8601_v22 = vshll.u32 %v10352_v54, 16  ;;  %v15663_v15 = vld [vmem:[#allocation16_spill] sm:$0xff] }
 0x273   : > { %v8593_v56 = vrot.slane %v15658_v0, 6  ;;  %v4018_v46 = vshrl.u32 %v14531_v45, 16  ;;  %v4021_v49 = vshll.u32 %v14531_v45, 16  ;;  %v8600_v9 = vrot.slane %v8598_v12, 5 }
 0x274   : > { %v4016_v36 = vsel %vm13317_vm10, %v4007_v58, %v4015_v38  ;;  %v8591_v29 = vrot.slane %v8590_v32, 4  ;;  %v8603_v52 = vrot.slane %v8601_v22, 6  ;;  %v15660_v24 = vshrl.u32 %v15659_v34, 16 }
 0x275   : > { %v8594_v19 = vor.u32 %v8593_v56, %v8592_v40  ;;  %v9831_v41 = vcombine.low %v4006_v8, %v4016_v36  ;;  %v4020_v3 = vrot.slane %v4018_v46, 5  ;;  %v4023_v44 = vrot.slane %v4021_v49, 6 }
 0x276   : > { %v4026_v1 = vrot.slane %v15660_v24, 5  ;;  %v8604_v26 = vor.u32 %v8603_v52, %v8600_v9  ;;  %v15661_v11 = vshll.u32 %v15659_v34, 16  ;;  %v4032_v35 = vshrl.u32 %v9814_v33, 16 }
 0x277   : > { %v8596_v16 = vrot.slane %v8594_v19, 4  ;;  %10922 = vmatprep.mubr.msk.bf16.mxu1 %vm695_vm1, %v9831_v41  ;;  %v8595_v30 = vsel %vm13317_vm10, %v8591_v29, %v8594_v19  ;;  %v4024_v14 = vor.u32 %v4023_v44, %v4020_v3  ;;  %v4035_v20 = vshll.u32 %v9814_v33, 16  ;;  %v15666_v19 = vld [vmem:[#allocation25_spill] sm:$0xff]  ;;  %v9815_v29 = vld [vmem:[%s12162_s9 + $0x44] sm:$0x3]  ;;  %v15667_v44 = vld [vmem:[#allocation11_spill] sm:$0xff] }
 0x278   : > { %v4027_v45 = vrot.slane %v15661_v11, 6  ;;  %v8607_v17 = vshrl.u32 %v15662_v2, 16  ;;  %v8610_v13 = vshll.u32 %v15662_v2, 16  ;;  %v4034_v48 = vrot.slane %v4032_v35, 5 }
 0x279   : > { %v8605_v42 = vsel %vm13317_vm10, %v8596_v16, %v8604_v26  ;;  %v15664_v61 = vshrl.u32 %v15663_v15, 16  ;;  %v4025_v38 = vrot.slane %v4024_v14, 4  ;;  %v4037_v28 = vrot.slane %v4035_v20, 6 }
 0x27a   : > { %v4028_v54 = vor.u32 %v4027_v45, %v4026_v1  ;;  %v10370_v58 = vcombine.low %v8595_v30, %v8605_v42  ;;  %v8609_v4 = vrot.slane %v8607_v17, 5  ;;  %v8612_v0 = vrot.slane %v8610_v13, 6  ;;  %v15670_v13 = vld [vmem:[#allocation26_spill] sm:$0xff] }
 0x27b   : > { %v8615_v27 = vrot.slane %v15664_v61, 5  ;;  %v15665_v56 = vshll.u32 %v15663_v15, 16  ;;  %v8621_v32 = vshrl.u32 %v10353_v5, 16  ;;  %v4038_v22 = vor.u32 %v4037_v28, %v4034_v48 }
 0x27c   : > { %v4030_v40 = vrot.slane %v4028_v54, 4  ;;  %11199 = vmatmul.mubr.msk.bf16.gmra.mrb[8].mxu0 %vm695_vm1, %v10370_v58  ;;  %v4029_v12 = vsel %vm13317_vm10, %v4025_v38, %v4028_v54  ;;  %v8624_v36 = vshll.u32 %v10353_v5, 16  ;;  %v4041_v33 = vshrl.u32 %v15666_v19, 16  ;;  %v10354_v58 = vld [vmem:[%s12162_s9 + $0x80] sm:$0x3] }
 0x27d   : > { %v8616_v8 = vrot.slane %v15665_v56, 6  ;;  %v8613_v46 = vor.u32 %v8612_v0, %v8609_v4  ;;  %v8623_v41 = vrot.slane %v8621_v32, 5  ;;  %v4044_v9 = vshll.u32 %v15666_v19, 16 }
 0x27e   : > { %v4039_v52 = vsel %vm13317_vm10, %v4030_v40, %v4038_v22  ;;  %v8626_v16 = vrot.slane %v8624_v36, 6  ;;  %v4043_v3 = vrot.slane %v4041_v33, 5  ;;  %v15668_v34 = vshrl.u32 %v15667_v44, 16 }
 0x27f   : > { %v8617_v49 = vor.u32 %v8616_v8, %v8615_v27  ;;  %v9832_v1 = vcombine.low %v4029_v12, %v4039_v52  ;;  %v8614_v30 = vrot.slane %v8613_v46, 4  ;;  %v4046_v11 = vrot.slane %v4044_v9, 6  ;;  %v15671_v8 = vld [vmem:[#allocation17_spill] sm:$0xff] }
 0x280   : > { %v4049_v24 = vrot.slane %v15668_v34, 5  ;;  %v8627_v45 = vor.u32 %v8626_v16, %v8623_v41  ;;  %v15669_v35 = vshll.u32 %v15667_v44, 16  ;;  %v4055_v20 = vshrl.u32 %v9815_v29, 16  ;;  %v9816_v9 = vld [vmem:[%s12162_s9 + $0x50] sm:$0x3] }
 0x281   : > { %v8619_v26 = vrot.slane %v8617_v49, 4  ;;  %v4058_v5 = vshll.u32 %v9815_v29, 16  ;;  %10923 = vmatmul.mubr.msk.bf16.gmra.mrb[4].mxu1 %vm695_vm1, %v9832_v1  ;;  %v8618_v2 = vsel %vm13317_vm10, %v8614_v30, %v8617_v49  ;;  %v4047_v17 = vor.u32 %v4046_v11, %v4043_v3  ;;  %v15674_v11 = vld [vmem:[#allocation30_spill] sm:$0xff] }
 0x282   : > { %v4050_v14 = vrot.slane %v15669_v35, 6  ;;  %v8630_v42 = vshrl.u32 %v15670_v13, 16  ;;  %v8633_v54 = vshll.u32 %v15670_v13, 16  ;;  %v4057_v61 = vrot.slane %v4055_v20, 5 }
 0x283   : > { %v8628_v48 = vsel %vm13317_vm10, %v8619_v26, %v8627_v45  ;;  %v4060_v27 = vrot.slane %v4058_v5, 6  ;;  %v4048_v28 = vrot.slane %v4047_v17, 4  ;;  %v15672_v32 = vshrl.u32 %v15671_v8, 16 }
 0x284   : > { %v4051_v15 = vor.u32 %v4050_v14, %v4049_v24  ;;  %v10371_v38 = vcombine.low %v8618_v2, %v8628_v48  ;;  %v8632_v4 = vrot.slane %v8630_v42, 5  ;;  %v8635_v40 = vrot.slane %v8633_v54, 6  ;;  %v10355_v42 = vld [vmem:[%s12162_s9 + $0x8c] sm:$0x3]  ;;  %v15677_v54 = vld [vmem:[#allocation27_spill] sm:$0xff] }
 0x285   : > { %v4061_v56 = vor.u32 %v4060_v27, %v4057_v61  ;;  %v8638_v12 = vrot.slane %v15672_v32, 5  ;;  %v15673_v22 = vshll.u32 %v15671_v8, 16  ;;  %v8644_v46 = vshrl.u32 %v10354_v58, 16 }
 0x286   : > { %v4053_v0 = vrot.slane %v4051_v15, 4  ;;  %11202 = vmatprep.mubr.msk.bf16.mxu0 %vm695_vm1, %v10371_v38  ;;  %v4052_v19 = vsel %vm13317_vm10, %v4048_v28, %v4051_v15  ;;  %v8636_v33 = vor.u32 %v8635_v40, %v8632_v4  ;;  %v8647_v49 = vshll.u32 %v10354_v58, 16  ;;  %v15678_v38 = vld [vmem:[#allocation18_spill] sm:$0xff] }
 0x287   : > { %v8639_v36 = vrot.slane %v15673_v22, 6  ;;  %v4064_v52 = vshrl.u32 %v14574_v57, 16  ;;  %v4067_v16 = vshll.u32 %v14574_v57, 16  ;;  %v8646_v34 = vrot.slane %v8644_v46, 5 }
 0x288   : > { %v4062_v41 = vsel %vm13317_vm10, %v4053_v0, %v4061_v56  ;;  %v8637_v44 = vrot.slane %v8636_v33, 4  ;;  %v8649_v24 = vrot.slane %v8647_v49, 6  ;;  %v15675_v45 = vshrl.u32 %v15674_v11, 16 }
 0x289   : > { %v8640_v29 = vor.u32 %v8639_v36, %v8638_v12  ;;  %v9833_v3 = vcombine.low %v4052_v19, %v4062_v41  ;;  %v4066_v30 = vrot.slane %v4064_v52, 5  ;;  %v4069_v26 = vrot.slane %v4067_v16, 6  ;;  %v15681_v41 = vld [vmem:[#allocation12_spill] sm:$0xff] }
 0x28a   : > { %v4072_v35 = vrot.slane %v15675_v45, 5  ;;  %v8650_v20 = vor.u32 %v8649_v24, %v8646_v34  ;;  %v15676_v5 = vshll.u32 %v15674_v11, 16  ;;  %v4078_v2 = vshrl.u32 %v9816_v9, 16 }
 0x28b   : > { %v8642_v1 = vrot.slane %v8640_v29, 4  ;;  %10926 = vmatprep.mubr.msk.bf16.mxu1 %vm695_vm1, %v9833_v3  ;;  %v8641_v14 = vsel %vm13317_vm10, %v8637_v44, %v8640_v29  ;;  %v4070_v17 = vor.u32 %v4069_v26, %v4066_v30  ;;  %v4081_v13 = vshll.u32 %v9816_v9, 16  ;;  %v9817_v3 = vld [vmem:[%s12162_s9 + $0x5c] sm:$0x3] }
 0x28c   : > { %v4073_v57 = vrot.slane %v15676_v5, 6  ;;  %v8653_v48 = vshrl.u32 %v15677_v54, 16  ;;  %v8656_v15 = vshll.u32 %v15677_v54, 16  ;;  %v4080_v58 = vrot.slane %v4078_v2, 5  ;;  %v15682_v30 = vld [vmem:[#allocation19_spill] sm:$0xff] }
 0x28d   : > { %v8651_v61 = vsel %vm13317_vm10, %v8642_v1, %v8650_v20  ;;  %v15679_v28 = vshrl.u32 %v15678_v38, 16  ;;  %v4071_v0 = vrot.slane %v4070_v17, 4  ;;  %v4083_v56 = vrot.slane %v4081_v13, 6 }
 0x28e   : > { %v4074_v27 = vor.u32 %v4073_v57, %v4072_v35  ;;  %v10372_v40 = vcombine.low %v8641_v14, %v8651_v61  ;;  %v8655_v8 = vrot.slane %v8653_v48, 5  ;;  %v8658_v12 = vrot.slane %v8656_v15, 6 }
 0x28f   : > { %v8661_v4 = vrot.slane %v15679_v28, 5  ;;  %v15680_v22 = vshll.u32 %v15678_v38, 16  ;;  %v8667_v19 = vshrl.u32 %v10355_v42, 16  ;;  %v4084_v46 = vor.u32 %v4083_v56, %v4080_v58  ;;  %v10356_v28 = vld [vmem:[%s12162_s9 + $0x98] sm:$0x3] }
 0x290   : > { %v4076_v32 = vrot.slane %v4074_v27, 4  ;;  %11203 = vmatmul.mubr.msk.bf16.gmra.mrb[12].mxu0 %vm695_vm1, %v10372_v40  ;;  %v4075_v33 = vsel %vm13317_vm10, %v4071_v0, %v4074_v27  ;;  %v8670_v49 = vshll.u32 %v10355_v42, 16  ;;  %v4087_v29 = vshrl.u32 %v15681_v41, 16 }
 0x291   : > { %v8662_v36 = vrot.slane %v15680_v22, 6  ;;  %v8659_v9 = vor.u32 %v8658_v12, %v8655_v8  ;;  %v8669_v16 = vrot.slane %v8667_v19, 5  ;;  %v4090_v44 = vshll.u32 %v15681_v41, 16  ;;  %v15685_v12 = vld [vmem:[#allocation31_spill] sm:$0xff] }
 0x292   : > { %v4085_v34 = vsel %vm13317_vm10, %v4076_v32, %v4084_v46  ;;  %v8672_v24 = vrot.slane %v8670_v49, 6  ;;  %v4089_v1 = vrot.slane %v4087_v29, 5  ;;  %v15683_v26 = vshrl.u32 %v15682_v30, 16 }
 0x293   : > { %v8663_v52 = vor.u32 %v8662_v36, %v8661_v4  ;;  %v9834_v45 = vcombine.low %v4075_v33, %v4085_v34  ;;  %v8660_v35 = vrot.slane %v8659_v9, 4  ;;  %v4092_v20 = vrot.slane %v4090_v44, 6 }
 0x294   : > { %v4095_v11 = vrot.slane %v15683_v26, 5  ;;  %v8673_v5 = vor.u32 %v8672_v24, %v8669_v16  ;;  %v15684_v57 = vshll.u32 %v15682_v30, 16  ;;  %v4101_v17 = vshrl.u32 %v9817_v3, 16 }
 0x295   : > { %v8665_v14 = vrot.slane %v8663_v52, 4  ;;  %v4104_v13 = vshll.u32 %v9817_v3, 16  ;;  %10927 = vmatmul.mubr.msk.bf16.gmra.mrb[8].mxu1 %vm695_vm1, %v9834_v45  ;;  %v8664_v42 = vsel %vm13317_vm10, %v8660_v35, %v8663_v52  ;;  %v4093_v54 = vor.u32 %v4092_v20, %v4089_v1  ;;  %v9818_v52 = vld [vmem:[%s12162_s9 + $0x68] sm:$0x3] }
 0x296   : > { %v4096_v2 = vrot.slane %v15684_v57, 6  ;;  %v8676_v48 = vshrl.u32 %v14601_v37, 16  ;;  %v8679_v15 = vshll.u32 %v14601_v37, 16  ;;  %v4103_v58 = vrot.slane %v4101_v17, 5 }
 0x297   : > { %v8674_v61 = vsel %vm13317_vm10, %v8665_v14, %v8673_v5  ;;  %v4106_v38 = vrot.slane %v4104_v13, 6  ;;  %v4094_v40 = vrot.slane %v4093_v54, 4  ;;  %v15686_v22 = vshrl.u32 %v15685_v12, 16  ;;  %v10357_v13 = vld [vmem:[%s12162_s9 + $0xa4] sm:$0x3] }
 0x298   : > { %v4097_v27 = vor.u32 %v4096_v2, %v4095_v11  ;;  %v10373_v4 = vcombine.low %v8664_v42, %v8674_v61  ;;  %v8678_v0 = vrot.slane %v8676_v48, 5  ;;  %v8681_v56 = vrot.slane %v8679_v15, 6 }
 0x299   : > { %v4107_v32 = vor.u32 %v4106_v38, %v4103_v58  ;;  %v8684_v36 = vrot.slane %v15686_v22, 5  ;;  %v15687_v19 = vshll.u32 %v15685_v12, 16  ;;  %v8690_v49 = vshrl.u32 %v10356_v28, 16 }
 0x29a   : > { %v4099_v8 = vrot.slane %v4097_v27, 4  ;;  %11206 = vmatprep.mubr.msk.bf16.mxu0 %vm695_vm1, %v10373_v4  ;;  %v4098_v33 = vsel %vm13317_vm10, %v4094_v40, %v4097_v27  ;;  %v8682_v46 = vor.u32 %v8681_v56, %v8678_v0  ;;  %v8693_v41 = vshll.u32 %v10356_v28, 16 }
 0x29b   : > { %v8685_v37 = vrot.slane %v15687_v19, 6  ;;  %v4110_v16 = vshrl.u32 %v14618_v43, 16  ;;  %v4113_v3 = vshll.u32 %v14618_v43, 16  ;;  %v8692_v24 = vrot.slane %v8690_v49, 5 }
 0x29c   : > { %v4108_v29 = vsel %vm13317_vm10, %v4099_v8, %v4107_v32  ;;  %v8683_v34 = vrot.slane %v8682_v46, 4  ;;  %v8695_v1 = vrot.slane %v8693_v41, 6  ;;  %v15688_v45 = vshrl.u32 %v14097_v60, 16  ;;  %v9819_v46 = vld [vmem:[%s12162_s9 + $0x74] sm:$0x3] }
 0x29d   : > { %v8686_v9 = vor.u32 %v8685_v37, %v8684_v36  ;;  %v9835_v44 = vcombine.low %v4098_v33, %v4108_v29  ;;  %v4112_v26 = vrot.slane %v4110_v16, 5  ;;  %v4115_v11 = vrot.slane %v4113_v3, 6 }
 0x29e   : > { %v4118_v35 = vrot.slane %v15688_v45, 5  ;;  %v8696_v20 = vor.u32 %v8695_v1, %v8692_v24  ;;  %v15689_v5 = vshll.u32 %v14097_v60, 16  ;;  %v4124_v57 = vshrl.u32 %v9818_v52, 16 }
 0x29f   : > { %v8688_v30 = vrot.slane %v8686_v9, 4  ;;  %10930 = vmatprep.mubr.msk.bf16.mxu1 %vm695_vm1, %v9835_v44  ;;  %v8687_v14 = vsel %vm13317_vm10, %v8683_v34, %v8686_v9  ;;  %v4116_v2 = vor.u32 %v4115_v11, %v4112_v26  ;;  %v4127_v17 = vshll.u32 %v9818_v52, 16 }
 0x2a0   : > { %v4119_v43 = vrot.slane %v15689_v5, 6  ;;  %v8699_v42 = vshrl.u32 %v14625_v59, 16  ;;  %v8702_v54 = vshll.u32 %v14625_v59, 16  ;;  %v4126_v61 = vrot.slane %v4124_v57, 5 }
 0x2a1   : > { %v8697_v48 = vsel %vm13317_vm10, %v8688_v30, %v8696_v20  ;;  %v15690_v27 = vshrl.u32 %v14123_v18, 16  ;;  %v4117_v60 = vrot.slane %v4116_v2, 4  ;;  %v4129_v28 = vrot.slane %v4127_v17, 6  ;;  %v10358_v17 = vld [vmem:[%s12162_s9 + $0xb0] sm:$0x3] }
 0x2a2   : > { %v4120_v15 = vor.u32 %v4119_v43, %v4118_v35  ;;  %v10374_v38 = vcombine.low %v8687_v14, %v8697_v48  ;;  %v8701_v4 = vrot.slane %v8699_v42, 5  ;;  %v8704_v0 = vrot.slane %v8702_v54, 6  ;;  %v11941_v35 = vld [vmem:[%s12162_s9 + $0xa8] sm:$0xe] }
 0x2a3   : > { %v8707_v58 = vrot.slane %v15690_v27, 5  ;;  %v15691_v56 = vshll.u32 %v14123_v18, 16  ;;  %v8713_v32 = vshrl.u32 %v10357_v13, 16  ;;  %v4130_v12 = vor.u32 %v4129_v28, %v4126_v61 }
 0x2a4   : > { %v4122_v40 = vrot.slane %v4120_v15, 4  ;;  %11207 = vmatmul.mubr.msk.bf16.gmra.mrb[16].mxu0 %vm695_vm1, %v10374_v38  ;;  %v4121_v59 = vsel %vm13317_vm10, %v4117_v60, %v4120_v15  ;;  %v8716_v22 = vshll.u32 %v10357_v13, 16  ;;  %v4133_v36 = vshrl.u32 %v14637_v47, 16 }
 0x2a5   : > { %v8708_v8 = vrot.slane %v15691_v56, 6  ;;  %v8705_v19 = vor.u32 %v8704_v0, %v8701_v4  ;;  %v8715_v33 = vrot.slane %v8713_v32, 5  ;;  %v4136_v49 = vshll.u32 %v14637_v47, 16  ;;  %v11942_v32 = vld [vmem:[%s12162_s9 + $0x78] sm:$0xe] }
 0x2a6   : > { %v4131_v18 = vsel %vm13317_vm10, %v4122_v40, %v4130_v12  ;;  %v8718_v41 = vrot.slane %v8716_v22, 6  ;;  %v4135_v29 = vrot.slane %v4133_v36, 5  ;;  %v15692_v9 = vshrl.u32 %v14149_v6, 16 }
 0x2a7   : > { %v8709_v37 = vor.u32 %v8708_v8, %v8707_v58  ;;  %v9836_v16 = vcombine.low %v4121_v59, %v4131_v18  ;;  %v8706_v3 = vrot.slane %v8705_v19, 4  ;;  %v4138_v34 = vrot.slane %v4136_v49, 6  ;;  %v9820_v8 = vld [vmem:[%s12162_s9 + $0x80] sm:$0x3] }
 0x2a8   : > { %v4141_v52 = vrot.slane %v15692_v9, 5  ;;  %v8719_v24 = vor.u32 %v8718_v41, %v8715_v33  ;;  %v15693_v1 = vshll.u32 %v14149_v6, 16  ;;  %v4147_v26 = vshrl.u32 %v9819_v46, 16 }
 0x2a9   : > { %v8711_v44 = vrot.slane %v8709_v37, 4  ;;  %v4150_v47 = vshll.u32 %v9819_v46, 16  ;;  %10931 = vmatmul.mubr.msk.bf16.gmra.mrb[12].mxu1 %vm695_vm1, %v9836_v16  ;;  %v8710_v11 = vsel %vm13317_vm10, %v8706_v3, %v8709_v37  ;;  %v4139_v45 = vor.u32 %v4138_v34, %v4135_v29  ;;  %v10359_v34 = vld [vmem:[%s12162_s9 + $0xbc] sm:$0x3] }
 0x2aa   : > { %v4142_v30 = vrot.slane %v15693_v1, 6  ;;  %v8722_v14 = vshrl.u32 %v11941_v35, 16  ;;  %v8725_v20 = vshll.u32 %v11941_v35, 16  ;;  %v4149_v57 = vrot.slane %v4147_v26, 5 }
 0x2ab   : > { %v8720_v5 = vsel %vm13317_vm10, %v8711_v44, %v8719_v24  ;;  %v4152_v2 = vrot.slane %v4150_v47, 6  ;;  %v4140_v13 = vrot.slane %v4139_v45, 4  ;;  %v15694_v61 = vshrl.u32 %v14182_v55, 16  ;;  %v11943_v24 = vld [vmem:[%s12162_s9 + $0xb4] sm:$0xe] }
 0x2ac   : > { %v4143_v43 = vor.u32 %v4142_v30, %v4141_v52  ;;  %v10375_v6 = vcombine.low %v8710_v11, %v8720_v5  ;;  %v8724_v42 = vrot.slane %v8722_v14, 5  ;;  %v8727_v54 = vrot.slane %v8725_v20, 6 }
 0x2ad   : > { %v4153_v15 = vor.u32 %v4152_v2, %v4149_v57  ;;  %v8730_v27 = vrot.slane %v15694_v61, 5  ;;  %v15695_v58 = vshll.u32 %v14182_v55, 16  ;;  %v8736_v4 = vshrl.u32 %v10358_v17, 16 }
 0x2ae   : > { %v4145_v48 = vrot.slane %v4143_v43, 4  ;;  %11210 = vmatprep.mubr.msk.bf16.mxu0 %vm695_vm1, %v10375_v6  ;;  %v4144_v60 = vsel %vm13317_vm10, %v4140_v13, %v4143_v43  ;;  %v8728_v28 = vor.u32 %v8727_v54, %v8724_v42  ;;  %v8739_v40 = vshll.u32 %v10358_v17, 16 }
 0x2af   : > { %v8731_v38 = vrot.slane %v15695_v58, 6  ;;  %v4156_v59 = vshrl.u32 %v11942_v32, 16  ;;  %v4159_v12 = vshll.u32 %v11942_v32, 16  ;;  %v8738_v36 = vrot.slane %v8736_v4, 5 }
 0x2b0   : > { %v4154_v0 = vsel %vm13317_vm10, %v4145_v48, %v4153_v15  ;;  %v8729_v55 = vrot.slane %v8728_v28, 4  ;;  %v8741_v19 = vrot.slane %v8739_v40, 6  ;;  %v15696_v49 = vshrl.u32 %v14204_v39, 16  ;;  %v11944_v48 = vld [vmem:[%s12162_s9 + $0x84] sm:$0xe] }
 0x2b1   : > { %v8732_v56 = vor.u32 %v8731_v38, %v8730_v27  ;;  %v9837_v22 = vcombine.low %v4144_v60, %v4154_v0  ;;  %v4158_v33 = vrot.slane %v4156_v59, 5  ;;  %v4161_v46 = vrot.slane %v4159_v12, 6  ;;  %v9821_v38 = vld [vmem:[%s12162_s9 + $0x8c] sm:$0x3] }
 0x2b2   : > { %v4164_v18 = vrot.slane %v15696_v49, 5  ;;  %v8742_v29 = vor.u32 %v8741_v19, %v8738_v36  ;;  %v15697_v9 = vshll.u32 %v14204_v39, 16  ;;  %v4170_v16 = vshrl.u32 %v9820_v8, 16 }
 0x2b3   : > { %v8734_v37 = vrot.slane %v8732_v56, 4  ;;  %10934 = vmatprep.mubr.msk.bf16.mxu1 %vm695_vm1, %v9837_v22  ;;  %v8733_v41 = vsel %vm13317_vm10, %v8729_v55, %v8732_v56  ;;  %v4162_v3 = vor.u32 %v4161_v46, %v4158_v33  ;;  %v4173_v44 = vshll.u32 %v9820_v8, 16  ;;  %v11945_v46 = vld [vmem:[%s12162_s9 + $0xc0] sm:$0xe] }
 0x2b4   : > { %v4165_v52 = vrot.slane %v15697_v9, 6  ;;  %v8745_v1 = vshrl.u32 %v11943_v24, 16  ;;  %v8748_v30 = vshll.u32 %v11943_v24, 16  ;;  %v4172_v11 = vrot.slane %v4170_v16, 5  ;;  %v10360_v16 = vld [vmem:[%s12162_s9 + $0xc8] sm:$0x3] }
 0x2b5   : > { %v8743_v26 = vsel %vm13317_vm10, %v8734_v37, %v8742_v29  ;;  %v15698_v45 = vshrl.u32 %v14228_v50, 16  ;;  %v4163_v20 = vrot.slane %v4162_v3, 4  ;;  %v4175_v39 = vrot.slane %v4173_v44, 6 }
 0x2b6   : > { %v4166_v47 = vor.u32 %v4165_v52, %v4164_v18  ;;  %v10376_v14 = vcombine.low %v8733_v41, %v8743_v26  ;;  %v8747_v5 = vrot.slane %v8745_v1, 5  ;;  %v8750_v57 = vrot.slane %v8748_v30, 6 }
 0x2b7   : > { %v8753_v35 = vrot.slane %v15698_v45, 5  ;;  %v15699_v2 = vshll.u32 %v14228_v50, 16  ;;  %v8759_v6 = vshrl.u32 %v10359_v34, 16  ;;  %v4176_v42 = vor.u32 %v4175_v39, %v4172_v11 }
 0x2b8   : > { %v4168_v43 = vrot.slane %v4166_v47, 4  ;;  %11211 = vmatmul.mubr.msk.bf16.gmra.mrb[20].mxu0 %vm695_vm1, %v10376_v14  ;;  %v4167_v13 = vsel %vm13317_vm10, %v4163_v20, %v4166_v47  ;;  %v8762_v54 = vshll.u32 %v10359_v34, 16  ;;  %v4179_v15 = vshrl.u32 %v11944_v48, 16 }
 0x2b9   : > { %v8754_v17 = vrot.slane %v15699_v2, 6  ;;  %v8751_v61 = vor.u32 %v8750_v57, %v8747_v5  ;;  %v8761_v58 = vrot.slane %v8759_v6, 5  ;;  %v4182_v60 = vshll.u32 %v11944_v48, 16  ;;  %v11946_v57 = vld [vmem:[%s12162_s9 + $0x90] sm:$0xe] }
 0x2ba   : > { %v4177_v50 = vsel %vm13317_vm10, %v4168_v43, %v4176_v42  ;;  %v8764_v28 = vrot.slane %v8762_v54, 6  ;;  %v4181_v4 = vrot.slane %v4179_v15, 5  ;;  %v15700_v40 = vshrl.u32 %v14247_v10, 16  ;;  %v9822_v43 = vld [vmem:[%s12162_s9 + $0x98] sm:$0x3] }
 0x2bb   : > { %v8755_v27 = vor.u32 %v8754_v17, %v8753_v35  ;;  %v9838_v56 = vcombine.low %v4167_v13, %v4177_v50  ;;  %v8752_v8 = vrot.slane %v8751_v61, 4  ;;  %v4184_v59 = vrot.slane %v4182_v60, 6 }
 0x2bc   : > { %v4187_v0 = vrot.slane %v15700_v40, 5  ;;  %v8765_v12 = vor.u32 %v8764_v28, %v8761_v58  ;;  %v15701_v22 = vshll.u32 %v14247_v10, 16  ;;  %v4193_v36 = vshrl.u32 %v9821_v38, 16 }
 0x2bd   : > { %v8757_v32 = vrot.slane %v8755_v27, 4  ;;  %v4196_v19 = vshll.u32 %v9821_v38, 16  ;;  %10935 = vmatmul.mubr.msk.bf16.gmra.mrb[16].mxu1 %vm695_vm1, %v9838_v56  ;;  %v8756_v37 = vsel %vm13317_vm10, %v8752_v8, %v8755_v27  ;;  %v4185_v33 = vor.u32 %v4184_v59, %v4181_v4  ;;  %v11947_v56 = vld [vmem:[%s12162_s9 + $0xcc] sm:$0xe] }
 0x2be   : > { %v4188_v55 = vrot.slane %v15701_v22, 6  ;;  %v8768_v49 = vshrl.u32 %v11945_v46, 16  ;;  %v8771_v18 = vshll.u32 %v11945_v46, 16  ;;  %v4195_v9 = vrot.slane %v4193_v36, 5 }
 0x2bf   : > { %v8766_v41 = vsel %vm13317_vm10, %v8757_v32, %v8765_v12  ;;  %v4198_v52 = vrot.slane %v4196_v19, 6  ;;  %v4186_v3 = vrot.slane %v4185_v33, 4  ;;  %v15702_v30 = vshrl.u32 %v14272_v23, 16 }
 0x2c0   : > { %v4189_v29 = vor.u32 %v4188_v55, %v4187_v0  ;;  %v10377_v10 = vcombine.low %v8756_v37, %v8766_v41  ;;  %v8770_v44 = vrot.slane %v8768_v49, 5  ;;  %v8773_v34 = vrot.slane %v8771_v18, 6  ;;  %v10361_v0 = vld [vmem:[%s12162_s9 + $0xd4] sm:$0x3] }
 0x2c1   : > { %v4199_v1 = vor.u32 %v4198_v52, %v4195_v9  ;;  %v8776_v26 = vrot.slane %v15702_v30, 5  ;;  %v15703_v47 = vshll.u32 %v14272_v23, 16  ;;  %v8782_v14 = vshrl.u32 %v10360_v16, 16 }
 0x2c2   : > { %v4191_v24 = vrot.slane %v4189_v29, 4  ;;  %11214 = vmatprep.mubr.msk.bf16.mxu0 %vm695_vm1, %v10377_v10  ;;  %v4190_v45 = vsel %vm13317_vm10, %v4186_v3, %v4189_v29  ;;  %v8774_v35 = vor.u32 %v8773_v34, %v8770_v44  ;;  %v8785_v20 = vshll.u32 %v10360_v16, 16  ;;  %v11948_v10 = vld [vmem:[%s12162_s9 + $0x9c] sm:$0xe] }
 0x2c3   : > { %v8777_v11 = vrot.slane %v15703_v47, 6  ;;  %v4202_v2 = vshrl.u32 %v11946_v57, 16  ;;  %v4205_v17 = vshll.u32 %v11946_v57, 16  ;;  %v8784_v13 = vrot.slane %v8782_v14, 5 }
 0x2c4   : > { %v4200_v39 = vsel %vm13317_vm10, %v4191_v24, %v4199_v1  ;;  %v8775_v23 = vrot.slane %v8774_v35, 4  ;;  %v8787_v42 = vrot.slane %v8785_v20, 6  ;;  %v15704_v61 = vshrl.u32 %v14293_v31, 16  ;;  %v9823_v1 = vld [vmem:[%s12162_s9 + $0xa4] sm:$0x3] }
 0x2c5   : > { %v8778_v5 = vor.u32 %v8777_v11, %v8776_v26  ;;  %v9839_v6 = vcombine.low %v4190_v45, %v4200_v39  ;;  %v4204_v48 = vrot.slane %v4202_v2, 5  ;;  %v4207_v15 = vrot.slane %v4205_v17, 6 }
 0x2c6   : > { %v4210_v27 = vrot.slane %v15704_v61, 5  ;;  %v8788_v38 = vor.u32 %v8787_v42, %v8784_v13  ;;  %v15705_v60 = vshll.u32 %v14293_v31, 16  ;;  %v4216_v28 = vshrl.u32 %v9822_v43, 16  ;;  %v11949_v13 = vld [vmem:[%s12162_s9 + $0xd8] sm:$0xe] }
 0x2c7   : > { %v8780_v54 = vrot.slane %v8778_v5, 4  ;;  %10938 = vmatprep.mubr.msk.bf16.mxu1 %vm695_vm1, %v9839_v6  ;;  %v8779_v58 = vsel %vm13317_vm10, %v8775_v23, %v8778_v5  ;;  %v4208_v4 = vor.u32 %v4207_v15, %v4204_v48  ;;  %v4219_v40 = vshll.u32 %v9822_v43, 16 }
 0x2c8   : > { %v4211_v50 = vrot.slane %v15705_v60, 6  ;;  %v8791_v8 = vshrl.u32 %v11947_v56, 16  ;;  %v8794_v32 = vshll.u32 %v11947_v56, 16  ;;  %v4218_v22 = vrot.slane %v4216_v28, 5 }
 0x2c9   : > { %v8789_v59 = vsel %vm13317_vm10, %v8780_v54, %v8788_v38  ;;  %v15706_v55 = vshrl.u32 %v14312_v25, 16  ;;  %v4209_v37 = vrot.slane %v4208_v4, 4  ;;  %v4221_v31 = vrot.slane %v4219_v40, 6 }
 0x2ca   : > { %v4212_v12 = vor.u32 %v4211_v50, %v4210_v27  ;;  %v10378_v19 = vcombine.low %v8779_v58, %v8789_v59  ;;  %v8793_v33 = vrot.slane %v8791_v8, 5  ;;  %v8796_v49 = vrot.slane %v8794_v32, 6  ;;  %v10362_v58 = vld [vmem:[%s12162_s9 + $0xe0] sm:$0x3] }
 0x2cb   : > { %v8799_v36 = vrot.slane %v15706_v55, 5  ;;  %v15707_v18 = vshll.u32 %v14312_v25, 16  ;;  %v8805_v29 = vshrl.u32 %v10361_v0, 16  ;;  %v4222_v52 = vor.u32 %v4221_v31, %v4218_v22 }
 0x2cc   : > { %v4214_v46 = vrot.slane %v4212_v12, 4  ;;  %11215 = vmatmul.mubr.msk.bf16.gmra.mrb[24].mxu0 %vm695_vm1, %v10378_v19  ;;  %v4213_v9 = vsel %vm13317_vm10, %v4209_v37, %v4212_v12  ;;  %v8808_v16 = vshll.u32 %v10361_v0, 16  ;;  %v4225_v3 = vshrl.u32 %v11948_v10, 16  ;;  %v9824_v19 = vld [vmem:[%s12162_s9 + $0xb0] sm:$0x3] }
 0x2cd   : > { %v8800_v41 = vrot.slane %v15707_v18, 6  ;;  %v8797_v44 = vor.u32 %v8796_v49, %v8793_v33  ;;  %v8807_v24 = vrot.slane %v8805_v29, 5  ;;  %v4228_v30 = vshll.u32 %v11948_v10, 16  ;;  %v11950_v37 = vld [vmem:[%s12162_s9 + $0xa8] sm:$0xe] }
 0x2ce   : > { %v4223_v25 = vsel %vm13317_vm10, %v4214_v46, %v4222_v52  ;;  %v8810_v26 = vrot.slane %v8808_v16, 6  ;;  %v4227_v47 = vrot.slane %v4225_v3, 5  ;;  %v15708_v11 = vshrl.u32 %v14333_v62, 16 }
 0x2cf   : > { %v8801_v34 = vor.u32 %v8800_v41, %v8799_v36  ;;  %v9840_v35 = vcombine.low %v4213_v9, %v4223_v25  ;;  %v8798_v14 = vrot.slane %v8797_v44, 4  ;;  %v4230_v39 = vrot.slane %v4228_v30, 6  ;;  %v9825_v25 = vld [vmem:[%s12162_s9 + $0xbc] sm:$0x3] }
 0x2d0   : > { %v4233_v45 = vrot.slane %v15708_v11, 5  ;;  %v8811_v5 = vor.u32 %v8810_v26, %v8807_v24  ;;  %v15709_v43 = vshll.u32 %v14333_v62, 16  ;;  %v4239_v2 = vshrl.u32 %v9823_v1, 16  ;;  %v11951_v26 = vld [vmem:[%s12162_s9 + $0xb4] sm:$0xe] }
 0x2d1   : > { %v8803_v20 = vrot.slane %v8801_v34, 4  ;;  %v4242_v17 = vshll.u32 %v9823_v1, 16  ;;  %10939 = vmatmul.mubr.msk.bf16.gmra.mrb[20].mxu1 %vm695_vm1, %v9840_v35  ;;  %v8802_v6 = vsel %vm13317_vm10, %v8798_v14, %v8801_v34  ;;  %v4231_v23 = vor.u32 %v4230_v39, %v4227_v47 }
 0x2d2   : > { %v4234_v57 = vrot.slane %v15709_v43, 6  ;;  %v8814_v42 = vshrl.u32 %v11949_v13, 16  ;;  %v8817_v54 = vshll.u32 %v11949_v13, 16  ;;  %v4241_v61 = vrot.slane %v4239_v2, 5 }
 0x2d3   : > { %v8812_v48 = vsel %vm13317_vm10, %v8803_v20, %v8811_v5  ;;  %v4244_v27 = vrot.slane %v4242_v17, 6  ;;  %v4232_v38 = vrot.slane %v4231_v23, 4  ;;  %v15710_v40 = vshrl.u32 %v14354_v7, 16 }
 0x2d4   : > { %v4235_v15 = vor.u32 %v4234_v57, %v4233_v45  ;;  %v10379_v62 = vcombine.low %v8802_v6, %v8812_v48  ;;  %v8816_v60 = vrot.slane %v8814_v42, 5  ;;  %v8819_v50 = vrot.slane %v8817_v54, 6 }
 0x2d5   : > { %v4245_v4 = vor.u32 %v4244_v27, %v4241_v61  ;;  %v8822_v0 = vrot.slane %v15710_v40, 5  ;;  %v15711_v56 = vshll.u32 %v14354_v7, 16  ;;  %v8828_v12 = vshrl.u32 %v10362_v58, 16 }
 0x2d6   : > { %v4237_v28 = vrot.slane %v4235_v15, 4  ;;  %11218 = vmatprep.mubr.msk.bf16.mxu0 %vm695_vm1, %v10379_v62  ;;  %v4236_v32 = vsel %vm13317_vm10, %v4232_v38, %v4235_v15  ;;  %v8820_v59 = vor.u32 %v8819_v50, %v8816_v60  ;;  %v8831_v22 = vshll.u32 %v10362_v58, 16  ;;  %v11952_v15 = vld [vmem:[%s12162_s9 + $0xc0] sm:$0xe]  ;;  %v9826_v38 = vld [vmem:[%s12162_s9 + $0xc8] sm:$0x3] }
 0x2d7   : > { %v8823_v8 = vrot.slane %v15711_v56, 6  ;;  %v4248_v31 = vshrl.u32 %v11950_v37, 16  ;;  %v4251_v33 = vshll.u32 %v11950_v37, 16  ;;  %v8830_v49 = vrot.slane %v8828_v12, 5  ;;  %s15135_s9 = sand.u32 1, %s12047_s13  }
 0x2d8   : > { %v4246_v55 = vsel %vm13317_vm10, %v4237_v28, %v4245_v4  ;;  %v8821_v7 = vrot.slane %v8820_v59, 4  ;;  %v8833_v18 = vrot.slane %v8831_v22, 6  ;;  %v15712_v52 = vshrl.u32 %v14371_v51, 16  ;;  %s9437_s5 = sshll.u32 %s15135_s9, 8  ;;  %s9278_s19 = scalar_lea.sflag [#allocation3], %s15135_s9 }
 0x2d9   : > { %v8824_v36 = vor.u32 %v8823_v8, %v8822_v0  ;;  %v9841_v46 = vcombine.low %v4236_v32, %v4246_v55  ;;  %v4250_v29 = vrot.slane %v4248_v31, 5  ;;  %v4253_v9 = vrot.slane %v4251_v33, 6  ;;  %s15138_s6 = scalar_lea.vmem [#allocation2], %s9437_s5 }
 0x2da   : > { %v4256_v16 = vrot.slane %v15712_v52, 5  ;;  %v8834_v3 = vor.u32 %v8833_v18, %v8830_v49  ;;  %v15713_v44 = vshll.u32 %v14371_v51, 16  ;;  %v4262_v24 = vshrl.u32 %v9824_v19, 16  ;;  %s9298_s8 = sshll.u32 %s15138_s6, 4  ;;  %s15176_s8 = int_to_ptr.vmem [resolvable:$true] %s9298_s8 }
 0x2db   : > { %v8826_v41 = vrot.slane %v8824_v36, 4  ;;  %10942 = vmatprep.mubr.msk.bf16.mxu1 %vm695_vm1, %v9841_v46  ;;  %v8825_v10 = vsel %vm13317_vm10, %v8821_v7, %v8824_v36  ;;  %v4254_v1 = vor.u32 %v4253_v9, %v4250_v29  ;;  %v4265_v30 = vshll.u32 %v9824_v19, 16  ;;  %s11953_s21 = scalar_lea.vmem %s15176_s8, 4096  ;;  %p11960_p1 = scmp.lt.s32.totalorder %s15176_s8, %s11958_s26 }
 0x2dc   : > { %v4257_v34 = vrot.slane %v15713_v44, 6  ;;  %v4271_v47 = vshrl.u32 %v11951_v26, 16  ;;  %v4274_v11 = vshll.u32 %v11951_v26, 16  ;;  %v4264_v14 = vrot.slane %v4262_v24, 5  ;;  %p11954_p12 = scmp.ne.s32.totalorder %s15176_s8, %s11953_s21  ;;  %p11961_p2 = scmp.lt.s32.totalorder %s11959_s27, %s11953_s21 }
 0x2dd   : > { %v8835_v45 = vsel %vm13317_vm10, %v8826_v41, %v8834_v3  ;;  %v15714_v20 = vshrl.u32 %v14406_v63, 16  ;;  %v4255_v43 = vrot.slane %v4254_v1, 4  ;;  %v4267_v51 = vrot.slane %v4265_v30, 6 }
 0x2de   : > { %v4258_v35 = vor.u32 %v4257_v34, %v4256_v16  ;;  %v10380_v5 = vcombine.low %v8825_v10, %v8835_v45  ;;  %v4273_v57 = vrot.slane %v4271_v47, 5  ;;  %v4276_v17 = vrot.slane %v4274_v11, 6  ;;  %p11955_p13 = pnand %p11954_p12, %p12129_p4  ;;  %p11962_p3 = por %p11961_p2, %p11960_p1 }
 0x2df   : > { %v4279_v39 = vrot.slane %v15714_v20, 5  ;;  %v15715_v6 = vshll.u32 %v14406_v63, 16  ;;  %v4285_v13 = vshrl.u32 %v9825_v25, 16  ;;  %v4268_v54 = vor.u32 %v4267_v51, %v4264_v14 }
 0x2e0   : > { %v4260_v2 = vrot.slane %v4258_v35, 4  ;;  %11219 = vmatmul.mubr.msk.bf16.gmra.mrb[28].mxu0 %vm695_vm1, %v10380_v5  ;;  %v4259_v42 = vsel %vm13317_vm10, %v4255_v43, %v4258_v35  ;;  %v4288_v48 = vshll.u32 %v9825_v25, 16  ;;  %v4294_v61 = vshrl.u32 %v11952_v15, 16  ;;  %p11956_p0 = pneg %p11955_p13 }
 0x2e1   : > { %v4280_v23 = vrot.slane %v15715_v6, 6  ;;  %v4277_v27 = vor.u32 %v4276_v17, %v4273_v57  ;;  %v4287_v62 = vrot.slane %v4285_v13, 5  ;;  %v4297_v60 = vshll.u32 %v11952_v15, 16 }
 0x2e2   : > { %v4269_v50 = vsel %vm13317_vm10, %v4260_v2, %v4268_v54  ;;  %v4290_v63 = vrot.slane %v4288_v48, 6  ;;  %v4296_v28 = vrot.slane %v4294_v61, 5  ;;  %v15716_v4 = vshrl.u32 %v15634_v21, 16  ;;  %p11963_p5 = pnand %p11962_p3, %p11956_p0 }
 0x2e3   : > { %v4281_v58 = vor.u32 %v4280_v23, %v4279_v39  ;;  %v9842_v0 = vcombine.low %v4259_v42, %v4269_v50  ;;  %v4278_v56 = vrot.slane %v4277_v27, 4  ;;  %v4299_v32 = vrot.slane %v4297_v60, 6 }
 0x2e4   : > { %v4302_v40 = vrot.slane %v15716_v4, 5  ;;  %v4291_v59 = vor.u32 %v4290_v63, %v4287_v62  ;;  %v15717_v12 = vshll.u32 %v15634_v21, 16  ;;  %v4308_v55 = vshrl.u32 %v9826_v38, 16 }
 0x2e5   : > { %v4283_v8 = vrot.slane %v4281_v58, 4  ;;  %v4311_v36 = vshll.u32 %v9826_v38, 16  ;;  %10943 = vmatmul.mubr.msk.bf16.gmra.mrb[24].mxu1 %vm695_vm1, %v9842_v0  ;;  %v4282_v19 = vsel %vm13317_vm10, %v4278_v56, %v4281_v58  ;;  %v4300_v37 = vor.u32 %v4299_v32, %v4296_v28 }
 0x2e6   : > { %v4303_v22 = vrot.slane %v15717_v12, 6  ;;  %v4310_v46 = vrot.slane %v4308_v55, 5 }
 0x2e7   : > { %v4292_v31 = vsel %vm13317_vm10, %v4283_v8, %v4291_v59  ;;  %v4313_v7 = vrot.slane %v4311_v36, 6  ;;  %v4301_v18 = vrot.slane %v4300_v37, 4 }
 0x2e8   : > { %v4304_v33 = vor.u32 %v4303_v22, %v4302_v40  ;;  %v9843_v49 = vcombine.low %v4282_v19, %v4292_v31 }
 0x2e9   : > { %v4314_v21 = vor.u32 %v4313_v7, %v4310_v46 }
 0x2ea   : > { %v4306_v41 = vrot.slane %v4304_v33, 4  ;;  %10946 = vmatprep.mubr.msk.bf16.mxu1 %vm695_vm1, %v9843_v49  ;;  %v4305_v29 = vsel %vm13317_vm10, %v4301_v18, %v4304_v33 }
 0x2ec   : > { %v4315_v9 = vsel %vm13317_vm10, %v4306_v41, %v4314_v21 }
 0x2ed   : > { %v9844_v52 = vcombine.low %v4305_v29, %v4315_v9 }
 0x2ef   : > { %10947 = vmatmul.mubr.msk.bf16.gmra.mrb[28].mxu1 %vm695_vm1, %v9844_v52 }
 0x32a   : > { %v11192_v16 = vpop.f32.mrb[0].mxu0 }
 0x32b   : > { %v8977_v10 = vpop.f32.mrb[1].mxu0 }
 0x32c   : > { %v11193_v3 = vpop.f32.mrb[2].mxu0 }
 0x32d   : > { %v8980_v44 = vpop.f32.mrb[3].mxu0 }
 0x33b   : > { %v11196_v34 = vpop.f32.mrb[4].mxu0 }
 0x33c   : > { %v8993_v24 = vpop.f32.mrb[5].mxu0 }
 0x33d   : > { %v11197_v1 = vpop.f32.mrb[6].mxu0 }
 0x33e   : > { %v8996_v30 = vpop.f32.mrb[7].mxu0 }
 0x340   : > { %v10920_v25 = vpop.f32.mrb[0].mxu1 }
 0x341   : > { %v11222_v26 = vadd.f32 %v11192_v16, %v10920_v25  ;;  %v4457_v47 = vpop.f32.mrb[1].mxu1 }
 0x342   : > { %v11223_v53 = vadd.f32 %v8977_v10, %v4457_v47  ;;  %v10921_v11 = vpop.f32.mrb[2].mxu1 }
 0x343   : > { %9138 = vst [vmem:[%s15138_s6 + $0x10] sm:$0xff] %v11222_v26  ;;  %v11224_v45 = vadd.f32 %v11193_v3, %v10921_v11  ;;  %v4460_v35 = vpop.f32.mrb[3].mxu1  ;;  %v9207_v43 = vmul.f32 %v11222_v26, %v11222_v26 }
 0x344   : > { %9136 = vst [vmem:[%s15138_s6] sm:$0xff] %v11223_v53  ;;  %v11225_v14 = vadd.f32 %v8980_v44, %v4460_v35  ;;  %v9205_v20 = vmul.f32 %v11223_v53, %v11223_v53 }
 0x345   : > { %9139 = vst [vmem:[%s15138_s6 + $0x18] sm:$0xff] %v11224_v45  ;;  %v9208_v2 = vmul.f32 %v11224_v45, %v11224_v45 }
 0x346   : > { %9137 = vst [vmem:[%s15138_s6 + $0x8] sm:$0xff] %v11225_v14  ;;  %v9168_v39 = vadd.f32 %v11225_v14, %v11223_v53  ;;  %v9206_v5 = vmul.f32 %v11225_v14, %v11225_v14 }
 0x348   : > { %v9169_v51 = vadd.f32 %v11222_v26, %v9168_v39  ;;  %v9237_v57 = vadd.f32 %v9206_v5, %v9205_v20 }
 0x34a   : > { %v9238_v17 = vadd.f32 %v9237_v57, %v9207_v43  ;;  %v9170_v6 = vadd.f32 %v11224_v45, %v9169_v51 }
 0x34c   : > { %v9239_v23 = vadd.f32 %v9238_v17, %v9208_v2 }
 0x34f   : > { %v11200_v13 = vpop.f32.mrb[8].mxu0 }
 0x350   : > { %v9009_v42 = vpop.f32.mrb[9].mxu0 }
 0x351   : > { %v11201_v54 = vpop.f32.mrb[10].mxu0 }
 0x352   : > { %v9012_v48 = vpop.f32.mrb[11].mxu0 }
 0x354   : > { %v10924_v15 = vpop.f32.mrb[4].mxu1 }
 0x355   : > { %v11226_v61 = vadd.f32 %v11196_v34, %v10924_v15  ;;  %v4473_v27 = vpop.f32.mrb[5].mxu1 }
 0x356   : > { %v11227_v58 = vadd.f32 %v8993_v24, %v4473_v27  ;;  %v10925_v62 = vpop.f32.mrb[6].mxu1 }
 0x357   : > { %9142 = vst [vmem:[%s15138_s6 + $0x30] sm:$0xff] %v11226_v61  ;;  %v11228_v38 = vadd.f32 %v11197_v1, %v10925_v62  ;;  %v4476_v60 = vpop.f32.mrb[7].mxu1  ;;  %v9211_v56 = vmul.f32 %v11226_v61, %v11226_v61 }
 0x358   : > { %9140 = vst [vmem:[%s15138_s6 + $0x20] sm:$0xff] %v11227_v58  ;;  %v9171_v50 = vadd.f32 %v11227_v58, %v9170_v6  ;;  %v9209_v63 = vmul.f32 %v11227_v58, %v11227_v58  ;;  %v11229_v28 = vadd.f32 %v8996_v30, %v4476_v60 }
 0x359   : > { %9143 = vst [vmem:[%s15138_s6 + $0x38] sm:$0xff] %v11228_v38  ;;  %v9212_v59 = vmul.f32 %v11228_v38, %v11228_v38 }
 0x35a   : > { %v9240_v4 = vadd.f32 %v9239_v23, %v9209_v63  ;;  %9141 = vst [vmem:[%s15138_s6 + $0x28] sm:$0xff] %v11229_v28  ;;  %v9172_v40 = vadd.f32 %v11229_v28, %v9171_v50  ;;  %v9210_v0 = vmul.f32 %v11229_v28, %v11229_v28 }
 0x35c   : > { %v9173_v8 = vadd.f32 %v11226_v61, %v9172_v40  ;;  %v9241_v32 = vadd.f32 %v9240_v4, %v9210_v0 }
 0x35e   : > { %v9242_v12 = vadd.f32 %v9241_v32, %v9211_v56  ;;  %v9174_v22 = vadd.f32 %v11228_v38, %v9173_v8 }
 0x360   : > { %v9243_v55 = vadd.f32 %v9242_v12, %v9212_v59 }
 0x363   : > { %v11204_v36 = vpop.f32.mrb[12].mxu0 }
 0x364   : > { %v9025_v19 = vpop.f32.mrb[13].mxu0 }
 0x365   : > { %v11205_v37 = vpop.f32.mrb[14].mxu0 }
 0x366   : > { %v9028_v31 = vpop.f32.mrb[15].mxu0 }
 0x368   : > { %v10928_v33 = vpop.f32.mrb[8].mxu1 }
 0x369   : > { %v11230_v46 = vadd.f32 %v11200_v13, %v10928_v33  ;;  %v4489_v7 = vpop.f32.mrb[9].mxu1 }
 0x36a   : > { %v11231_v49 = vadd.f32 %v9009_v42, %v4489_v7  ;;  %v10929_v18 = vpop.f32.mrb[10].mxu1 }
 0x36b   : > { %9146 = vst [vmem:[%s15138_s6 + $0x50] sm:$0xff] %v11230_v46  ;;  %v11232_v41 = vadd.f32 %v11201_v54, %v10929_v18  ;;  %v4492_v21 = vpop.f32.mrb[11].mxu1  ;;  %v9215_v44 = vmul.f32 %v11230_v46, %v11230_v46 }
 0x36c   : > { %9144 = vst [vmem:[%s15138_s6 + $0x40] sm:$0xff] %v11231_v49  ;;  %v9175_v29 = vadd.f32 %v11231_v49, %v9174_v22  ;;  %v9213_v9 = vmul.f32 %v11231_v49, %v11231_v49  ;;  %v11233_v52 = vadd.f32 %v9012_v48, %v4492_v21 }
 0x36d   : > { %9147 = vst [vmem:[%s15138_s6 + $0x58] sm:$0xff] %v11232_v41  ;;  %v9216_v1 = vmul.f32 %v11232_v41, %v11232_v41 }
 0x36e   : > { %v9244_v16 = vadd.f32 %v9243_v55, %v9213_v9  ;;  %9145 = vst [vmem:[%s15138_s6 + $0x48] sm:$0xff] %v11233_v52  ;;  %v9176_v10 = vadd.f32 %v11233_v52, %v9175_v29  ;;  %v9214_v3 = vmul.f32 %v11233_v52, %v11233_v52 }
 0x370   : > { %v9177_v34 = vadd.f32 %v11230_v46, %v9176_v10  ;;  %v9245_v24 = vadd.f32 %v9244_v16, %v9214_v3 }
 0x372   : > { %v9246_v30 = vadd.f32 %v9245_v24, %v9215_v44  ;;  %v9178_v25 = vadd.f32 %v11232_v41, %v9177_v34 }
 0x374   : > { %v9247_v26 = vadd.f32 %v9246_v30, %v9216_v1 }
 0x377   : > { %v11208_v47 = vpop.f32.mrb[16].mxu0 }
 0x378   : > { %v9041_v53 = vpop.f32.mrb[17].mxu0 }
 0x379   : > { %v11209_v11 = vpop.f32.mrb[18].mxu0 }
 0x37a   : > { %v9044_v45 = vpop.f32.mrb[19].mxu0 }
 0x37c   : > { %v10932_v35 = vpop.f32.mrb[12].mxu1 }
 0x37d   : > { %v11234_v14 = vadd.f32 %v11204_v36, %v10932_v35  ;;  %v4505_v20 = vpop.f32.mrb[13].mxu1 }
 0x37e   : > { %v11235_v39 = vadd.f32 %v9025_v19, %v4505_v20  ;;  %v10933_v5 = vpop.f32.mrb[14].mxu1 }
 0x37f   : > { %9150 = vst [vmem:[%s15138_s6 + $0x70] sm:$0xff] %v11234_v14  ;;  %v11236_v43 = vadd.f32 %v11205_v37, %v10933_v5  ;;  %v4508_v51 = vpop.f32.mrb[15].mxu1  ;;  %v9219_v42 = vmul.f32 %v11234_v14, %v11234_v14 }
 0x380   : > { %9148 = vst [vmem:[%s15138_s6 + $0x60] sm:$0xff] %v11235_v39  ;;  %v9179_v57 = vadd.f32 %v11235_v39, %v9178_v25  ;;  %v9217_v2 = vmul.f32 %v11235_v39, %v11235_v39  ;;  %v11237_v17 = vadd.f32 %v9028_v31, %v4508_v51 }
 0x381   : > { %9151 = vst [vmem:[%s15138_s6 + $0x78] sm:$0xff] %v11236_v43  ;;  %v9220_v15 = vmul.f32 %v11236_v43, %v11236_v43 }
 0x382   : > { %v9248_v6 = vadd.f32 %v9247_v26, %v9217_v2  ;;  %9149 = vst [vmem:[%s15138_s6 + $0x68] sm:$0xff] %v11237_v17  ;;  %v9180_v23 = vadd.f32 %v11237_v17, %v9179_v57  ;;  %v9218_v13 = vmul.f32 %v11237_v17, %v11237_v17 }
 0x384   : > { %v9181_v54 = vadd.f32 %v11234_v14, %v9180_v23  ;;  %v9249_v48 = vadd.f32 %v9248_v6, %v9218_v13 }
 0x386   : > { %v9250_v61 = vadd.f32 %v9249_v48, %v9219_v42  ;;  %v9182_v27 = vadd.f32 %v11236_v43, %v9181_v54 }
 0x388   : > { %v9251_v58 = vadd.f32 %v9250_v61, %v9220_v15 }
 0x38b   : > { %v11212_v62 = vpop.f32.mrb[20].mxu0 }
 0x38c   : > { %v9057_v38 = vpop.f32.mrb[21].mxu0 }
 0x38d   : > { %v11213_v60 = vpop.f32.mrb[22].mxu0 }
 0x38e   : > { %v9060_v50 = vpop.f32.mrb[23].mxu0 }
 0x390   : > { %v10936_v63 = vpop.f32.mrb[16].mxu1 }
 0x391   : > { %v11238_v28 = vadd.f32 %v11208_v47, %v10936_v63  ;;  %v4521_v4 = vpop.f32.mrb[17].mxu1 }
 0x392   : > { %v11239_v40 = vadd.f32 %v9041_v53, %v4521_v4  ;;  %v10937_v0 = vpop.f32.mrb[18].mxu1 }
 0x393   : > { %9154 = vst [vmem:[%s15138_s6 + $0x90] sm:$0xff] %v11238_v28  ;;  %v11240_v56 = vadd.f32 %v11209_v11, %v10937_v0  ;;  %v4524_v8 = vpop.f32.mrb[19].mxu1  ;;  %v9223_v19 = vmul.f32 %v11238_v28, %v11238_v28 }
 0x394   : > { %9152 = vst [vmem:[%s15138_s6 + $0x80] sm:$0xff] %v11239_v40  ;;  %v9183_v32 = vadd.f32 %v11239_v40, %v9182_v27  ;;  %v9221_v59 = vmul.f32 %v11239_v40, %v11239_v40  ;;  %v11241_v12 = vadd.f32 %v9044_v45, %v4524_v8 }
 0x395   : > { %9155 = vst [vmem:[%s15138_s6 + $0x98] sm:$0xff] %v11240_v56  ;;  %v9224_v33 = vmul.f32 %v11240_v56, %v11240_v56 }
 0x396   : > { %v9252_v22 = vadd.f32 %v9251_v58, %v9221_v59  ;;  %9153 = vst [vmem:[%s15138_s6 + $0x88] sm:$0xff] %v11241_v12  ;;  %v9184_v55 = vadd.f32 %v11241_v12, %v9183_v32  ;;  %v9222_v36 = vmul.f32 %v11241_v12, %v11241_v12 }
 0x398   : > { %v9185_v37 = vadd.f32 %v11238_v28, %v9184_v55  ;;  %v9253_v31 = vadd.f32 %v9252_v22, %v9222_v36 }
 0x39a   : > { %v9254_v46 = vadd.f32 %v9253_v31, %v9223_v19  ;;  %v9186_v7 = vadd.f32 %v11240_v56, %v9185_v37 }
 0x39c   : > { %v9255_v49 = vadd.f32 %v9254_v46, %v9224_v33 }
 0x39f   : > { %v11216_v18 = vpop.f32.mrb[24].mxu0 }
 0x3a0   : > { %v9073_v41 = vpop.f32.mrb[25].mxu0 }
 0x3a1   : > { %v11217_v21 = vpop.f32.mrb[26].mxu0 }
 0x3a2   : > { %v9076_v29 = vpop.f32.mrb[27].mxu0 }
 0x3a4   : > { %v10940_v9 = vpop.f32.mrb[20].mxu1 }
 0x3a5   : > { %v11242_v52 = vadd.f32 %v11212_v62, %v10940_v9  ;;  %v4537_v16 = vpop.f32.mrb[21].mxu1 }
 0x3a6   : > { %v11243_v10 = vadd.f32 %v9057_v38, %v4537_v16  ;;  %v10941_v3 = vpop.f32.mrb[22].mxu1 }
 0x3a7   : > { %9158 = vst [vmem:[%s15138_s6 + $0xb0] sm:$0xff] %v11242_v52  ;;  %v11244_v44 = vadd.f32 %v11213_v60, %v10941_v3  ;;  %v4540_v34 = vpop.f32.mrb[23].mxu1  ;;  %v9227_v53 = vmul.f32 %v11242_v52, %v11242_v52 }
 0x3a8   : > { %9156 = vst [vmem:[%s15138_s6 + $0xa0] sm:$0xff] %v11243_v10  ;;  %v9187_v24 = vadd.f32 %v11243_v10, %v9186_v7  ;;  %v9225_v1 = vmul.f32 %v11243_v10, %v11243_v10  ;;  %v11245_v30 = vadd.f32 %v9060_v50, %v4540_v34 }
 0x3a9   : > { %9159 = vst [vmem:[%s15138_s6 + $0xb8] sm:$0xff] %v11244_v44  ;;  %v9228_v35 = vmul.f32 %v11244_v44, %v11244_v44 }
 0x3aa   : > { %v9256_v25 = vadd.f32 %v9255_v49, %v9225_v1  ;;  %9157 = vst [vmem:[%s15138_s6 + $0xa8] sm:$0xff] %v11245_v30  ;;  %v9188_v26 = vadd.f32 %v11245_v30, %v9187_v24  ;;  %v9226_v47 = vmul.f32 %v11245_v30, %v11245_v30 }
 0x3ac   : > { %v9189_v11 = vadd.f32 %v11242_v52, %v9188_v26  ;;  %v9257_v45 = vadd.f32 %v9256_v25, %v9226_v47 }
 0x3ae   : > { %v9258_v14 = vadd.f32 %v9257_v45, %v9227_v53  ;;  %v9190_v20 = vadd.f32 %v11244_v44, %v9189_v11 }
 0x3b0   : > { %v9259_v39 = vadd.f32 %v9258_v14, %v9228_v35 }
 0x3b3   : > { %v11220_v5 = vpop.f32.mrb[28].mxu0 }
 0x3b4   : > { %v9089_v43 = vpop.f32.mrb[29].mxu0 }
 0x3b5   : > { %v11221_v51 = vpop.f32.mrb[30].mxu0 }
 0x3b6   : > { %v9092_v57 = vpop.f32.mrb[31].mxu0 }
 0x3b8   : > { %v10944_v2 = vpop.f32.mrb[24].mxu1 }
 0x3b9   : > { %v11246_v17 = vadd.f32 %v11216_v18, %v10944_v2  ;;  %v4553_v6 = vpop.f32.mrb[25].mxu1 }
 0x3ba   : > { %v11247_v23 = vadd.f32 %v9073_v41, %v4553_v6  ;;  %v10945_v13 = vpop.f32.mrb[26].mxu1 }
 0x3bb   : > { %9162 = vst [vmem:[%s15138_s6 + $0xd0] sm:$0xff] %v11246_v17  ;;  %v11248_v42 = vadd.f32 %v11217_v21, %v10945_v13  ;;  %v4556_v54 = vpop.f32.mrb[27].mxu1  ;;  %v9231_v38 = vmul.f32 %v11246_v17, %v11246_v17 }
 0x3bc   : > { %9160 = vst [vmem:[%s15138_s6 + $0xc0] sm:$0xff] %v11247_v23  ;;  %v9191_v48 = vadd.f32 %v11247_v23, %v9190_v20  ;;  %v9229_v15 = vmul.f32 %v11247_v23, %v11247_v23  ;;  %v11249_v61 = vadd.f32 %v9076_v29, %v4556_v54 }
 0x3bd   : > { %9163 = vst [vmem:[%s15138_s6 + $0xd8] sm:$0xff] %v11248_v42  ;;  %v9232_v40 = vmul.f32 %v11248_v42, %v11248_v42 }
 0x3be   : > { %v9260_v27 = vadd.f32 %v9259_v39, %v9229_v15  ;;  %9161 = vst [vmem:[%s15138_s6 + $0xc8] sm:$0xff] %v11249_v61  ;;  %v9192_v58 = vadd.f32 %v11249_v61, %v9191_v48  ;;  %v9230_v62 = vmul.f32 %v11249_v61, %v11249_v61 }
 0x3c0   : > { %v9193_v60 = vadd.f32 %v11246_v17, %v9192_v58  ;;  %v9261_v50 = vadd.f32 %v9260_v27, %v9230_v62 }
 0x3c2   : > { %v10948_v63 = vpop.f32.mrb[28].mxu1  ;;  %v9262_v0 = vadd.f32 %v9261_v50, %v9231_v38  ;;  %v9194_v8 = vadd.f32 %v11248_v42, %v9193_v60 }
 0x3c3   : > { %v11250_v28 = vadd.f32 %v11220_v5, %v10948_v63  ;;  %v4569_v4 = vpop.f32.mrb[29].mxu1 }
 0x3c4   : > { %v11251_v56 = vadd.f32 %v9089_v43, %v4569_v4  ;;  %v10949_v32 = vpop.f32.mrb[30].mxu1  ;;  %v9263_v36 = vadd.f32 %v9262_v0, %v9232_v40 }
 0x3c5   : > { %9166 = vst [vmem:[%s15138_s6 + $0xf0] sm:$0xff] %v11250_v28  ;;  %v11252_v59 = vadd.f32 %v11221_v51, %v10949_v32  ;;  %v4572_v12 = vpop.f32.mrb[31].mxu1 }
 0x3c6   : > { %9164 = vst [vmem:[%s15138_s6 + $0xe0] sm:$0xff] %v11251_v56  ;;  %v9195_v22 = vadd.f32 %v11251_v56, %v9194_v8  ;;  %v9233_v55 = vmul.f32 %v11251_v56, %v11251_v56  ;;  %v11253_v19 = vadd.f32 %v9092_v57, %v4572_v12 }
 0x3c7   : > { %9167 = vst [vmem:[%s15138_s6 + $0xf8] sm:$0xff] %v11252_v59 }
 0x3c8   : > { %v9264_v37 = vadd.f32 %v9263_v36, %v9233_v55  ;;  %9165 = vst [vmem:[%s15138_s6 + $0xe8] sm:$0xff] %v11253_v19  ;;  %v9196_v31 = vadd.f32 %v11253_v19, %v9195_v22  ;;  %v9234_v33 = vmul.f32 %v11253_v19, %v11253_v19 }
 0x3c9   : > { %11966 = shalt.err (!%p11963_p5)
}
 0x3ca   : > { %s11967_s28 = scalar_lea.hbm %s15174_s18, 4096  ;;  %s11971_s4 = scalar_lea.hbm %s15260_s2, 8192 }
 0x3cb   : > { %p11968_p6 = scmp.ne.s32.totalorder %s15174_s18, %s11967_s28  ;;  %p11972_p10 = scmp.lt.u32.totalorder %s15174_s18, %s15260_s2 }
 0x3cc   : > { %p11973_p11 = scmp.lt.u32.totalorder %s11971_s4, %s11967_s28  ;;  %p11975_p13 = scmp.lt.u32.totalorder %s11967_s28, %s15174_s18 }
 0x3cd   : > { %p11969_p7 = pnand %p11968_p6, %p12129_p4 }
 0x3ce   : > { %p11974_p12 = por %p11973_p11, %p11972_p10 }
 0x3cf   : > { %p11970_p9 = pneg %p11969_p7 }
 0x3d0   : > { %p11976_p0 = por %p11975_p13, %p11974_p12 }
 0x3d2   : > { %p11977_p1 = pnand %p11976_p0, %p11970_p9 }
 0x3d4   : > { %11980 = shalt.err (!%p11977_p1)
}
 0x3d5   : > { %s12066_s7 = smov 128   ;;  %s12067_s10 = smov 8   ;;  %v9235_v46 = vmul.f32 %v11250_v28, %v11250_v28  ;;  %v9197_v7 = vadd.f32 %v11250_v28, %v9196_v31  ;;  %v9265_v49 = vadd.f32 %v9264_v37, %v9234_v33  ;;  %v9236_v18 = vmul.f32 %v11252_v59, %v11252_v59 }
 0x3d6   : > { %11719 = dma.vmem_to_hbm [thread:$0]  (%p12129_p4), %s15176_s8, 4096, %s15174_s18, %s9278_s19, %s12066_s7, %s12066_s7, %s12067_s10   ;;  %vm9274_vm11 = vcmask 1040384  }
 0x3d7   : > { %v9198_v41 = vadd.f32 %v11252_v59, %v9197_v7  ;;  %v9266_v21 = vadd.f32 %v9265_v49, %v9235_v46  ;;  %s9438_s11 = sshll.u32 %s15135_s9, 1  ;;  %s10402_s8 = sshll.u32 %s12055_s15, 5 }
 0x3d8   : > { %s190_s18 = scalar_lea.vmem [#allocation4], %s9438_s11  ;;  %s15210_s26 = scalar_lea.hbm %s15261_s3, %s10402_s8 }
 0x3d9   : > { %v9199_v29 = vrot.slane %v9198_v41, 4  ;;  %v9267_v9 = vadd.f32 %v9266_v21, %v9236_v18  ;;  %s9315_s19 = sshll.u32 %s190_s18, 4  ;;  %s9283_s27 = scalar_lea.sflag [#allocation5], %s15135_s9  ;;  %s15212_s19 = int_to_ptr.vmem [resolvable:$true] %s9315_s19 }
 0x3da   : > { %s11981_s28 = scalar_lea.vmem %s15212_s19, 32  ;;  %s12068_s15 = smov [#allocation4]  }
 0x3db   : > { %v9200_v52 = vadd.f32 %v9199_v29, %v9198_v41  ;;  %v9268_v16 = vrot.slane %v9267_v9, 4  ;;  %p11982_p2 = scmp.ne.s32.totalorder %s15212_s19, %s11981_s28  ;;  %s11985_s29 = sshll.u32 %s12068_s15, 4  ;;  %s11986_s29 = int_to_ptr.vmem [resolvable:$false] %s11985_s29 }
 0x3dc   : > { %s11987_s30 = scalar_lea.vmem %s11986_s29, 64  ;;  %p11988_p6 = scmp.lt.s32.totalorder %s15212_s19, %s11986_s29 }
 0x3dd   : > { %v9201_v10 = vrot.slane %v9200_v52, 2  ;;  %v9269_v3 = vadd.f32 %v9268_v16, %v9267_v9  ;;  %p11983_p3 = pnand %p11982_p2, %p12129_p4  ;;  %p11989_p7 = scmp.lt.s32.totalorder %s11987_s30, %s11981_s28 }
 0x3df   : > { %v9202_v44 = vadd.f32 %v9201_v10, %v9200_v52  ;;  %v9270_v34 = vrot.slane %v9269_v3, 2  ;;  %p11984_p5 = pneg %p11983_p3  ;;  %p11990_p9 = por %p11989_p7, %p11988_p6 }
 0x3e1   : > { %v9203_v24 = vrot.slane %v9202_v44, 1  ;;  %v9271_v1 = vadd.f32 %v9270_v34, %v9269_v3  ;;  %p11991_p10 = pnand %p11990_p9, %p11984_p5 }
 0x3e3   : > { %v9272_v30 = vrot.slane %v9271_v1, 1  ;;  %v9204_v25 = vadd.f32 %v9203_v24, %v9202_v44 }
 0x3e5   : > { %v9273_v26 = vadd.f32 %v9272_v30, %v9271_v1 }
 0x3e7   : > { %v9275_v47 = vsel %vm9274_vm11, %v9204_v25, %v9273_v26 }
 0x3e8   : > { %9276 = vst [vmem:[%s190_s18] sm:$0x3] %v9275_v47 }
 0x3e9   : > { %11994 = shalt.err (!%p11991_p10)
}
 0x3ea   : > { %s11995_s9 = scalar_lea.hbm %s15210_s26, 32  ;;  %s11999_s6 = scalar_lea.hbm %s15261_s3, 64 }
 0x3eb   : > { %p11996_p11 = scmp.ne.s32.totalorder %s15210_s26, %s11995_s9  ;;  %p12000_p0 = scmp.lt.u32.totalorder %s15210_s26, %s15261_s3 }
 0x3ec   : > { %p12001_p1 = scmp.lt.u32.totalorder %s11999_s6, %s11995_s9  ;;  %p12003_p3 = scmp.lt.u32.totalorder %s11995_s9, %s15210_s26 }
 0x3ed   : > { %p11997_p12 = pnand %p11996_p11, %p12129_p4 }
 0x3ee   : > { %p12002_p2 = por %p12001_p1, %p12000_p0 }
 0x3ef   : > { %p11998_p13 = pneg %p11997_p12 }
 0x3f0   : > { %p12004_p5 = por %p12003_p3, %p12002_p2 }
 0x3f2   : > { %p12005_p6 = pnand %p12004_p5, %p11998_p13 }
 0x3f4   : > { %12008 = shalt.err (!%p12005_p6)
}
 0x3f5   : > { %11720 = dma.vmem_to_hbm [thread:$0]  (%p12129_p4), %s15212_s19, 32, %s15210_s26, %s9283_s27  }
 0x3f6 PF: > { %p11730_p7 = scmp.ge.s32.totalorder %s12063_s17, 2  ;;  %s9327_s11 = sand.u32 1, %s12043_s12  }
 0x3f7   : > { %s9328_s8 = scalar_lea.sflag [#allocation3], %s9327_s11 }
 0x3f8   : > { %p11724_p9 = pnand %p11730_p7, %p12136_p8 }
 0x3fa   : > { %12034 = dma.done.wait (!%p11724_p9), %s9328_s8, 4096  }
 0x3fb   : > { %12036 = vsyncadd (!%p11724_p9), %s9328_s8, 4294963200  ;;  %s9337_s18 = scalar_lea.sflag [#allocation5], %s9327_s11 }
 0x3fc   : > { %12038 = dma.done.wait (!%p11724_p9), %s9337_s18, 32  }
 0x3fd   : > { %12040 = vsyncadd (!%p11724_p9), %s9337_s18, 4294967264  ;;  %s20_s17 = sadd.s32 1, %s12063_s17   ;;  %s15718_s12 = smov %s12047_s13 }
 0x3fe   : > { %p17_p10 = scmp.ge.s32.totalorder %s20_s17, 4   ;;  %s15719_s13 = smov %s12051_s14 }
 0x3ff   : > { %s15720_s14 = smov %s12142_s25  ;;  %s15721_s15 = smov %s12059_s16 }
 0x400   : > { %s15722_s16 = smov %s15724_s20  ;;  %19 = sbr.rel (!%p17_p10) target bundleno = 6 (0x6), region = 99 }
 0x407   :  { %9342 = vsyncpa [#allocation3], 1 }
 0x408   :  { %9344 = vsyncpa [#allocation3 + $0x1], 1 }
 0x409   :  { %9345 = vsyncpa [#allocation5], 1 }
 0x40a   :  { %9347 = vsyncpa [#allocation5 + $0x1], 1 }

</bundles_post_ra>
